<compile_context>
chip_gen: v6e
topology: v6e:2x2x1
jax: 0.10.0
libtpu: 0.0.40
codegen_flags: <defaults>
</compile_context>

<pallas_src>
import functools

import jax
import jax.numpy as jnp
from jax import lax
from jax.experimental import pallas as pl
from jax.experimental.pallas import tpu as pltpu


def _round_up(x, m):
    return ((x + m - 1) // m) * m


def _compiler_params(n_grid_axes=1):
    return pltpu.CompilerParams(
        dimension_semantics=("parallel",) * n_grid_axes,
        vmem_limit_bytes=32 * 1024 * 1024,
    )


_CONV_TM = 512    # conv row tile (rows = N*OH*OW)
_DENSE_TM = 256   # fc row tile  (rows = batch)


# ----------------------------------------------------------------------------
# Pallas kernels
# ----------------------------------------------------------------------------
def _conv_relu_pool_kernel(p_ref, w_ref, b_ref, o_ref):
    """p_ref: (4, TM, F) bf16 im2col patches (axis 0 = 2x2 pool-window position)
       w_ref: (F, Cout) bf16 GEMM weights, b_ref: (1, Cout) f32, o_ref: (TM, Cout) f32."""
    w = w_ref[...]
    acc = jnp.dot(p_ref[0], w, preferred_element_type=jnp.float32)
    for p in range(1, 4):  # unrolled: remaining pooling-window positions
        acc = jnp.maximum(acc, jnp.dot(p_ref[p], w, preferred_element_type=jnp.float32))
    # bias-add + ReLU hoisted out of the loop: max_p relu(y_p + b) == relu(max_p y_p + b)
    o_ref[...] = jnp.maximum(acc + b_ref[...], 0.0).astype(o_ref.dtype)


def _dense_kernel(x_ref, w_ref, b_ref, o_ref, *, activation):
    """x_ref: (TM, K) bf16, w_ref: (N, K) bf16 (PyTorch layout, trans_b contraction),
       b_ref: (1, N) f32, o_ref: (TM, N) f32."""
    y = lax.dot_general(
        x_ref[...], w_ref[...],
        dimension_numbers=(((1,), (1,)), ((), ())),   # x @ w.T, no wrapper transpose
        preferred_element_type=jnp.float32,
    ) + b_ref[...]
    if activation == "relu":
        y = jnp.maximum(y, 0.0)
    elif activation == "log_softmax":
        m = jnp.max(y, axis=-1, keepdims=True)
        y = y - m
        y = y - jnp.log(jnp.sum(jnp.exp(y), axis=-1, keepdims=True))
    o_ref[...] = y.astype(o_ref.dtype)


# ----------------------------------------------------------------------------
# Wrappers (layout plumbing in JAX, hot path in Pallas)
# ----------------------------------------------------------------------------
def conv_relu_pool(x_nhwc, wg, bg, *, k=5, pad=2):
    """Conv2d(kxk, 'same') + ReLU + MaxPool2d(2), fused in one Pallas kernel.
       wg: (k*k*Cin, Cout) bf16 GEMM weight, bg: (1, Cout) f32."""
    N, H, W, Cin = x_nhwc.shape
    F, Cout = wg.shape
    OH, OW = H // 2, W // 2
    M = N * OH * OW

    xp = jnp.pad(x_nhwc, ((0, 0), (pad, pad), (pad, pad), (0, 0))).astype(jnp.bfloat16)
    # Build the (4, M, F) pool-position patch tensor directly (one fused gather,
    # no (N,H,W,F) intermediate), feature order (kh, kw, ci).
    pos = []
    for dh in (0, 1):
        for dw in (0, 1):
            views = [
                xp[:, dh + kh: dh + kh + 2 * OH - 1: 2,
                      dw + kw: dw + kw + 2 * OW - 1: 2, :]
                for kh in range(k) for kw in range(k)
            ]
            pos.append(jnp.stack(views, axis=3).reshape(M, F))
    pw = jnp.stack(pos, axis=0)  # (4, M, F) bf16

    tm = min(_CONV_TM, _round_up(M, 8))
    m_pad = _round_up(M, tm)
    if m_pad != M:
        pw = jnp.pad(pw, ((0, 0), (0, m_pad - M), (0, 0)))

    # TODO(synk): lane-dense conv output (group rows so last dim is a 128 multiple)
    # deferred — Cout of 32/64 currently uses masked stores.
    out = pl.pallas_call(
        _conv_relu_pool_kernel,
        out_shape=jax.ShapeDtypeStruct((m_pad, Cout), jnp.float32),
        grid=(m_pad // tm,),
        in_specs=[
            pl.BlockSpec((4, tm, F), lambda i: (0, i, 0)),
            pl.BlockSpec((F, Cout), lambda i: (0, 0)),   # weight stays VMEM-resident
            pl.BlockSpec((1, Cout), lambda i: (0, 0)),
        ],
        out_specs=pl.BlockSpec((tm, Cout), lambda i: (i, 0)),
        compiler_params=_compiler_params(1),
    )(pw, wg, bg)
    return out[:M].reshape(N, OH, OW, Cout)


def dense(x, w_oi, bg, *, activation=None):
    """x: (M, K) f32/bf16, w_oi: PyTorch Linear weight (N, K) bf16, bg: (1, N) f32.
       Returns act(x @ w.T + b) in f32."""
    M, K = x.shape
    Nout = w_oi.shape[0]
    xb = x.astype(jnp.bfloat16)

    tm = min(_DENSE_TM, _round_up(M, 8))
    m_pad = _round_up(M, tm)
    if m_pad != M:
        xb = jnp.pad(xb, ((0, m_pad - M), (0, 0)))

    kern = functools.partial(_dense_kernel, activation=activation)
    out = pl.pallas_call(
        kern,
        out_shape=jax.ShapeDtypeStruct((m_pad, Nout), jnp.float32),
        grid=(m_pad // tm,),
        in_specs=[
            pl.BlockSpec((tm, K), lambda i: (i, 0)),
            pl.BlockSpec((Nout, K), lambda i: (0, 0)),   # weight stays VMEM-resident
            pl.BlockSpec((1, Nout), lambda i: (0, 0)),
        ],
        out_specs=pl.BlockSpec((tm, Nout), lambda i: (i, 0)),
        compiler_params=_compiler_params(1),
    )(xb, w_oi, bg)
    return out[:M]


# ----------------------------------------------------------------------------
# Model
# ----------------------------------------------------------------------------
def init_params(key):
    ks = jax.random.split(key, 8)
    def w(k_, shape, fan_in):
        return jax.random.normal(k_, shape, jnp.float32) / jnp.sqrt(fan_in)
    return {
        "conv1_w": w(ks[0], (32, 1, 5, 5), 1 * 5 * 5),
        "conv1_b": w(ks[1], (32,), 1 * 5 * 5),
        "conv2_w": w(ks[2], (64, 32, 5, 5), 32 * 5 * 5),
        "conv2_b": w(ks[3], (64,), 32 * 5 * 5),
        "fc1_w":   w(ks[4], (1024, 64 * 7 * 7), 64 * 7 * 7),
        "fc1_b":   w(ks[5], (1024,), 64 * 7 * 7),
        "fc2_w":   w(ks[6], (10, 1024), 1024),
        "fc2_b":   w(ks[7], (10,), 1024),
    }


def prepare_params(p):
    """One-time (outside forward) layout/dtype prep: conv weights -> (kh*kw*Cin, Cout)
       GEMM layout, matmul weights cast to bf16, biases reshaped to (1, N) f32."""
    def conv_w(w_oihw):
        cout, cin, kh, kw = w_oihw.shape
        return (jnp.transpose(w_oihw, (2, 3, 1, 0))
                .reshape(kh * kw * cin, cout).astype(jnp.bfloat16))
    def bias(b):
        return b.reshape(1, -1).astype(jnp.float32)
    return {
        "conv1_w": conv_w(p["conv1_w"]), "conv1_b": bias(p["conv1_b"]),
        "conv2_w": conv_w(p["conv2_w"]), "conv2_b": bias(p["conv2_b"]),
        "fc1_w": p["fc1_w"].astype(jnp.bfloat16), "fc1_b": bias(p["fc1_b"]),
        "fc2_w": p["fc2_w"].astype(jnp.bfloat16), "fc2_b": bias(p["fc2_b"]),
    }


@jax.jit
def forward(x_nchw, prepared):
    # NCHW -> NHWC for the conv kernels
    x = jnp.transpose(x_nchw, (0, 2, 3, 1))                            # (N, 28, 28, 1)
    x = conv_relu_pool(x, prepared["conv1_w"], prepared["conv1_b"])    # (N, 14, 14, 32)
    x = conv_relu_pool(x, prepared["conv2_w"], prepared["conv2_b"])    # (N, 7, 7, 64)
    # flatten in PyTorch (C, H, W) order to match fc1 weight layout
    x = jnp.transpose(x, (0, 3, 1, 2)).reshape(x.shape[0], -1)         # (N, 3136)
    x = dense(x, prepared["fc1_w"], prepared["fc1_b"], activation="relu")
    # F.dropout(training=False) is the identity in eval mode -> no-op.
    x = dense(x, prepared["fc2_w"], prepared["fc2_b"], activation="log_softmax")
    return x                                                           # (N, 10) log-probs


if __name__ == "__main__":
    key = jax.random.PRNGKey(0)
    k_params, k_x = jax.random.split(key)
    params = init_params(k_params)
    prepared = prepare_params(params)
    x = jax.random.normal(k_x, (2, 1, 28, 28), jnp.float32)

    out = forward(x, prepared)
    out = jax.block_until_ready(out)

    assert out.shape == (2, 10)
    # log_softmax rows must exponentiate-sum to 1
    row_sums = jnp.sum(jnp.exp(out), axis=1)
    assert bool(jnp.allclose(row_sums, 1.0, atol=1e-3)), row_sums
    print("KERNEL_OK")
</pallas_src>

<mosaic_0001>
module attributes {stable_mosaic.version = 11 : i64} {
  func.func @_conv_relu_pool_kernel(%arg0: i32, %arg1: memref<4x392x25xbf16, #tpu.memory_space<vmem>>, %arg2: memref<25x32xbf16, #tpu.memory_space<vmem>>, %arg3: memref<1x32xf32, #tpu.memory_space<vmem>>, %arg4: memref<392x32xf32, #tpu.memory_space<vmem>>) attributes {dimension_semantics = [#tpu.dimension_semantics<parallel>], iteration_bounds = array<i64: 1>, scalar_prefetch = 0 : i64, scratch_operands = 0 : i64, tpu.core_type = #tpu.core_type<tc>, window_params = [{transform_indices = @transform_0, window_bounds = array<i64: 4, 392, 25>}, {pipeline_mode = #tpu.pipeline_mode<synchronous>, transform_indices = @transform_1, window_bounds = array<i64: 25, 32>}, {pipeline_mode = #tpu.pipeline_mode<synchronous>, transform_indices = @transform_2, window_bounds = array<i64: 1, 32>}, {transform_indices = @transform_3, window_bounds = array<i64: 392, 32>}]} {
    %c0 = arith.constant 0 : index
    %c0_0 = arith.constant 0 : index
    %0 = vector.load %arg2[%c0, %c0_0] : memref<25x32xbf16, #tpu.memory_space<vmem>>, vector<25x32xbf16>
    %c0_1 = arith.constant 0 : index
    %c0_2 = arith.constant 0 : index
    %c0_3 = arith.constant 0 : index
    %1 = vector.load %arg1[%c0_1, %c0_2, %c0_3] : memref<4x392x25xbf16, #tpu.memory_space<vmem>>, vector<1x392x25xbf16>
    %2 = vector.shape_cast %1 : vector<1x392x25xbf16> to vector<392x25xbf16>
    %cst = arith.constant dense<0.000000e+00> : vector<392x32xf32>
    %3 = tpu.matmul %2, %0, %cst {dimension_numbers = #tpu.dot_dimension_numbers<[1], [0], [0], [1], [0, 0, 1, 1], [], []>} : vector<392x25xbf16>, vector<25x32xbf16>, vector<392x32xf32> -> vector<392x32xf32>
    %c1 = arith.constant 1 : index
    %c0_4 = arith.constant 0 : index
    %c0_5 = arith.constant 0 : index
    %4 = vector.load %arg1[%c1, %c0_4, %c0_5] : memref<4x392x25xbf16, #tpu.memory_space<vmem>>, vector<1x392x25xbf16>
    %5 = vector.shape_cast %4 : vector<1x392x25xbf16> to vector<392x25xbf16>
    %cst_6 = arith.constant dense<0.000000e+00> : vector<392x32xf32>
    %6 = tpu.matmul %5, %0, %cst_6 {dimension_numbers = #tpu.dot_dimension_numbers<[1], [0], [0], [1], [0, 0, 1, 1], [], []>} : vector<392x25xbf16>, vector<25x32xbf16>, vector<392x32xf32> -> vector<392x32xf32>
    %7 = arith.maximumf %3, %6 : vector<392x32xf32>
    %c2 = arith.constant 2 : index
    %c0_7 = arith.constant 0 : index
    %c0_8 = arith.constant 0 : index
    %8 = vector.load %arg1[%c2, %c0_7, %c0_8] : memref<4x392x25xbf16, #tpu.memory_space<vmem>>, vector<1x392x25xbf16>
    %9 = vector.shape_cast %8 : vector<1x392x25xbf16> to vector<392x25xbf16>
    %cst_9 = arith.constant dense<0.000000e+00> : vector<392x32xf32>
    %10 = tpu.matmul %9, %0, %cst_9 {dimension_numbers = #tpu.dot_dimension_numbers<[1], [0], [0], [1], [0, 0, 1, 1], [], []>} : vector<392x25xbf16>, vector<25x32xbf16>, vector<392x32xf32> -> vector<392x32xf32>
    %11 = arith.maximumf %7, %10 : vector<392x32xf32>
    %c3 = arith.constant 3 : index
    %c0_10 = arith.constant 0 : index
    %c0_11 = arith.constant 0 : index
    %12 = vector.load %arg1[%c3, %c0_10, %c0_11] : memref<4x392x25xbf16, #tpu.memory_space<vmem>>, vector<1x392x25xbf16>
    %13 = vector.shape_cast %12 : vector<1x392x25xbf16> to vector<392x25xbf16>
    %cst_12 = arith.constant dense<0.000000e+00> : vector<392x32xf32>
    %14 = tpu.matmul %13, %0, %cst_12 {dimension_numbers = #tpu.dot_dimension_numbers<[1], [0], [0], [1], [0, 0, 1, 1], [], []>} : vector<392x25xbf16>, vector<25x32xbf16>, vector<392x32xf32> -> vector<392x32xf32>
    %15 = arith.maximumf %11, %14 : vector<392x32xf32>
    %c0_13 = arith.constant 0 : index
    %c0_14 = arith.constant 0 : index
    %16 = vector.load %arg3[%c0_13, %c0_14] : memref<1x32xf32, #tpu.memory_space<vmem>>, vector<1x32xf32>
    %17 = vector.broadcast %16 : vector<1x32xf32> to vector<392x32xf32>
    %18 = arith.addf %15, %17 : vector<392x32xf32>
    %cst_15 = arith.constant 0.000000e+00 : f32
    %19 = vector.broadcast %cst_15 : f32 to vector<392x32xf32>
    %20 = arith.maximumf %18, %19 : vector<392x32xf32>
    %c0_16 = arith.constant 0 : index
    %c0_17 = arith.constant 0 : index
    %21 = vector.load %arg4[%c0_16, %c0_17] : memref<392x32xf32, #tpu.memory_space<vmem>>, vector<392x32xf32>
    tpu.vector_store %arg4[%c0_16, %c0_17], %20 {strides = array<i32>} : memref<392x32xf32, #tpu.memory_space<vmem>>, vector<392x32xf32>,
    return
  }
  func.func @transform_0(%arg0: i32) -> (i32, i32, i32) {
    %c0_i32 = arith.constant 0 : i32
    %c0_i32_0 = arith.constant 0 : i32
    %c0_i32_1 = arith.constant 0 : i32
    return %c0_i32, %arg0, %c0_i32_0 : i32, i32, i32
  }
  func.func @transform_1(%arg0: i32) -> (i32, i32) {
    %c0_i32 = arith.constant 0 : i32
    %c0_i32_0 = arith.constant 0 : i32
    %c0_i32_1 = arith.constant 0 : i32
    return %c0_i32, %c0_i32_0 : i32, i32
  }
  func.func @transform_2(%arg0: i32) -> (i32, i32) {
    %c0_i32 = arith.constant 0 : i32
    %c0_i32_0 = arith.constant 0 : i32
    %c0_i32_1 = arith.constant 0 : i32
    return %c0_i32, %c0_i32_0 : i32, i32
  }
  func.func @transform_3(%arg0: i32) -> (i32, i32) {
    %c0_i32 = arith.constant 0 : i32
    %c0_i32_0 = arith.constant 0 : i32
    return %arg0, %c0_i32 : i32, i32
  }
}

module attributes {stable_mosaic.version = 11 : i64} {
  func.func @_conv_relu_pool_kernel(%arg0: i32, %arg1: memref<4x104x800xbf16, #tpu.memory_space<vmem>>, %arg2: memref<800x64xbf16, #tpu.memory_space<vmem>>, %arg3: memref<1x64xf32, #tpu.memory_space<vmem>>, %arg4: memref<104x64xf32, #tpu.memory_space<vmem>>) attributes {dimension_semantics = [#tpu.dimension_semantics<parallel>], iteration_bounds = array<i64: 1>, scalar_prefetch = 0 : i64, scratch_operands = 0 : i64, tpu.core_type = #tpu.core_type<tc>, window_params = [{transform_indices = @transform_0, window_bounds = array<i64: 4, 104, 800>}, {pipeline_mode = #tpu.pipeline_mode<synchronous>, transform_indices = @transform_1, window_bounds = array<i64: 800, 64>}, {pipeline_mode = #tpu.pipeline_mode<synchronous>, transform_indices = @transform_2, window_bounds = array<i64: 1, 64>}, {transform_indices = @transform_3, window_bounds = array<i64: 104, 64>}]} {
    %c0 = arith.constant 0 : index
    %c0_0 = arith.constant 0 : index
    %0 = vector.load %arg2[%c0, %c0_0] : memref<800x64xbf16, #tpu.memory_space<vmem>>, vector<800x64xbf16>
    %c0_1 = arith.constant 0 : index
    %c0_2 = arith.constant 0 : index
    %c0_3 = arith.constant 0 : index
    %1 = vector.load %arg1[%c0_1, %c0_2, %c0_3] : memref<4x104x800xbf16, #tpu.memory_space<vmem>>, vector<1x104x800xbf16>
    %2 = vector.shape_cast %1 : vector<1x104x800xbf16> to vector<104x800xbf16>
    %cst = arith.constant dense<0.000000e+00> : vector<104x64xf32>
    %3 = tpu.matmul %2, %0, %cst {dimension_numbers = #tpu.dot_dimension_numbers<[1], [0], [0], [1], [0, 0, 1, 1], [], []>} : vector<104x800xbf16>, vector<800x64xbf16>, vector<104x64xf32> -> vector<104x64xf32>
    %c1 = arith.constant 1 : index
    %c0_4 = arith.constant 0 : index
    %c0_5 = arith.constant 0 : index
    %4 = vector.load %arg1[%c1, %c0_4, %c0_5] : memref<4x104x800xbf16, #tpu.memory_space<vmem>>, vector<1x104x800xbf16>
    %5 = vector.shape_cast %4 : vector<1x104x800xbf16> to vector<104x800xbf16>
    %cst_6 = arith.constant dense<0.000000e+00> : vector<104x64xf32>
    %6 = tpu.matmul %5, %0, %cst_6 {dimension_numbers = #tpu.dot_dimension_numbers<[1], [0], [0], [1], [0, 0, 1, 1], [], []>} : vector<104x800xbf16>, vector<800x64xbf16>, vector<104x64xf32> -> vector<104x64xf32>
    %7 = arith.maximumf %3, %6 : vector<104x64xf32>
    %c2 = arith.constant 2 : index
    %c0_7 = arith.constant 0 : index
    %c0_8 = arith.constant 0 : index
    %8 = vector.load %arg1[%c2, %c0_7, %c0_8] : memref<4x104x800xbf16, #tpu.memory_space<vmem>>, vector<1x104x800xbf16>
    %9 = vector.shape_cast %8 : vector<1x104x800xbf16> to vector<104x800xbf16>
    %cst_9 = arith.constant dense<0.000000e+00> : vector<104x64xf32>
    %10 = tpu.matmul %9, %0, %cst_9 {dimension_numbers = #tpu.dot_dimension_numbers<[1], [0], [0], [1], [0, 0, 1, 1], [], []>} : vector<104x800xbf16>, vector<800x64xbf16>, vector<104x64xf32> -> vector<104x64xf32>
    %11 = arith.maximumf %7, %10 : vector<104x64xf32>
    %c3 = arith.constant 3 : index
    %c0_10 = arith.constant 0 : index
    %c0_11 = arith.constant 0 : index
    %12 = vector.load %arg1[%c3, %c0_10, %c0_11] : memref<4x104x800xbf16, #tpu.memory_space<vmem>>, vector<1x104x800xbf16>
    %13 = vector.shape_cast %12 : vector<1x104x800xbf16> to vector<104x800xbf16>
    %cst_12 = arith.constant dense<0.000000e+00> : vector<104x64xf32>
    %14 = tpu.matmul %13, %0, %cst_12 {dimension_numbers = #tpu.dot_dimension_numbers<[1], [0], [0], [1], [0, 0, 1, 1], [], []>} : vector<104x800xbf16>, vector<800x64xbf16>, vector<104x64xf32> -> vector<104x64xf32>
    %15 = arith.maximumf %11, %14 : vector<104x64xf32>
    %c0_13 = arith.constant 0 : index
    %c0_14 = arith.constant 0 : index
    %16 = vector.load %arg3[%c0_13, %c0_14] : memref<1x64xf32, #tpu.memory_space<vmem>>, vector<1x64xf32>
    %17 = vector.broadcast %16 : vector<1x64xf32> to vector<104x64xf32>
    %18 = arith.addf %15, %17 : vector<104x64xf32>
    %cst_15 = arith.constant 0.000000e+00 : f32
    %19 = vector.broadcast %cst_15 : f32 to vector<104x64xf32>
    %20 = arith.maximumf %18, %19 : vector<104x64xf32>
    %c0_16 = arith.constant 0 : index
    %c0_17 = arith.constant 0 : index
    %21 = vector.load %arg4[%c0_16, %c0_17] : memref<104x64xf32, #tpu.memory_space<vmem>>, vector<104x64xf32>
    tpu.vector_store %arg4[%c0_16, %c0_17], %20 {strides = array<i32>} : memref<104x64xf32, #tpu.memory_space<vmem>>, vector<104x64xf32>,
    return
  }
  func.func @transform_0(%arg0: i32) -> (i32, i32, i32) {
    %c0_i32 = arith.constant 0 : i32
    %c0_i32_0 = arith.constant 0 : i32
    %c0_i32_1 = arith.constant 0 : i32
    return %c0_i32, %arg0, %c0_i32_0 : i32, i32, i32
  }
  func.func @transform_1(%arg0: i32) -> (i32, i32) {
    %c0_i32 = arith.constant 0 : i32
    %c0_i32_0 = arith.constant 0 : i32
    %c0_i32_1 = arith.constant 0 : i32
    return %c0_i32, %c0_i32_0 : i32, i32
  }
  func.func @transform_2(%arg0: i32) -> (i32, i32) {
    %c0_i32 = arith.constant 0 : i32
    %c0_i32_0 = arith.constant 0 : i32
    %c0_i32_1 = arith.constant 0 : i32
    return %c0_i32, %c0_i32_0 : i32, i32
  }
  func.func @transform_3(%arg0: i32) -> (i32, i32) {
    %c0_i32 = arith.constant 0 : i32
    %c0_i32_0 = arith.constant 0 : i32
    return %arg0, %c0_i32 : i32, i32
  }
}

module attributes {stable_mosaic.version = 11 : i64} {
  func.func @_dense_kernel(%arg0: i32, %arg1: memref<8x3136xbf16, #tpu.memory_space<vmem>>, %arg2: memref<1024x3136xbf16, #tpu.memory_space<vmem>>, %arg3: memref<1x1024xf32, #tpu.memory_space<vmem>>, %arg4: memref<8x1024xf32, #tpu.memory_space<vmem>>) attributes {dimension_semantics = [#tpu.dimension_semantics<parallel>], iteration_bounds = array<i64: 1>, scalar_prefetch = 0 : i64, scratch_operands = 0 : i64, tpu.core_type = #tpu.core_type<tc>, window_params = [{transform_indices = @transform_0, window_bounds = array<i64: 8, 3136>}, {pipeline_mode = #tpu.pipeline_mode<synchronous>, transform_indices = @transform_1, window_bounds = array<i64: 1024, 3136>}, {pipeline_mode = #tpu.pipeline_mode<synchronous>, transform_indices = @transform_2, window_bounds = array<i64: 1, 1024>}, {transform_indices = @transform_3, window_bounds = array<i64: 8, 1024>}]} {
    %c0 = arith.constant 0 : index
    %c0_0 = arith.constant 0 : index
    %0 = vector.load %arg1[%c0, %c0_0] : memref<8x3136xbf16, #tpu.memory_space<vmem>>, vector<8x3136xbf16>
    %c0_1 = arith.constant 0 : index
    %c0_2 = arith.constant 0 : index
    %1 = vector.load %arg2[%c0_1, %c0_2] : memref<1024x3136xbf16, #tpu.memory_space<vmem>>, vector<1024x3136xbf16>
    %cst = arith.constant dense<0.000000e+00> : vector<8x1024xf32>
    %2 = tpu.matmul %0, %1, %cst {dimension_numbers = #tpu.dot_dimension_numbers<[1], [1], [0], [0], [0, 0, 1, 0], [], []>} : vector<8x3136xbf16>, vector<1024x3136xbf16>, vector<8x1024xf32> -> vector<8x1024xf32>
    %c0_3 = arith.constant 0 : index
    %c0_4 = arith.constant 0 : index
    %3 = vector.load %arg3[%c0_3, %c0_4] : memref<1x1024xf32, #tpu.memory_space<vmem>>, vector<1x1024xf32>
    %4 = vector.broadcast %3 : vector<1x1024xf32> to vector<8x1024xf32>
    %5 = arith.addf %2, %4 : vector<8x1024xf32>
    %cst_5 = arith.constant 0.000000e+00 : f32
    %6 = vector.broadcast %cst_5 : f32 to vector<8x1024xf32>
    %7 = arith.maximumf %5, %6 : vector<8x1024xf32>
    %c0_6 = arith.constant 0 : index
    %c0_7 = arith.constant 0 : index
    %8 = vector.load %arg4[%c0_6, %c0_7] : memref<8x1024xf32, #tpu.memory_space<vmem>>, vector<8x1024xf32>
    tpu.vector_store %arg4[%c0_6, %c0_7], %7 {strides = array<i32>} : memref<8x1024xf32, #tpu.memory_space<vmem>>, vector<8x1024xf32>,
    return
  }
  func.func @transform_0(%arg0: i32) -> (i32, i32) {
    %c0_i32 = arith.constant 0 : i32
    %c0_i32_0 = arith.constant 0 : i32
    return %arg0, %c0_i32 : i32, i32
  }
  func.func @transform_1(%arg0: i32) -> (i32, i32) {
    %c0_i32 = arith.constant 0 : i32
    %c0_i32_0 = arith.constant 0 : i32
    %c0_i32_1 = arith.constant 0 : i32
    return %c0_i32, %c0_i32_0 : i32, i32
  }
  func.func @transform_2(%arg0: i32) -> (i32, i32) {
    %c0_i32 = arith.constant 0 : i32
    %c0_i32_0 = arith.constant 0 : i32
    %c0_i32_1 = arith.constant 0 : i32
    return %c0_i32, %c0_i32_0 : i32, i32
  }
  func.func @transform_3(%arg0: i32) -> (i32, i32) {
    %c0_i32 = arith.constant 0 : i32
    %c0_i32_0 = arith.constant 0 : i32
    return %arg0, %c0_i32 : i32, i32
  }
}

module attributes {stable_mosaic.version = 11 : i64} {
  func.func @_dense_kernel(%arg0: i32, %arg1: memref<8x1024xbf16, #tpu.memory_space<vmem>>, %arg2: memref<10x1024xbf16, #tpu.memory_space<vmem>>, %arg3: memref<1x10xf32, #tpu.memory_space<vmem>>, %arg4: memref<8x10xf32, #tpu.memory_space<vmem>>) attributes {dimension_semantics = [#tpu.dimension_semantics<parallel>], iteration_bounds = array<i64: 1>, scalar_prefetch = 0 : i64, scratch_operands = 0 : i64, tpu.core_type = #tpu.core_type<tc>, window_params = [{transform_indices = @transform_0, window_bounds = array<i64: 8, 1024>}, {pipeline_mode = #tpu.pipeline_mode<synchronous>, transform_indices = @transform_1, window_bounds = array<i64: 10, 1024>}, {pipeline_mode = #tpu.pipeline_mode<synchronous>, transform_indices = @transform_2, window_bounds = array<i64: 1, 10>}, {transform_indices = @transform_3, window_bounds = array<i64: 8, 10>}]} {
    %c0 = arith.constant 0 : index
    %c0_0 = arith.constant 0 : index
    %0 = vector.load %arg1[%c0, %c0_0] : memref<8x1024xbf16, #tpu.memory_space<vmem>>, vector<8x1024xbf16>
    %c0_1 = arith.constant 0 : index
    %c0_2 = arith.constant 0 : index
    %1 = vector.load %arg2[%c0_1, %c0_2] : memref<10x1024xbf16, #tpu.memory_space<vmem>>, vector<10x1024xbf16>
    %cst = arith.constant dense<0.000000e+00> : vector<8x10xf32>
    %2 = tpu.matmul %0, %1, %cst {dimension_numbers = #tpu.dot_dimension_numbers<[1], [1], [0], [0], [0, 0, 1, 0], [], []>} : vector<8x1024xbf16>, vector<10x1024xbf16>, vector<8x10xf32> -> vector<8x10xf32>
    %c0_3 = arith.constant 0 : index
    %c0_4 = arith.constant 0 : index
    %3 = vector.load %arg3[%c0_3, %c0_4] : memref<1x10xf32, #tpu.memory_space<vmem>>, vector<1x10xf32>
    %4 = vector.broadcast %3 : vector<1x10xf32> to vector<8x10xf32>
    %5 = arith.addf %2, %4 : vector<8x10xf32>
    %cst_5 = arith.constant dense<0xFF800000> : vector<8xf32>
    %6 = vector.multi_reduction <maximumf>, %5, %cst_5 [1] : vector<8x10xf32> to vector<8xf32>
    %7 = vector.shape_cast %6 : vector<8xf32> to vector<8x1xf32>
    %8 = vector.broadcast %7 : vector<8x1xf32> to vector<8x10xf32>
    %9 = arith.subf %5, %8 : vector<8x10xf32>
    %10 = math.exp %9 : vector<8x10xf32>
    %cst_6 = arith.constant dense<0.000000e+00> : vector<8xf32>
    %11 = vector.multi_reduction <add>, %10, %cst_6 [1] : vector<8x10xf32> to vector<8xf32>
    %12 = vector.shape_cast %11 : vector<8xf32> to vector<8x1xf32>
    %13 = math.log %12 : vector<8x1xf32>
    %14 = vector.broadcast %13 : vector<8x1xf32> to vector<8x10xf32>
    %15 = arith.subf %9, %14 : vector<8x10xf32>
    %c0_7 = arith.constant 0 : index
    %c0_8 = arith.constant 0 : index
    %16 = vector.load %arg4[%c0_7, %c0_8] : memref<8x10xf32, #tpu.memory_space<vmem>>, vector<8x10xf32>
    tpu.vector_store %arg4[%c0_7, %c0_8], %15 {strides = array<i32>} : memref<8x10xf32, #tpu.memory_space<vmem>>, vector<8x10xf32>,
    return
  }
  func.func @transform_0(%arg0: i32) -> (i32, i32) {
    %c0_i32 = arith.constant 0 : i32
    %c0_i32_0 = arith.constant 0 : i32
    return %arg0, %c0_i32 : i32, i32
  }
  func.func @transform_1(%arg0: i32) -> (i32, i32) {
    %c0_i32 = arith.constant 0 : i32
    %c0_i32_0 = arith.constant 0 : i32
    %c0_i32_1 = arith.constant 0 : i32
    return %c0_i32, %c0_i32_0 : i32, i32
  }
  func.func @transform_2(%arg0: i32) -> (i32, i32) {
    %c0_i32 = arith.constant 0 : i32
    %c0_i32_0 = arith.constant 0 : i32
    %c0_i32_1 = arith.constant 0 : i32
    return %c0_i32, %c0_i32_0 : i32, i32
  }
  func.func @transform_3(%arg0: i32) -> (i32, i32) {
    %c0_i32 = arith.constant 0 : i32
    %c0_i32_0 = arith.constant 0 : i32
    return %arg0, %c0_i32 : i32, i32
  }
}

</mosaic_0001>

<bundles_post_ra>
// kernel: forward.4
= control target key start
LH: loop header
LB: loop body
LE: loop exit
PB: predicated region body
PF: predicated region fallthrough
CT: control target
= control target key end

     0   :  { %8 = vsyncpa [#allocation3], 0  ;;  %s4647_s0 = inlined_call_operand.vmem [shape: bf16[4,392,25], index: 0, kind: input, shape index: {}]   ;;  %s4648_s1 = inlined_call_operand.hbm [shape: bf16[25,32], index: 1, kind: input, shape index: {}]   ;;  %s4649_s2 = inlined_call_operand.hbm [shape: f32[1,32], index: 2, kind: input, shape index: {}]   ;;  %s4650_s3 = inlined_call_operand.vmem [shape: f32[392,32], index: 3, kind: output, shape index: {}]  }
   0x1   :  { %9 = vsyncpa [#allocation5], 0  ;;  %s3318_s12 = smov [#allocation2]  }
   0x2   :  { %s17_s13 = sshll.u32 %s3318_s12, 4  ;;  %s18_s13 = int_to_ptr.vmem [resolvable:$true] %s17_s13 }
   0x3   :  { %s3282_s14 = scalar_lea.vmem %s18_s13, 256  ;;  %p3287_p1 = scmp.lt.s32.totalorder %s18_s13, %s18_s13 }
   0x4   :  { %p3283_p0 = scmp.ne.s32.totalorder %s18_s13, %s3282_s14  ;;  %p3288_p2 = scmp.lt.s32.totalorder %s3282_s14, %s3282_s14 }
   0x6   :  { %p3289_p3 = por %p3288_p2, %p3287_p1 }
   0x8   :  { %p3290_p4 = pnand %p3289_p3, %p3283_p0 }
   0xa   :  { %3293 = shalt.err (!%p3290_p4)
}
   0xb   :  { %s3319_s15 = smov 64   ;;  %s3320_s16 = smov 4  }
   0xc   :  { %23 = dma.hbm_to_vmem [thread:$0]  %s4648_s1, 256, %s18_s13, [#allocation3], %s3319_s15, %s3319_s15, %s3320_s16  }
   0xd   :  { %s3321_s19 = smov [#allocation4]  }
   0xe   :  { %s30_s20 = sshll.u32 %s3321_s19, 4  ;;  %s31_s20 = int_to_ptr.vmem [resolvable:$true] %s30_s20 }
   0xf   :  { %s3302_s21 = scalar_lea.vmem %s31_s20, 16  ;;  %s3306_s22 = scalar_lea.vmem %s31_s20, 32 }
  0x10   :  { %p3303_p5 = scmp.ne.s32.totalorder %s31_s20, %s3302_s21  ;;  %p3307_p6 = scmp.lt.s32.totalorder %s31_s20, %s31_s20 }
  0x11   :  { %p3308_p7 = scmp.lt.s32.totalorder %s3306_s22, %s3302_s21 }
  0x13   :  { %p3309_p8 = por %p3308_p7, %p3307_p6 }
  0x15   :  { %p3310_p9 = pnand %p3309_p8, %p3303_p5 }
  0x17   :  { %3313 = shalt.err (!%p3310_p9)
}
  0x18   :  { %33 = dma.hbm_to_vmem [thread:$0]  %s4649_s2, 16, %s31_s20, [#allocation5]  }
  0x19   :  { %3314 = dma.done.wait [#allocation3], 256  }
  0x1a   :  { %3315 = vsyncadd [#allocation3], 4294967040 }
  0x1b   :  { %3316 = dma.done.wait [#allocation5], 16  }
  0x1c   :  { %3317 = vsyncadd [#allocation5], 4294967280  ;;  %vm304_vm0 = vcmask 1043456   ;;  %v4651_v0 = vmov 0.0   ;;  %vm3323_vm1 = vmmov 0   ;;  %vm305_vm2 = vcmask 1044480  }
  0x1d   :  { %2749 = vmatprep.subr.bf16.mxu0 %v4651_v0  ;;  %2853 = vmatprep.subr.bf16.mxu1 %v4651_v0  ;;  %v3324_v1 = vmov 65535   ;;  %v3172_v4 = vld [vmem:[#allocation2 + $0x8] sm:$0x1f]   ;;  %v3173_v6 = vld [vmem:[#allocation2] sm:$0xff]   ;;  %vm228_vm3 = vcmask 203776   ;;  %v3178_v11 = vld [vmem:[%s4647_s0 + $0x10] sm:$0xff]  }
  0x1e   :  { %2753 = vmatprep.mubr.msk.bf16.mxu0 %vm3323_vm1, %v4651_v0  ;;  %2857 = vmatprep.mubr.msk.bf16.mxu1 %vm3323_vm1, %v4651_v0  ;;  %v306_v2 = vsel %vm304_vm0, 4294967295, %v3324_v1  ;;  %v3174_v7 = vld [vmem:[%s4647_s0] sm:$0xff]   ;;  %v3176_v9 = vld [vmem:[%s4647_s0 + $0x8] sm:$0xff]   ;;  %v3179_v12 = vld [vmem:[%s4647_s0 + $0xd4] sm:$0xff]   ;;  %vm2235_vm4 = vcmask 261120  }
  0x1f   :  { %v307_v3 = vsel %vm305_vm2, %v306_v2, 0  ;;  %v3175_v8 = vld [vmem:[%s4647_s0 + $0xc4] sm:$0xff]   ;;  %v3177_v10 = vld [vmem:[%s4647_s0 + $0xcc] sm:$0xff]   ;;  %v3180_v13 = vld [vmem:[%s4647_s0 + $0x18] sm:$0xff]  }
  0x20   :  { %v309_v5 = vand.u32 %v3172_v4, %v307_v3  ;;  %v3181_v14 = vld [vmem:[%s4647_s0 + $0xdc] sm:$0xff]   ;;  %v3183_v16 = vld [vmem:[%s4647_s0 + $0xe4] sm:$0xff]   ;;  %v3185_v18 = vld [vmem:[%s4647_s0 + $0xec] sm:$0xff]  }
  0x21   :  { %v3182_v15 = vld [vmem:[%s4647_s0 + $0x20] sm:$0xff]   ;;  %v3184_v17 = vld [vmem:[%s4647_s0 + $0x28] sm:$0xff]   ;;  %v3186_v19 = vld [vmem:[%s4647_s0 + $0x30] sm:$0xff]  }
  0x22   :  { %2750 = vmatpush3.bf16.msra.mxu0 %v309_v5  ;;  %2854 = vmatpush3.bf16.msra.mxu1 %v309_v5  ;;  %v3187_v20 = vld [vmem:[%s4647_s0 + $0xf4] sm:$0xff]   ;;  %v3189_v22 = vld [vmem:[%s4647_s0 + $0xfc] sm:$0xff]   ;;  %v3191_v24 = vld [vmem:[%s4647_s0 + $0x104] sm:$0xff]  }
  0x23   :  { %2751 = vmatprep.subr.bf16.mxu0 %v4651_v0  ;;  %2855 = vmatprep.subr.bf16.mxu1 %v4651_v0  ;;  %v3188_v21 = vld [vmem:[%s4647_s0 + $0x38] sm:$0xff]   ;;  %v3190_v23 = vld [vmem:[%s4647_s0 + $0x40] sm:$0xff]   ;;  %v3192_v25 = vld [vmem:[%s4647_s0 + $0x48] sm:$0xff]  }
  0x24   :  { %v3193_v26 = vld [vmem:[%s4647_s0 + $0x10c] sm:$0xff]   ;;  %v3195_v28 = vld [vmem:[%s4647_s0 + $0x114] sm:$0xff]   ;;  %v3197_v30 = vld [vmem:[%s4647_s0 + $0x11c] sm:$0xff]  }
  0x25   :  { %v3194_v27 = vld [vmem:[%s4647_s0 + $0x50] sm:$0xff]   ;;  %v3196_v29 = vld [vmem:[%s4647_s0 + $0x58] sm:$0xff]   ;;  %v3198_v31 = vld [vmem:[%s4647_s0 + $0x60] sm:$0xff]  }
  0x26   :  { %2752 = vmatpush3.bf16.msra.mxu0 %v3173_v6  ;;  %2856 = vmatpush3.bf16.msra.mxu1 %v3173_v6  ;;  %v3199_v32 = vld [vmem:[%s4647_s0 + $0x124] sm:$0xff]   ;;  %v3201_v34 = vld [vmem:[%s4647_s0 + $0x12c] sm:$0xff]   ;;  %v3203_v36 = vld [vmem:[%s4647_s0 + $0x134] sm:$0xff]  }
  0x27   :  { %2957 = vmatprep.subr.bf16.mxu0 %v4651_v0  ;;  %3061 = vmatprep.subr.bf16.mxu1 %v4651_v0  ;;  %v3200_v33 = vld [vmem:[%s4647_s0 + $0x68] sm:$0xff]   ;;  %v3202_v35 = vld [vmem:[%s4647_s0 + $0x70] sm:$0xff]   ;;  %v3204_v37 = vld [vmem:[%s4647_s0 + $0x78] sm:$0xff]  }
  0x28   :  { %v3205_v38 = vld [vmem:[%s4647_s0 + $0x13c] sm:$0xff]   ;;  %v3207_v40 = vld [vmem:[%s4647_s0 + $0x144] sm:$0xff]   ;;  %v3209_v42 = vld [vmem:[%s4647_s0 + $0x14c] sm:$0xff]  }
  0x29   :  { %2754 = vmatmul.mubr.msk.bf16.vlgmr.msra.gmra.mxu0 %vm228_vm3, %v3174_v7  ;;  %2858 = vmatmul.mubr.msk.bf16.vlgmr.msra.gmra.mxu1 %vm228_vm3, %v3175_v8  ;;  %v3206_v39 = vld [vmem:[%s4647_s0 + $0x80] sm:$0xff]   ;;  %v3208_v41 = vld [vmem:[%s4647_s0 + $0x88] sm:$0xff]   ;;  %v3210_v43 = vld [vmem:[%s4647_s0 + $0x90] sm:$0xff]  }
  0x2a   :  { %2958 = vmatpush3.bf16.msra.mxu0 %v309_v5  ;;  %3062 = vmatpush3.bf16.msra.mxu1 %v309_v5  ;;  %v3211_v44 = vld [vmem:[%s4647_s0 + $0x154] sm:$0xff]   ;;  %v3213_v46 = vld [vmem:[%s4647_s0 + $0x15c] sm:$0xff]   ;;  %v3215_v48 = vld [vmem:[%s4647_s0 + $0x164] sm:$0xff]  }
  0x2b   :  { %2757 = vmatprep.mubr.msk.bf16.mxu0 %vm3323_vm1, %v4651_v0  ;;  %2861 = vmatprep.mubr.msk.bf16.mxu1 %vm3323_vm1, %v4651_v0  ;;  %v3212_v45 = vld [vmem:[%s4647_s0 + $0x98] sm:$0xff]   ;;  %v3214_v47 = vld [vmem:[%s4647_s0 + $0xa0] sm:$0xff]   ;;  %v3216_v49 = vld [vmem:[%s4647_s0 + $0xa8] sm:$0xff]  }
  0x2c   :  { %2959 = vmatprep.subr.bf16.mxu0 %v4651_v0  ;;  %3063 = vmatprep.subr.bf16.mxu1 %v4651_v0  ;;  %v3217_v50 = vld [vmem:[%s4647_s0 + $0x16c] sm:$0xff]   ;;  %v3219_v52 = vld [vmem:[%s4647_s0 + $0x174] sm:$0xff]   ;;  %v3221_v54 = vld [vmem:[%s4647_s0 + $0x17c] sm:$0xff]  }
  0x2d   :  { %v3218_v51 = vld [vmem:[%s4647_s0 + $0xb0] sm:$0xff]   ;;  %v3220_v53 = vld [vmem:[%s4647_s0 + $0xb8] sm:$0xff]   ;;  %v3222_v55 = vld [vmem:[%s4647_s0 + $0xc0] ss:$0 sps:$4 sm:$0xff]  }
  0x2e   :  { %2960 = vmatpush3.bf16.msra.mxu0 %v3173_v6  ;;  %3064 = vmatpush3.bf16.msra.mxu1 %v3173_v6  ;;  %v3223_v56 = vld [vmem:[%s4647_s0 + $0x184] ss:$0 sps:$4 sm:$0xff]   ;;  %v3224_v1 = vld [vmem:[%s4647_s0 + $0x188] sm:$0xff]  }
  0x2f   :  { %v3225_v2 = vld [vmem:[%s4647_s0 + $0x24c] sm:$0xff]  }
  0x31   :  { %2758 = vmatmul.mubr.msk.bf16.gmra.mxu0 %vm228_vm3, %v3176_v9  ;;  %2862 = vmatmul.mubr.msk.bf16.gmra.mxu1 %vm228_vm3, %v3177_v10 }
  0x32   :  { %2761 = vmatprep.mubr.msk.bf16.mxu0 %vm3323_vm1, %v4651_v0  ;;  %2865 = vmatprep.mubr.msk.bf16.mxu1 %vm3323_vm1, %v4651_v0 }
  0x39   :  { %2762 = vmatmul.mubr.msk.bf16.gmra.mxu0 %vm228_vm3, %v3178_v11  ;;  %2866 = vmatmul.mubr.msk.bf16.gmra.mxu1 %vm228_vm3, %v3179_v12 }
  0x3a   :  { %2765 = vmatprep.mubr.msk.bf16.mxu0 %vm3323_vm1, %v4651_v0  ;;  %2869 = vmatprep.mubr.msk.bf16.mxu1 %vm3323_vm1, %v4651_v0 }
  0x41   :  { %2766 = vmatmul.mubr.msk.bf16.gmra.mxu0 %vm228_vm3, %v3180_v13  ;;  %2870 = vmatmul.mubr.msk.bf16.gmra.mxu1 %vm228_vm3, %v3181_v14  ;;  %v3226_v13 = vld [vmem:[%s4647_s0 + $0x190] sm:$0xff]  }
  0x42   :  { %2769 = vmatprep.mubr.msk.bf16.mxu0 %vm3323_vm1, %v4651_v0  ;;  %2873 = vmatprep.mubr.msk.bf16.mxu1 %vm3323_vm1, %v4651_v0  ;;  %v3227_v14 = vld [vmem:[%s4647_s0 + $0x254] sm:$0xff]  }
  0x49   :  { %2770 = vmatmul.mubr.msk.bf16.gmra.mxu0 %vm228_vm3, %v3182_v15  ;;  %2874 = vmatmul.mubr.msk.bf16.gmra.mxu1 %vm228_vm3, %v3183_v16 }
  0x4a   :  { %2773 = vmatprep.mubr.msk.bf16.mxu0 %vm3323_vm1, %v4651_v0  ;;  %2877 = vmatprep.mubr.msk.bf16.mxu1 %vm3323_vm1, %v4651_v0 }
  0x51   :  { %2774 = vmatmul.mubr.msk.bf16.gmra.mxu0 %vm228_vm3, %v3184_v17  ;;  %2878 = vmatmul.mubr.msk.bf16.gmra.mxu1 %vm228_vm3, %v3185_v18 }
  0x52   :  { %2777 = vmatprep.mubr.msk.bf16.mxu0 %vm3323_vm1, %v4651_v0  ;;  %2881 = vmatprep.mubr.msk.bf16.mxu1 %vm3323_vm1, %v4651_v0 }
  0x59   :  { %2778 = vmatmul.mubr.msk.bf16.gmra.mxu0 %vm228_vm3, %v3186_v19  ;;  %2882 = vmatmul.mubr.msk.bf16.gmra.mxu1 %vm228_vm3, %v3187_v20 }
  0x5a   :  { %2781 = vmatprep.mubr.msk.bf16.mxu0 %vm3323_vm1, %v4651_v0  ;;  %2885 = vmatprep.mubr.msk.bf16.mxu1 %vm3323_vm1, %v4651_v0 }
  0x61   :  { %2782 = vmatmul.mubr.msk.bf16.gmra.mxu0 %vm228_vm3, %v3188_v21  ;;  %2886 = vmatmul.mubr.msk.bf16.gmra.mxu1 %vm228_vm3, %v3189_v22 }
  0x62   :  { %2785 = vmatprep.mubr.msk.bf16.mxu0 %vm3323_vm1, %v4651_v0  ;;  %2889 = vmatprep.mubr.msk.bf16.mxu1 %vm3323_vm1, %v4651_v0 }
  0x69   :  { %2786 = vmatmul.mubr.msk.bf16.gmra.mxu0 %vm228_vm3, %v3190_v23  ;;  %2890 = vmatmul.mubr.msk.bf16.gmra.mxu1 %vm228_vm3, %v3191_v24 }
  0x6a   :  { %2789 = vmatprep.mubr.msk.bf16.mxu0 %vm3323_vm1, %v4651_v0  ;;  %2893 = vmatprep.mubr.msk.bf16.mxu1 %vm3323_vm1, %v4651_v0 }
  0x71   :  { %2790 = vmatmul.mubr.msk.bf16.gmra.mxu0 %vm228_vm3, %v3192_v25  ;;  %2894 = vmatmul.mubr.msk.bf16.gmra.mxu1 %vm228_vm3, %v3193_v26  ;;  %v3228_v25 = vld [vmem:[%s4647_s0 + $0x198] sm:$0xff]  }
  0x72   :  { %2793 = vmatprep.mubr.msk.bf16.mxu0 %vm3323_vm1, %v4651_v0  ;;  %2897 = vmatprep.mubr.msk.bf16.mxu1 %vm3323_vm1, %v4651_v0  ;;  %v3229_v26 = vld [vmem:[%s4647_s0 + $0x25c] sm:$0xff]  }
  0x79   :  { %2794 = vmatmul.mubr.msk.bf16.gmra.mxu0 %vm228_vm3, %v3194_v27  ;;  %2898 = vmatmul.mubr.msk.bf16.gmra.mxu1 %vm228_vm3, %v3195_v28 }
  0x7a   :  { %2797 = vmatprep.mubr.msk.bf16.mxu0 %vm3323_vm1, %v4651_v0  ;;  %2901 = vmatprep.mubr.msk.bf16.mxu1 %vm3323_vm1, %v4651_v0 }
  0x81   :  { %2798 = vmatmul.mubr.msk.bf16.gmra.mxu0 %vm228_vm3, %v3196_v29  ;;  %2902 = vmatmul.mubr.msk.bf16.gmra.mxu1 %vm228_vm3, %v3197_v30 }
  0x82   :  { %2801 = vmatprep.mubr.msk.bf16.mxu0 %vm3323_vm1, %v4651_v0  ;;  %2905 = vmatprep.mubr.msk.bf16.mxu1 %vm3323_vm1, %v4651_v0 }
  0x89   :  { %2802 = vmatmul.mubr.msk.bf16.gmra.mxu0 %vm228_vm3, %v3198_v31  ;;  %2906 = vmatmul.mubr.msk.bf16.gmra.mxu1 %vm228_vm3, %v3199_v32 }
  0x8a   :  { %2805 = vmatprep.mubr.msk.bf16.mxu0 %vm3323_vm1, %v4651_v0  ;;  %2909 = vmatprep.mubr.msk.bf16.mxu1 %vm3323_vm1, %v4651_v0 }
  0x91   :  { %2806 = vmatmul.mubr.msk.bf16.gmra.mxu0 %vm228_vm3, %v3200_v33  ;;  %2910 = vmatmul.mubr.msk.bf16.gmra.mxu1 %vm228_vm3, %v3201_v34 }
  0x92   :  { %2809 = vmatprep.mubr.msk.bf16.mxu0 %vm3323_vm1, %v4651_v0  ;;  %2913 = vmatprep.mubr.msk.bf16.mxu1 %vm3323_vm1, %v4651_v0 }
  0x99   :  { %2810 = vmatmul.mubr.msk.bf16.gmra.mxu0 %vm228_vm3, %v3202_v35  ;;  %2914 = vmatmul.mubr.msk.bf16.gmra.mxu1 %vm228_vm3, %v3203_v36 }
  0x9a   :  { %2813 = vmatprep.mubr.msk.bf16.mxu0 %vm3323_vm1, %v4651_v0  ;;  %2917 = vmatprep.mubr.msk.bf16.mxu1 %vm3323_vm1, %v4651_v0 }
  0xa1   :  { %2814 = vmatmul.mubr.msk.bf16.gmra.mxu0 %vm228_vm3, %v3204_v37  ;;  %2918 = vmatmul.mubr.msk.bf16.gmra.mxu1 %vm228_vm3, %v3205_v38  ;;  %v3230_v37 = vld [vmem:[%s4647_s0 + $0x1a0] sm:$0xff]  }
  0xa2   :  { %2817 = vmatprep.mubr.msk.bf16.mxu0 %vm3323_vm1, %v4651_v0  ;;  %2921 = vmatprep.mubr.msk.bf16.mxu1 %vm3323_vm1, %v4651_v0  ;;  %v3231_v38 = vld [vmem:[%s4647_s0 + $0x264] sm:$0xff]  }
  0xa9   :  { %2818 = vmatmul.mubr.msk.bf16.gmra.mxu0 %vm228_vm3, %v3206_v39  ;;  %2922 = vmatmul.mubr.msk.bf16.gmra.mxu1 %vm228_vm3, %v3207_v40 }
  0xaa   :  { %2821 = vmatprep.mubr.msk.bf16.mxu0 %vm3323_vm1, %v4651_v0  ;;  %2925 = vmatprep.mubr.msk.bf16.mxu1 %vm3323_vm1, %v4651_v0 }
  0xb1   :  { %2822 = vmatmul.mubr.msk.bf16.gmra.mxu0 %vm228_vm3, %v3208_v41  ;;  %2926 = vmatmul.mubr.msk.bf16.gmra.mxu1 %vm228_vm3, %v3209_v42 }
  0xb2   :  { %2825 = vmatprep.mubr.msk.bf16.mxu0 %vm3323_vm1, %v4651_v0  ;;  %2929 = vmatprep.mubr.msk.bf16.mxu1 %vm3323_vm1, %v4651_v0 }
  0xb9   :  { %2826 = vmatmul.mubr.msk.bf16.gmra.mxu0 %vm228_vm3, %v3210_v43  ;;  %2930 = vmatmul.mubr.msk.bf16.gmra.mxu1 %vm228_vm3, %v3211_v44 }
  0xba   :  { %2829 = vmatprep.mubr.msk.bf16.mxu0 %vm3323_vm1, %v4651_v0  ;;  %2933 = vmatprep.mubr.msk.bf16.mxu1 %vm3323_vm1, %v4651_v0 }
  0xc1   :  { %2830 = vmatmul.mubr.msk.bf16.gmra.mxu0 %vm228_vm3, %v3212_v45  ;;  %2934 = vmatmul.mubr.msk.bf16.gmra.mxu1 %vm228_vm3, %v3213_v46 }
  0xc2   :  { %2833 = vmatprep.mubr.msk.bf16.mxu0 %vm3323_vm1, %v4651_v0  ;;  %2937 = vmatprep.mubr.msk.bf16.mxu1 %vm3323_vm1, %v4651_v0 }
  0xc9   :  { %2834 = vmatmul.mubr.msk.bf16.gmra.mxu0 %vm228_vm3, %v3214_v47  ;;  %2938 = vmatmul.mubr.msk.bf16.gmra.mxu1 %vm228_vm3, %v3215_v48 }
  0xca   :  { %2837 = vmatprep.mubr.msk.bf16.mxu0 %vm3323_vm1, %v4651_v0  ;;  %2941 = vmatprep.mubr.msk.bf16.mxu1 %vm3323_vm1, %v4651_v0 }
  0xd1   :  { %2838 = vmatmul.mubr.msk.bf16.gmra.mxu0 %vm228_vm3, %v3216_v49  ;;  %2942 = vmatmul.mubr.msk.bf16.gmra.mxu1 %vm228_vm3, %v3217_v50  ;;  %v3232_v49 = vld [vmem:[%s4647_s0 + $0x1a8] sm:$0xff]  }
  0xd2   :  { %2841 = vmatprep.mubr.msk.bf16.mxu0 %vm3323_vm1, %v4651_v0  ;;  %2945 = vmatprep.mubr.msk.bf16.mxu1 %vm3323_vm1, %v4651_v0  ;;  %v3233_v50 = vld [vmem:[%s4647_s0 + $0x26c] sm:$0xff]  }
  0xd9   :  { %2842 = vmatmul.mubr.msk.bf16.gmra.mxu0 %vm228_vm3, %v3218_v51  ;;  %2946 = vmatmul.mubr.msk.bf16.gmra.mxu1 %vm228_vm3, %v3219_v52 }
  0xda   :  { %2845 = vmatprep.mubr.msk.bf16.mxu0 %vm3323_vm1, %v4651_v0  ;;  %2949 = vmatprep.mubr.msk.bf16.mxu1 %vm3323_vm1, %v4651_v0 }
  0xe1   :  { %2846 = vmatmul.mubr.msk.bf16.gmra.mxu0 %vm228_vm3, %v3220_v53  ;;  %2950 = vmatmul.mubr.msk.bf16.gmra.mxu1 %vm228_vm3, %v3221_v54 }
  0xe2   :  { %2849 = vmatprep.mubr.msk.bf16.mxu0 %vm3323_vm1, %v4651_v0  ;;  %2953 = vmatprep.mubr.msk.bf16.mxu1 %vm3323_vm1, %v4651_v0 }
  0xe9   :  { %v3657_v57 = vpop.f32.mrf.mxu0  ;;  %2850 = vmatmul.mubr.msk.bf16.gmra.mxu0 %vm228_vm3, %v3222_v55  ;;  %v3660_v58 = vpop.f32.mrf.mxu1  ;;  %2954 = vmatmul.mubr.msk.bf16.gmra.mxu1 %vm228_vm3, %v3223_v56 }
  0xea   :  { %2961 = vmatprep.mubr.msk.bf16.mxu0 %vm3323_vm1, %v4651_v0  ;;  %3065 = vmatprep.mubr.msk.bf16.mxu1 %vm3323_vm1, %v4651_v0 }
  0xeb   :  { %v2755_v60 = vpop.f32.mrf.mxu0  ;;  %v2859_v61 = vpop.f32.mrf.mxu1 }
  0xed   :  { %v3669_v62 = vpop.f32.mrf.mxu0  ;;  %v3671_v63 = vpop.f32.mrf.mxu1 }
  0xef   :  { %v2756_v4 = vpop.f32.mrf.mxu0  ;;  %v2860_v5 = vpop.f32.mrf.mxu1 }
  0xf0   :  { %v3234_v4 = vld [vmem:[%s4647_s0 + $0x1b0] sm:$0xff]  }
  0xf1   :  { %v3681_v6 = vpop.f32.mrf.mxu0  ;;  %v3683_v7 = vpop.f32.mrf.mxu1  ;;  %2962 = vmatmul.mubr.msk.bf16.vlgmr.msra.gmra.mxu0 %vm228_vm3, %v3224_v1  ;;  %3066 = vmatmul.mubr.msk.bf16.vlgmr.msra.gmra.mxu1 %vm228_vm3, %v3225_v2  ;;  %v3235_v5 = vld [vmem:[%s4647_s0 + $0x274] sm:$0xff]  }
  0xf2   :  { %2965 = vmatprep.mubr.msk.bf16.mxu0 %vm3323_vm1, %v4651_v0  ;;  %3069 = vmatprep.mubr.msk.bf16.mxu1 %vm3323_vm1, %v4651_v0 }
  0xf3   :  { %v2759_v9 = vpop.f32.mrf.mxu0  ;;  %v2863_v10 = vpop.f32.mrf.mxu1 }
  0xf5   :  { %v3693_v11 = vpop.f32.mrf.mxu0  ;;  %v3695_v12 = vpop.f32.mrf.mxu1 }
  0xf7   :  { %v2760_v16 = vpop.f32.mrf.mxu0  ;;  %v2864_v17 = vpop.f32.mrf.mxu1 }
  0xf9   :  { %v3705_v18 = vpop.f32.mrf.mxu0  ;;  %v3707_v19 = vpop.f32.mrf.mxu1  ;;  %2966 = vmatmul.mubr.msk.bf16.gmra.mxu0 %vm228_vm3, %v3226_v13  ;;  %3070 = vmatmul.mubr.msk.bf16.gmra.mxu1 %vm228_vm3, %v3227_v14 }
  0xfa   :  { %2969 = vmatprep.mubr.msk.bf16.mxu0 %vm3323_vm1, %v4651_v0  ;;  %3073 = vmatprep.mubr.msk.bf16.mxu1 %vm3323_vm1, %v4651_v0 }
  0xfb   :  { %v2763_v21 = vpop.f32.mrf.mxu0  ;;  %v2867_v22 = vpop.f32.mrf.mxu1 }
  0xfd   :  { %v3717_v23 = vpop.f32.mrf.mxu0  ;;  %v3719_v24 = vpop.f32.mrf.mxu1 }
  0xff   :  { %v2764_v28 = vpop.f32.mrf.mxu0  ;;  %v2868_v29 = vpop.f32.mrf.mxu1 }
 0x100   :  { %v3236_v28 = vld [vmem:[%s4647_s0 + $0x1b8] sm:$0xff]  }
 0x101   :  { %v3729_v30 = vpop.f32.mrf.mxu0  ;;  %v3731_v31 = vpop.f32.mrf.mxu1  ;;  %2970 = vmatmul.mubr.msk.bf16.gmra.mxu0 %vm228_vm3, %v3228_v25  ;;  %3074 = vmatmul.mubr.msk.bf16.gmra.mxu1 %vm228_vm3, %v3229_v26  ;;  %v3237_v29 = vld [vmem:[%s4647_s0 + $0x27c] sm:$0xff]  }
 0x102   :  { %2973 = vmatprep.mubr.msk.bf16.mxu0 %vm3323_vm1, %v4651_v0  ;;  %3077 = vmatprep.mubr.msk.bf16.mxu1 %vm3323_vm1, %v4651_v0 }
 0x103   :  { %v2767_v33 = vpop.f32.mrf.mxu0  ;;  %v2871_v34 = vpop.f32.mrf.mxu1 }
 0x105   :  { %v3741_v35 = vpop.f32.mrf.mxu0  ;;  %v3743_v36 = vpop.f32.mrf.mxu1 }
 0x107   :  { %v2768_v40 = vpop.f32.mrf.mxu0  ;;  %v2872_v41 = vpop.f32.mrf.mxu1 }
 0x109   :  { %v3753_v42 = vpop.f32.mrf.mxu0  ;;  %v3755_v43 = vpop.f32.mrf.mxu1  ;;  %2974 = vmatmul.mubr.msk.bf16.gmra.mxu0 %vm228_vm3, %v3230_v37  ;;  %3078 = vmatmul.mubr.msk.bf16.gmra.mxu1 %vm228_vm3, %v3231_v38 }
 0x10a   :  { %2977 = vmatprep.mubr.msk.bf16.mxu0 %vm3323_vm1, %v4651_v0  ;;  %3081 = vmatprep.mubr.msk.bf16.mxu1 %vm3323_vm1, %v4651_v0 }
 0x10b   :  { %v2771_v45 = vpop.f32.mrf.mxu0  ;;  %v2875_v46 = vpop.f32.mrf.mxu1 }
 0x10d   :  { %v3765_v47 = vpop.f32.mrf.mxu0  ;;  %v3767_v48 = vpop.f32.mrf.mxu1 }
 0x10f   :  { %v2772_v52 = vpop.f32.mrf.mxu0  ;;  %v2876_v53 = vpop.f32.mrf.mxu1 }
 0x110   :  { %v3238_v52 = vld [vmem:[%s4647_s0 + $0x1c0] sm:$0xff]  }
 0x111   :  { %v3777_v54 = vpop.f32.mrf.mxu0  ;;  %v3779_v55 = vpop.f32.mrf.mxu1  ;;  %2978 = vmatmul.mubr.msk.bf16.gmra.mxu0 %vm228_vm3, %v3232_v49  ;;  %3082 = vmatmul.mubr.msk.bf16.gmra.mxu1 %vm228_vm3, %v3233_v50  ;;  %v3239_v53 = vld [vmem:[%s4647_s0 + $0x284] sm:$0xff]  }
 0x112   :  { %2981 = vmatprep.mubr.msk.bf16.mxu0 %vm3323_vm1, %v4651_v0  ;;  %3085 = vmatprep.mubr.msk.bf16.mxu1 %vm3323_vm1, %v4651_v0 }
 0x113   :  { %v2775_v60 = vpop.f32.mrf.mxu0  ;;  %v2879_v61 = vpop.f32.mrf.mxu1 }
 0x115   :  { %v3789_v1 = vpop.f32.mrf.mxu0  ;;  %v3791_v2 = vpop.f32.mrf.mxu1 }
 0x117   :  { %v2776_v10 = vpop.f32.mrf.mxu0  ;;  %v2880_v13 = vpop.f32.mrf.mxu1 }
 0x119   :  { %v3801_v14 = vpop.f32.mrf.mxu0  ;;  %v3803_v16 = vpop.f32.mrf.mxu1  ;;  %2982 = vmatmul.mubr.msk.bf16.gmra.mxu0 %vm228_vm3, %v3234_v4  ;;  %3086 = vmatmul.mubr.msk.bf16.gmra.mxu1 %vm228_vm3, %v3235_v5 }
 0x11a   :  { %2985 = vmatprep.mubr.msk.bf16.mxu0 %vm3323_vm1, %v4651_v0  ;;  %3089 = vmatprep.mubr.msk.bf16.mxu1 %vm3323_vm1, %v4651_v0 }
 0x11b   :  { %v2779_v21 = vpop.f32.mrf.mxu0  ;;  %v2883_v22 = vpop.f32.mrf.mxu1 }
 0x11d   :  { %v3813_v25 = vpop.f32.mrf.mxu0  ;;  %v3815_v26 = vpop.f32.mrf.mxu1 }
 0x11f   :  { %v2780_v34 = vpop.f32.mrf.mxu0  ;;  %v2884_v37 = vpop.f32.mrf.mxu1 }
 0x120   :  { %v3240_v34 = vld [vmem:[%s4647_s0 + $0x1c8] sm:$0xff]  }
 0x121   :  { %v3825_v38 = vpop.f32.mrf.mxu0  ;;  %v3827_v40 = vpop.f32.mrf.mxu1  ;;  %2986 = vmatmul.mubr.msk.bf16.gmra.mxu0 %vm228_vm3, %v3236_v28  ;;  %3090 = vmatmul.mubr.msk.bf16.gmra.mxu1 %vm228_vm3, %v3237_v29  ;;  %v3241_v37 = vld [vmem:[%s4647_s0 + $0x28c] sm:$0xff]  }
 0x122   :  { %2989 = vmatprep.mubr.msk.bf16.mxu0 %vm3323_vm1, %v4651_v0  ;;  %3093 = vmatprep.mubr.msk.bf16.mxu1 %vm3323_vm1, %v4651_v0 }
 0x123   :  { %v2783_v45 = vpop.f32.mrf.mxu0  ;;  %v2887_v46 = vpop.f32.mrf.mxu1 }
 0x125   :  { %v3837_v49 = vpop.f32.mrf.mxu0  ;;  %v3839_v50 = vpop.f32.mrf.mxu1 }
 0x127   :  { %v2784_v61 = vpop.f32.mrf.mxu0  ;;  %v2888_v4 = vpop.f32.mrf.mxu1 }
 0x129   :  { %v3849_v5 = vpop.f32.mrf.mxu0  ;;  %v3851_v10 = vpop.f32.mrf.mxu1  ;;  %2990 = vmatmul.mubr.msk.bf16.gmra.mxu0 %vm228_vm3, %v3238_v52  ;;  %3094 = vmatmul.mubr.msk.bf16.gmra.mxu1 %vm228_vm3, %v3239_v53 }
 0x12a   :  { %2993 = vmatprep.mubr.msk.bf16.mxu0 %vm3323_vm1, %v4651_v0  ;;  %3097 = vmatprep.mubr.msk.bf16.mxu1 %vm3323_vm1, %v4651_v0 }
 0x12b   :  { %v2787_v21 = vpop.f32.mrf.mxu0  ;;  %v2891_v22 = vpop.f32.mrf.mxu1 }
 0x12d   :  { %v3861_v28 = vpop.f32.mrf.mxu0  ;;  %v3863_v29 = vpop.f32.mrf.mxu1 }
 0x12f   :  { %v2788_v46 = vpop.f32.mrf.mxu0  ;;  %v2892_v52 = vpop.f32.mrf.mxu1 }
 0x131   :  { %v3873_v53 = vpop.f32.mrf.mxu0  ;;  %v3875_v61 = vpop.f32.mrf.mxu1  ;;  %2994 = vmatmul.mubr.msk.bf16.gmra.mxu0 %vm228_vm3, %v3240_v34  ;;  %3098 = vmatmul.mubr.msk.bf16.gmra.mxu1 %vm228_vm3, %v3241_v37  ;;  %v3242_v34 = vld [vmem:[%s4647_s0 + $0x1d0] sm:$0xff]  }
 0x132   :  { %2997 = vmatprep.mubr.msk.bf16.mxu0 %vm3323_vm1, %v4651_v0  ;;  %3101 = vmatprep.mubr.msk.bf16.mxu1 %vm3323_vm1, %v4651_v0  ;;  %v3243_v37 = vld [vmem:[%s4647_s0 + $0x294] sm:$0xff]  }
 0x133   :  { %v2791_v21 = vpop.f32.mrf.mxu0  ;;  %v2895_v22 = vpop.f32.mrf.mxu1 }
 0x135   :  { %v3885_v46 = vpop.f32.mrf.mxu0  ;;  %v3887_v52 = vpop.f32.mrf.mxu1 }
 0x137   :  { %v2792_v45 = vpop.f32.mrf.mxu0  ;;  %v2896_v13 = vpop.f32.mrf.mxu1 }
 0x139   :  { %v3897_v60 = vpop.f32.mrf.mxu0  ;;  %v3899_v21 = vpop.f32.mrf.mxu1  ;;  %2998 = vmatmul.mubr.msk.bf16.gmra.mxu0 %vm228_vm3, %v3242_v34  ;;  %3102 = vmatmul.mubr.msk.bf16.gmra.mxu1 %vm228_vm3, %v3243_v37  ;;  %v3244_v34 = vld [vmem:[%s4647_s0 + $0x1d8] sm:$0xff]  }
 0x13a   :  { %3001 = vmatprep.mubr.msk.bf16.mxu0 %vm3323_vm1, %v4651_v0  ;;  %3105 = vmatprep.mubr.msk.bf16.mxu1 %vm3323_vm1, %v4651_v0  ;;  %v3245_v37 = vld [vmem:[%s4647_s0 + $0x29c] sm:$0xff]  }
 0x13b   :  { %v2795_v4 = vpop.f32.mrf.mxu0  ;;  %v2899_v45 = vpop.f32.mrf.mxu1 }
 0x13d   :  { %v3909_v13 = vpop.f32.mrf.mxu0  ;;  %v3911_v41 = vpop.f32.mrf.mxu1 }
 0x13f   :  { %v2796_v33 = vpop.f32.mrf.mxu0  ;;  %v2900_v17 = vpop.f32.mrf.mxu1 }
 0x141   :  { %v3921_v9 = vpop.f32.mrf.mxu0  ;;  %v3923_v4 = vpop.f32.mrf.mxu1  ;;  %3002 = vmatmul.mubr.msk.bf16.gmra.mxu0 %vm228_vm3, %v3244_v34  ;;  %3106 = vmatmul.mubr.msk.bf16.gmra.mxu1 %vm228_vm3, %v3245_v37  ;;  %v3246_v34 = vld [vmem:[%s4647_s0 + $0x1e0] sm:$0xff]  }
 0x142   :  { %3005 = vmatprep.mubr.msk.bf16.mxu0 %vm3323_vm1, %v4651_v0  ;;  %3109 = vmatprep.mubr.msk.bf16.mxu1 %vm3323_vm1, %v4651_v0  ;;  %v3247_v37 = vld [vmem:[%s4647_s0 + $0x2a4] sm:$0xff]  }
 0x143   :  { %v2799_v22 = vpop.f32.mrf.mxu0  ;;  %v2903_v33 = vpop.f32.mrf.mxu1 }
 0x145   :  { %v3933_v17 = vpop.f32.mrf.mxu0  ;;  %v3935_v56 = vpop.f32.mrf.mxu1 }
 0x146   :  { %4704 = vst [vmem:[#allocation8_spill] sm:$0xff] %v3935_v56 }
 0x147   :  { %v2800_v51 = vpop.f32.mrf.mxu0  ;;  %v2904_v44 = vpop.f32.mrf.mxu1 }
 0x149   :  { %v3945_v39 = vpop.f32.mrf.mxu0  ;;  %v3947_v22 = vpop.f32.mrf.mxu1  ;;  %3006 = vmatmul.mubr.msk.bf16.gmra.mxu0 %vm228_vm3, %v3246_v34  ;;  %3110 = vmatmul.mubr.msk.bf16.gmra.mxu1 %vm228_vm3, %v3247_v37  ;;  %v3248_v34 = vld [vmem:[%s4647_s0 + $0x1e8] sm:$0xff]  }
 0x14a   :  { %4705 = vst [vmem:[#allocation9_spill] sm:$0xff] %v3945_v39  ;;  %4706 = vst [vmem:[#allocation10_spill] sm:$0xff] %v3947_v22  ;;  %3009 = vmatprep.mubr.msk.bf16.mxu0 %vm3323_vm1, %v4651_v0  ;;  %3113 = vmatprep.mubr.msk.bf16.mxu1 %vm3323_vm1, %v4651_v0  ;;  %v3249_v37 = vld [vmem:[%s4647_s0 + $0x2ac] sm:$0xff]  }
 0x14b   :  { %v2803_v45 = vpop.f32.mrf.mxu0  ;;  %v2907_v51 = vpop.f32.mrf.mxu1 }
 0x14d   :  { %v3957_v44 = vpop.f32.mrf.mxu0  ;;  %v3959_v32 = vpop.f32.mrf.mxu1 }
 0x14e   :  { %4707 = vst [vmem:[#allocation11_spill] sm:$0xff] %v3957_v44  ;;  %4708 = vst [vmem:[#allocation12_spill] sm:$0xff] %v3959_v32 }
 0x14f   :  { %v2804_v27 = vpop.f32.mrf.mxu0  ;;  %v2908_v20 = vpop.f32.mrf.mxu1 }
 0x151   :  { %v3969_v15 = vpop.f32.mrf.mxu0  ;;  %v3971_v45 = vpop.f32.mrf.mxu1  ;;  %3010 = vmatmul.mubr.msk.bf16.gmra.mxu0 %vm228_vm3, %v3248_v34  ;;  %3114 = vmatmul.mubr.msk.bf16.gmra.mxu1 %vm228_vm3, %v3249_v37  ;;  %v3250_v34 = vld [vmem:[%s4647_s0 + $0x1f0] sm:$0xff]  }
 0x152   :  { %4709 = vst [vmem:[#allocation13_spill] sm:$0xff] %v3969_v15  ;;  %4710 = vst [vmem:[#allocation14_spill] sm:$0xff] %v3971_v45  ;;  %3013 = vmatprep.mubr.msk.bf16.mxu0 %vm3323_vm1, %v4651_v0  ;;  %3117 = vmatprep.mubr.msk.bf16.mxu1 %vm3323_vm1, %v4651_v0  ;;  %v3251_v37 = vld [vmem:[%s4647_s0 + $0x2b4] sm:$0xff]   ;;  %v4715_v45 = vmov 0.0  }
 0x153   :  { %v2807_v33 = vpop.f32.mrf.mxu0  ;;  %v2911_v27 = vpop.f32.mrf.mxu1 }
 0x155   :  { %v3981_v20 = vpop.f32.mrf.mxu0  ;;  %v3983_v8 = vpop.f32.mrf.mxu1 }
 0x156   :  { %4711 = vst [vmem:[#allocation15_spill] sm:$0xff] %v3981_v20  ;;  %4712 = vst [vmem:[#allocation16_spill] sm:$0xff] %v3983_v8 }
 0x157   :  { %v2808_v3 = vpop.f32.mrf.mxu0  ;;  %v2912_v59 = vpop.f32.mrf.mxu1 }
 0x159   :  { %v3993_v0 = vpop.f32.mrf.mxu0  ;;  %v3995_v33 = vpop.f32.mrf.mxu1  ;;  %3014 = vmatmul.mubr.msk.bf16.gmra.mxu0 %vm228_vm3, %v3250_v34  ;;  %3118 = vmatmul.mubr.msk.bf16.gmra.mxu1 %vm228_vm3, %v3251_v37  ;;  %v3252_v34 = vld [vmem:[%s4647_s0 + $0x1f8] sm:$0xff]  }
 0x15a   :  { %4713 = vst [vmem:[#allocation17_spill] sm:$0xff] %v3993_v0  ;;  %4714 = vst [vmem:[#allocation18_spill] sm:$0xff] %v3995_v33  ;;  %3017 = vmatprep.mubr.msk.bf16.mxu0 %vm3323_vm1, %v4715_v45  ;;  %3121 = vmatprep.mubr.msk.bf16.mxu1 %vm3323_vm1, %v4715_v45  ;;  %v3253_v37 = vld [vmem:[%s4647_s0 + $0x2bc] sm:$0xff]  }
 0x15b   :  { %v2811_v51 = vpop.f32.mrf.mxu0  ;;  %v2915_v3 = vpop.f32.mrf.mxu1 }
 0x15d   :  { %v4005_v59 = vpop.f32.mrf.mxu0  ;;  %v4007_v8 = vpop.f32.mrf.mxu1 }
 0x15e   :  { %4716 = vst [vmem:[#allocation19_spill] sm:$0xff] %v4005_v59  ;;  %4717 = vst [vmem:[#allocation20_spill] sm:$0xff] %v4007_v8 }
 0x15f   :  { %v2812_v33 = vpop.f32.mrf.mxu0  ;;  %v2916_v0 = vpop.f32.mrf.mxu1 }
 0x161   :  { %v4017_v20 = vpop.f32.mrf.mxu0  ;;  %v4019_v51 = vpop.f32.mrf.mxu1  ;;  %3018 = vmatmul.mubr.msk.bf16.gmra.mxu0 %vm228_vm3, %v3252_v34  ;;  %3122 = vmatmul.mubr.msk.bf16.gmra.mxu1 %vm228_vm3, %v3253_v37  ;;  %v3254_v34 = vld [vmem:[%s4647_s0 + $0x200] sm:$0xff]  }
 0x162   :  { %4718 = vst [vmem:[#allocation21_spill] sm:$0xff] %v4017_v20  ;;  %4719 = vst [vmem:[#allocation22_spill] sm:$0xff] %v4019_v51  ;;  %3021 = vmatprep.mubr.msk.bf16.mxu0 %vm3323_vm1, %v4715_v45  ;;  %3125 = vmatprep.mubr.msk.bf16.mxu1 %vm3323_vm1, %v4715_v45  ;;  %v3255_v37 = vld [vmem:[%s4647_s0 + $0x2c4] sm:$0xff]  }
 0x163   :  { %v2815_v27 = vpop.f32.mrf.mxu0  ;;  %v2919_v33 = vpop.f32.mrf.mxu1 }
 0x165   :  { %v4029_v0 = vpop.f32.mrf.mxu0  ;;  %v4031_v8 = vpop.f32.mrf.mxu1 }
 0x166   :  { %4720 = vst [vmem:[#allocation23_spill] sm:$0xff] %v4029_v0  ;;  %4721 = vst [vmem:[#allocation24_spill] sm:$0xff] %v4031_v8 }
 0x167   :  { %v2816_v51 = vpop.f32.mrf.mxu0  ;;  %v2920_v20 = vpop.f32.mrf.mxu1 }
 0x169   :  { %v4041_v59 = vpop.f32.mrf.mxu0  ;;  %v4043_v27 = vpop.f32.mrf.mxu1  ;;  %3022 = vmatmul.mubr.msk.bf16.gmra.mxu0 %vm228_vm3, %v3254_v34  ;;  %3126 = vmatmul.mubr.msk.bf16.gmra.mxu1 %vm228_vm3, %v3255_v37  ;;  %v3256_v34 = vld [vmem:[%s4647_s0 + $0x208] sm:$0xff]  }
 0x16a   :  { %4722 = vst [vmem:[#allocation25_spill] sm:$0xff] %v4041_v59  ;;  %4723 = vst [vmem:[#allocation26_spill] sm:$0xff] %v4043_v27  ;;  %3025 = vmatprep.mubr.msk.bf16.mxu0 %vm3323_vm1, %v4715_v45  ;;  %3129 = vmatprep.mubr.msk.bf16.mxu1 %vm3323_vm1, %v4715_v45  ;;  %v3257_v37 = vld [vmem:[%s4647_s0 + $0x2cc] sm:$0xff]  }
 0x16b   :  { %v2819_v3 = vpop.f32.mrf.mxu0  ;;  %v2923_v51 = vpop.f32.mrf.mxu1 }
 0x16d   :  { %v4053_v20 = vpop.f32.mrf.mxu0  ;;  %v4055_v8 = vpop.f32.mrf.mxu1 }
 0x16e   :  { %4724 = vst [vmem:[#allocation27_spill] sm:$0xff] %v4053_v20  ;;  %4725 = vst [vmem:[#allocation28_spill] sm:$0xff] %v4055_v8 }
 0x16f   :  { %v2820_v27 = vpop.f32.mrf.mxu0  ;;  %v2924_v59 = vpop.f32.mrf.mxu1 }
 0x171   :  { %v4065_v0 = vpop.f32.mrf.mxu0  ;;  %v4067_v3 = vpop.f32.mrf.mxu1  ;;  %3026 = vmatmul.mubr.msk.bf16.gmra.mxu0 %vm228_vm3, %v3256_v34  ;;  %3130 = vmatmul.mubr.msk.bf16.gmra.mxu1 %vm228_vm3, %v3257_v37  ;;  %v3258_v34 = vld [vmem:[%s4647_s0 + $0x210] sm:$0xff]  }
 0x172   :  { %4726 = vst [vmem:[#allocation29_spill] sm:$0xff] %v4065_v0  ;;  %4727 = vst [vmem:[#allocation30_spill] sm:$0xff] %v4067_v3  ;;  %3029 = vmatprep.mubr.msk.bf16.mxu0 %vm3323_vm1, %v4715_v45  ;;  %3133 = vmatprep.mubr.msk.bf16.mxu1 %vm3323_vm1, %v4715_v45  ;;  %v3259_v37 = vld [vmem:[%s4647_s0 + $0x2d4] sm:$0xff]  }
 0x173   :  { %v2823_v33 = vpop.f32.mrf.mxu0  ;;  %v2927_v27 = vpop.f32.mrf.mxu1 }
 0x175   :  { %v4077_v59 = vpop.f32.mrf.mxu0  ;;  %v4079_v8 = vpop.f32.mrf.mxu1 }
 0x176   :  { %4728 = vst [vmem:[#allocation31_spill] sm:$0xff] %v4077_v59  ;;  %4729 = vst [vmem:[#allocation32_spill] sm:$0xff] %v4079_v8 }
 0x177   :  { %v2824_v3 = vpop.f32.mrf.mxu0  ;;  %v2928_v0 = vpop.f32.mrf.mxu1 }
 0x179   :  { %v4089_v20 = vpop.f32.mrf.mxu0  ;;  %v4091_v33 = vpop.f32.mrf.mxu1  ;;  %3030 = vmatmul.mubr.msk.bf16.gmra.mxu0 %vm228_vm3, %v3258_v34  ;;  %3134 = vmatmul.mubr.msk.bf16.gmra.mxu1 %vm228_vm3, %v3259_v37  ;;  %v3260_v34 = vld [vmem:[%s4647_s0 + $0x218] sm:$0xff]  }
 0x17a   :  { %4730 = vst [vmem:[#allocation33_spill] sm:$0xff] %v4089_v20  ;;  %4731 = vst [vmem:[#allocation34_spill] sm:$0xff] %v4091_v33  ;;  %3033 = vmatprep.mubr.msk.bf16.mxu0 %vm3323_vm1, %v4715_v45  ;;  %3137 = vmatprep.mubr.msk.bf16.mxu1 %vm3323_vm1, %v4715_v45  ;;  %v3261_v37 = vld [vmem:[%s4647_s0 + $0x2dc] sm:$0xff]  }
 0x17b   :  { %v2827_v51 = vpop.f32.mrf.mxu0  ;;  %v2931_v3 = vpop.f32.mrf.mxu1 }
 0x17d   :  { %v4101_v0 = vpop.f32.mrf.mxu0  ;;  %v4103_v8 = vpop.f32.mrf.mxu1 }
 0x17e   :  { %4732 = vst [vmem:[#allocation35_spill] sm:$0xff] %v4101_v0  ;;  %4733 = vst [vmem:[#allocation36_spill] sm:$0xff] %v4103_v8 }
 0x17f   :  { %v2828_v33 = vpop.f32.mrf.mxu0  ;;  %v2932_v20 = vpop.f32.mrf.mxu1 }
 0x181   :  { %v4113_v59 = vpop.f32.mrf.mxu0  ;;  %v4115_v51 = vpop.f32.mrf.mxu1  ;;  %3034 = vmatmul.mubr.msk.bf16.gmra.mxu0 %vm228_vm3, %v3260_v34  ;;  %3138 = vmatmul.mubr.msk.bf16.gmra.mxu1 %vm228_vm3, %v3261_v37  ;;  %v3262_v34 = vld [vmem:[%s4647_s0 + $0x220] sm:$0xff]  }
 0x182   :  { %4734 = vst [vmem:[#allocation37_spill] sm:$0xff] %v4113_v59  ;;  %4735 = vst [vmem:[#allocation38_spill] sm:$0xff] %v4115_v51  ;;  %3037 = vmatprep.mubr.msk.bf16.mxu0 %vm3323_vm1, %v4715_v45  ;;  %3141 = vmatprep.mubr.msk.bf16.mxu1 %vm3323_vm1, %v4715_v45  ;;  %v3263_v37 = vld [vmem:[%s4647_s0 + $0x2e4] sm:$0xff]  }
 0x183   :  { %v2831_v27 = vpop.f32.mrf.mxu0  ;;  %v2935_v33 = vpop.f32.mrf.mxu1 }
 0x185   :  { %v4125_v20 = vpop.f32.mrf.mxu0  ;;  %v4127_v8 = vpop.f32.mrf.mxu1 }
 0x186   :  { %4736 = vst [vmem:[#allocation39_spill] sm:$0xff] %v4125_v20  ;;  %4737 = vst [vmem:[#allocation40_spill] sm:$0xff] %v4127_v8 }
 0x187   :  { %v2832_v51 = vpop.f32.mrf.mxu0  ;;  %v2936_v59 = vpop.f32.mrf.mxu1 }
 0x189   :  { %v4137_v0 = vpop.f32.mrf.mxu0  ;;  %v4139_v27 = vpop.f32.mrf.mxu1  ;;  %3038 = vmatmul.mubr.msk.bf16.gmra.mxu0 %vm228_vm3, %v3262_v34  ;;  %3142 = vmatmul.mubr.msk.bf16.gmra.mxu1 %vm228_vm3, %v3263_v37  ;;  %v3264_v34 = vld [vmem:[%s4647_s0 + $0x228] sm:$0xff]  }
 0x18a   :  { %4738 = vst [vmem:[#allocation41_spill] sm:$0xff] %v4137_v0  ;;  %4739 = vst [vmem:[#allocation42_spill] sm:$0xff] %v4139_v27  ;;  %3041 = vmatprep.mubr.msk.bf16.mxu0 %vm3323_vm1, %v4715_v45  ;;  %3145 = vmatprep.mubr.msk.bf16.mxu1 %vm3323_vm1, %v4715_v45  ;;  %v3265_v37 = vld [vmem:[%s4647_s0 + $0x2ec] sm:$0xff]  }
 0x18b   :  { %v2835_v3 = vpop.f32.mrf.mxu0  ;;  %v2939_v51 = vpop.f32.mrf.mxu1 }
 0x18d   :  { %v4149_v59 = vpop.f32.mrf.mxu0  ;;  %v4151_v8 = vpop.f32.mrf.mxu1 }
 0x18e   :  { %4740 = vst [vmem:[#allocation43_spill] sm:$0xff] %v4149_v59  ;;  %4741 = vst [vmem:[#allocation44_spill] sm:$0xff] %v4151_v8 }
 0x18f   :  { %v2836_v27 = vpop.f32.mrf.mxu0  ;;  %v2940_v0 = vpop.f32.mrf.mxu1 }
 0x191   :  { %v4161_v20 = vpop.f32.mrf.mxu0  ;;  %v4163_v3 = vpop.f32.mrf.mxu1  ;;  %3042 = vmatmul.mubr.msk.bf16.gmra.mxu0 %vm228_vm3, %v3264_v34  ;;  %3146 = vmatmul.mubr.msk.bf16.gmra.mxu1 %vm228_vm3, %v3265_v37  ;;  %v3266_v34 = vld [vmem:[%s4647_s0 + $0x230] sm:$0xff]  }
 0x192   :  { %4742 = vst [vmem:[#allocation45_spill] sm:$0xff] %v4161_v20  ;;  %4743 = vst [vmem:[#allocation46_spill] sm:$0xff] %v4163_v3  ;;  %3045 = vmatprep.mubr.msk.bf16.mxu0 %vm3323_vm1, %v4715_v45  ;;  %3149 = vmatprep.mubr.msk.bf16.mxu1 %vm3323_vm1, %v4715_v45  ;;  %v3267_v37 = vld [vmem:[%s4647_s0 + $0x2f4] sm:$0xff]  }
 0x193   :  { %v2839_v33 = vpop.f32.mrf.mxu0  ;;  %v2943_v27 = vpop.f32.mrf.mxu1 }
 0x195   :  { %v4173_v0 = vpop.f32.mrf.mxu0  ;;  %v4175_v8 = vpop.f32.mrf.mxu1 }
 0x196   :  { %4744 = vst [vmem:[#allocation47_spill] sm:$0xff] %v4173_v0  ;;  %4745 = vst [vmem:[#allocation48_spill] sm:$0xff] %v4175_v8 }
 0x197   :  { %v2840_v3 = vpop.f32.mrf.mxu0  ;;  %v2944_v20 = vpop.f32.mrf.mxu1 }
 0x199   :  { %v4185_v59 = vpop.f32.mrf.mxu0  ;;  %v4187_v33 = vpop.f32.mrf.mxu1  ;;  %3046 = vmatmul.mubr.msk.bf16.gmra.mxu0 %vm228_vm3, %v3266_v34  ;;  %3150 = vmatmul.mubr.msk.bf16.gmra.mxu1 %vm228_vm3, %v3267_v37  ;;  %v3268_v34 = vld [vmem:[%s4647_s0 + $0x238] sm:$0xff]  }
 0x19a   :  { %4746 = vst [vmem:[#allocation49_spill] sm:$0xff] %v4185_v59  ;;  %4747 = vst [vmem:[#allocation50_spill] sm:$0xff] %v4187_v33  ;;  %3049 = vmatprep.mubr.msk.bf16.mxu0 %vm3323_vm1, %v4715_v45  ;;  %3153 = vmatprep.mubr.msk.bf16.mxu1 %vm3323_vm1, %v4715_v45  ;;  %v3269_v37 = vld [vmem:[%s4647_s0 + $0x2fc] sm:$0xff]  }
 0x19b   :  { %v2843_v51 = vpop.f32.mrf.mxu0  ;;  %v2947_v3 = vpop.f32.mrf.mxu1 }
 0x19d   :  { %v4197_v20 = vpop.f32.mrf.mxu0  ;;  %v4199_v8 = vpop.f32.mrf.mxu1 }
 0x19e   :  { %4748 = vst [vmem:[#allocation51_spill] sm:$0xff] %v4197_v20  ;;  %4749 = vst [vmem:[#allocation52_spill] sm:$0xff] %v4199_v8 }
 0x19f   :  { %v2844_v33 = vpop.f32.mrf.mxu0  ;;  %v2948_v59 = vpop.f32.mrf.mxu1 }
 0x1a1   :  { %v4209_v0 = vpop.f32.mrf.mxu0  ;;  %v4211_v51 = vpop.f32.mrf.mxu1  ;;  %3050 = vmatmul.mubr.msk.bf16.gmra.mxu0 %vm228_vm3, %v3268_v34  ;;  %3154 = vmatmul.mubr.msk.bf16.gmra.mxu1 %vm228_vm3, %v3269_v37  ;;  %v3270_v34 = vld [vmem:[%s4647_s0 + $0x240] sm:$0xff]  }
 0x1a2   :  { %4750 = vst [vmem:[#allocation53_spill] sm:$0xff] %v4209_v0  ;;  %4751 = vst [vmem:[#allocation54_spill] sm:$0xff] %v4211_v51  ;;  %3053 = vmatprep.mubr.msk.bf16.mxu0 %vm3323_vm1, %v4715_v45  ;;  %3157 = vmatprep.mubr.msk.bf16.mxu1 %vm3323_vm1, %v4715_v45  ;;  %v3271_v37 = vld [vmem:[%s4647_s0 + $0x304] sm:$0xff]  }
 0x1a3   :  { %v2847_v27 = vpop.f32.mrf.mxu0  ;;  %v2951_v33 = vpop.f32.mrf.mxu1 }
 0x1a5   :  { %v4221_v59 = vpop.f32.mrf.mxu0  ;;  %v4223_v8 = vpop.f32.mrf.mxu1 }
 0x1a6   :  { %4752 = vst [vmem:[#allocation55_spill] sm:$0xff] %v4221_v59  ;;  %4753 = vst [vmem:[#allocation56_spill] sm:$0xff] %v4223_v8  ;;  %v3272_v59 = vld [vmem:[%s4647_s0 + $0x248] ss:$0 sps:$4 sm:$0xff]  }
 0x1a7   :  { %v2848_v51 = vpop.f32.mrf.mxu0  ;;  %v2952_v0 = vpop.f32.mrf.mxu1 }
 0x1a9   :  { %v4233_v20 = vpop.f32.mrf.mxu0  ;;  %v4235_v27 = vpop.f32.mrf.mxu1  ;;  %3054 = vmatmul.mubr.msk.bf16.gmra.mxu0 %vm228_vm3, %v3270_v34  ;;  %3158 = vmatmul.mubr.msk.bf16.gmra.mxu1 %vm228_vm3, %v3271_v37  ;;  %v3273_v34 = vld [vmem:[%s4647_s0 + $0x30c] ss:$0 sps:$4 sm:$0xff]  }
 0x1aa   :  { %4754 = vst [vmem:[#allocation57_spill] sm:$0xff] %v4233_v20  ;;  %4755 = vst [vmem:[#allocation58_spill] sm:$0xff] %v4235_v27  ;;  %3057 = vmatprep.mubr.msk.bf16.mxu0 %vm3323_vm1, %v4715_v45  ;;  %3161 = vmatprep.mubr.msk.bf16.mxu1 %vm3323_vm1, %v4715_v45  ;;  %v4756_v45 = vmax.f32 %v3657_v57, %v3660_v58 }
 0x1ab   :  { %v2851_v3 = vpop.f32.mrf.mxu0  ;;  %v2955_v51 = vpop.f32.mrf.mxu1 }
 0x1ac   :  { %v4256_v3 = vld [vmem:[#allocation4] ss:$0 sm:$0xff] }
 0x1ad   :  { %v540_v0 = vpop.f32.mrf.mxu0  ;;  %v1020_v8 = vpop.f32.mrf.mxu1 }
 0x1af   :  { %v2852_v37 = vpop.f32.mrf.mxu0  ;;  %v2956_v33 = vpop.f32.mrf.mxu1 }
 0x1b0   :  { %v4757_v33 = vmax.f32 %v3669_v62, %v3671_v63 }
 0x1b1   :  { %v1354_v27 = vpop.f32.mrf.mxu0  ;;  %3058 = vmatmul.mubr.msk.bf16.gmra.mxu0 %vm228_vm3, %v3272_v59  ;;  %v1883_v20 = vpop.f32.mrf.mxu1  ;;  %3162 = vmatmul.mubr.msk.bf16.gmra.mxu1 %vm228_vm3, %v3273_v34 }
 0x1b2   :  { %v1552_v8 = vmax.f32 %v4756_v45, %v1354_v27 }
 0x1b3   :  { %v2963_v51 = vpop.f32.mrf.mxu0  ;;  %v3067_v0 = vpop.f32.mrf.mxu1 }
 0x1b4   :  { %v2081_v15 = vmax.f32 %v1552_v8, %v1883_v20 }
 0x1b5   :  { %v1357_v32 = vpop.f32.mrf.mxu0  ;;  %v1886_v44 = vpop.f32.mrf.mxu1 }
 0x1b6   :  { %v2137_v37 = vadd.f32 %v4256_v3, %v2081_v15  ;;  %v1553_v59 = vmax.f32 %v4757_v33, %v1357_v32  ;;  %v4758_v15 = vmax.f32 %v3681_v6, %v3683_v7 }
 0x1b7   :  { %v2964_v22 = vpop.f32.mrf.mxu0  ;;  %v3068_v34 = vpop.f32.mrf.mxu1 }
 0x1b8   :  { %v2186_v39 = vmax.f32 %v2137_v37, 0.0  ;;  %v2082_v56 = vmax.f32 %v1553_v59, %v1886_v44  ;;  %v4760_v34 = vmax.f32 %v3705_v18, %v3707_v19 }
 0x1b9   :  { %v1362_v57 = vpop.f32.mrf.mxu0  ;;  %v1891_v58 = vpop.f32.mrf.mxu1 }
 0x1ba   :  { %2236 = vst.msk [vmem:[%s4650_s3] sm:$0xff] %vm2235_vm4, %v2186_v39  ;;  %v2138_v20 = vadd.f32 %v4256_v3, %v2082_v56  ;;  %v1554_v27 = vmax.f32 %v4758_v15, %v1362_v57  ;;  %v4759_v39 = vmax.f32 %v3693_v11, %v3695_v12 }
 0x1bb   :  { %v2967_v62 = vpop.f32.mrf.mxu0  ;;  %v3071_v63 = vpop.f32.mrf.mxu1 }
 0x1bc   :  { %v2187_v32 = vmax.f32 %v2138_v20, 0.0  ;;  %v2083_v22 = vmax.f32 %v1554_v27, %v1891_v58  ;;  %v4761_v63 = vmax.f32 %v3717_v23, %v3719_v24 }
 0x1bd   :  { %v1365_v45 = vpop.f32.mrf.mxu0  ;;  %v1894_v8 = vpop.f32.mrf.mxu1 }
 0x1be   :  { %2237 = vst.msk [vmem:[%s4650_s3 + $0x8] sm:$0xff] %vm2235_vm4, %v2187_v32  ;;  %v2139_v44 = vadd.f32 %v4256_v3, %v2083_v22  ;;  %v1555_v56 = vmax.f32 %v4759_v39, %v1365_v45 }
 0x1bf   :  { %v2968_v51 = vpop.f32.mrf.mxu0  ;;  %v3072_v6 = vpop.f32.mrf.mxu1 }
 0x1c0   :  { %v2188_v7 = vmax.f32 %v2139_v44, 0.0  ;;  %v2084_v0 = vmax.f32 %v1555_v56, %v1894_v8  ;;  %v4762_v56 = vmax.f32 %v3729_v30, %v3731_v31 }
 0x1c1   :  { %v1370_v37 = vpop.f32.mrf.mxu0  ;;  %v1899_v33 = vpop.f32.mrf.mxu1 }
 0x1c2   :  { %2238 = vst.msk [vmem:[%s4650_s3 + $0x10] sm:$0xff] %vm2235_vm4, %v2188_v7  ;;  %v2140_v59 = vadd.f32 %v4256_v3, %v2084_v0  ;;  %v1556_v57 = vmax.f32 %v4760_v34, %v1370_v37 }
 0x1c3   :  { %v2971_v58 = vpop.f32.mrf.mxu0  ;;  %v3075_v11 = vpop.f32.mrf.mxu1 }
 0x1c4   :  { %v2189_v12 = vmax.f32 %v2140_v59, 0.0  ;;  %v2085_v20 = vmax.f32 %v1556_v57, %v1899_v33  ;;  %v4763_v59 = vmax.f32 %v3741_v35, %v3743_v36 }
 0x1c5   :  { %v1373_v15 = vpop.f32.mrf.mxu0  ;;  %v1902_v27 = vpop.f32.mrf.mxu1 }
 0x1c6   :  { %2239 = vst.msk [vmem:[%s4650_s3 + $0x18] sm:$0xff] %vm2235_vm4, %v2189_v12  ;;  %v2141_v62 = vadd.f32 %v4256_v3, %v2085_v20  ;;  %v1557_v32 = vmax.f32 %v4761_v63, %v1373_v15  ;;  %v4764_v15 = vmax.f32 %v3753_v42, %v3755_v43 }
 0x1c7   :  { %v2972_v22 = vpop.f32.mrf.mxu0  ;;  %v3076_v18 = vpop.f32.mrf.mxu1 }
 0x1c8   :  { %v2190_v19 = vmax.f32 %v2141_v62, 0.0  ;;  %v2086_v45 = vmax.f32 %v1557_v32, %v1902_v27 }
 0x1c9   :  { %v1378_v8 = vpop.f32.mrf.mxu0  ;;  %v1907_v44 = vpop.f32.mrf.mxu1 }
 0x1ca   :  { %2240 = vst.msk [vmem:[%s4650_s3 + $0x20] sm:$0xff] %vm2235_vm4, %v2190_v19  ;;  %v2142_v39 = vadd.f32 %v4256_v3, %v2086_v45  ;;  %v1558_v51 = vmax.f32 %v4762_v56, %v1378_v8  ;;  %v4765_v19 = vmax.f32 %v3765_v47, %v3767_v48 }
 0x1cb   :  { %v2975_v6 = vpop.f32.mrf.mxu0  ;;  %v3079_v23 = vpop.f32.mrf.mxu1 }
 0x1cc   :  { %v2191_v24 = vmax.f32 %v2142_v39, 0.0  ;;  %v2087_v7 = vmax.f32 %v1558_v51, %v1907_v44  ;;  %v4766_v6 = vmax.f32 %v3777_v54, %v3779_v55 }
 0x1cd   :  { %v1381_v0 = vpop.f32.mrf.mxu0  ;;  %v1910_v37 = vpop.f32.mrf.mxu1 }
 0x1ce   :  { %2241 = vst.msk [vmem:[%s4650_s3 + $0x28] sm:$0xff] %vm2235_vm4, %v2191_v24  ;;  %v2143_v33 = vadd.f32 %v4256_v3, %v2087_v7  ;;  %v1559_v34 = vmax.f32 %v4763_v59, %v1381_v0  ;;  %v4767_v59 = vmax.f32 %v3789_v1, %v3791_v2 }
 0x1cf   :  { %v2976_v57 = vpop.f32.mrf.mxu0  ;;  %v3080_v30 = vpop.f32.mrf.mxu1 }
 0x1d0   :  { %v2192_v31 = vmax.f32 %v2143_v33, 0.0  ;;  %v2088_v58 = vmax.f32 %v1559_v34, %v1910_v37 }
 0x1d1   :  { %v1386_v11 = vpop.f32.mrf.mxu0  ;;  %v1915_v12 = vpop.f32.mrf.mxu1 }
 0x1d2   :  { %2242 = vst.msk [vmem:[%s4650_s3 + $0x30] sm:$0xff] %vm2235_vm4, %v2192_v31  ;;  %v2144_v20 = vadd.f32 %v4256_v3, %v2088_v58  ;;  %v1560_v27 = vmax.f32 %v4764_v15, %v1386_v11 }
 0x1d3   :  { %v2979_v62 = vpop.f32.mrf.mxu0  ;;  %v3083_v35 = vpop.f32.mrf.mxu1 }
 0x1d4   :  { %v2193_v36 = vmax.f32 %v2144_v20, 0.0  ;;  %v2089_v63 = vmax.f32 %v1560_v27, %v1915_v12  ;;  %v4768_v12 = vmax.f32 %v3801_v14, %v3803_v16 }
 0x1d5   :  { %v1389_v32 = vpop.f32.mrf.mxu0  ;;  %v1918_v22 = vpop.f32.mrf.mxu1 }
 0x1d6   :  { %2243 = vst.msk [vmem:[%s4650_s3 + $0x38] sm:$0xff] %vm2235_vm4, %v2193_v36  ;;  %v2145_v18 = vadd.f32 %v4256_v3, %v2089_v63  ;;  %v1561_v45 = vmax.f32 %v4765_v19, %v1389_v32  ;;  %v4769_v63 = vmax.f32 %v3813_v25, %v3815_v26 }
 0x1d7   :  { %v2980_v8 = vpop.f32.mrf.mxu0  ;;  %v3084_v42 = vpop.f32.mrf.mxu1 }
 0x1d8   :  { %v2194_v43 = vmax.f32 %v2145_v18, 0.0  ;;  %v2090_v44 = vmax.f32 %v1561_v45, %v1918_v22  ;;  %v4770_v42 = vmax.f32 %v3825_v38, %v3827_v40 }
 0x1d9   :  { %v1394_v39 = vpop.f32.mrf.mxu0  ;;  %v1923_v56 = vpop.f32.mrf.mxu1 }
 0x1da   :  { %2244 = vst.msk [vmem:[%s4650_s3 + $0x40] sm:$0xff] %vm2235_vm4, %v2194_v43  ;;  %v2146_v51 = vadd.f32 %v4256_v3, %v2090_v44  ;;  %v1562_v23 = vmax.f32 %v4766_v6, %v1394_v39 }
 0x1db   :  { %v2983_v24 = vpop.f32.mrf.mxu0  ;;  %v3087_v47 = vpop.f32.mrf.mxu1 }
 0x1dc   :  { %v2195_v48 = vmax.f32 %v2146_v51, 0.0  ;;  %v2091_v7 = vmax.f32 %v1562_v23, %v1923_v56  ;;  %v4771_v23 = vmax.f32 %v3837_v49, %v3839_v50 }
 0x1dd   :  { %v1397_v0 = vpop.f32.mrf.mxu0  ;;  %v1926_v37 = vpop.f32.mrf.mxu1 }
 0x1de   :  { %2245 = vst.msk [vmem:[%s4650_s3 + $0x48] sm:$0xff] %vm2235_vm4, %v2195_v48  ;;  %v2147_v33 = vadd.f32 %v4256_v3, %v2091_v7  ;;  %v1563_v34 = vmax.f32 %v4767_v59, %v1397_v0 }
 0x1df   :  { %v2984_v57 = vpop.f32.mrf.mxu0  ;;  %v3088_v54 = vpop.f32.mrf.mxu1 }
 0x1e0   :  { %v2196_v55 = vmax.f32 %v2147_v33, 0.0  ;;  %v2092_v30 = vmax.f32 %v1563_v34, %v1926_v37  ;;  %v4772_v33 = vmax.f32 %v3849_v5, %v3851_v10 }
 0x1e1   :  { %v1402_v31 = vpop.f32.mrf.mxu0  ;;  %v1931_v58 = vpop.f32.mrf.mxu1 }
 0x1e2   :  { %2246 = vst.msk [vmem:[%s4650_s3 + $0x50] sm:$0xff] %vm2235_vm4, %v2196_v55  ;;  %v2148_v11 = vadd.f32 %v4256_v3, %v2092_v30  ;;  %v1564_v20 = vmax.f32 %v4768_v12, %v1402_v31  ;;  %v4773_v31 = vmax.f32 %v3861_v28, %v3863_v29 }
 0x1e3   :  { %v2987_v15 = vpop.f32.mrf.mxu0  ;;  %v3091_v1 = vpop.f32.mrf.mxu1 }
 0x1e4   :  { %v2197_v2 = vmax.f32 %v2148_v11, 0.0  ;;  %v2093_v27 = vmax.f32 %v1564_v20, %v1931_v58 }
 0x1e5   :  { %v1405_v62 = vpop.f32.mrf.mxu0  ;;  %v1934_v35 = vpop.f32.mrf.mxu1 }
 0x1e6   :  { %2247 = vst.msk [vmem:[%s4650_s3 + $0x58] sm:$0xff] %vm2235_vm4, %v2197_v2  ;;  %v2149_v36 = vadd.f32 %v4256_v3, %v2093_v27  ;;  %v1565_v32 = vmax.f32 %v4769_v63, %v1405_v62  ;;  %v4774_v2 = vmax.f32 %v3873_v53, %v3875_v61 }
 0x1e7   :  { %v2988_v22 = vpop.f32.mrf.mxu0  ;;  %v3092_v14 = vpop.f32.mrf.mxu1 }
 0x1e8   :  { %v2198_v16 = vmax.f32 %v2149_v36, 0.0  ;;  %v2094_v18 = vmax.f32 %v1565_v32, %v1934_v35  ;;  %v4775_v22 = vmax.f32 %v3885_v46, %v3887_v52 }
 0x1e9   :  { %v1410_v19 = vpop.f32.mrf.mxu0  ;;  %v1939_v45 = vpop.f32.mrf.mxu1 }
 0x1ea   :  { %2248 = vst.msk [vmem:[%s4650_s3 + $0x60] sm:$0xff] %vm2235_vm4, %v2198_v16  ;;  %v2150_v8 = vadd.f32 %v4256_v3, %v2094_v18  ;;  %v1566_v43 = vmax.f32 %v4770_v42, %v1410_v19  ;;  %v4776_v42 = vmax.f32 %v3897_v60, %v3899_v21 }
 0x1eb   :  { %v2991_v44 = vpop.f32.mrf.mxu0  ;;  %v3095_v25 = vpop.f32.mrf.mxu1 }
 0x1ec   :  { %v2199_v26 = vmax.f32 %v2150_v8, 0.0  ;;  %v2095_v39 = vmax.f32 %v1566_v43, %v1939_v45 }
 0x1ed   :  { %v1413_v56 = vpop.f32.mrf.mxu0  ;;  %v1942_v51 = vpop.f32.mrf.mxu1 }
 0x1ee   :  { %2249 = vst.msk [vmem:[%s4650_s3 + $0x68] sm:$0xff] %vm2235_vm4, %v2199_v26  ;;  %v2151_v6 = vadd.f32 %v4256_v3, %v2095_v39  ;;  %v1567_v24 = vmax.f32 %v4771_v23, %v1413_v56 }
 0x1ef   :  { %v2992_v47 = vpop.f32.mrf.mxu0  ;;  %v3096_v38 = vpop.f32.mrf.mxu1 }
 0x1f0   :  { %v2200_v40 = vmax.f32 %v2151_v6, 0.0  ;;  %v2096_v48 = vmax.f32 %v1567_v24, %v1942_v51  ;;  %v4777_v51 = vmax.f32 %v3909_v13, %v3911_v41 }
 0x1f1   :  { %v1418_v7 = vpop.f32.mrf.mxu0  ;;  %v1947_v0 = vpop.f32.mrf.mxu1 }
 0x1f2   :  { %2250 = vst.msk [vmem:[%s4650_s3 + $0x70] sm:$0xff] %vm2235_vm4, %v2200_v40  ;;  %v2152_v37 = vadd.f32 %v4256_v3, %v2096_v48  ;;  %v1568_v59 = vmax.f32 %v4772_v33, %v1418_v7  ;;  %v4778_v48 = vmax.f32 %v3921_v9, %v3923_v4 }
 0x1f3   :  { %v2995_v34 = vpop.f32.mrf.mxu0  ;;  %v3099_v49 = vpop.f32.mrf.mxu1 }
 0x1f4   :  { %v2201_v50 = vmax.f32 %v2152_v37, 0.0  ;;  %v2097_v57 = vmax.f32 %v1568_v59, %v1947_v0  ;;  %v4779_v49 = vld [vmem:[#allocation8_spill] sm:$0xff] }
 0x1f5   :  { %v1421_v54 = vpop.f32.mrf.mxu0  ;;  %v1950_v55 = vpop.f32.mrf.mxu1 }
 0x1f6   :  { %2251 = vst.msk [vmem:[%s4650_s3 + $0x78] sm:$0xff] %vm2235_vm4, %v2201_v50  ;;  %v2153_v30 = vadd.f32 %v4256_v3, %v2097_v57  ;;  %v1569_v58 = vmax.f32 %v4773_v31, %v1421_v54  ;;  %v4780_v50 = vmax.f32 %v3933_v17, %v4779_v49 }
 0x1f7   :  { %v2996_v11 = vpop.f32.mrf.mxu0  ;;  %v3100_v5 = vpop.f32.mrf.mxu1 }
 0x1f8   :  { %v2202_v10 = vmax.f32 %v2153_v30, 0.0  ;;  %v2098_v12 = vmax.f32 %v1569_v58, %v1950_v55  ;;  %v4781_v11 = vld [vmem:[#allocation9_spill] sm:$0xff]  ;;  %v4782_v5 = vld [vmem:[#allocation10_spill] sm:$0xff] }
 0x1f9   :  { %v1426_v20 = vpop.f32.mrf.mxu0  ;;  %v1955_v15 = vpop.f32.mrf.mxu1 }
 0x1fa   :  { %2252 = vst.msk [vmem:[%s4650_s3 + $0x80] sm:$0xff] %vm2235_vm4, %v2202_v10  ;;  %v2154_v1 = vadd.f32 %v4256_v3, %v2098_v12  ;;  %v1570_v27 = vmax.f32 %v4774_v2, %v1426_v20  ;;  %v4783_v10 = vmax.f32 %v4781_v11, %v4782_v5 }
 0x1fb   :  { %v2999_v62 = vpop.f32.mrf.mxu0  ;;  %v3103_v28 = vpop.f32.mrf.mxu1 }
 0x1fc   :  { %v2203_v29 = vmax.f32 %v2154_v1, 0.0  ;;  %v2099_v35 = vmax.f32 %v1570_v27, %v1955_v15  ;;  %v4784_v28 = vld [vmem:[#allocation11_spill] sm:$0xff] }
 0x1fd   :  { %v1429_v36 = vpop.f32.mrf.mxu0  ;;  %v1958_v63 = vpop.f32.mrf.mxu1 }
 0x1fe   :  { %2253 = vst.msk [vmem:[%s4650_s3 + $0x88] sm:$0xff] %vm2235_vm4, %v2203_v29  ;;  %v2155_v32 = vadd.f32 %v4256_v3, %v2099_v35  ;;  %v1571_v14 = vmax.f32 %v4775_v22, %v1429_v36  ;;  %v4785_v29 = vld [vmem:[#allocation12_spill] sm:$0xff] }
 0x1ff   :  { %v3000_v16 = vpop.f32.mrf.mxu0  ;;  %v3104_v53 = vpop.f32.mrf.mxu1  ;;  %v4786_v35 = vmax.f32 %v4784_v28, %v4785_v29 }
 0x200   :  { %v2204_v61 = vmax.f32 %v2155_v32, 0.0  ;;  %v2100_v18 = vmax.f32 %v1571_v14, %v1958_v63 }
 0x201   :  { %v1434_v19 = vpop.f32.mrf.mxu0  ;;  %v1963_v45 = vpop.f32.mrf.mxu1 }
 0x202   :  { %2254 = vst.msk [vmem:[%s4650_s3 + $0x90] sm:$0xff] %vm2235_vm4, %v2204_v61  ;;  %v2156_v8 = vadd.f32 %v4256_v3, %v2100_v18  ;;  %v1572_v43 = vmax.f32 %v4776_v42, %v1434_v19  ;;  %v4787_v18 = vld [vmem:[#allocation13_spill] sm:$0xff]  ;;  %v4788_v19 = vld [vmem:[#allocation14_spill] sm:$0xff] }
 0x203   :  { %v3003_v44 = vpop.f32.mrf.mxu0  ;;  %v3107_v46 = vpop.f32.mrf.mxu1 }
 0x204   :  { %v2205_v52 = vmax.f32 %v2156_v8, 0.0  ;;  %v2101_v25 = vmax.f32 %v1572_v43, %v1963_v45  ;;  %v4789_v45 = vmax.f32 %v4787_v18, %v4788_v19 }
 0x205   :  { %v1437_v26 = vpop.f32.mrf.mxu0  ;;  %v1966_v39 = vpop.f32.mrf.mxu1 }
 0x206   :  { %2255 = vst.msk [vmem:[%s4650_s3 + $0x98] sm:$0xff] %vm2235_vm4, %v2205_v52  ;;  %v2157_v56 = vadd.f32 %v4256_v3, %v2101_v25  ;;  %v1573_v6 = vmax.f32 %v4777_v51, %v1437_v26 }
 0x207   :  { %v3004_v23 = vpop.f32.mrf.mxu0  ;;  %v3108_v60 = vpop.f32.mrf.mxu1 }
 0x208   :  { %v2206_v21 = vmax.f32 %v2157_v56, 0.0  ;;  %v2102_v24 = vmax.f32 %v1573_v6, %v1966_v39  ;;  %v4790_v39 = vld [vmem:[#allocation15_spill] sm:$0xff]  ;;  %v4791_v56 = vld [vmem:[#allocation16_spill] sm:$0xff] }
 0x209   :  { %v1442_v47 = vpop.f32.mrf.mxu0  ;;  %v1971_v38 = vpop.f32.mrf.mxu1  ;;  %v4792_v51 = vmax.f32 %v4790_v39, %v4791_v56 }
 0x20a   :  { %2256 = vst.msk [vmem:[%s4650_s3 + $0xa0] sm:$0xff] %vm2235_vm4, %v2206_v21  ;;  %v2158_v40 = vadd.f32 %v4256_v3, %v2102_v24  ;;  %v1574_v7 = vmax.f32 %v4778_v48, %v1442_v47  ;;  %v4793_v48 = vld [vmem:[#allocation17_spill] sm:$0xff] }
 0x20b   :  { %v3007_v0 = vpop.f32.mrf.mxu0  ;;  %v3111_v41 = vpop.f32.mrf.mxu1 }
 0x20c   :  { %v2207_v13 = vmax.f32 %v2158_v40, 0.0  ;;  %v2103_v37 = vmax.f32 %v1574_v7, %v1971_v38  ;;  %v4794_v7 = vld [vmem:[#allocation18_spill] sm:$0xff] }
 0x20d   :  { %v1445_v33 = vpop.f32.mrf.mxu0  ;;  %v1974_v59 = vpop.f32.mrf.mxu1  ;;  %v4795_v0 = vmax.f32 %v4793_v48, %v4794_v7 }
 0x20e   :  { %2257 = vst.msk [vmem:[%s4650_s3 + $0xa8] sm:$0xff] %vm2235_vm4, %v2207_v13  ;;  %v2159_v34 = vadd.f32 %v4256_v3, %v2103_v37  ;;  %v1575_v57 = vmax.f32 %v4780_v50, %v1445_v33 }
 0x20f   :  { %v3008_v54 = vpop.f32.mrf.mxu0  ;;  %v3112_v9 = vpop.f32.mrf.mxu1 }
 0x210   :  { %v2208_v4 = vmax.f32 %v2159_v34, 0.0  ;;  %v2104_v55 = vmax.f32 %v1575_v57, %v1974_v59  ;;  %v4796_v57 = vld [vmem:[#allocation19_spill] sm:$0xff]  ;;  %v4797_v54 = vld [vmem:[#allocation20_spill] sm:$0xff] }
 0x211   :  { %v1450_v30 = vpop.f32.mrf.mxu0  ;;  %v1979_v31 = vpop.f32.mrf.mxu1  ;;  %v4798_v9 = vmax.f32 %v4796_v57, %v4797_v54 }
 0x212   :  { %2258 = vst.msk [vmem:[%s4650_s3 + $0xb0] sm:$0xff] %vm2235_vm4, %v2208_v4  ;;  %v2160_v58 = vadd.f32 %v4256_v3, %v2104_v55  ;;  %v1576_v12 = vmax.f32 %v4783_v10, %v1450_v30 }
 0x213   :  { %v3011_v20 = vpop.f32.mrf.mxu0  ;;  %v3115_v17 = vpop.f32.mrf.mxu1 }
 0x214   :  { %v2209_v15 = vmax.f32 %v2160_v58, 0.0  ;;  %v2105_v1 = vmax.f32 %v1576_v12, %v1979_v31  ;;  %v4799_v12 = vld [vmem:[#allocation21_spill] sm:$0xff]  ;;  %v4800_v20 = vld [vmem:[#allocation22_spill] sm:$0xff] }
 0x215   :  { %v1453_v2 = vpop.f32.mrf.mxu0  ;;  %v1982_v27 = vpop.f32.mrf.mxu1  ;;  %v4801_v17 = vmax.f32 %v4799_v12, %v4800_v20 }
 0x216   :  { %2259 = vst.msk [vmem:[%s4650_s3 + $0xb8] sm:$0xff] %vm2235_vm4, %v2209_v15  ;;  %v2161_v62 = vadd.f32 %v4256_v3, %v2105_v1  ;;  %v1577_v36 = vmax.f32 %v4786_v35, %v1453_v2 }
 0x217   :  { %v3012_v63 = vpop.f32.mrf.mxu0  ;;  %v3116_v32 = vpop.f32.mrf.mxu1 }
 0x218   :  { %v2210_v22 = vmax.f32 %v2161_v62, 0.0  ;;  %v2106_v14 = vmax.f32 %v1577_v36, %v1982_v27  ;;  %v4802_v36 = vld [vmem:[#allocation23_spill] sm:$0xff]  ;;  %v4803_v63 = vld [vmem:[#allocation24_spill] sm:$0xff] }
 0x219   :  { %v1458_v16 = vpop.f32.mrf.mxu0  ;;  %v1987_v53 = vpop.f32.mrf.mxu1  ;;  %v4804_v32 = vmax.f32 %v4802_v36, %v4803_v63 }
 0x21a   :  { %2260 = vst.msk [vmem:[%s4650_s3 + $0xc0] sm:$0xff] %vm2235_vm4, %v2210_v22  ;;  %v2162_v61 = vadd.f32 %v4256_v3, %v2106_v14  ;;  %v1578_v8 = vmax.f32 %v4789_v45, %v1458_v16 }
 0x21b   :  { %v3015_v42 = vpop.f32.mrf.mxu0  ;;  %v3119_v43 = vpop.f32.mrf.mxu1 }
 0x21c   :  { %v2211_v44 = vmax.f32 %v2162_v61, 0.0  ;;  %v2107_v46 = vmax.f32 %v1578_v8, %v1987_v53  ;;  %v4805_v8 = vld [vmem:[#allocation25_spill] sm:$0xff]  ;;  %v4806_v42 = vld [vmem:[#allocation26_spill] sm:$0xff] }
 0x21d   :  { %v1461_v52 = vpop.f32.mrf.mxu0  ;;  %v1990_v25 = vpop.f32.mrf.mxu1  ;;  %v4807_v43 = vmax.f32 %v4805_v8, %v4806_v42 }
 0x21e   :  { %2261 = vst.msk [vmem:[%s4650_s3 + $0xc8] sm:$0xff] %vm2235_vm4, %v2211_v44  ;;  %v2163_v26 = vadd.f32 %v4256_v3, %v2107_v46  ;;  %v1579_v6 = vmax.f32 %v4792_v51, %v1461_v52 }
 0x21f   :  { %v3016_v23 = vpop.f32.mrf.mxu0  ;;  %v3120_v60 = vpop.f32.mrf.mxu1 }
 0x220   :  { %v2212_v21 = vmax.f32 %v2163_v26, 0.0  ;;  %v2108_v24 = vmax.f32 %v1579_v6, %v1990_v25  ;;  %v4808_v6 = vld [vmem:[#allocation27_spill] sm:$0xff]  ;;  %v4809_v23 = vld [vmem:[#allocation28_spill] sm:$0xff] }
 0x221   :  { %v1466_v47 = vpop.f32.mrf.mxu0  ;;  %v1995_v38 = vpop.f32.mrf.mxu1  ;;  %v4810_v60 = vmax.f32 %v4808_v6, %v4809_v23 }
 0x222   :  { %2262 = vst.msk [vmem:[%s4650_s3 + $0xd0] sm:$0xff] %vm2235_vm4, %v2212_v21  ;;  %v2164_v40 = vadd.f32 %v4256_v3, %v2108_v24  ;;  %v1580_v41 = vmax.f32 %v4795_v0, %v1466_v47 }
 0x223   :  { %v3019_v13 = vpop.f32.mrf.mxu0  ;;  %v3123_v37 = vpop.f32.mrf.mxu1 }
 0x224   :  { %v2213_v33 = vmax.f32 %v2164_v40, 0.0  ;;  %v2109_v59 = vmax.f32 %v1580_v41, %v1995_v38  ;;  %v4811_v41 = vld [vmem:[#allocation29_spill] sm:$0xff]  ;;  %v4812_v13 = vld [vmem:[#allocation30_spill] sm:$0xff] }
 0x225   :  { %v1469_v34 = vpop.f32.mrf.mxu0  ;;  %v1998_v49 = vpop.f32.mrf.mxu1  ;;  %v4813_v37 = vmax.f32 %v4811_v41, %v4812_v13 }
 0x226   :  { %2263 = vst.msk [vmem:[%s4650_s3 + $0xd8] sm:$0xff] %vm2235_vm4, %v2213_v33  ;;  %v2165_v50 = vadd.f32 %v4256_v3, %v2109_v59  ;;  %v1581_v4 = vmax.f32 %v4798_v9, %v1469_v34 }
 0x227   :  { %v3020_v55 = vpop.f32.mrf.mxu0  ;;  %v3124_v30 = vpop.f32.mrf.mxu1 }
 0x228   :  { %v2214_v31 = vmax.f32 %v2165_v50, 0.0  ;;  %v2110_v58 = vmax.f32 %v1581_v4, %v1998_v49  ;;  %v4814_v4 = vld [vmem:[#allocation31_spill] sm:$0xff]  ;;  %v4815_v55 = vld [vmem:[#allocation32_spill] sm:$0xff] }
 0x229   :  { %v1474_v11 = vpop.f32.mrf.mxu0  ;;  %v2003_v5 = vpop.f32.mrf.mxu1  ;;  %v4816_v30 = vmax.f32 %v4814_v4, %v4815_v55 }
 0x22a   :  { %2264 = vst.msk [vmem:[%s4650_s3 + $0xe0] sm:$0xff] %vm2235_vm4, %v2214_v31  ;;  %v2166_v10 = vadd.f32 %v4256_v3, %v2110_v58  ;;  %v1582_v15 = vmax.f32 %v4801_v17, %v1474_v11 }
 0x22b   :  { %v3023_v1 = vpop.f32.mrf.mxu0  ;;  %v3127_v2 = vpop.f32.mrf.mxu1 }
 0x22c   :  { %v2215_v27 = vmax.f32 %v2166_v10, 0.0  ;;  %v2111_v62 = vmax.f32 %v1582_v15, %v2003_v5  ;;  %v4817_v15 = vld [vmem:[#allocation33_spill] sm:$0xff]  ;;  %v4818_v1 = vld [vmem:[#allocation34_spill] sm:$0xff] }
 0x22d   :  { %v1477_v28 = vpop.f32.mrf.mxu0  ;;  %v2006_v29 = vpop.f32.mrf.mxu1  ;;  %v4819_v2 = vmax.f32 %v4817_v15, %v4818_v1 }
 0x22e   :  { %2265 = vst.msk [vmem:[%s4650_s3 + $0xe8] sm:$0xff] %vm2235_vm4, %v2215_v27  ;;  %v2167_v35 = vadd.f32 %v4256_v3, %v2111_v62  ;;  %v1583_v22 = vmax.f32 %v4804_v32, %v1477_v28 }
 0x22f   :  { %v3024_v14 = vpop.f32.mrf.mxu0  ;;  %v3128_v16 = vpop.f32.mrf.mxu1 }
 0x230   :  { %v2216_v53 = vmax.f32 %v2167_v35, 0.0  ;;  %v2112_v61 = vmax.f32 %v1583_v22, %v2006_v29  ;;  %v4820_v22 = vld [vmem:[#allocation35_spill] sm:$0xff]  ;;  %v4821_v14 = vld [vmem:[#allocation36_spill] sm:$0xff] }
 0x231   :  { %v1482_v18 = vpop.f32.mrf.mxu0  ;;  %v2011_v19 = vpop.f32.mrf.mxu1  ;;  %v4822_v16 = vmax.f32 %v4820_v22, %v4821_v14 }
 0x232   :  { %2266 = vst.msk [vmem:[%s4650_s3 + $0xf0] sm:$0xff] %vm2235_vm4, %v2216_v53  ;;  %v2168_v45 = vadd.f32 %v4256_v3, %v2112_v61  ;;  %v1584_v44 = vmax.f32 %v4807_v43, %v1482_v18 }
 0x233   :  { %v3027_v46 = vpop.f32.mrf.mxu0  ;;  %v3131_v52 = vpop.f32.mrf.mxu1 }
 0x234   :  { %v2217_v25 = vmax.f32 %v2168_v45, 0.0  ;;  %v2113_v26 = vmax.f32 %v1584_v44, %v2011_v19  ;;  %v4823_v44 = vld [vmem:[#allocation37_spill] sm:$0xff]  ;;  %v4824_v46 = vld [vmem:[#allocation38_spill] sm:$0xff] }
 0x235   :  { %v1485_v39 = vpop.f32.mrf.mxu0  ;;  %v2014_v56 = vpop.f32.mrf.mxu1  ;;  %v4825_v52 = vmax.f32 %v4823_v44, %v4824_v46 }
 0x236   :  { %2267 = vst.msk [vmem:[%s4650_s3 + $0xf8] sm:$0xff] %vm2235_vm4, %v2217_v25  ;;  %v2169_v51 = vadd.f32 %v4256_v3, %v2113_v26  ;;  %v1585_v21 = vmax.f32 %v4810_v60, %v1485_v39 }
 0x237   :  { %v3028_v24 = vpop.f32.mrf.mxu0  ;;  %v3132_v47 = vpop.f32.mrf.mxu1 }
 0x238   :  { %v2218_v38 = vmax.f32 %v2169_v51, 0.0  ;;  %v2114_v40 = vmax.f32 %v1585_v21, %v2014_v56  ;;  %v4826_v21 = vld [vmem:[#allocation39_spill] sm:$0xff]  ;;  %v4827_v24 = vld [vmem:[#allocation40_spill] sm:$0xff] }
 0x239   :  { %v1490_v48 = vpop.f32.mrf.mxu0  ;;  %v2019_v7 = vpop.f32.mrf.mxu1  ;;  %v4828_v47 = vmax.f32 %v4826_v21, %v4827_v24 }
 0x23a   :  { %2268 = vst.msk [vmem:[%s4650_s3 + $0x100] sm:$0xff] %vm2235_vm4, %v2218_v38  ;;  %v2170_v0 = vadd.f32 %v4256_v3, %v2114_v40  ;;  %v1586_v33 = vmax.f32 %v4813_v37, %v1490_v48 }
 0x23b   :  { %v3031_v59 = vpop.f32.mrf.mxu0  ;;  %v3135_v34 = vpop.f32.mrf.mxu1 }
 0x23c   :  { %v2219_v49 = vmax.f32 %v2170_v0, 0.0  ;;  %v2115_v50 = vmax.f32 %v1586_v33, %v2019_v7  ;;  %v4829_v33 = vld [vmem:[#allocation41_spill] sm:$0xff]  ;;  %v4830_v59 = vld [vmem:[#allocation42_spill] sm:$0xff] }
 0x23d   :  { %v1493_v57 = vpop.f32.mrf.mxu0  ;;  %v2022_v54 = vpop.f32.mrf.mxu1  ;;  %v4831_v34 = vmax.f32 %v4829_v33, %v4830_v59 }
 0x23e   :  { %2269 = vst.msk [vmem:[%s4650_s3 + $0x108] sm:$0xff] %vm2235_vm4, %v2219_v49  ;;  %v2171_v9 = vadd.f32 %v4256_v3, %v2115_v50  ;;  %v1587_v31 = vmax.f32 %v4816_v30, %v1493_v57 }
 0x23f   :  { %v3032_v58 = vpop.f32.mrf.mxu0  ;;  %v3136_v11 = vpop.f32.mrf.mxu1 }
 0x240   :  { %v2220_v5 = vmax.f32 %v2171_v9, 0.0  ;;  %v2116_v10 = vmax.f32 %v1587_v31, %v2022_v54  ;;  %v4832_v31 = vld [vmem:[#allocation43_spill] sm:$0xff]  ;;  %v4833_v58 = vld [vmem:[#allocation44_spill] sm:$0xff] }
 0x241   :  { %v1498_v12 = vpop.f32.mrf.mxu0  ;;  %v2027_v20 = vpop.f32.mrf.mxu1  ;;  %v4834_v11 = vmax.f32 %v4832_v31, %v4833_v58 }
 0x242   :  { %2270 = vst.msk [vmem:[%s4650_s3 + $0x110] sm:$0xff] %vm2235_vm4, %v2220_v5  ;;  %v2172_v17 = vadd.f32 %v4256_v3, %v2116_v10  ;;  %v1588_v27 = vmax.f32 %v4819_v2, %v1498_v12 }
 0x243   :  { %v3035_v62 = vpop.f32.mrf.mxu0  ;;  %v3139_v28 = vpop.f32.mrf.mxu1 }
 0x244   :  { %v2221_v29 = vmax.f32 %v2172_v17, 0.0  ;;  %v2117_v35 = vmax.f32 %v1588_v27, %v2027_v20  ;;  %v4835_v27 = vld [vmem:[#allocation45_spill] sm:$0xff]  ;;  %v4836_v62 = vld [vmem:[#allocation46_spill] sm:$0xff] }
 0x245   :  { %v1501_v36 = vpop.f32.mrf.mxu0  ;;  %v2030_v63 = vpop.f32.mrf.mxu1  ;;  %v4837_v28 = vmax.f32 %v4835_v27, %v4836_v62 }
 0x246   :  { %2271 = vst.msk [vmem:[%s4650_s3 + $0x118] sm:$0xff] %vm2235_vm4, %v2221_v29  ;;  %v2173_v32 = vadd.f32 %v4256_v3, %v2117_v35  ;;  %v1589_v53 = vmax.f32 %v4822_v16, %v1501_v36 }
 0x247   :  { %v3036_v61 = vpop.f32.mrf.mxu0  ;;  %v3140_v18 = vpop.f32.mrf.mxu1 }
 0x248   :  { %v2222_v19 = vmax.f32 %v2173_v32, 0.0  ;;  %v2118_v45 = vmax.f32 %v1589_v53, %v2030_v63  ;;  %v4838_v53 = vld [vmem:[#allocation47_spill] sm:$0xff]  ;;  %v4839_v61 = vld [vmem:[#allocation48_spill] sm:$0xff] }
 0x249   :  { %v1506_v8 = vpop.f32.mrf.mxu0  ;;  %v2035_v42 = vpop.f32.mrf.mxu1  ;;  %v4840_v18 = vmax.f32 %v4838_v53, %v4839_v61 }
 0x24a   :  { %2272 = vst.msk [vmem:[%s4650_s3 + $0x120] sm:$0xff] %vm2235_vm4, %v2222_v19  ;;  %v2174_v43 = vadd.f32 %v4256_v3, %v2118_v45  ;;  %v1590_v25 = vmax.f32 %v4825_v52, %v1506_v8 }
 0x24b   :  { %v3039_v26 = vpop.f32.mrf.mxu0  ;;  %v3143_v39 = vpop.f32.mrf.mxu1 }
 0x24c   :  { %v2223_v56 = vmax.f32 %v2174_v43, 0.0  ;;  %v2119_v51 = vmax.f32 %v1590_v25, %v2035_v42  ;;  %v4841_v25 = vld [vmem:[#allocation49_spill] sm:$0xff]  ;;  %v4842_v26 = vld [vmem:[#allocation50_spill] sm:$0xff] }
 0x24d   :  { %v1509_v6 = vpop.f32.mrf.mxu0  ;;  %v2038_v23 = vpop.f32.mrf.mxu1  ;;  %v4843_v39 = vmax.f32 %v4841_v25, %v4842_v26 }
 0x24e   :  { %2273 = vst.msk [vmem:[%s4650_s3 + $0x128] sm:$0xff] %vm2235_vm4, %v2223_v56  ;;  %v2175_v60 = vadd.f32 %v4256_v3, %v2119_v51  ;;  %v1591_v38 = vmax.f32 %v4828_v47, %v1509_v6 }
 0x24f   :  { %v3040_v40 = vpop.f32.mrf.mxu0  ;;  %v3144_v48 = vpop.f32.mrf.mxu1 }
 0x250   :  { %v2224_v7 = vmax.f32 %v2175_v60, 0.0  ;;  %v2120_v0 = vmax.f32 %v1591_v38, %v2038_v23  ;;  %v4844_v38 = vld [vmem:[#allocation51_spill] sm:$0xff]  ;;  %v4845_v40 = vld [vmem:[#allocation52_spill] sm:$0xff] }
 0x251   :  { %v1514_v41 = vpop.f32.mrf.mxu0  ;;  %v2043_v13 = vpop.f32.mrf.mxu1  ;;  %v4846_v48 = vmax.f32 %v4844_v38, %v4845_v40 }
 0x252   :  { %2274 = vst.msk [vmem:[%s4650_s3 + $0x130] sm:$0xff] %vm2235_vm4, %v2224_v7  ;;  %v2176_v37 = vadd.f32 %v4256_v3, %v2120_v0  ;;  %v1592_v49 = vmax.f32 %v4831_v34, %v1514_v41 }
 0x253   :  { %v3043_v50 = vpop.f32.mrf.mxu0  ;;  %v3147_v57 = vpop.f32.mrf.mxu1 }
 0x254   :  { %v2225_v54 = vmax.f32 %v2176_v37, 0.0  ;;  %v2121_v9 = vmax.f32 %v1592_v49, %v2043_v13  ;;  %v4847_v49 = vld [vmem:[#allocation53_spill] sm:$0xff]  ;;  %v4848_v50 = vld [vmem:[#allocation54_spill] sm:$0xff] }
 0x255   :  { %v1517_v4 = vpop.f32.mrf.mxu0  ;;  %v2046_v55 = vpop.f32.mrf.mxu1  ;;  %v4849_v57 = vmax.f32 %v4847_v49, %v4848_v50 }
 0x256   :  { %2275 = vst.msk [vmem:[%s4650_s3 + $0x138] sm:$0xff] %vm2235_vm4, %v2225_v54  ;;  %v2177_v30 = vadd.f32 %v4256_v3, %v2121_v9  ;;  %v1593_v5 = vmax.f32 %v4834_v11, %v1517_v4 }
 0x257   :  { %v3044_v10 = vpop.f32.mrf.mxu0  ;;  %v3148_v12 = vpop.f32.mrf.mxu1 }
 0x258   :  { %v2226_v20 = vmax.f32 %v2177_v30, 0.0  ;;  %v2122_v17 = vmax.f32 %v1593_v5, %v2046_v55  ;;  %v4850_v5 = vld [vmem:[#allocation55_spill] sm:$0xff]  ;;  %v4851_v10 = vld [vmem:[#allocation56_spill] sm:$0xff] }
 0x259   :  { %v1522_v15 = vpop.f32.mrf.mxu0  ;;  %v2051_v1 = vpop.f32.mrf.mxu1  ;;  %v4852_v12 = vmax.f32 %v4850_v5, %v4851_v10 }
 0x25a   :  { %2276 = vst.msk [vmem:[%s4650_s3 + $0x140] sm:$0xff] %vm2235_vm4, %v2226_v20  ;;  %v2178_v2 = vadd.f32 %v4256_v3, %v2122_v17  ;;  %v1594_v29 = vmax.f32 %v4837_v28, %v1522_v15 }
 0x25b   :  { %v3047_v35 = vpop.f32.mrf.mxu0  ;;  %v3151_v36 = vpop.f32.mrf.mxu1 }
 0x25c   :  { %v2227_v63 = vmax.f32 %v2178_v2, 0.0  ;;  %v2123_v32 = vmax.f32 %v1594_v29, %v2051_v1  ;;  %v4853_v29 = vld [vmem:[#allocation57_spill] sm:$0xff]  ;;  %v4854_v35 = vld [vmem:[#allocation58_spill] sm:$0xff] }
 0x25d   :  { %v1525_v22 = vpop.f32.mrf.mxu0  ;;  %v2054_v14 = vpop.f32.mrf.mxu1  ;;  %v4855_v36 = vmax.f32 %v4853_v29, %v4854_v35 }
 0x25e   :  { %2277 = vst.msk [vmem:[%s4650_s3 + $0x148] sm:$0xff] %vm2235_vm4, %v2227_v63  ;;  %v2179_v16 = vadd.f32 %v4256_v3, %v2123_v32  ;;  %v1595_v19 = vmax.f32 %v4840_v18, %v1525_v22 }
 0x25f   :  { %v3048_v45 = vpop.f32.mrf.mxu0  ;;  %v3152_v8 = vpop.f32.mrf.mxu1 }
 0x260   :  { %v2228_v42 = vmax.f32 %v2179_v16, 0.0  ;;  %v2124_v43 = vmax.f32 %v1595_v19, %v2054_v14 }
 0x261   :  { %v1530_v44 = vpop.f32.mrf.mxu0  ;;  %v2059_v46 = vpop.f32.mrf.mxu1 }
 0x262   :  { %2278 = vst.msk [vmem:[%s4650_s3 + $0x150] sm:$0xff] %vm2235_vm4, %v2228_v42  ;;  %v2180_v52 = vadd.f32 %v4256_v3, %v2124_v43  ;;  %v1596_v56 = vmax.f32 %v4843_v39, %v1530_v44 }
 0x263   :  { %v3051_v51 = vpop.f32.mrf.mxu0  ;;  %v3155_v6 = vpop.f32.mrf.mxu1 }
 0x264   :  { %v2229_v23 = vmax.f32 %v2180_v52, 0.0  ;;  %v2125_v60 = vmax.f32 %v1596_v56, %v2059_v46 }
 0x265   :  { %v1533_v21 = vpop.f32.mrf.mxu0  ;;  %v2062_v24 = vpop.f32.mrf.mxu1 }
 0x266   :  { %2279 = vst.msk [vmem:[%s4650_s3 + $0x158] sm:$0xff] %vm2235_vm4, %v2229_v23  ;;  %v2181_v47 = vadd.f32 %v4256_v3, %v2125_v60  ;;  %v1597_v7 = vmax.f32 %v4846_v48, %v1533_v21 }
 0x267   :  { %v3052_v0 = vpop.f32.mrf.mxu0  ;;  %v3156_v41 = vpop.f32.mrf.mxu1 }
 0x268   :  { %v2230_v13 = vmax.f32 %v2181_v47, 0.0  ;;  %v2126_v37 = vmax.f32 %v1597_v7, %v2062_v24 }
 0x269   :  { %v1538_v33 = vpop.f32.mrf.mxu0  ;;  %v2067_v59 = vpop.f32.mrf.mxu1 }
 0x26a   :  { %2280 = vst.msk [vmem:[%s4650_s3 + $0x160] sm:$0xff] %vm2235_vm4, %v2230_v13  ;;  %v2182_v34 = vadd.f32 %v4256_v3, %v2126_v37  ;;  %v1598_v54 = vmax.f32 %v4849_v57, %v1538_v33 }
 0x26b   :  { %v3055_v9 = vpop.f32.mrf.mxu0  ;;  %v3159_v4 = vpop.f32.mrf.mxu1 }
 0x26c   :  { %v2231_v55 = vmax.f32 %v2182_v34, 0.0  ;;  %v2127_v30 = vmax.f32 %v1598_v54, %v2067_v59 }
 0x26d   :  { %v1541_v31 = vpop.f32.mrf.mxu0  ;;  %v2070_v58 = vpop.f32.mrf.mxu1 }
 0x26e   :  { %2281 = vst.msk [vmem:[%s4650_s3 + $0x168] sm:$0xff] %vm2235_vm4, %v2231_v55  ;;  %v2183_v11 = vadd.f32 %v4256_v3, %v2127_v30  ;;  %v1599_v20 = vmax.f32 %v4852_v12, %v1541_v31 }
 0x26f   :  { %v3056_v17 = vpop.f32.mrf.mxu0  ;;  %v3160_v15 = vpop.f32.mrf.mxu1 }
 0x270   :  { %v2232_v1 = vmax.f32 %v2183_v11, 0.0  ;;  %v2128_v2 = vmax.f32 %v1599_v20, %v2070_v58 }
 0x271   :  { %v1546_v27 = vpop.f32.mrf.mxu0  ;;  %v2075_v62 = vpop.f32.mrf.mxu1 }
 0x272   :  { %2282 = vst.msk [vmem:[%s4650_s3 + $0x170] sm:$0xff] %vm2235_vm4, %v2232_v1  ;;  %v2184_v28 = vadd.f32 %v4256_v3, %v2128_v2  ;;  %v1600_v63 = vmax.f32 %v4855_v36, %v1546_v27 }
 0x273   :  { %v3059_v32 = vpop.f32.mrf.mxu0  ;;  %v3163_v22 = vpop.f32.mrf.mxu1 }
 0x274   :  { %v2233_v14 = vmax.f32 %v2184_v28, 0.0  ;;  %v2129_v16 = vmax.f32 %v1600_v63, %v2075_v62 }
 0x275   :  { %v1549_v53 = vpop.f32.mrf.mxu0  ;;  %v2078_v61 = vpop.f32.mrf.mxu1 }
 0x276   :  { %2283 = vst.msk [vmem:[%s4650_s3 + $0x178] sm:$0xff] %vm2235_vm4, %v2233_v14  ;;  %v2185_v18 = vadd.f32 %v4256_v3, %v2129_v16 }
 0x277   :  { %v3060_v19 = vpop.f32.mrf.mxu0  ;;  %v3164_v45 = vpop.f32.mrf.mxu1 }
 0x278   :  { %v2234_v8 = vmax.f32 %v2185_v18, 0.0 }
 0x27a   :  { %2284 = vst.msk [vmem:[%s4650_s3 + $0x180] sm:$0xff] %vm2235_vm4, %v2234_v8 }
 0x27b   :  { %2289 = vsyncpa [#allocation3], 1 }
 0x27c   :  { %2290 = vsyncpa [#allocation5], 1 }

// kernel: forward.5
= control target key start
LH: loop header
LB: loop body
LE: loop exit
PB: predicated region body
PF: predicated region fallthrough
CT: control target
= control target key end

     0   :  { %v6645_v36 = vmov 0.0   ;;  %vm4807_vm0 = vmmov 0   ;;  %vm701_vm1 = vcmask 261120   ;;  %vm3127_vm2 = vcmask 523264   ;;  %s6641_s1 = inlined_call_operand.vmem [shape: bf16[800,64], index: 1, kind: input, shape index: {}]   ;;  %s6642_s0 = inlined_call_operand.vmem [shape: bf16[4,104,800], index: 0, kind: input, shape index: {}]   ;;  %s6643_s2 = inlined_call_operand.vmem [shape: f32[1,64], index: 2, kind: input, shape index: {}]   ;;  %s6644_s3 = inlined_call_operand.vmem [shape: f32[104,64], index: 3, kind: output, shape index: {}]  }
   0x1   :  { %v4831_v0 = vld [vmem:[%s6641_s1 + $0x78] sm:$0xff]   ;;  %v4854_v4 = vld [vmem:[%s6641_s1 + $0x70] sm:$0xff]   ;;  %v4878_v8 = vld [vmem:[%s6641_s1 + $0x68] sm:$0xff]  }
   0x2   :  { %v4836_v1 = vld [vmem:[%s6641_s1 + $0xf8] sm:$0xff]   ;;  %3576 = vmatprep.subr.bf16.mxu0 %v4831_v0  ;;  %v4860_v5 = vld [vmem:[%s6641_s1 + $0xf0] sm:$0xff]   ;;  %v4884_v9 = vld [vmem:[%s6641_s1 + $0xe8] sm:$0xff]  }
   0x3   :  { %v4842_v2 = vld [vmem:[%s6641_s1 + $0x38] sm:$0xff]   ;;  %3634 = vmatprep.subr.bf16.mxu1 %v4836_v1  ;;  %v4866_v6 = vld [vmem:[%s6641_s1 + $0x30] sm:$0xff]   ;;  %v4890_v10 = vld [vmem:[%s6641_s1 + $0x28] sm:$0xff]  }
   0x4   :  { %v4848_v3 = vld [vmem:[%s6641_s1 + $0xb8] sm:$0xff]   ;;  %3577 = vmatpush3.bf16.msra.mxu0 %v4842_v2  ;;  %v4872_v7 = vld [vmem:[%s6641_s1 + $0xb0] sm:$0xff]   ;;  %v4896_v11 = vld [vmem:[%s6641_s1 + $0xa8] sm:$0xff]  }
   0x5   :  { %3635 = vmatpush3.bf16.msra.mxu1 %v4848_v3  ;;  %3578 = vmatprep.subr.bf16.mxu0 %v4854_v4  ;;  %v4902_v12 = vld [vmem:[%s6641_s1 + $0x60] sm:$0xff]   ;;  %v4926_v16 = vld [vmem:[%s6641_s1 + $0x58] sm:$0xff]   ;;  %v4950_v20 = vld [vmem:[%s6641_s1 + $0x50] sm:$0xff]  }
   0x6   :  { %3636 = vmatprep.subr.bf16.mxu1 %v4860_v5  ;;  %v4908_v13 = vld [vmem:[%s6641_s1 + $0xe0] sm:$0xff]   ;;  %v4932_v17 = vld [vmem:[%s6641_s1 + $0xd8] sm:$0xff]   ;;  %v4956_v21 = vld [vmem:[%s6641_s1 + $0xd0] sm:$0xff]  }
   0x7   :  { %v4914_v14 = vld [vmem:[%s6641_s1 + $0x20] sm:$0xff]   ;;  %v4938_v18 = vld [vmem:[%s6641_s1 + $0x18] sm:$0xff]   ;;  %v4962_v22 = vld [vmem:[%s6641_s1 + $0x10] sm:$0xff]  }
   0x8   :  { %3579 = vmatpush3.bf16.msra.mxu0 %v4866_v6  ;;  %v4920_v15 = vld [vmem:[%s6641_s1 + $0xa0] sm:$0xff]   ;;  %v4944_v19 = vld [vmem:[%s6641_s1 + $0x98] sm:$0xff]   ;;  %v4968_v23 = vld [vmem:[%s6641_s1 + $0x90] sm:$0xff]  }
   0x9   :  { %3637 = vmatpush3.bf16.msra.mxu1 %v4872_v7  ;;  %3580 = vmatprep.subr.bf16.mxu0 %v4878_v8  ;;  %v4974_v24 = vld [vmem:[%s6641_s1 + $0x48] sm:$0xff]   ;;  %v4998_v28 = vld [vmem:[%s6641_s1 + $0x40] sm:$0xff]   ;;  %v5036_v37 = vld [vmem:[%s6641_s1 + $0x178] sm:$0xff]  }
   0xa   :  { %3638 = vmatprep.subr.bf16.mxu1 %v4884_v9  ;;  %v4980_v25 = vld [vmem:[%s6641_s1 + $0xc8] sm:$0xff]   ;;  %v5004_v29 = vld [vmem:[%s6641_s1 + $0xc0] sm:$0xff]   ;;  %v5041_v38 = vld [vmem:[%s6641_s1 + $0x138] sm:$0xff]  }
   0xb   :  { %v4986_v26 = vld [vmem:[%s6641_s1 + $0x8] sm:$0xff]   ;;  %v5010_v30 = vld [vmem:[%s6641_s1] sm:$0xff]   ;;  %v4478_v39 = vld [vmem:[%s6642_s0 + $0x3c] ss:$28 sps:$4 sm:$0xff]  }
   0xc   :  { %3581 = vmatpush3.bf16.msra.mxu0 %v4890_v10  ;;  %v4992_v27 = vld [vmem:[%s6641_s1 + $0x88] sm:$0xff]   ;;  %v5016_v31 = vld [vmem:[%s6641_s1 + $0x80] sm:$0xff]   ;;  %v5054_v41 = vld [vmem:[%s6641_s1 + $0x170] sm:$0xff]  }
   0xd   :  { %3639 = vmatpush3.bf16.msra.mxu1 %v4896_v11  ;;  %3582 = vmatprep.subr.bf16.mxu0 %v4902_v12  ;;  %v4470_v32 = vld [vmem:[%s6642_s0] ss:$28 sps:$4 sm:$0xff]   ;;  %v4473_v34 = vld [vmem:[%s6642_s0 + $0x8] ss:$28 sps:$4 sm:$0xff]   ;;  %v4484_v43 = vld [vmem:[%s6642_s0 + $0x38] ss:$28 sps:$4 sm:$0xff]  }
   0xe   :  { %3640 = vmatprep.subr.bf16.mxu1 %v4908_v13  ;;  %v4472_v33 = vld [vmem:[%s6642_s0 + $0x4] ss:$28 sps:$4 sm:$0xff]   ;;  %v4475_v35 = vld [vmem:[%s6642_s0 + $0xc] ss:$28 sps:$4 sm:$0xff]   ;;  %v5072_v45 = vld [vmem:[%s6641_s1 + $0x130] sm:$0xff]  }
   0xf   :  { %755 = vmatprep.mubr.bf16.mxu0 %v4472_v33  ;;  %843 = vmatprep.mubr.bf16.mxu1 %v4475_v35  ;;  %v4480_v40 = vld [vmem:[%s6642_s0 + $0x44] ss:$28 sps:$4 sm:$0xff]   ;;  %v5059_v42 = vld [vmem:[%s6641_s1 + $0x188] sm:$0xff]   ;;  %v4488_v47 = vld [vmem:[%s6642_s0 + $0x74] ss:$28 sps:$4 sm:$0xff]  }
  0x10   :  { %3583 = vmatpush3.bf16.msra.mxu0 %v4914_v14  ;;  %v4485_v44 = vld [vmem:[%s6642_s0 + $0x40] ss:$28 sps:$4 sm:$0xff]   ;;  %v5077_v46 = vld [vmem:[%s6641_s1 + $0x168] sm:$0xff]   ;;  %v4494_v51 = vld [vmem:[%s6642_s0 + $0x78] ss:$28 sps:$4 sm:$0xff]  }
  0x11   :  { %3641 = vmatpush3.bf16.msra.mxu1 %v4920_v15  ;;  %3584 = vmatprep.subr.bf16.mxu0 %v4926_v16  ;;  %v4490_v48 = vld [vmem:[%s6642_s0 + $0x7c] ss:$28 sps:$4 sm:$0xff]   ;;  %v5091_v49 = vld [vmem:[%s6641_s1 + $0x128] sm:$0xff]   ;;  %v5102_v52 = vld [vmem:[%s6641_s1 + $0x160] sm:$0xff]  }
  0x12   :  { %3642 = vmatprep.subr.bf16.mxu1 %v4932_v17  ;;  %v4493_v50 = vld [vmem:[%s6642_s0 + $0x70] ss:$28 sps:$4 sm:$0xff]   ;;  %v5107_v53 = vld [vmem:[%s6641_s1 + $0x120] sm:$0xff]   ;;  %v5120_v56 = vld [vmem:[%s6641_s1 + $0x158] sm:$0xff]  }
  0x13   :  { %v4497_v54 = vld [vmem:[%s6642_s0 + $0xac] ss:$28 sps:$4 sm:$0xff]   ;;  %v4499_v55 = vld [vmem:[%s6642_s0 + $0xb4] ss:$28 sps:$4 sm:$0xff]   ;;  %v5126_v57 = vld [vmem:[%s6641_s1 + $0x118] sm:$0xff]  }
  0x14   :  { %3585 = vmatpush3.bf16.msra.mxu0 %v4938_v18  ;;  %v4501_v58 = vld [vmem:[%s6642_s0 + $0xa8] ss:$28 sps:$4 sm:$0xff]   ;;  %v4502_v59 = vld [vmem:[%s6642_s0 + $0xb0] ss:$28 sps:$4 sm:$0xff]   ;;  %v4509_v33 = vld [vmem:[%s6642_s0 + $0xe0] ss:$28 sps:$4 sm:$0xff]  }
  0x15   :  { %3643 = vmatpush3.bf16.msra.mxu1 %v4944_v19  ;;  %3586 = vmatprep.subr.bf16.mxu0 %v4950_v20  ;;  %v4505_v60 = vld [vmem:[%s6642_s0 + $0xe4] ss:$28 sps:$4 sm:$0xff]   ;;  %v4507_v61 = vld [vmem:[%s6642_s0 + $0xec] ss:$28 sps:$4 sm:$0xff]   ;;  %v5145_v62 = vld [vmem:[%s6641_s1 + $0x150] sm:$0xff]  }
  0x16   :  { %3644 = vmatprep.subr.bf16.mxu1 %v4956_v21  ;;  %v5150_v63 = vld [vmem:[%s6641_s1 + $0x180] sm:$0xff]  }
  0x17   :  { %v4510_v35 = vld [vmem:[%s6642_s0 + $0xe8] ss:$28 sps:$4 sm:$0xff]  }
  0x18   :  { %3587 = vmatpush3.bf16.msra.mxu0 %v4962_v22 }
  0x19   :  { %3645 = vmatpush3.bf16.msra.mxu1 %v4968_v23  ;;  %3588 = vmatprep.subr.bf16.mxu0 %v4974_v24 }
  0x1a   :  { %3646 = vmatprep.subr.bf16.mxu1 %v4980_v25 }
  0x1c   :  { %3589 = vmatpush3.bf16.msra.mxu0 %v4986_v26 }
  0x1d   :  { %3647 = vmatpush3.bf16.msra.mxu1 %v4992_v27  ;;  %3590 = vmatprep.subr.bf16.mxu0 %v4998_v28 }
  0x1e   :  { %3648 = vmatprep.subr.bf16.mxu1 %v5004_v29 }
  0x20   :  { %3591 = vmatpush3.bf16.msra.mxu0 %v5010_v30 }
  0x21   :  { %3649 = vmatpush3.bf16.msra.mxu1 %v5016_v31  ;;  %3692 = vmatprep.subr.bf16.mxu0 %v5036_v37 }
  0x22   :  { %4308 = vmatprep.subr.bf16.mxu1 %v6645_v36 }
  0x23   :  { %756 = vmatmul.mubr.bf16.vlgmr.msra.gmra.mxu0 %v4470_v32  ;;  %v5156_v32 = vld [vmem:[%s6641_s1 + $0x110] sm:$0xff]  }
  0x24   :  { %844 = vmatmul.mubr.bf16.vlgmr.msra.gmra.mxu1 %v4473_v34  ;;  %3693 = vmatpush3.bf16.msra.mxu0 %v5041_v38  ;;  %v5166_v34 = vld [vmem:[%s6641_s1 + $0x148] sm:$0xff]  }
  0x25   :  { %763 = vmatprep.mubr.bf16.mxu0 %v4478_v39  ;;  %851 = vmatprep.mubr.bf16.mxu1 %v4480_v40  ;;  %v5174_v39 = vld [vmem:[%s6641_s1 + $0x108] sm:$0xff]   ;;  %v4514_v40 = vld [vmem:[%s6642_s0 + $0x11c] ss:$28 sps:$4 sm:$0xff]  }
  0x26   :  { %3694 = vmatprep.subr.bf16.mxu0 %v5054_v41  ;;  %4309 = vmatpush3.bf16.msra.mxu1 %v5059_v42 }
  0x27   :  { %4310 = vmatprep.subr.bf16.mxu1 %v6645_v36 }
  0x28   :  { %3695 = vmatpush3.bf16.msra.mxu0 %v5072_v45 }
  0x29   :  { %3696 = vmatprep.subr.bf16.mxu0 %v5077_v46 }
  0x2a   :  { %4311 = vmatpush3.bf16.msra.mxu1 %v5150_v63 }
  0x2b   :  { %764 = vmatmul.mubr.bf16.gmra.mxu0 %v4484_v43  ;;  %3817 = vmatprep.subr.bf16.mxu1 %v4836_v1  ;;  %v4516_v43 = vld [vmem:[%s6642_s0 + $0x124] ss:$28 sps:$4 sm:$0xff]  }
  0x2c   :  { %852 = vmatmul.mubr.bf16.gmra.mxu1 %v4485_v44  ;;  %771 = vmatprep.mubr.bf16.mxu0 %v4488_v47  ;;  %v5187_v44 = vld [vmem:[%s6641_s1 + $0x140] sm:$0xff]   ;;  %v163_v47 = vld [vmem:[%s6642_s0 + $0x150] sm:$0xff] }
  0x2d   :  { %859 = vmatprep.mubr.bf16.mxu1 %v4490_v48  ;;  %3697 = vmatpush3.bf16.msra.mxu0 %v5091_v49  ;;  %v5193_v1 = vld [vmem:[%s6641_s1 + $0x100] sm:$0xff]   ;;  %v164_v48 = vld [vmem:[%s6642_s0 + $0x158] sm:$0xff] }
  0x2e   :  { %3698 = vmatprep.subr.bf16.mxu0 %v5102_v52 }
  0x31   :  { %3699 = vmatpush3.bf16.msra.mxu0 %v5107_v53 }
  0x32   :  { %3700 = vmatprep.subr.bf16.mxu0 %v5120_v56 }
  0x33   :  { %772 = vmatmul.mubr.bf16.gmra.mxu0 %v4493_v50  ;;  %v4518_v50 = vld [vmem:[%s6642_s0 + $0x118] ss:$28 sps:$4 sm:$0xff]  }
  0x34   :  { %860 = vmatmul.mubr.bf16.gmra.mxu1 %v4494_v51  ;;  %779 = vmatprep.mubr.bf16.mxu0 %v4497_v54  ;;  %v4519_v51 = vld [vmem:[%s6642_s0 + $0x120] ss:$28 sps:$4 sm:$0xff]   ;;  %v3188_v54 = vcombine.high %v163_v47, %v163_v47 }
  0x35   :  { %867 = vmatprep.mubr.bf16.mxu1 %v4499_v55  ;;  %3701 = vmatpush3.bf16.msra.mxu0 %v5126_v57  ;;  %v3190_v55 = vcombine.high %v164_v48, %v164_v48 }
  0x36   :  { %3702 = vmatprep.subr.bf16.mxu0 %v5145_v62 }
  0x39   :  { %3703 = vmatpush3.bf16.msra.mxu0 %v5156_v32 }
  0x3a   :  { %3704 = vmatprep.subr.bf16.mxu0 %v5166_v34 }
  0x3b   :  { %780 = vmatmul.mubr.bf16.gmra.mxu0 %v4501_v58  ;;  %v3187_v58 = vcombine.low %v163_v47, %v163_v47  ;;  %v4595_v47 = vld [vmem:[%s6642_s0 + $0x17c] ss:$28 sps:$4 sm:$0xff]  }
  0x3c   :  { %868 = vmatmul.mubr.bf16.gmra.mxu1 %v4502_v59  ;;  %787 = vmatprep.mubr.bf16.mxu0 %v4505_v60  ;;  %v3189_v59 = vcombine.low %v164_v48, %v164_v48  ;;  %v4528_v60 = vld [vmem:[%s6642_s0 + $0x10] ss:$28 sps:$4 sm:$0xff]   ;;  %v4598_v48 = vld [vmem:[%s6642_s0 + $0x184] ss:$28 sps:$4 sm:$0xff]  }
  0x3d   :  { %875 = vmatprep.mubr.bf16.mxu1 %v4507_v61  ;;  %3705 = vmatpush3.bf16.msra.mxu0 %v5174_v39  ;;  %v4531_v61 = vld [vmem:[%s6642_s0 + $0x18] ss:$28 sps:$4 sm:$0xff]  }
  0x3e   :  { %3706 = vmatprep.subr.bf16.mxu0 %v5187_v44 }
  0x41   :  { %3707 = vmatpush3.bf16.msra.mxu0 %v5193_v1 }
  0x42   :  { %3759 = vmatprep.subr.bf16.mxu0 %v4831_v0  ;;  %v4530_v0 = vld [vmem:[%s6642_s0 + $0x14] ss:$28 sps:$4 sm:$0xff]  }
  0x43   :  { %788 = vmatmul.mubr.bf16.gmra.mxu0 %v4509_v33  ;;  %v4532_v33 = vld [vmem:[%s6642_s0 + $0x4c] ss:$28 sps:$4 sm:$0xff]  }
  0x44   :  { %876 = vmatmul.mubr.bf16.gmra.mxu1 %v4510_v35  ;;  %795 = vmatprep.mubr.bf16.mxu0 %v4514_v40  ;;  %v4534_v35 = vld [vmem:[%s6642_s0 + $0x48] ss:$28 sps:$4 sm:$0xff]   ;;  %v4535_v40 = vld [vmem:[%s6642_s0 + $0x50] ss:$28 sps:$4 sm:$0xff]  }
  0x45   :  { %883 = vmatprep.mubr.bf16.mxu1 %v4516_v43 }
  0x4b   :  { %796 = vmatmul.mubr.bf16.gmra.mxu0 %v4518_v50  ;;  %v4599_v50 = vld [vmem:[%s6642_s0 + $0x1b8] ss:$28 sps:$4 sm:$0xff]  }
  0x4c   :  { %884 = vmatmul.mubr.bf16.gmra.mxu1 %v4519_v51  ;;  %803 = vmatprep.mubr.bf16.mxu0 %v3188_v54  ;;  %v5449_v51 = vld [vmem:[%s6641_s1 + $0x38] sm:$0xff]   ;;  %v5457_v54 = vld [vmem:[%s6641_s1 + $0x70] sm:$0xff]  }
  0x4d   :  { %891 = vmatprep.mubr.bf16.mxu1 %v3190_v55  ;;  %v5463_v55 = vld [vmem:[%s6641_s1 + $0xb8] sm:$0xff]  }
  0x53   :  { %804 = vmatmul.mubr.bf16.gmra.mxu0 %v3187_v58  ;;  %v4601_v58 = vld [vmem:[%s6642_s0 + $0x1b4] ss:$28 sps:$4 sm:$0xff]  }
  0x54   :  { %892 = vmatmul.mubr.bf16.gmra.mxu1 %v3189_v59  ;;  %931 = vmatprep.mubr.bf16.mxu0 %v4530_v0  ;;  %v5472_v59 = vld [vmem:[%s6641_s1 + $0xf0] sm:$0xff]   ;;  %v4602_v0 = vld [vmem:[%s6642_s0 + $0x1bc] ss:$28 sps:$4 sm:$0xff]  }
  0x55   :  { %4312 = vmatprep.mubr.msk.bf16.mxu1 %vm4807_vm0, %v6645_v36 }
  0x5b   :  { %932 = vmatmul.mubr.bf16.vlgmr.msra.gmra.mxu0 %v4528_v60  ;;  %v5481_v60 = vld [vmem:[%s6641_s1 + $0x30] sm:$0xff]  }
  0x5c   :  { %4313 = vmatmul.mubr.msk.bf16.vlgmr.msra.gmra.mxu1 %vm701_vm1, %v4531_v61  ;;  %3760 = vmatpush3.bf16.msra.mxu0 %v4842_v2  ;;  %v4536_v2 = vld [vmem:[%s6642_s0 + $0x84] ss:$28 sps:$4 sm:$0xff]   ;;  %v4603_v61 = vld [vmem:[%s6642_s0 + $0x1f0] ss:$28 sps:$4 sm:$0xff]  }
  0x5d   :  { %939 = vmatprep.mubr.bf16.mxu0 %v4532_v33  ;;  %4316 = vmatprep.mubr.msk.bf16.mxu1 %vm4807_vm0, %v6645_v36  ;;  %v5490_v33 = vld [vmem:[%s6641_s1 + $0x68] sm:$0xff]  }
  0x5e   :  { %3761 = vmatprep.subr.bf16.mxu0 %v4854_v4  ;;  %3818 = vmatpush3.bf16.msra.mxu1 %v4848_v3  ;;  %v4538_v3 = vld [vmem:[%s6642_s0 + $0x80] ss:$28 sps:$4 sm:$0xff]   ;;  %v4539_v4 = vld [vmem:[%s6642_s0 + $0x88] ss:$28 sps:$4 sm:$0xff]  }
  0x5f   :  { %3819 = vmatprep.subr.bf16.mxu1 %v4860_v5  ;;  %v4540_v5 = vld [vmem:[%s6642_s0 + $0xbc] ss:$28 sps:$4 sm:$0xff]  }
  0x60   :  { %3762 = vmatpush3.bf16.msra.mxu0 %v4866_v6  ;;  %v4542_v6 = vld [vmem:[%s6642_s0 + $0xb8] ss:$28 sps:$4 sm:$0xff]  }
  0x61   :  { %3763 = vmatprep.subr.bf16.mxu0 %v4878_v8  ;;  %v4544_v8 = vld [vmem:[%s6642_s0 + $0xf4] ss:$28 sps:$4 sm:$0xff]  }
  0x62   :  { %3820 = vmatpush3.bf16.msra.mxu1 %v4872_v7  ;;  %v4543_v7 = vld [vmem:[%s6642_s0 + $0xc0] ss:$28 sps:$4 sm:$0xff]  }
  0x63   :  { %940 = vmatmul.mubr.bf16.gmra.mxu0 %v4534_v35  ;;  %3821 = vmatprep.subr.bf16.mxu1 %v4884_v9  ;;  %v4546_v9 = vld [vmem:[%s6642_s0 + $0xf0] ss:$28 sps:$4 sm:$0xff]  }
  0x64   :  { %4317 = vmatmul.mubr.msk.bf16.gmra.mxu1 %vm701_vm1, %v4535_v40  ;;  %947 = vmatprep.mubr.bf16.mxu0 %v4536_v2  ;;  %v5496_v35 = vld [vmem:[%s6641_s1 + $0xb0] sm:$0xff]   ;;  %v5502_v40 = vld [vmem:[%s6641_s1 + $0xe8] sm:$0xff]  }
  0x65   :  { %4320 = vmatprep.mubr.msk.bf16.mxu1 %vm4807_vm0, %v6645_v36  ;;  %3764 = vmatpush3.bf16.msra.mxu0 %v4890_v10  ;;  %v4547_v10 = vld [vmem:[%s6642_s0 + $0xf8] ss:$28 sps:$4 sm:$0xff]   ;;  %v5511_v2 = vld [vmem:[%s6641_s1 + $0x28] sm:$0xff]  }
  0x66   :  { %3765 = vmatprep.subr.bf16.mxu0 %v4902_v12  ;;  %3822 = vmatpush3.bf16.msra.mxu1 %v4896_v11  ;;  %v4548_v11 = vld [vmem:[%s6642_s0 + $0x12c] ss:$28 sps:$4 sm:$0xff]   ;;  %v165_v12 = vld [vmem:[%s6642_s0 + $0x160] sm:$0xff] }
  0x67   :  { %3823 = vmatprep.subr.bf16.mxu1 %v4908_v13  ;;  %v4550_v13 = vld [vmem:[%s6642_s0 + $0x128] ss:$28 sps:$4 sm:$0xff]  }
  0x69   :  { %3766 = vmatpush3.bf16.msra.mxu0 %v4914_v14  ;;  %v4551_v14 = vld [vmem:[%s6642_s0 + $0x130] ss:$28 sps:$4 sm:$0xff]  }
  0x6a   :  { %3767 = vmatprep.subr.bf16.mxu0 %v4926_v16  ;;  %3824 = vmatpush3.bf16.msra.mxu1 %v4920_v15  ;;  %v3192_v15 = vcombine.high %v165_v12, %v165_v12  ;;  %v4554_v16 = vld [vmem:[%s6642_s0 + $0x168] ss:$0 sps:$4 sm:$0xff]  }
  0x6b   :  { %948 = vmatmul.mubr.bf16.gmra.mxu0 %v4538_v3  ;;  %3825 = vmatprep.subr.bf16.mxu1 %v4932_v17  ;;  %v4557_v17 = vld [vmem:[%s6642_s0 + $0x170] ss:$28 sps:$4 sm:$0xff]   ;;  %v5517_v3 = vld [vmem:[%s6641_s1 + $0x60] sm:$0xff]  }
  0x6c   :  { %4321 = vmatmul.mubr.msk.bf16.gmra.mxu1 %vm701_vm1, %v4539_v4  ;;  %955 = vmatprep.mubr.bf16.mxu0 %v4540_v5  ;;  %v5523_v4 = vld [vmem:[%s6641_s1 + $0xa8] sm:$0xff]  }
  0x6d   :  { %4324 = vmatprep.mubr.msk.bf16.mxu1 %vm4807_vm0, %v6645_v36  ;;  %3768 = vmatpush3.bf16.msra.mxu0 %v4938_v18  ;;  %v3191_v18 = vcombine.low %v165_v12, %v165_v12  ;;  %v4605_v5 = vld [vmem:[%s6642_s0 + $0x1ec] ss:$28 sps:$4 sm:$0xff]   ;;  %v5562_v12 = vld [vmem:[%s6641_s1 + $0xd8] sm:$0xff]  }
  0x6e   :  { %3769 = vmatprep.subr.bf16.mxu0 %v4950_v20  ;;  %3826 = vmatpush3.bf16.msra.mxu1 %v4944_v19  ;;  %v4560_v19 = vld [vmem:[%s6642_s0 + $0x178] ss:$28 sps:$4 sm:$0xff]   ;;  %v4555_v20 = vld [vmem:[%s6642_s0 + $0x16c] ss:$28 sps:$4 sm:$0xff]  }
  0x6f   :  { %3827 = vmatprep.subr.bf16.mxu1 %v4956_v21  ;;  %v4558_v21 = vld [vmem:[%s6642_s0 + $0x174] ss:$28 sps:$4 sm:$0xff]  }
  0x71   :  { %3770 = vmatpush3.bf16.msra.mxu0 %v4962_v22  ;;  %v4561_v22 = vld [vmem:[%s6642_s0 + $0x1a8] ss:$28 sps:$4 sm:$0xff]  }
  0x72   :  { %3771 = vmatprep.subr.bf16.mxu0 %v4974_v24  ;;  %3828 = vmatpush3.bf16.msra.mxu1 %v4968_v23  ;;  %v4563_v23 = vld [vmem:[%s6642_s0 + $0x1b0] ss:$28 sps:$4 sm:$0xff]   ;;  %v4565_v24 = vld [vmem:[%s6642_s0 + $0x1a4] ss:$28 sps:$4 sm:$0xff]  }
  0x73   :  { %956 = vmatmul.mubr.bf16.gmra.mxu0 %v4542_v6  ;;  %3829 = vmatprep.subr.bf16.mxu1 %v4980_v25  ;;  %v4566_v25 = vld [vmem:[%s6642_s0 + $0x1ac] ss:$28 sps:$4 sm:$0xff]   ;;  %v5532_v6 = vld [vmem:[%s6641_s1 + $0xe0] sm:$0xff]  }
  0x74   :  { %4325 = vmatmul.mubr.msk.bf16.gmra.mxu1 %vm701_vm1, %v4543_v7  ;;  %963 = vmatprep.mubr.bf16.mxu0 %v4544_v8  ;;  %v4606_v7 = vld [vmem:[%s6642_s0 + $0x1f4] ss:$28 sps:$4 sm:$0xff]   ;;  %v4607_v8 = vld [vmem:[%s6642_s0 + $0x228] ss:$28 sps:$4 sm:$0xff]  }
  0x75   :  { %4328 = vmatprep.mubr.msk.bf16.mxu1 %vm4807_vm0, %v6645_v36  ;;  %3772 = vmatpush3.bf16.msra.mxu0 %v4986_v26  ;;  %v4567_v26 = vld [vmem:[%s6642_s0 + $0x1e0] ss:$28 sps:$4 sm:$0xff]  }
  0x76   :  { %3773 = vmatprep.subr.bf16.mxu0 %v4998_v28  ;;  %3830 = vmatpush3.bf16.msra.mxu1 %v4992_v27  ;;  %v4569_v27 = vld [vmem:[%s6642_s0 + $0x1e8] ss:$28 sps:$4 sm:$0xff]   ;;  %v5363_v28 = vld [vmem:[%s6641_s1 + $0xf8] sm:$0xff]  }
  0x77   :  { %3831 = vmatprep.subr.bf16.mxu1 %v5004_v29  ;;  %v4571_v29 = vld [vmem:[%s6642_s0 + $0x1dc] ss:$28 sps:$4 sm:$0xff]  }
  0x79   :  { %3774 = vmatpush3.bf16.msra.mxu0 %v5010_v30  ;;  %v4572_v30 = vld [vmem:[%s6642_s0 + $0x1e4] ss:$28 sps:$4 sm:$0xff]  }
  0x7a   :  { %3832 = vmatpush3.bf16.msra.mxu1 %v5016_v31  ;;  %3875 = vmatprep.subr.bf16.mxu0 %v5036_v37  ;;  %v4573_v31 = vld [vmem:[%s6642_s0 + $0x218] ss:$28 sps:$4 sm:$0xff]   ;;  %v4575_v37 = vld [vmem:[%s6642_s0 + $0x220] ss:$28 sps:$4 sm:$0xff]  }
  0x7b   :  { %964 = vmatmul.mubr.bf16.gmra.mxu0 %v4546_v9  ;;  %4340 = vmatprep.subr.bf16.mxu1 %v6645_v36  ;;  %v5544_v9 = vld [vmem:[%s6641_s1 + $0x20] sm:$0xff]  }
  0x7c   :  { %4329 = vmatmul.mubr.msk.bf16.gmra.mxu1 %vm701_vm1, %v4547_v10  ;;  %971 = vmatprep.mubr.bf16.mxu0 %v4548_v11  ;;  %v5550_v10 = vld [vmem:[%s6641_s1 + $0x58] sm:$0xff]   ;;  %v5556_v11 = vld [vmem:[%s6641_s1 + $0xa0] sm:$0xff]  }
  0x7d   :  { %4332 = vmatprep.mubr.msk.bf16.mxu1 %vm4807_vm0, %v6645_v36 }
  0x83   :  { %972 = vmatmul.mubr.bf16.gmra.mxu0 %v4550_v13  ;;  %v5571_v13 = vld [vmem:[%s6641_s1 + $0x18] sm:$0xff]  }
  0x84   :  { %4333 = vmatmul.mubr.msk.bf16.gmra.mxu1 %vm701_vm1, %v4551_v14  ;;  %979 = vmatprep.mubr.bf16.mxu0 %v3192_v15  ;;  %v5577_v14 = vld [vmem:[%s6641_s1 + $0x50] sm:$0xff]   ;;  %v5583_v15 = vld [vmem:[%s6641_s1 + $0x98] sm:$0xff]  }
  0x85   :  { %4336 = vmatprep.mubr.msk.bf16.mxu1 %vm4807_vm0, %v6645_v36 }
  0x8b   :  { %980 = vmatmul.mubr.bf16.gmra.mxu0 %v3191_v18  ;;  %v4610_v18 = vld [vmem:[%s6642_s0 + $0x22c] ss:$28 sps:$4 sm:$0xff]  }
  0x8c   :  { %4337 = vmatmul.mubr.msk.bf16.gmra.mxu1 %vm701_vm1, %v4554_v16  ;;  %1415 = vmatprep.mubr.bf16.mxu0 %v4557_v17  ;;  %v4609_v16 = vld [vmem:[%s6642_s0 + $0x224] ss:$28 sps:$4 sm:$0xff]   ;;  %v5592_v17 = vld [vmem:[%s6641_s1 + $0xd0] sm:$0xff]  }
  0x8d   :  { %1503 = vmatprep.mubr.bf16.mxu1 %v4560_v19  ;;  %v4611_v19 = vld [vmem:[%s6642_s0 + $0x260] ss:$28 sps:$4 sm:$0xff]  }
  0x93   :  { %1416 = vmatmul.mubr.bf16.vlgmr.msra.gmra.mxu0 %v4555_v20  ;;  %v5604_v20 = vld [vmem:[%s6641_s1 + $0x10] sm:$0xff]  }
  0x94   :  { %1504 = vmatmul.mubr.bf16.vlgmr.msra.gmra.mxu1 %v4558_v21  ;;  %3876 = vmatpush3.bf16.msra.mxu0 %v5041_v38  ;;  %v4577_v38 = vld [vmem:[%s6642_s0 + $0x214] ss:$28 sps:$4 sm:$0xff]   ;;  %v5610_v21 = vld [vmem:[%s6641_s1 + $0x48] sm:$0xff]  }
  0x95   :  { %1423 = vmatprep.mubr.bf16.mxu0 %v4561_v22  ;;  %1511 = vmatprep.mubr.bf16.mxu1 %v4563_v23  ;;  %v5616_v22 = vld [vmem:[%s6641_s1 + $0x90] sm:$0xff]  }
  0x96   :  { %3877 = vmatprep.subr.bf16.mxu0 %v5054_v41  ;;  %4341 = vmatpush3.bf16.msra.mxu1 %v5059_v42  ;;  %v4578_v41 = vld [vmem:[%s6642_s0 + $0x21c] ss:$28 sps:$4 sm:$0xff]   ;;  %v4579_v42 = vld [vmem:[%s6642_s0 + $0x250] ss:$28 sps:$4 sm:$0xff]  }
  0x97   :  { %4342 = vmatprep.subr.bf16.mxu1 %v6645_v36 }
  0x98   :  { %3878 = vmatpush3.bf16.msra.mxu0 %v5072_v45  ;;  %v4581_v45 = vld [vmem:[%s6642_s0 + $0x258] ss:$28 sps:$4 sm:$0xff]  }
  0x99   :  { %3879 = vmatprep.subr.bf16.mxu0 %v5077_v46  ;;  %v4583_v46 = vld [vmem:[%s6642_s0 + $0x24c] ss:$28 sps:$4 sm:$0xff]  }
  0x9a   :  { %4343 = vmatpush3.bf16.msra.mxu1 %v5150_v63  ;;  %v4589_v63 = vld [vmem:[%s6642_s0 + $0x284] ss:$28 sps:$4 sm:$0xff]  }
  0x9b   :  { %1424 = vmatmul.mubr.bf16.gmra.mxu0 %v4565_v24  ;;  %4000 = vmatprep.subr.bf16.mxu1 %v5363_v28  ;;  %v5622_v24 = vld [vmem:[%s6641_s1 + $0xc8] sm:$0xff]  }
  0x9c   :  { %1512 = vmatmul.mubr.bf16.gmra.mxu1 %v4566_v25  ;;  %1431 = vmatprep.mubr.bf16.mxu0 %v4567_v26 }
  0x9d   :  { %1519 = vmatprep.mubr.bf16.mxu1 %v4569_v27  ;;  %3880 = vmatpush3.bf16.msra.mxu0 %v5091_v49  ;;  %v4584_v49 = vld [vmem:[%s6642_s0 + $0x254] ss:$28 sps:$4 sm:$0xff]   ;;  %v5631_v27 = vld [vmem:[%s6641_s1 + $0x8] sm:$0xff]  }
  0x9e   :  { %3881 = vmatprep.subr.bf16.mxu0 %v5102_v52  ;;  %v4585_v52 = vld [vmem:[%s6642_s0 + $0x288] ss:$28 sps:$4 sm:$0xff]  }
  0xa1   :  { %3882 = vmatpush3.bf16.msra.mxu0 %v5107_v53  ;;  %v4587_v53 = vld [vmem:[%s6642_s0 + $0x290] ss:$28 sps:$4 sm:$0xff]  }
  0xa2   :  { %3883 = vmatprep.subr.bf16.mxu0 %v5120_v56  ;;  %v5416_v56 = vld [vmem:[%s6641_s1 + $0x78] sm:$0xff]  }
  0xa3   :  { %1432 = vmatmul.mubr.bf16.gmra.mxu0 %v4571_v29 }
  0xa4   :  { %1520 = vmatmul.mubr.bf16.gmra.mxu1 %v4572_v30  ;;  %1439 = vmatprep.mubr.bf16.mxu0 %v4573_v31  ;;  %v5637_v31 = vld [vmem:[%s6641_s1 + $0x40] sm:$0xff]  }
  0xa5   :  { %1527 = vmatprep.mubr.bf16.mxu1 %v4575_v37  ;;  %3884 = vmatpush3.bf16.msra.mxu0 %v5126_v57  ;;  %v3299_v57 = vld [vmem:[%s6642_s0 + $0x2bc] sm:$0xff]  ;;  %v5643_v37 = vld [vmem:[%s6641_s1 + $0x88] sm:$0xff]  }
  0xa6   :  { %3885 = vmatprep.subr.bf16.mxu0 %v5145_v62  ;;  %v3300_v62 = vld [vmem:[%s6642_s0 + $0x2c4] sm:$0xff]  ;;  %v3345_v43 = vcombine.low %v3299_v57, %v3299_v57 }
  0xa9   :  { %3886 = vmatpush3.bf16.msra.mxu0 %v5156_v32  ;;  %v4590_v32 = vld [vmem:[%s6642_s0 + $0x28c] ss:$28 sps:$4 sm:$0xff]  }
  0xaa   :  { %3887 = vmatprep.subr.bf16.mxu0 %v5166_v34  ;;  %v3346_v34 = vcombine.high %v3299_v57, %v3299_v57 }
  0xab   :  { %1440 = vmatmul.mubr.bf16.gmra.mxu0 %v4577_v38 }
  0xac   :  { %1528 = vmatmul.mubr.bf16.gmra.mxu1 %v4578_v41  ;;  %1447 = vmatprep.mubr.bf16.mxu0 %v4579_v42  ;;  %v4613_v42 = vld [vmem:[%s6642_s0 + $0x25c] ss:$28 sps:$4 sm:$0xff]  }
  0xad   :  { %1535 = vmatprep.mubr.bf16.mxu1 %v4581_v45  ;;  %3888 = vmatpush3.bf16.msra.mxu0 %v5174_v39  ;;  %v3348_v39 = vcombine.high %v3300_v62, %v3300_v62  ;;  %v5652_v45 = vld [vmem:[%s6641_s1 + $0xc0] sm:$0xff]  }
  0xae   :  { %3889 = vmatprep.subr.bf16.mxu0 %v5187_v44  ;;  %v3347_v44 = vcombine.low %v3300_v62, %v3300_v62  ;;  %v5666_v62 = vld [vmem:[%s6641_s1] sm:$0xff]  }
  0xb1   :  { %3890 = vmatpush3.bf16.msra.mxu0 %v5193_v1  ;;  %v4597_v1 = vld [vmem:[%s6642_s0 + $0x180] ss:$28 sps:$4 sm:$0xff]  }
  0xb2   :  { %3942 = vmatprep.subr.bf16.mxu0 %v5416_v56 }
  0xb3   :  { %1448 = vmatmul.mubr.bf16.gmra.mxu0 %v4583_v46 }
  0xb4   :  { %1536 = vmatmul.mubr.bf16.gmra.mxu1 %v4584_v49  ;;  %1455 = vmatprep.mubr.bf16.mxu0 %v4585_v52  ;;  %v4614_v49 = vld [vmem:[%s6642_s0 + $0x264] ss:$28 sps:$4 sm:$0xff]   ;;  %v4615_v52 = vld [vmem:[%s6642_s0 + $0x298] ss:$28 sps:$4 sm:$0xff]  }
  0xb5   :  { %1543 = vmatprep.mubr.bf16.mxu1 %v4587_v53 }
  0xbb   :  { %1456 = vmatmul.mubr.bf16.gmra.mxu0 %v4589_v63 }
  0xbc   :  { %1544 = vmatmul.mubr.bf16.gmra.mxu1 %v4590_v32  ;;  %1463 = vmatprep.mubr.bf16.mxu0 %v3346_v34  ;;  %v5672_v34 = vld [vmem:[%s6641_s1 + $0x80] sm:$0xff]  }
  0xbd   :  { %1551 = vmatprep.mubr.bf16.mxu1 %v3348_v39  ;;  %v5678_v39 = vld [vmem:[%s6641_s1 + $0x178] sm:$0xff]  }
  0xc3   :  { %1464 = vmatmul.mubr.bf16.gmra.mxu0 %v3345_v43 }
  0xc4   :  { %1552 = vmatmul.mubr.bf16.gmra.mxu1 %v3347_v44  ;;  %1591 = vmatprep.mubr.bf16.mxu0 %v4597_v1 }
  0xc5   :  { %4344 = vmatprep.mubr.msk.bf16.mxu1 %vm4807_vm0, %v6645_v36 }
  0xcb   :  { %1592 = vmatmul.mubr.bf16.vlgmr.msra.gmra.mxu0 %v4595_v47 }
  0xcc   :  { %4345 = vmatmul.mubr.msk.bf16.vlgmr.msra.gmra.mxu1 %vm701_vm1, %v4598_v48  ;;  %3943 = vmatpush3.bf16.msra.mxu0 %v5449_v51 }
  0xcd   :  { %1599 = vmatprep.mubr.bf16.mxu0 %v4599_v50  ;;  %4348 = vmatprep.mubr.msk.bf16.mxu1 %vm4807_vm0, %v6645_v36  ;;  %v3301_v50 = vld [vmem:[%s6642_s0 + $0x2cc] sm:$0xff] }
  0xce   :  { %3944 = vmatprep.subr.bf16.mxu0 %v5457_v54  ;;  %4001 = vmatpush3.bf16.msra.mxu1 %v5463_v55 }
  0xcf   :  { %4002 = vmatprep.subr.bf16.mxu1 %v5472_v59 }
  0xd0   :  { %3945 = vmatpush3.bf16.msra.mxu0 %v5481_v60 }
  0xd1   :  { %3946 = vmatprep.subr.bf16.mxu0 %v5490_v33 }
  0xd2   :  { %4003 = vmatpush3.bf16.msra.mxu1 %v5496_v35 }
  0xd3   :  { %1600 = vmatmul.mubr.bf16.gmra.mxu0 %v4601_v58  ;;  %4004 = vmatprep.subr.bf16.mxu1 %v5502_v40 }
  0xd4   :  { %4349 = vmatmul.mubr.msk.bf16.gmra.mxu1 %vm701_vm1, %v4602_v0  ;;  %1607 = vmatprep.mubr.bf16.mxu0 %v4603_v61 }
  0xd5   :  { %4352 = vmatprep.mubr.msk.bf16.mxu1 %vm4807_vm0, %v6645_v36  ;;  %3947 = vmatpush3.bf16.msra.mxu0 %v5511_v2 }
  0xd6   :  { %3948 = vmatprep.subr.bf16.mxu0 %v5517_v3  ;;  %4005 = vmatpush3.bf16.msra.mxu1 %v5523_v4 }
  0xd7   :  { %4006 = vmatprep.subr.bf16.mxu1 %v5532_v6 }
  0xd9   :  { %3949 = vmatpush3.bf16.msra.mxu0 %v5544_v9 }
  0xda   :  { %3950 = vmatprep.subr.bf16.mxu0 %v5550_v10  ;;  %4007 = vmatpush3.bf16.msra.mxu1 %v5556_v11 }
  0xdb   :  { %1608 = vmatmul.mubr.bf16.gmra.mxu0 %v4605_v5  ;;  %4008 = vmatprep.subr.bf16.mxu1 %v5562_v12 }
  0xdc   :  { %4353 = vmatmul.mubr.msk.bf16.gmra.mxu1 %vm701_vm1, %v4606_v7  ;;  %1615 = vmatprep.mubr.bf16.mxu0 %v4607_v8  ;;  %v4617_v7 = vld [vmem:[%s6642_s0 + $0x294] ss:$28 sps:$4 sm:$0xff]  }
  0xdd   :  { %4356 = vmatprep.mubr.msk.bf16.mxu1 %vm4807_vm0, %v6645_v36  ;;  %3951 = vmatpush3.bf16.msra.mxu0 %v5571_v13 }
  0xde   :  { %3952 = vmatprep.subr.bf16.mxu0 %v5577_v14  ;;  %4009 = vmatpush3.bf16.msra.mxu1 %v5583_v15 }
  0xdf   :  { %4010 = vmatprep.subr.bf16.mxu1 %v5592_v17 }
  0xe1   :  { %3953 = vmatpush3.bf16.msra.mxu0 %v5604_v20 }
  0xe2   :  { %3954 = vmatprep.subr.bf16.mxu0 %v5610_v21  ;;  %4011 = vmatpush3.bf16.msra.mxu1 %v5616_v22 }
  0xe3   :  { %v3592_v23 = vpop.f32.mrf.mxu0  ;;  %1616 = vmatmul.mubr.bf16.gmra.mxu0 %v4609_v16  ;;  %4012 = vmatprep.subr.bf16.mxu1 %v5622_v24  ;;  %v4618_v16 = vld [vmem:[%s6642_s0 + $0x29c] ss:$28 sps:$4 sm:$0xff]  }
  0xe4   :  { %v3650_v25 = vpop.f32.mrf.mxu1  ;;  %4357 = vmatmul.mubr.msk.bf16.gmra.mxu1 %vm701_vm1, %v4610_v18  ;;  %1623 = vmatprep.mubr.bf16.mxu0 %v4611_v19  ;;  %v3350_v18 = vcombine.high %v3301_v50, %v3301_v50 }
  0xe5   :  { %v3593_v26 = vpop.f32.mrf.mxu0  ;;  %4360 = vmatprep.mubr.msk.bf16.mxu1 %vm4807_vm0, %v6645_v36  ;;  %3955 = vmatpush3.bf16.msra.mxu0 %v5631_v27 }
  0xe6   :  { %v3594_v29 = vadd.f32 %v3593_v26, %v3592_v23  ;;  %v3651_v30 = vpop.f32.mrf.mxu1  ;;  %3956 = vmatprep.subr.bf16.mxu0 %v5637_v31  ;;  %4013 = vmatpush3.bf16.msra.mxu1 %v5643_v37 }
  0xe7   :  { %v3652_v38 = vadd.f32 %v3651_v30, %v3650_v25  ;;  %v3595_v41 = vpop.f32.mrf.mxu0  ;;  %4014 = vmatprep.subr.bf16.mxu1 %v5652_v45 }
  0xe8   :  { %v3653_v46 = vpop.f32.mrf.mxu1 }
  0xe9   :  { %v5661_v53 = vadd.f32 %v3652_v38, %v3594_v29  ;;  %v3596_v57 = vpop.f32.mrf.mxu0  ;;  %3957 = vmatpush3.bf16.msra.mxu0 %v5666_v62 }
  0xea   :  { %v3597_v63 = vadd.f32 %v3596_v57, %v3595_v41  ;;  %v3654_v32 = vpop.f32.mrf.mxu1  ;;  %4015 = vmatpush3.bf16.msra.mxu1 %v5672_v34  ;;  %4058 = vmatprep.subr.bf16.mxu0 %v5678_v39 }
  0xeb   :  { %v3655_v43 = vadd.f32 %v3654_v32, %v3653_v46  ;;  %v3598_v44 = vpop.f32.mrf.mxu0  ;;  %1624 = vmatmul.mubr.bf16.gmra.mxu0 %v4613_v42  ;;  %4372 = vmatprep.subr.bf16.mxu1 %v6645_v36 }
  0xec   :  { %v3656_v1 = vpop.f32.mrf.mxu1  ;;  %4361 = vmatmul.mubr.msk.bf16.gmra.mxu1 %vm701_vm1, %v4614_v49  ;;  %1631 = vmatprep.mubr.bf16.mxu0 %v4615_v52 }
  0xed   :  { %v5683_v47 = vadd.f32 %v3655_v43, %v3597_v63  ;;  %v3599_v48 = vpop.f32.mrf.mxu0  ;;  %4364 = vmatprep.mubr.msk.bf16.mxu1 %vm4807_vm0, %v6645_v36  ;;  %v3349_v63 = vcombine.low %v3301_v50, %v3301_v50  ;;  %v4621_v43 = vld [vmem:[%s6642_s0 + $0x2d4] ss:$0 sps:$4 sm:$0xff]  }
  0xee   :  { %v3600_v58 = vadd.f32 %v3599_v48, %v3598_v44  ;;  %v3657_v0 = vpop.f32.mrf.mxu1  ;;  %v4624_v44 = vld [vmem:[%s6642_s0 + $0x2dc] ss:$28 sps:$4 sm:$0xff]  }
  0xef   :  { %v3658_v61 = vadd.f32 %v3657_v0, %v3656_v1  ;;  %v3601_v5 = vpop.f32.mrf.mxu0 }
  0xf0   :  { %v3659_v8 = vpop.f32.mrf.mxu1 }
  0xf1   :  { %v5696_v19 = vadd.f32 %v3658_v61, %v3600_v58  ;;  %v3602_v23 = vpop.f32.mrf.mxu0  ;;  %v4627_v58 = vld [vmem:[%s6642_s0 + $0x2e4] ss:$28 sps:$4 sm:$0xff]  }
  0xf2   :  { %v3603_v25 = vadd.f32 %v3602_v23, %v3601_v5  ;;  %v3660_v26 = vpop.f32.mrf.mxu1 }
  0xf3   :  { %v3661_v29 = vadd.f32 %v3660_v26, %v3659_v8  ;;  %v3604_v30 = vpop.f32.mrf.mxu0  ;;  %1632 = vmatmul.mubr.bf16.gmra.mxu0 %v4617_v7 }
  0xf4   :  { %v3662_v38 = vpop.f32.mrf.mxu1  ;;  %4365 = vmatmul.mubr.msk.bf16.gmra.mxu1 %vm701_vm1, %v4618_v16  ;;  %1639 = vmatprep.mubr.bf16.mxu0 %v3350_v18 }
  0xf5   :  { %v5699_v41 = vadd.f32 %v3661_v29, %v3603_v25  ;;  %v3605_v42 = vpop.f32.mrf.mxu0  ;;  %4368 = vmatprep.mubr.msk.bf16.mxu1 %vm4807_vm0, %v6645_v36  ;;  %v4622_v29 = vld [vmem:[%s6642_s0 + $0x2d8] ss:$28 sps:$4 sm:$0xff]  }
  0xf6   :  { %v3606_v46 = vadd.f32 %v3605_v42, %v3604_v30  ;;  %v3663_v49 = vpop.f32.mrf.mxu1 }
  0xf7   :  { %v3664_v52 = vadd.f32 %v3663_v49, %v3662_v38  ;;  %v3607_v57 = vpop.f32.mrf.mxu0  ;;  %v4625_v38 = vld [vmem:[%s6642_s0 + $0x2e0] ss:$28 sps:$4 sm:$0xff]   ;;  %v4630_v49 = vld [vmem:[%s6642_s0 + $0x314] ss:$28 sps:$4 sm:$0xff]  }
  0xf8   :  { %v3665_v32 = vpop.f32.mrf.mxu1 }
  0xf9   :  { %v5709_v1 = vadd.f32 %v3664_v52, %v3606_v46  ;;  %v3608_v48 = vpop.f32.mrf.mxu0  ;;  %v4633_v52 = vld [vmem:[%s6642_s0 + $0x31c] ss:$28 sps:$4 sm:$0xff]  }
  0xfa   :  { %v3609_v0 = vadd.f32 %v3608_v48, %v3607_v57  ;;  %v3666_v61 = vpop.f32.mrf.mxu1  ;;  %v5734_v48 = vld [vmem:[%s6641_s1 + $0x138] sm:$0xff]  }
  0xfb   :  { %v3667_v5 = vadd.f32 %v3666_v61, %v3665_v32  ;;  %v3610_v50 = vpop.f32.mrf.mxu0  ;;  %1640 = vmatmul.mubr.bf16.gmra.mxu0 %v3349_v63  ;;  %6666 = vst [vmem:[#allocation2_spill] sm:$0xff] %v5734_v48 }
  0xfc   :  { %v3668_v7 = vpop.f32.mrf.mxu1  ;;  %4369 = vmatmul.mubr.msk.bf16.gmra.mxu1 %vm701_vm1, %v4621_v43  ;;  %2088 = vmatprep.mubr.bf16.mxu0 %v4624_v44 }
  0xfd   :  { %v5715_v8 = vadd.f32 %v3667_v5, %v3609_v0  ;;  %v3611_v16 = vpop.f32.mrf.mxu0  ;;  %2176 = vmatprep.mubr.bf16.mxu1 %v4627_v58 }
  0xfe   :  { %v3612_v18 = vadd.f32 %v3611_v16, %v3610_v50  ;;  %v3669_v23 = vpop.f32.mrf.mxu1  ;;  %v5742_v50 = vld [vmem:[%s6641_s1 + $0x170] sm:$0xff]  }
  0xff   :  { %v3670_v25 = vadd.f32 %v3669_v23, %v3668_v7  ;;  %v3613_v26 = vpop.f32.mrf.mxu0  ;;  %6667 = vst [vmem:[#allocation3_spill] sm:$0xff] %v5742_v50  ;;  %v5748_v7 = vld [vmem:[%s6641_s1 + $0x188] sm:$0xff]  }
 0x100   :  { %v3671_v30 = vpop.f32.mrf.mxu1  ;;  %6668 = vst [vmem:[#allocation4_spill] sm:$0xff] %v5748_v7  ;;  %v4628_v23 = vld [vmem:[%s6642_s0 + $0x310] ss:$28 sps:$4 sm:$0xff]  }
 0x101   :  { %v5723_v42 = vadd.f32 %v3670_v25, %v3612_v18  ;;  %v3614_v46 = vpop.f32.mrf.mxu0 }
 0x102   :  { %v3615_v57 = vadd.f32 %v3614_v46, %v3613_v26  ;;  %v3672_v63 = vpop.f32.mrf.mxu1  ;;  %v4631_v26 = vld [vmem:[%s6642_s0 + $0x318] ss:$28 sps:$4 sm:$0xff]  }
 0x103   :  { %v3673_v32 = vadd.f32 %v3672_v63, %v3671_v30  ;;  %v3616_v43 = vpop.f32.mrf.mxu0  ;;  %2089 = vmatmul.mubr.bf16.vlgmr.msra.gmra.mxu0 %v4622_v29  ;;  %v5761_v29 = vld [vmem:[%s6641_s1 + $0x130] sm:$0xff]   ;;  %v4636_v30 = vld [vmem:[%s6642_s0 + $0x34c] ss:$28 sps:$4 sm:$0xff]  }
 0x104   :  { %v3674_v44 = vpop.f32.mrf.mxu1  ;;  %2177 = vmatmul.mubr.bf16.vlgmr.msra.gmra.mxu1 %v4625_v38  ;;  %4059 = vmatpush3.bf16.msra.mxu0 %v5734_v48  ;;  %6669 = vst [vmem:[#allocation5_spill] sm:$0xff] %v5761_v29 }
 0x105   :  { %v5737_v58 = vadd.f32 %v3673_v32, %v3615_v57  ;;  %v3617_v0 = vpop.f32.mrf.mxu0  ;;  %2096 = vmatprep.mubr.bf16.mxu0 %v4630_v49  ;;  %2184 = vmatprep.mubr.bf16.mxu1 %v4633_v52  ;;  %v5772_v49 = vld [vmem:[%s6641_s1 + $0x168] sm:$0xff]   ;;  %v4639_v52 = vld [vmem:[%s6642_s0 + $0x354] ss:$28 sps:$4 sm:$0xff]   ;;  %v5781_v32 = vld [vmem:[%s6641_s1 + $0x180] sm:$0xff]  }
 0x106   :  { %v3618_v61 = vadd.f32 %v3617_v0, %v3616_v43  ;;  %v3675_v5 = vpop.f32.mrf.mxu1  ;;  %4060 = vmatprep.subr.bf16.mxu0 %v5742_v50  ;;  %4373 = vmatpush3.bf16.msra.mxu1 %v5748_v7  ;;  %6670 = vst [vmem:[#allocation6_spill] sm:$0xff] %v5772_v49  ;;  %6671 = vst [vmem:[#allocation7_spill] sm:$0xff] %v5781_v32  ;;  %v3407_v7 = vld [vmem:[%s6642_s0 + $0x428] sm:$0xff] }
 0x107   :  { %v3676_v16 = vadd.f32 %v3675_v5, %v3674_v44  ;;  %v3619_v18 = vpop.f32.mrf.mxu0  ;;  %4374 = vmatprep.subr.bf16.mxu1 %v6645_v36  ;;  %v5822_v36 = vld [vmem:[%s6641_s1 + $0x158] sm:$0xff]   ;;  %v3453_v48 = vcombine.low %v3407_v7, %v3407_v7 }
 0x108   :  { %v3677_v25 = vpop.f32.mrf.mxu1  ;;  %4061 = vmatpush3.bf16.msra.mxu0 %v5761_v29  ;;  %6675 = vst [vmem:[#allocation11_spill] sm:$0xff] %v5822_v36 }
 0x109   :  { %v5767_v38 = vadd.f32 %v3676_v16, %v3618_v61  ;;  %v3620_v46 = vpop.f32.mrf.mxu0  ;;  %4062 = vmatprep.subr.bf16.mxu0 %v5772_v49  ;;  %v5790_v16 = vld [vmem:[%s6641_s1 + $0x128] sm:$0xff]  }
 0x10a   :  { %v3621_v57 = vadd.f32 %v3620_v46, %v3619_v18  ;;  %v3678_v63 = vpop.f32.mrf.mxu1  ;;  %4375 = vmatpush3.bf16.msra.mxu1 %v5781_v32  ;;  %6672 = vst [vmem:[#allocation8_spill] sm:$0xff] %v5790_v16 }
 0x10b   :  { %v3679_v43 = vadd.f32 %v3678_v63, %v3677_v25  ;;  %v3622_v44 = vpop.f32.mrf.mxu0  ;;  %2097 = vmatmul.mubr.bf16.gmra.mxu0 %v4628_v23  ;;  %4183 = vmatprep.subr.bf16.mxu1 %v5363_v28  ;;  %v5796_v28 = vld [vmem:[%s6641_s1 + $0x160] sm:$0xff]  }
 0x10c   :  { %v3680_v0 = vpop.f32.mrf.mxu1  ;;  %2185 = vmatmul.mubr.bf16.gmra.mxu1 %v4631_v26  ;;  %2104 = vmatprep.mubr.bf16.mxu0 %v4636_v30  ;;  %6673 = vst [vmem:[#allocation9_spill] sm:$0xff] %v5796_v28  ;;  %v4634_v30 = vld [vmem:[%s6642_s0 + $0x348] ss:$28 sps:$4 sm:$0xff]  }
 0x10d   :  { %v5785_v61 = vadd.f32 %v3679_v43, %v3621_v57  ;;  %v3623_v5 = vpop.f32.mrf.mxu0  ;;  %2192 = vmatprep.mubr.bf16.mxu1 %v4639_v52  ;;  %4063 = vmatpush3.bf16.msra.mxu0 %v5790_v16  ;;  %v4637_v52 = vld [vmem:[%s6642_s0 + $0x350] ss:$28 sps:$4 sm:$0xff]   ;;  %v4642_v57 = vld [vmem:[%s6642_s0 + $0x384] ss:$28 sps:$4 sm:$0xff]  }
 0x10e   :  { %v3624_v18 = vadd.f32 %v3623_v5, %v3622_v44  ;;  %v3681_v25 = vpop.f32.mrf.mxu1  ;;  %4064 = vmatprep.subr.bf16.mxu0 %v5796_v28  ;;  %v5813_v44 = vld [vmem:[%s6641_s1 + $0x120] sm:$0xff]  }
 0x10f   :  { %v3682_v23 = vadd.f32 %v3681_v25, %v3680_v0  ;;  %v3625_v26 = vpop.f32.mrf.mxu0  ;;  %6674 = vst [vmem:[#allocation10_spill] sm:$0xff] %v5813_v44  ;;  %v4645_v0 = vld [vmem:[%s6642_s0 + $0x38c] ss:$28 sps:$4 sm:$0xff]  }
 0x110   :  { %v3683_v46 = vpop.f32.mrf.mxu1 }
 0x111   :  { %v5808_v63 = vadd.f32 %v3682_v23, %v3624_v18  ;;  %v3626_v43 = vpop.f32.mrf.mxu0  ;;  %4065 = vmatpush3.bf16.msra.mxu0 %v5813_v44 }
 0x112   :  { %v3627_v5 = vadd.f32 %v3626_v43, %v3625_v26  ;;  %v3684_v25 = vpop.f32.mrf.mxu1  ;;  %4066 = vmatprep.subr.bf16.mxu0 %v5822_v36  ;;  %v5830_v26 = vld [vmem:[%s6641_s1 + $0x118] sm:$0xff]  }
 0x113   :  { %v3685_v18 = vadd.f32 %v3684_v25, %v3683_v46  ;;  %v3628_v23 = vpop.f32.mrf.mxu0  ;;  %2105 = vmatmul.mubr.bf16.gmra.mxu0 %v4634_v30  ;;  %6676 = vst [vmem:[#allocation12_spill] sm:$0xff] %v5830_v26  ;;  %v5836_v30 = vld [vmem:[%s6641_s1 + $0x150] sm:$0xff]  }
 0x114   :  { %v3686_v28 = vpop.f32.mrf.mxu1  ;;  %2193 = vmatmul.mubr.bf16.gmra.mxu1 %v4637_v52  ;;  %2112 = vmatprep.mubr.bf16.mxu0 %v4642_v57  ;;  %6677 = vst [vmem:[#allocation13_spill] sm:$0xff] %v5836_v30  ;;  %v4640_v57 = vld [vmem:[%s6642_s0 + $0x380] ss:$28 sps:$4 sm:$0xff]  }
 0x115   :  { %v5825_v44 = vadd.f32 %v3685_v18, %v3627_v5  ;;  %v3629_v16 = vpop.f32.mrf.mxu0  ;;  %2200 = vmatprep.mubr.bf16.mxu1 %v4645_v0  ;;  %4067 = vmatpush3.bf16.msra.mxu0 %v5830_v26  ;;  %v4643_v5 = vld [vmem:[%s6642_s0 + $0x388] ss:$28 sps:$4 sm:$0xff]  }
 0x116   :  { %v3630_v43 = vadd.f32 %v3629_v16, %v3628_v23  ;;  %v3687_v32 = vpop.f32.mrf.mxu1  ;;  %4068 = vmatprep.subr.bf16.mxu0 %v5836_v30  ;;  %v4648_v16 = vld [vmem:[%s6642_s0 + $0x3bc] ss:$28 sps:$4 sm:$0xff]  }
 0x117   :  { %v3688_v46 = vadd.f32 %v3687_v32, %v3686_v28  ;;  %v3631_v52 = vpop.f32.mrf.mxu0  ;;  %v4651_v32 = vld [vmem:[%s6642_s0 + $0x3c4] ss:$28 sps:$4 sm:$0xff]   ;;  %v5856_v28 = vld [vmem:[%s6641_s1 + $0x110] sm:$0xff]  }
 0x118   :  { %v3689_v0 = vpop.f32.mrf.mxu1  ;;  %6678 = vst [vmem:[#allocation14_spill] sm:$0xff] %v5856_v28  ;;  %v5862_v52 = vld [vmem:[%s6641_s1 + $0x148] sm:$0xff]  }
 0x119   :  { %v5848_v25 = vadd.f32 %v3688_v46, %v3630_v43  ;;  %v3632_v18 = vpop.f32.mrf.mxu0  ;;  %4069 = vmatpush3.bf16.msra.mxu0 %v5856_v28  ;;  %6679 = vst [vmem:[#allocation15_spill] sm:$0xff] %v5862_v52 }
 0x11a   :  { %v3690_v23 = vpop.f32.mrf.mxu1  ;;  %4070 = vmatprep.subr.bf16.mxu0 %v5862_v52  ;;  %v5868_v18 = vld [vmem:[%s6641_s1 + $0x108] sm:$0xff]   ;;  %v5874_v52 = vld [vmem:[%s6641_s1 + $0x140] sm:$0xff]  }
 0x11b   :  { %v3708_v43 = vpop.f32.mrf.mxu0  ;;  %2113 = vmatmul.mubr.bf16.gmra.mxu0 %v4640_v57  ;;  %6680 = vst [vmem:[#allocation16_spill] sm:$0xff] %v5868_v18  ;;  %6681 = vst [vmem:[#allocation17_spill] sm:$0xff] %v5874_v52 }
 0x11c   :  { %v1021_v46 = vpop.f32.mrf.mxu1  ;;  %2201 = vmatmul.mubr.bf16.gmra.mxu1 %v4643_v5  ;;  %2120 = vmatprep.mubr.bf16.mxu0 %v4648_v16  ;;  %v4646_v5 = vld [vmem:[%s6642_s0 + $0x3b8] ss:$28 sps:$4 sm:$0xff]  }
 0x11d   :  { %v3709_v0 = vpop.f32.mrf.mxu0  ;;  %2208 = vmatprep.mubr.bf16.mxu1 %v4651_v32  ;;  %4071 = vmatpush3.bf16.msra.mxu0 %v5868_v18  ;;  %v5893_v18 = vld [vmem:[%s6641_s1 + $0x100] sm:$0xff]  }
 0x11e   :  { %v3710_v23 = vadd.f32 %v3709_v0, %v3708_v43  ;;  %v4314_v28 = vpop.f32.mrf.mxu1  ;;  %4072 = vmatprep.subr.bf16.mxu0 %v5874_v52  ;;  %v4649_v43 = vld [vmem:[%s6642_s0 + $0x3c0] ss:$28 sps:$4 sm:$0xff]   ;;  %6682 = vst [vmem:[#allocation18_spill] sm:$0xff] %v5893_v18 }
 0x11f   :  { %v3711_v57 = vpop.f32.mrf.mxu0  ;;  %v4654_v28 = vld [vmem:[%s6642_s0 + $0x3f4] ss:$28 sps:$4 sm:$0xff]   ;;  %v4657_v52 = vld [vmem:[%s6642_s0 + $0x3fc] ss:$28 sps:$4 sm:$0xff]  }
 0x120   :  { %v934_v16 = vadd.f32 %v3710_v23, %v5661_v53  ;;  %v1024_v32 = vpop.f32.mrf.mxu1 }
 0x121   :  { %v3712_v0 = vpop.f32.mrf.mxu0  ;;  %4073 = vmatpush3.bf16.msra.mxu0 %v5893_v18 }
 0x122   :  { %v5896_v53 = vadd.f32 %v1021_v46, %v934_v16  ;;  %v3713_v23 = vadd.f32 %v3712_v0, %v3711_v57  ;;  %v4315_v30 = vpop.f32.mrf.mxu1  ;;  %4125 = vmatprep.subr.bf16.mxu0 %v5416_v56  ;;  %v3408_v56 = vld [vmem:[%s6642_s0 + $0x430] sm:$0xff] }
 0x123   :  { %v3714_v26 = vpop.f32.mrf.mxu0  ;;  %2121 = vmatmul.mubr.bf16.gmra.mxu0 %v4646_v5  ;;  %v4655_v16 = vld [vmem:[%s6642_s0 + $0x3f8] ss:$28 sps:$4 sm:$0xff]  }
 0x124   :  { %6683 = vst [vmem:[#allocation19_spill] sm:$0xff] %v5896_v53  ;;  %v937_v36 = vadd.f32 %v3713_v23, %v5683_v47  ;;  %v1029_v49 = vpop.f32.mrf.mxu1  ;;  %2209 = vmatmul.mubr.bf16.gmra.mxu1 %v4649_v43  ;;  %2128 = vmatprep.mubr.bf16.mxu0 %v4654_v28  ;;  %v4652_v47 = vld [vmem:[%s6642_s0 + $0x3f0] ss:$28 sps:$4 sm:$0xff]  }
 0x125   :  { %v3715_v29 = vpop.f32.mrf.mxu0  ;;  %2216 = vmatprep.mubr.bf16.mxu1 %v4657_v52 }
 0x126   :  { %v5903_v18 = vadd.f32 %v1024_v32, %v937_v36  ;;  %v3716_v46 = vadd.f32 %v3715_v29, %v3714_v26  ;;  %v4318_v57 = vpop.f32.mrf.mxu1  ;;  %v3454_v36 = vcombine.high %v3407_v7, %v3407_v7  ;;  %v3456_v29 = vcombine.high %v3408_v56, %v3408_v56 }
 0x127   :  { %v3717_v30 = vpop.f32.mrf.mxu0 }
 0x128   :  { %6684 = vst [vmem:[#allocation20_spill] sm:$0xff] %v5903_v18  ;;  %v942_v5 = vadd.f32 %v3716_v46, %v5696_v19  ;;  %v1032_v52 = vpop.f32.mrf.mxu1 }
 0x129   :  { %v3718_v32 = vpop.f32.mrf.mxu0 }
 0x12a   :  { %v5915_v26 = vadd.f32 %v1029_v49, %v942_v5  ;;  %v3719_v43 = vadd.f32 %v3718_v32, %v3717_v30  ;;  %v4319_v28 = vpop.f32.mrf.mxu1  ;;  %v3455_v30 = vcombine.low %v3408_v56, %v3408_v56 }
 0x12b   :  { %v3720_v0 = vpop.f32.mrf.mxu0  ;;  %2129 = vmatmul.mubr.bf16.gmra.mxu0 %v4652_v47  ;;  %v4664_v47 = vld [vmem:[%s6642_s0 + $0x2ec] ss:$28 sps:$4 sm:$0xff]  }
 0x12c   :  { %v945_v23 = vadd.f32 %v3719_v43, %v5699_v41  ;;  %v1037_v57 = vpop.f32.mrf.mxu1  ;;  %2217 = vmatmul.mubr.bf16.gmra.mxu1 %v4655_v16  ;;  %2136 = vmatprep.mubr.bf16.mxu0 %v3454_v36 }
 0x12d   :  { %v3721_v19 = vpop.f32.mrf.mxu0  ;;  %2224 = vmatprep.mubr.bf16.mxu1 %v3456_v29 }
 0x12e   :  { %v5918_v46 = vadd.f32 %v1032_v52, %v945_v23  ;;  %v3722_v18 = vadd.f32 %v3721_v19, %v3720_v0  ;;  %v4322_v53 = vpop.f32.mrf.mxu1 }
 0x12f   :  { %v3723_v50 = vpop.f32.mrf.mxu0 }
 0x130   :  { %v950_v49 = vadd.f32 %v3722_v18, %v5709_v1  ;;  %v1040_v5 = vpop.f32.mrf.mxu1  ;;  %v6685_v1 = vmov 0.0  }
 0x131   :  { %v3724_v41 = vpop.f32.mrf.mxu0 }
 0x132   :  { %v5924_v32 = vadd.f32 %v1037_v57, %v950_v49  ;;  %v3725_v16 = vadd.f32 %v3724_v41, %v3723_v50  ;;  %v4323_v36 = vpop.f32.mrf.mxu1  ;;  %v4662_v50 = vld [vmem:[%s6642_s0 + $0x2e8] ss:$28 sps:$4 sm:$0xff]  }
 0x133   :  { %v3726_v29 = vpop.f32.mrf.mxu0  ;;  %2137 = vmatmul.mubr.bf16.gmra.mxu0 %v3453_v48  ;;  %v4668_v57 = vld [vmem:[%s6642_s0 + $0x324] ss:$28 sps:$4 sm:$0xff]  }
 0x134   :  { %v953_v52 = vadd.f32 %v3725_v16, %v5715_v8  ;;  %v1045_v53 = vpop.f32.mrf.mxu1  ;;  %2225 = vmatmul.mubr.bf16.gmra.mxu1 %v3455_v30  ;;  %2264 = vmatprep.mubr.bf16.mxu0 %v4664_v47  ;;  %v4665_v8 = vld [vmem:[%s6642_s0 + $0x2f0] ss:$28 sps:$4 sm:$0xff]  }
 0x135   :  { %v3727_v7 = vpop.f32.mrf.mxu0  ;;  %4376 = vmatprep.mubr.msk.bf16.mxu1 %vm4807_vm0, %v6685_v1 }
 0x136   :  { %v5929_v18 = vadd.f32 %v1040_v5, %v953_v52  ;;  %v3728_v56 = vadd.f32 %v3727_v7, %v3726_v29  ;;  %v4326_v43 = vpop.f32.mrf.mxu1  ;;  %v4669_v7 = vld [vmem:[%s6642_s0 + $0x328] ss:$28 sps:$4 sm:$0xff]  }
 0x137   :  { %v3729_v28 = vpop.f32.mrf.mxu0 }
 0x138   :  { %v958_v48 = vadd.f32 %v3728_v56, %v5723_v42  ;;  %v1048_v0 = vpop.f32.mrf.mxu1 }
 0x139   :  { %v3730_v23 = vpop.f32.mrf.mxu0 }
 0x13a   :  { %v5941_v19 = vadd.f32 %v1045_v53, %v958_v48  ;;  %v3731_v49 = vadd.f32 %v3730_v23, %v3729_v28  ;;  %v4327_v5 = vpop.f32.mrf.mxu1 }
 0x13b   :  { %v3732_v30 = vpop.f32.mrf.mxu0  ;;  %2265 = vmatmul.mubr.bf16.vlgmr.msra.gmra.mxu0 %v4662_v50 }
 0x13c   :  { %v961_v47 = vadd.f32 %v3731_v49, %v5737_v58  ;;  %v1053_v41 = vpop.f32.mrf.mxu1  ;;  %4377 = vmatmul.mubr.msk.bf16.vlgmr.msra.gmra.mxu1 %vm701_vm1, %v4665_v8  ;;  %4126 = vmatpush3.bf16.msra.mxu0 %v5449_v51  ;;  %v4666_v58 = vld [vmem:[%s6642_s0 + $0x320] ss:$28 sps:$4 sm:$0xff]  }
 0x13d   :  { %v3733_v42 = vpop.f32.mrf.mxu0  ;;  %2272 = vmatprep.mubr.bf16.mxu0 %v4668_v57  ;;  %4380 = vmatprep.mubr.msk.bf16.mxu1 %vm4807_vm0, %v6685_v1 }
 0x13e   :  { %v5948_v16 = vadd.f32 %v1048_v0, %v961_v47  ;;  %v3734_v36 = vadd.f32 %v3733_v42, %v3732_v30  ;;  %v4330_v29 = vpop.f32.mrf.mxu1  ;;  %4127 = vmatprep.subr.bf16.mxu0 %v5457_v54  ;;  %4184 = vmatpush3.bf16.msra.mxu1 %v5463_v55  ;;  %v4672_v54 = vld [vmem:[%s6642_s0 + $0x35c] ss:$28 sps:$4 sm:$0xff]  }
 0x13f   :  { %v3735_v52 = vpop.f32.mrf.mxu0  ;;  %4185 = vmatprep.subr.bf16.mxu1 %v5472_v59 }
 0x140   :  { %v966_v51 = vadd.f32 %v3734_v36, %v5767_v38  ;;  %v1056_v53 = vpop.f32.mrf.mxu1  ;;  %4128 = vmatpush3.bf16.msra.mxu0 %v5481_v60 }
 0x141   :  { %v3736_v55 = vpop.f32.mrf.mxu0  ;;  %4129 = vmatprep.subr.bf16.mxu0 %v5490_v33 }
 0x142   :  { %v5965_v56 = vadd.f32 %v1053_v41, %v966_v51  ;;  %v3737_v43 = vadd.f32 %v3736_v55, %v3735_v52  ;;  %v4331_v59 = vpop.f32.mrf.mxu1  ;;  %4186 = vmatpush3.bf16.msra.mxu1 %v5496_v35  ;;  %v4681_v51 = vld [vmem:[%s6642_s0 + $0x3d0] ss:$28 sps:$4 sm:$0xff]  }
 0x143   :  { %v3738_v38 = vpop.f32.mrf.mxu0  ;;  %2273 = vmatmul.mubr.bf16.gmra.mxu0 %v4666_v58  ;;  %4187 = vmatprep.subr.bf16.mxu1 %v5502_v40 }
 0x144   :  { %v969_v28 = vadd.f32 %v3737_v43, %v5785_v61  ;;  %v1061_v60 = vpop.f32.mrf.mxu1  ;;  %4381 = vmatmul.mubr.msk.bf16.gmra.mxu1 %vm701_vm1, %v4669_v7  ;;  %2280 = vmatprep.mubr.bf16.mxu0 %v4672_v54  ;;  %v4670_v61 = vld [vmem:[%s6642_s0 + $0x358] ss:$28 sps:$4 sm:$0xff]  }
 0x145   :  { %v3739_v50 = vpop.f32.mrf.mxu0  ;;  %4384 = vmatprep.mubr.msk.bf16.mxu1 %vm4807_vm0, %v6685_v1  ;;  %4130 = vmatpush3.bf16.msra.mxu0 %v5511_v2  ;;  %v4673_v2 = vld [vmem:[%s6642_s0 + $0x360] ss:$28 sps:$4 sm:$0xff]  }
 0x146   :  { %v5974_v33 = vadd.f32 %v1056_v53, %v969_v28  ;;  %v3740_v48 = vadd.f32 %v3739_v50, %v3738_v38  ;;  %v4334_v35 = vpop.f32.mrf.mxu1  ;;  %4131 = vmatprep.subr.bf16.mxu0 %v5517_v3  ;;  %4188 = vmatpush3.bf16.msra.mxu1 %v5523_v4  ;;  %v4676_v3 = vld [vmem:[%s6642_s0 + $0x394] ss:$28 sps:$4 sm:$0xff]  }
 0x147   :  { %v3741_v40 = vpop.f32.mrf.mxu0  ;;  %4189 = vmatprep.subr.bf16.mxu1 %v5532_v6 }
 0x148   :  { %v974_v0 = vadd.f32 %v3740_v48, %v5808_v63  ;;  %v1064_v8 = vpop.f32.mrf.mxu1  ;;  %v4685_v48 = vld [vmem:[%s6642_s0 + $0x408] ss:$28 sps:$4 sm:$0xff]  }
 0x149   :  { %v3742_v23 = vpop.f32.mrf.mxu0  ;;  %4132 = vmatpush3.bf16.msra.mxu0 %v5544_v9 }
 0x14a   :  { %v5990_v4 = vadd.f32 %v1061_v60, %v974_v0  ;;  %v3743_v57 = vadd.f32 %v3742_v23, %v3741_v40  ;;  %v4335_v49 = vpop.f32.mrf.mxu1  ;;  %4133 = vmatprep.subr.bf16.mxu0 %v5550_v10  ;;  %4190 = vmatpush3.bf16.msra.mxu1 %v5556_v11  ;;  %v4682_v60 = vld [vmem:[%s6642_s0 + $0x400] ss:$28 sps:$4 sm:$0xff]  }
 0x14b   :  { %v3744_v6 = vpop.f32.mrf.mxu0  ;;  %2281 = vmatmul.mubr.bf16.gmra.mxu0 %v4670_v61  ;;  %4191 = vmatprep.subr.bf16.mxu1 %v5562_v12 }
 0x14c   :  { %v977_v63 = vadd.f32 %v3743_v57, %v5825_v44  ;;  %v1069_v5 = vpop.f32.mrf.mxu1  ;;  %4385 = vmatmul.mubr.msk.bf16.gmra.mxu1 %vm701_vm1, %v4673_v2  ;;  %2288 = vmatprep.mubr.bf16.mxu0 %v4676_v3  ;;  %v4674_v44 = vld [vmem:[%s6642_s0 + $0x390] ss:$28 sps:$4 sm:$0xff]  }
 0x14d   :  { %v3745_v30 = vpop.f32.mrf.mxu0  ;;  %4388 = vmatprep.mubr.msk.bf16.mxu1 %vm4807_vm0, %v6685_v1  ;;  %4134 = vmatpush3.bf16.msra.mxu0 %v5571_v13  ;;  %v4677_v13 = vld [vmem:[%s6642_s0 + $0x398] ss:$28 sps:$4 sm:$0xff]  }
 0x14e   :  { %v6000_v9 = vadd.f32 %v1064_v8, %v977_v63  ;;  %v3746_v10 = vadd.f32 %v3745_v30, %v3744_v6  ;;  %v4338_v11 = vpop.f32.mrf.mxu1  ;;  %4135 = vmatprep.subr.bf16.mxu0 %v5577_v14  ;;  %4192 = vmatpush3.bf16.msra.mxu1 %v5583_v15  ;;  %v4680_v14 = vld [vmem:[%s6642_s0 + $0x3cc] ss:$28 sps:$4 sm:$0xff]  }
 0x14f   :  { %v3747_v12 = vpop.f32.mrf.mxu0  ;;  %4193 = vmatprep.subr.bf16.mxu1 %v5592_v17 }
 0x150   :  { %v982_v47 = vadd.f32 %v3746_v10, %v5848_v25  ;;  %v1072_v41 = vpop.f32.mrf.mxu1  ;;  %v4688_v12 = vld [vmem:[%s6642_s0 + $0x440] ss:$0 sps:$4 sm:$0xff]  }
 0x151   :  { %v3748_v42 = vpop.f32.mrf.mxu0  ;;  %4136 = vmatpush3.bf16.msra.mxu0 %v5604_v20 }
 0x152   :  { %v6016_v15 = vadd.f32 %v1069_v5, %v982_v47  ;;  %v4339_v36 = vpop.f32.mrf.mxu1  ;;  %4137 = vmatprep.subr.bf16.mxu0 %v5610_v21  ;;  %4194 = vmatpush3.bf16.msra.mxu1 %v5616_v22 }
 0x153   :  { %v3775_v17 = vpop.f32.mrf.mxu0  ;;  %2289 = vmatmul.mubr.bf16.gmra.mxu0 %v4674_v44  ;;  %4195 = vmatprep.subr.bf16.mxu1 %v5622_v24  ;;  %v4678_v24 = vld [vmem:[%s6642_s0 + $0x3c8] ss:$28 sps:$4 sm:$0xff]  }
 0x154   :  { %v3833_v25 = vpop.f32.mrf.mxu1  ;;  %4389 = vmatmul.mubr.msk.bf16.gmra.mxu1 %vm701_vm1, %v4677_v13  ;;  %2296 = vmatprep.mubr.bf16.mxu0 %v4680_v14  ;;  %v4691_v44 = vld [vmem:[%s6642_s0 + $0x448] ss:$28 sps:$4 sm:$0xff]   ;;  %v4694_v13 = vld [vmem:[%s6642_s0 + $0x450] ss:$28 sps:$4 sm:$0xff]  }
 0x155   :  { %v3776_v29 = vpop.f32.mrf.mxu0  ;;  %4392 = vmatprep.mubr.msk.bf16.mxu1 %vm4807_vm0, %v6685_v1  ;;  %4138 = vmatpush3.bf16.msra.mxu0 %v5631_v27  ;;  %v4684_v27 = vld [vmem:[%s6642_s0 + $0x404] ss:$28 sps:$4 sm:$0xff]  }
 0x156   :  { %v3777_v20 = vadd.f32 %v3776_v29, %v3775_v17  ;;  %v3834_v52 = vpop.f32.mrf.mxu1  ;;  %4139 = vmatprep.subr.bf16.mxu0 %v5637_v31  ;;  %4196 = vmatpush3.bf16.msra.mxu1 %v5643_v37 }
 0x157   :  { %v3835_v21 = vadd.f32 %v3834_v52, %v3833_v25  ;;  %v3778_v22 = vpop.f32.mrf.mxu0  ;;  %4197 = vmatprep.subr.bf16.mxu1 %v5652_v45 }
 0x158   :  { %v3836_v58 = vpop.f32.mrf.mxu1 }
 0x159   :  { %v6037_v31 = vadd.f32 %v3835_v21, %v3777_v20  ;;  %v3779_v37 = vpop.f32.mrf.mxu0  ;;  %4140 = vmatpush3.bf16.msra.mxu0 %v5666_v62  ;;  %v3409_v62 = vld [vmem:[%s6642_s0 + $0x438] sm:$0xff] }
 0x15a   :  { %v3780_v53 = vadd.f32 %v3779_v37, %v3778_v22  ;;  %v3837_v7 = vpop.f32.mrf.mxu1  ;;  %4198 = vmatpush3.bf16.msra.mxu1 %v5672_v34  ;;  %4241 = vmatprep.subr.bf16.mxu0 %v5678_v39  ;;  %v3458_v35 = vcombine.high %v3409_v62, %v3409_v62  ;;  %v3457_v10 = vcombine.low %v3409_v62, %v3409_v62 }
 0x15b   :  { %v3838_v45 = vadd.f32 %v3837_v7, %v3836_v58  ;;  %v3781_v54 = vpop.f32.mrf.mxu0  ;;  %2297 = vmatmul.mubr.bf16.gmra.mxu0 %v4678_v24  ;;  %4404 = vmatprep.subr.bf16.mxu1 %v6685_v1  ;;  %v4689_v58 = vld [vmem:[%s6642_s0 + $0x444] ss:$28 sps:$4 sm:$0xff]  }
 0x15c   :  { %v3839_v55 = vpop.f32.mrf.mxu1  ;;  %4393 = vmatmul.mubr.msk.bf16.gmra.mxu1 %vm701_vm1, %v4681_v51  ;;  %2304 = vmatprep.mubr.bf16.mxu0 %v4684_v27  ;;  %v4692_v27 = vld [vmem:[%s6642_s0 + $0x44c] ss:$28 sps:$4 sm:$0xff]   ;;  %v4697_v7 = vld [vmem:[%s6642_s0 + $0x480] ss:$28 sps:$4 sm:$0xff]  }
 0x15d   :  { %v6044_v43 = vadd.f32 %v3838_v45, %v3780_v53  ;;  %v3782_v59 = vpop.f32.mrf.mxu0  ;;  %4396 = vmatprep.mubr.msk.bf16.mxu1 %vm4807_vm0, %v6685_v1  ;;  %v4700_v45 = vld [vmem:[%s6642_s0 + $0x488] ss:$28 sps:$4 sm:$0xff]  }
 0x15e   :  { %v3783_v34 = vadd.f32 %v3782_v59, %v3781_v54  ;;  %v3840_v39 = vpop.f32.mrf.mxu1 }
 0x15f   :  { %v3841_v38 = vadd.f32 %v3840_v39, %v3839_v55  ;;  %v3784_v28 = vpop.f32.mrf.mxu0  ;;  %v6686_v39 = vld [vmem:[#allocation2_spill] sm:$0xff] }
 0x160   :  { %v3842_v50 = vpop.f32.mrf.mxu1 }
 0x161   :  { %v6057_v40 = vadd.f32 %v3841_v38, %v3783_v34  ;;  %v3785_v61 = vpop.f32.mrf.mxu0 }
 0x162   :  { %v3786_v0 = vadd.f32 %v3785_v61, %v3784_v28  ;;  %v3843_v8 = vpop.f32.mrf.mxu1 }
 0x163   :  { %v3844_v2 = vadd.f32 %v3843_v8, %v3842_v50  ;;  %v3787_v3 = vpop.f32.mrf.mxu0  ;;  %2305 = vmatmul.mubr.bf16.gmra.mxu0 %v4682_v60  ;;  %v4695_v8 = vld [vmem:[%s6642_s0 + $0x47c] ss:$28 sps:$4 sm:$0xff]  }
 0x164   :  { %v3845_v23 = vpop.f32.mrf.mxu1  ;;  %4397 = vmatmul.mubr.msk.bf16.gmra.mxu1 %vm701_vm1, %v4685_v48  ;;  %2312 = vmatprep.mubr.bf16.mxu0 %v3458_v35  ;;  %v6687_v48 = vld [vmem:[#allocation3_spill] sm:$0xff]  ;;  %v6688_v35 = vld [vmem:[#allocation4_spill] sm:$0xff] }
 0x165   :  { %v6060_v57 = vadd.f32 %v3844_v2, %v3786_v0  ;;  %v3788_v49 = vpop.f32.mrf.mxu0  ;;  %4400 = vmatprep.mubr.msk.bf16.mxu1 %vm4807_vm0, %v6685_v1 }
 0x166   :  { %v3789_v6 = vadd.f32 %v3788_v49, %v3787_v3  ;;  %v3846_v63 = vpop.f32.mrf.mxu1  ;;  %v4698_v3 = vld [vmem:[%s6642_s0 + $0x484] ss:$28 sps:$4 sm:$0xff]   ;;  %v4703_v49 = vld [vmem:[%s6642_s0 + $0x4b8] ss:$28 sps:$4 sm:$0xff]  }
 0x167   :  { %v3847_v5 = vadd.f32 %v3846_v63, %v3845_v23  ;;  %v3790_v30 = vpop.f32.mrf.mxu0  ;;  %v6689_v23 = vld [vmem:[#allocation5_spill] sm:$0xff] }
 0x168   :  { %v3848_v11 = vpop.f32.mrf.mxu1 }
 0x169   :  { %v6070_v47 = vadd.f32 %v3847_v5, %v3789_v6  ;;  %v3791_v41 = vpop.f32.mrf.mxu0  ;;  %v6690_v5 = vld [vmem:[#allocation6_spill] sm:$0xff] }
 0x16a   :  { %v3792_v14 = vadd.f32 %v3791_v41, %v3790_v30  ;;  %v3849_v42 = vpop.f32.mrf.mxu1  ;;  %v4706_v30 = vld [vmem:[%s6642_s0 + $0x4c0] ss:$28 sps:$4 sm:$0xff]  }
 0x16b   :  { %v3850_v36 = vadd.f32 %v3849_v42, %v3848_v11  ;;  %v3793_v17 = vpop.f32.mrf.mxu0  ;;  %2313 = vmatmul.mubr.bf16.gmra.mxu0 %v3457_v10 }
 0x16c   :  { %v3851_v25 = vpop.f32.mrf.mxu1  ;;  %4401 = vmatmul.mubr.msk.bf16.gmra.mxu1 %vm701_vm1, %v4688_v12  ;;  %2761 = vmatprep.mubr.bf16.mxu0 %v4691_v44  ;;  %v6691_v12 = vld [vmem:[#allocation7_spill] sm:$0xff] }
 0x16d   :  { %v6076_v29 = vadd.f32 %v3850_v36, %v3792_v14  ;;  %v3794_v20 = vpop.f32.mrf.mxu0  ;;  %2849 = vmatprep.mubr.bf16.mxu1 %v4694_v13  ;;  %v6692_v36 = vld [vmem:[#allocation8_spill] sm:$0xff] }
 0x16e   :  { %v3795_v52 = vadd.f32 %v3794_v20, %v3793_v17  ;;  %v3852_v21 = vpop.f32.mrf.mxu1  ;;  %v6693_v20 = vld [vmem:[#allocation9_spill] sm:$0xff] }
 0x16f   :  { %v3853_v22 = vadd.f32 %v3852_v21, %v3851_v25  ;;  %v3796_v24 = vpop.f32.mrf.mxu0 }
 0x170   :  { %v3854_v51 = vpop.f32.mrf.mxu1 }
 0x171   :  { %v6084_v37 = vadd.f32 %v3853_v22, %v3795_v52  ;;  %v3797_v53 = vpop.f32.mrf.mxu0  ;;  %v4701_v22 = vld [vmem:[%s6642_s0 + $0x4b4] ss:$28 sps:$4 sm:$0xff]  }
 0x172   :  { %v3798_v54 = vadd.f32 %v3797_v53, %v3796_v24  ;;  %v3855_v55 = vpop.f32.mrf.mxu1 }
 0x173   :  { %v3856_v59 = vadd.f32 %v3855_v55, %v3854_v51  ;;  %v3799_v62 = vpop.f32.mrf.mxu0  ;;  %2762 = vmatmul.mubr.bf16.vlgmr.msra.gmra.mxu0 %v4689_v58  ;;  %v4704_v58 = vld [vmem:[%s6642_s0 + $0x4bc] ss:$28 sps:$4 sm:$0xff]   ;;  %v4709_v51 = vld [vmem:[%s6642_s0 + $0x4f0] ss:$28 sps:$4 sm:$0xff]  }
 0x174   :  { %v3857_v34 = vpop.f32.mrf.mxu1  ;;  %2850 = vmatmul.mubr.bf16.vlgmr.msra.gmra.mxu1 %v4692_v27  ;;  %4242 = vmatpush3.bf16.msra.mxu0 %v6686_v39 }
 0x175   :  { %v6093_v38 = vadd.f32 %v3856_v59, %v3798_v54  ;;  %v3800_v28 = vpop.f32.mrf.mxu0  ;;  %2769 = vmatprep.mubr.bf16.mxu0 %v4697_v7  ;;  %2857 = vmatprep.mubr.bf16.mxu1 %v4700_v45  ;;  %v6694_v7 = vld [vmem:[#allocation10_spill] sm:$0xff]  ;;  %v4712_v45 = vld [vmem:[%s6642_s0 + $0x4f8] ss:$28 sps:$4 sm:$0xff]   ;;  %v6695_v59 = vld [vmem:[#allocation11_spill] sm:$0xff] }
 0x176   :  { %v3801_v60 = vadd.f32 %v3800_v28, %v3799_v62  ;;  %v3858_v50 = vpop.f32.mrf.mxu1  ;;  %4243 = vmatprep.subr.bf16.mxu0 %v6687_v48  ;;  %4405 = vmatpush3.bf16.msra.mxu1 %v6688_v35 }
 0x177   :  { %v3859_v61 = vadd.f32 %v3858_v50, %v3857_v34  ;;  %v3802_v0 = vpop.f32.mrf.mxu0  ;;  %4406 = vmatprep.subr.bf16.mxu1 %v6685_v1  ;;  %v6696_v50 = vld [vmem:[#allocation12_spill] sm:$0xff] }
 0x178   :  { %v3860_v2 = vpop.f32.mrf.mxu1  ;;  %4244 = vmatpush3.bf16.msra.mxu0 %v6689_v23  ;;  %v4710_v23 = vld [vmem:[%s6642_s0 + $0x4f4] ss:$28 sps:$4 sm:$0xff]  }
 0x179   :  { %v6108_v6 = vadd.f32 %v3859_v61, %v3801_v60  ;;  %v3803_v63 = vpop.f32.mrf.mxu0  ;;  %4245 = vmatprep.subr.bf16.mxu0 %v6690_v5  ;;  %v6697_v61 = vld [vmem:[#allocation13_spill] sm:$0xff] }
 0x17a   :  { %v3804_v10 = vadd.f32 %v3803_v63, %v3802_v0  ;;  %v3861_v11 = vpop.f32.mrf.mxu1  ;;  %4407 = vmatpush3.bf16.msra.mxu1 %v6691_v12  ;;  %v6699_v12 = vld [vmem:[#allocation15_spill] sm:$0xff] }
 0x17b   :  { %v3862_v44 = vadd.f32 %v3861_v11, %v3860_v2  ;;  %v3805_v41 = vpop.f32.mrf.mxu0  ;;  %2770 = vmatmul.mubr.bf16.gmra.mxu0 %v4695_v8  ;;  %v4707_v2 = vld [vmem:[%s6642_s0 + $0x4ec] ss:$28 sps:$4 sm:$0xff]  }
 0x17c   :  { %v3863_v13 = vpop.f32.mrf.mxu1  ;;  %2858 = vmatmul.mubr.bf16.gmra.mxu1 %v4698_v3  ;;  %2777 = vmatprep.mubr.bf16.mxu0 %v4703_v49  ;;  %v4715_v49 = vld [vmem:[%s6642_s0 + $0x528] ss:$28 sps:$4 sm:$0xff]  }
 0x17d   :  { %v6115_v14 = vadd.f32 %v3862_v44, %v3804_v10  ;;  %v3806_v42 = vpop.f32.mrf.mxu0  ;;  %2865 = vmatprep.mubr.bf16.mxu1 %v4706_v30  ;;  %4246 = vmatpush3.bf16.msra.mxu0 %v6692_v36  ;;  %v4718_v30 = vld [vmem:[%s6642_s0 + $0x530] ss:$28 sps:$4 sm:$0xff]   ;;  %v6698_v10 = vld [vmem:[#allocation14_spill] sm:$0xff] }
 0x17e   :  { %v3807_v17 = vadd.f32 %v3806_v42, %v3805_v41  ;;  %v3864_v25 = vpop.f32.mrf.mxu1  ;;  %4247 = vmatprep.subr.bf16.mxu0 %v6693_v20  ;;  %v6700_v42 = vld [vmem:[#allocation16_spill] sm:$0xff] }
 0x17f   :  { %v3865_v52 = vadd.f32 %v3864_v25, %v3863_v13  ;;  %v3808_v21 = vpop.f32.mrf.mxu0  ;;  %v6701_v25 = vld [vmem:[#allocation17_spill] sm:$0xff] }
 0x180   :  { %v3866_v24 = vpop.f32.mrf.mxu1 }
 0x181   :  { %v6128_v27 = vadd.f32 %v3865_v52, %v3807_v17  ;;  %v3809_v53 = vpop.f32.mrf.mxu0  ;;  %4248 = vmatpush3.bf16.msra.mxu0 %v6694_v7  ;;  %v4713_v52 = vld [vmem:[%s6642_s0 + $0x524] ss:$28 sps:$4 sm:$0xff]  }
 0x182   :  { %v3810_v54 = vadd.f32 %v3809_v53, %v3808_v21  ;;  %v3867_v55 = vpop.f32.mrf.mxu1  ;;  %4249 = vmatprep.subr.bf16.mxu0 %v6695_v59  ;;  %v4724_v53 = vld [vmem:[%s6642_s0 + $0x568] ss:$28 sps:$4 sm:$0xff]  }
 0x183   :  { %v3868_v62 = vadd.f32 %v3867_v55, %v3866_v24  ;;  %v3811_v34 = vpop.f32.mrf.mxu0  ;;  %2778 = vmatmul.mubr.bf16.gmra.mxu0 %v4701_v22  ;;  %v4716_v24 = vld [vmem:[%s6642_s0 + $0x52c] ss:$28 sps:$4 sm:$0xff]   ;;  %v6702_v7 = vld [vmem:[#allocation18_spill] sm:$0xff] }
 0x184   :  { %v3869_v39 = vpop.f32.mrf.mxu1  ;;  %2866 = vmatmul.mubr.bf16.gmra.mxu1 %v4704_v58  ;;  %2785 = vmatprep.mubr.bf16.mxu0 %v4709_v51  ;;  %v4721_v58 = vld [vmem:[%s6642_s0 + $0x560] ss:$28 sps:$4 sm:$0xff]   ;;  %v6703_v59 = vld [vmem:[#allocation19_spill] sm:$0xff] }
 0x185   :  { %v6135_v28 = vadd.f32 %v3868_v62, %v3810_v54  ;;  %v3812_v60 = vpop.f32.mrf.mxu0  ;;  %2873 = vmatprep.mubr.bf16.mxu1 %v4712_v45  ;;  %4250 = vmatpush3.bf16.msra.mxu0 %v6696_v50  ;;  %v3515_v50 = vld [vmem:[%s6642_s0 + $0x594] sm:$0xff] }
 0x186   :  { %v3813_v48 = vadd.f32 %v3812_v60, %v3811_v34  ;;  %v3870_v35 = vpop.f32.mrf.mxu1  ;;  %4251 = vmatprep.subr.bf16.mxu0 %v6697_v61 }
 0x187   :  { %v3871_v0 = vadd.f32 %v3870_v35, %v3869_v39  ;;  %v3814_v8 = vpop.f32.mrf.mxu0 }
 0x188   :  { %v3872_v3 = vpop.f32.mrf.mxu1 }
 0x189   :  { %v6148_v63 = vadd.f32 %v3871_v0, %v3813_v48  ;;  %v3815_v5 = vpop.f32.mrf.mxu0  ;;  %4252 = vmatpush3.bf16.msra.mxu0 %v6698_v10  ;;  %v3516_v0 = vld [vmem:[%s6642_s0 + $0x59c] sm:$0xff] }
 0x18a   :  { %v3873_v11 = vpop.f32.mrf.mxu1  ;;  %4253 = vmatprep.subr.bf16.mxu0 %v6699_v12  ;;  %v4722_v5 = vld [vmem:[%s6642_s0 + $0x564] ss:$28 sps:$4 sm:$0xff]  }
 0x18b   :  { %v3891_v44 = vpop.f32.mrf.mxu0  ;;  %2786 = vmatmul.mubr.bf16.gmra.mxu0 %v4707_v2  ;;  %v6704_v2 = vld [vmem:[#allocation20_spill] sm:$0xff]  ;;  %v3564_v11 = vcombine.high %v3516_v0, %v3516_v0 }
 0x18c   :  { %v1681_v41 = vpop.f32.mrf.mxu1  ;;  %2874 = vmatmul.mubr.bf16.gmra.mxu1 %v4710_v23  ;;  %2793 = vmatprep.mubr.bf16.mxu0 %v4715_v49 }
 0x18d   :  { %v3892_v13 = vpop.f32.mrf.mxu0  ;;  %2881 = vmatprep.mubr.bf16.mxu1 %v4718_v30  ;;  %4254 = vmatpush3.bf16.msra.mxu0 %v6700_v42  ;;  %v3562_v30 = vcombine.high %v3515_v50, %v3515_v50 }
 0x18e   :  { %v3893_v36 = vadd.f32 %v3892_v13, %v3891_v44  ;;  %v4346_v17 = vpop.f32.mrf.mxu1  ;;  %4255 = vmatprep.subr.bf16.mxu0 %v6701_v25 }
 0x18f   :  { %v3894_v20 = vpop.f32.mrf.mxu0 }
 0x190   :  { %v1594_v21 = vadd.f32 %v3893_v36, %v6037_v31  ;;  %v1684_v22 = vpop.f32.mrf.mxu1 }
 0x191   :  { %v3895_v51 = vpop.f32.mrf.mxu0  ;;  %4256 = vmatpush3.bf16.msra.mxu0 %v6702_v7 }
 0x192   :  { %v6171_v45 = vadd.f32 %v1681_v41, %v1594_v21  ;;  %v3896_v54 = vadd.f32 %v3895_v51, %v3894_v20  ;;  %v4347_v31 = vpop.f32.mrf.mxu1 }
 0x193   :  { %v3897_v55 = vpop.f32.mrf.mxu0  ;;  %2794 = vmatmul.mubr.bf16.gmra.mxu0 %v4713_v52 }
 0x194   :  { %v1735_v62 = vmax.f32 %v6703_v59, %v6171_v45  ;;  %v1597_v34 = vadd.f32 %v3896_v54, %v6044_v43  ;;  %v1689_v39 = vpop.f32.mrf.mxu1  ;;  %2882 = vmatmul.mubr.bf16.gmra.mxu1 %v4716_v24  ;;  %2801 = vmatprep.mubr.bf16.mxu0 %v4721_v58  ;;  %v4719_v43 = vld [vmem:[%s6642_s0 + $0x55c] ss:$28 sps:$4 sm:$0xff]  }
 0x195   :  { %v3898_v60 = vpop.f32.mrf.mxu0  ;;  %2889 = vmatprep.mubr.bf16.mxu1 %v4724_v53  ;;  %v3563_v53 = vcombine.low %v3516_v0, %v3516_v0 }
 0x196   :  { %v6179_v48 = vadd.f32 %v1684_v22, %v1597_v34  ;;  %v3899_v35 = vadd.f32 %v3898_v60, %v3897_v55  ;;  %v4350_v61 = vpop.f32.mrf.mxu1  ;;  %v3561_v22 = vcombine.low %v3515_v50, %v3515_v50 }
 0x197   :  { %v3900_v8 = vpop.f32.mrf.mxu0 }
 0x198   :  { %v1736_v3 = vmax.f32 %v6704_v2, %v6179_v48  ;;  %v1602_v23 = vadd.f32 %v3899_v35, %v6057_v40  ;;  %v1692_v49 = vpop.f32.mrf.mxu1 }
 0x199   :  { %v3901_v10 = vpop.f32.mrf.mxu0 }
 0x19a   :  { %v6193_v12 = vadd.f32 %v1689_v39, %v1602_v23  ;;  %v3902_v44 = vadd.f32 %v3901_v10, %v3900_v8  ;;  %v4351_v41 = vpop.f32.mrf.mxu1 }
 0x19b   :  { %v3903_v13 = vpop.f32.mrf.mxu0  ;;  %2802 = vmatmul.mubr.bf16.gmra.mxu0 %v4719_v43  ;;  %v4729_v43 = vld [vmem:[%s6642_s0 + $0x454] ss:$28 sps:$4 sm:$0xff]  }
 0x19c   :  { %v1737_v42 = vmax.f32 %v5915_v26, %v6193_v12  ;;  %v1605_v36 = vadd.f32 %v3902_v44, %v6060_v57  ;;  %v1697_v40 = vpop.f32.mrf.mxu1  ;;  %2890 = vmatmul.mubr.bf16.gmra.mxu1 %v4722_v5  ;;  %2809 = vmatprep.mubr.bf16.mxu0 %v3562_v30  ;;  %v4731_v57 = vld [vmem:[%s6642_s0 + $0x458] ss:$28 sps:$4 sm:$0xff]   ;;  %v4735_v30 = vld [vmem:[%s6642_s0 + $0x490] ss:$28 sps:$4 sm:$0xff]  }
 0x19d   :  { %v3904_v17 = vpop.f32.mrf.mxu0  ;;  %2897 = vmatprep.mubr.bf16.mxu1 %v3564_v11  ;;  %v4732_v5 = vld [vmem:[%s6642_s0 + $0x45c] ss:$28 sps:$4 sm:$0xff]  }
 0x19e   :  { %v6198_v25 = vadd.f32 %v1692_v49, %v1605_v36  ;;  %v3905_v20 = vadd.f32 %v3904_v17, %v3903_v13  ;;  %v4354_v52 = vpop.f32.mrf.mxu1 }
 0x19f   :  { %v3906_v21 = vpop.f32.mrf.mxu0 }
 0x1a0   :  { %v1738_v24 = vmax.f32 %v5918_v46, %v6198_v25  ;;  %v1610_v58 = vadd.f32 %v3905_v20, %v6070_v47  ;;  %v1700_v51 = vpop.f32.mrf.mxu1 }
 0x1a1   :  { %v3907_v7 = vpop.f32.mrf.mxu0 }
 0x1a2   :  { %v6206_v54 = vadd.f32 %v1697_v40, %v1610_v58  ;;  %v3908_v31 = vadd.f32 %v3907_v7, %v3906_v21  ;;  %v4355_v55 = vpop.f32.mrf.mxu1  ;;  %v4733_v58 = vld [vmem:[%s6642_s0 + $0x48c] ss:$28 sps:$4 sm:$0xff]  }
 0x1a3   :  { %v3909_v34 = vpop.f32.mrf.mxu0  ;;  %2810 = vmatmul.mubr.bf16.gmra.mxu0 %v3561_v22  ;;  %v4739_v7 = vld [vmem:[%s6642_s0 + $0x4c8] ss:$28 sps:$4 sm:$0xff]  }
 0x1a4   :  { %v1739_v39 = vmax.f32 %v5924_v32, %v6206_v54  ;;  %v1613_v60 = vadd.f32 %v3908_v31, %v6076_v29  ;;  %v1705_v50 = vpop.f32.mrf.mxu1  ;;  %2898 = vmatmul.mubr.bf16.gmra.mxu1 %v3563_v53  ;;  %2937 = vmatprep.mubr.bf16.mxu0 %v4731_v57  ;;  %v4736_v57 = vld [vmem:[%s6642_s0 + $0x494] ss:$28 sps:$4 sm:$0xff]  }
 0x1a5   :  { %v3910_v47 = vpop.f32.mrf.mxu0  ;;  %4408 = vmatprep.mubr.msk.bf16.mxu1 %vm4807_vm0, %v6685_v1 }
 0x1a6   :  { %v6213_v35 = vadd.f32 %v1700_v51, %v1613_v60  ;;  %v3911_v61 = vadd.f32 %v3910_v47, %v3909_v34  ;;  %v4358_v0 = vpop.f32.mrf.mxu1 }
 0x1a7   :  { %v3912_v8 = vpop.f32.mrf.mxu0 }
 0x1a8   :  { %v1618_v29 = vadd.f32 %v3911_v61, %v6084_v37  ;;  %v1708_v49 = vpop.f32.mrf.mxu1 }
 0x1a9   :  { %v3913_v10 = vpop.f32.mrf.mxu0 }
 0x1aa   :  { %v6227_v11 = vadd.f32 %v1705_v50, %v1618_v29  ;;  %v3914_v44 = vadd.f32 %v3913_v10, %v3912_v8  ;;  %v4359_v41 = vpop.f32.mrf.mxu1 }
 0x1ab   :  { %v3915_v13 = vpop.f32.mrf.mxu0  ;;  %2938 = vmatmul.mubr.bf16.vlgmr.msra.gmra.mxu0 %v4729_v43  ;;  %v4743_v41 = vld [vmem:[%s6642_s0 + $0x500] ss:$28 sps:$4 sm:$0xff]  }
 0x1ac   :  { %v1621_v37 = vadd.f32 %v3914_v44, %v6093_v38  ;;  %v1713_v40 = vpop.f32.mrf.mxu1  ;;  %4409 = vmatmul.mubr.msk.bf16.vlgmr.msra.gmra.mxu1 %vm701_vm1, %v4732_v5  ;;  %2945 = vmatprep.mubr.bf16.mxu0 %v4735_v30  ;;  %v4737_v5 = vld [vmem:[%s6642_s0 + $0x4c4] ss:$28 sps:$4 sm:$0xff]   ;;  %v4740_v44 = vld [vmem:[%s6642_s0 + $0x4cc] ss:$28 sps:$4 sm:$0xff]  }
 0x1ad   :  { %v3916_v17 = vpop.f32.mrf.mxu0  ;;  %4412 = vmatprep.mubr.msk.bf16.mxu1 %vm4807_vm0, %v6685_v1 }
 0x1ae   :  { %v6235_v20 = vadd.f32 %v1708_v49, %v1621_v37  ;;  %v3917_v52 = vadd.f32 %v3916_v17, %v3915_v13  ;;  %v4362_v21 = vpop.f32.mrf.mxu1 }
 0x1af   :  { %v3918_v22 = vpop.f32.mrf.mxu0 }
 0x1b0   :  { %v1626_v51 = vadd.f32 %v3917_v52, %v6108_v6  ;;  %v1716_v53 = vpop.f32.mrf.mxu1 }
 0x1b1   :  { %v3919_v31 = vpop.f32.mrf.mxu0 }
 0x1b2   :  { %v6249_v55 = vadd.f32 %v1713_v40, %v1626_v51  ;;  %v3920_v34 = vadd.f32 %v3919_v31, %v3918_v22  ;;  %v4363_v60 = vpop.f32.mrf.mxu1  ;;  %v4741_v31 = vld [vmem:[%s6642_s0 + $0x4fc] ss:$28 sps:$4 sm:$0xff]  }
 0x1b3   :  { %v3921_v50 = vpop.f32.mrf.mxu0  ;;  %2946 = vmatmul.mubr.bf16.gmra.mxu0 %v4733_v58 }
 0x1b4   :  { %v1629_v6 = vadd.f32 %v3920_v34, %v6115_v14  ;;  %v1721_v61 = vpop.f32.mrf.mxu1  ;;  %4413 = vmatmul.mubr.msk.bf16.gmra.mxu1 %vm701_vm1, %v4736_v57  ;;  %2953 = vmatprep.mubr.bf16.mxu0 %v4739_v7 }
 0x1b5   :  { %v3922_v0 = vpop.f32.mrf.mxu0  ;;  %4416 = vmatprep.mubr.msk.bf16.mxu1 %vm4807_vm0, %v6685_v1 }
 0x1b6   :  { %v6257_v8 = vadd.f32 %v1716_v53, %v1629_v6  ;;  %v3923_v43 = vadd.f32 %v3922_v0, %v3921_v50  ;;  %v4366_v29 = vpop.f32.mrf.mxu1  ;;  %v4744_v50 = vld [vmem:[%s6642_s0 + $0x504] ss:$28 sps:$4 sm:$0xff]   ;;  %v4747_v6 = vld [vmem:[%s6642_s0 + $0x538] ss:$28 sps:$4 sm:$0xff]  }
 0x1b7   :  { %v3924_v49 = vpop.f32.mrf.mxu0 }
 0x1b8   :  { %v1634_v30 = vadd.f32 %v3923_v43, %v6128_v27  ;;  %v1724_v10 = vpop.f32.mrf.mxu1 }
 0x1b9   :  { %v3925_v13 = vpop.f32.mrf.mxu0 }
 0x1ba   :  { %v6271_v37 = vadd.f32 %v1721_v61, %v1634_v30  ;;  %v3926_v40 = vadd.f32 %v3925_v13, %v3924_v49  ;;  %v4367_v17 = vpop.f32.mrf.mxu1  ;;  %v4745_v13 = vld [vmem:[%s6642_s0 + $0x534] ss:$28 sps:$4 sm:$0xff]  }
 0x1bb   :  { %v3927_v52 = vpop.f32.mrf.mxu0  ;;  %2954 = vmatmul.mubr.bf16.gmra.mxu0 %v4737_v5  ;;  %v4748_v17 = vld [vmem:[%s6642_s0 + $0x53c] ss:$28 sps:$4 sm:$0xff]  }
 0x1bc   :  { %v1637_v27 = vadd.f32 %v3926_v40, %v6135_v28  ;;  %v1729_v22 = vpop.f32.mrf.mxu1  ;;  %4417 = vmatmul.mubr.msk.bf16.gmra.mxu1 %vm701_vm1, %v4740_v44  ;;  %2961 = vmatprep.mubr.bf16.mxu0 %v4743_v41 }
 0x1bd   :  { %v3928_v58 = vpop.f32.mrf.mxu0  ;;  %4420 = vmatprep.mubr.msk.bf16.mxu1 %vm4807_vm0, %v6685_v1 }
 0x1be   :  { %v6279_v51 = vadd.f32 %v1724_v10, %v1637_v27  ;;  %v3929_v53 = vadd.f32 %v3928_v58, %v3927_v52  ;;  %v4370_v57 = vpop.f32.mrf.mxu1  ;;  %v4751_v52 = vld [vmem:[%s6642_s0 + $0x570] ss:$28 sps:$4 sm:$0xff]  }
 0x1bf   :  { %v3930_v7 = vpop.f32.mrf.mxu0 }
 0x1c0   :  { %v1642_v34 = vadd.f32 %v3929_v53, %v6148_v63  ;;  %v1732_v60 = vpop.f32.mrf.mxu1 }
 0x1c1   :  { %v3931_v61 = vpop.f32.mrf.mxu0 }
 0x1c2   :  { %v6293_v0 = vadd.f32 %v1729_v22, %v1642_v34  ;;  %v4371_v43 = vpop.f32.mrf.mxu1 }
 0x1c3   :  { %v3958_v29 = vpop.f32.mrf.mxu0  ;;  %2962 = vmatmul.mubr.bf16.gmra.mxu0 %v4741_v31 }
 0x1c4   :  { %v4016_v5 = vpop.f32.mrf.mxu1  ;;  %4421 = vmatmul.mubr.msk.bf16.gmra.mxu1 %vm701_vm1, %v4744_v50  ;;  %2969 = vmatprep.mubr.bf16.mxu0 %v4747_v6  ;;  %v3517_v50 = vld [vmem:[%s6642_s0 + $0x5a4] sm:$0xff] }
 0x1c5   :  { %v3959_v63 = vpop.f32.mrf.mxu0  ;;  %4424 = vmatprep.mubr.msk.bf16.mxu1 %vm4807_vm0, %v6685_v1 }
 0x1c6   :  { %v3960_v30 = vadd.f32 %v3959_v63, %v3958_v29  ;;  %v4017_v10 = vpop.f32.mrf.mxu1 }
 0x1c7   :  { %v4018_v44 = vadd.f32 %v4017_v10, %v4016_v5  ;;  %v3961_v41 = vpop.f32.mrf.mxu0  ;;  %v4749_v5 = vld [vmem:[%s6642_s0 + $0x56c] ss:$28 sps:$4 sm:$0xff]   ;;  %v3566_v10 = vcombine.high %v3517_v50, %v3517_v50 }
 0x1c8   :  { %v4019_v40 = vpop.f32.mrf.mxu1 }
 0x1c9   :  { %v6309_v27 = vadd.f32 %v4018_v44, %v3960_v30  ;;  %v3962_v22 = vpop.f32.mrf.mxu0  ;;  %v4752_v30 = vld [vmem:[%s6642_s0 + $0x574] ss:$28 sps:$4 sm:$0xff]  }
 0x1ca   :  { %v3963_v58 = vadd.f32 %v3962_v22, %v3961_v41  ;;  %v4020_v53 = vpop.f32.mrf.mxu1 }
 0x1cb   :  { %v4021_v57 = vadd.f32 %v4020_v53, %v4019_v40  ;;  %v3964_v7 = vpop.f32.mrf.mxu0  ;;  %2970 = vmatmul.mubr.bf16.gmra.mxu0 %v4745_v13 }
 0x1cc   :  { %v4022_v31 = vpop.f32.mrf.mxu1  ;;  %4425 = vmatmul.mubr.msk.bf16.gmra.mxu1 %vm701_vm1, %v4748_v17  ;;  %2977 = vmatprep.mubr.bf16.mxu0 %v4751_v52 }
 0x1cd   :  { %v6312_v34 = vadd.f32 %v4021_v57, %v3963_v58  ;;  %v3965_v60 = vpop.f32.mrf.mxu0  ;;  %4428 = vmatprep.mubr.msk.bf16.mxu1 %vm4807_vm0, %v6685_v1 }
 0x1ce   :  { %v3966_v6 = vadd.f32 %v3965_v60, %v3964_v7  ;;  %v4023_v61 = vpop.f32.mrf.mxu1 }
 0x1cf   :  { %v4024_v43 = vadd.f32 %v4023_v61, %v4022_v31  ;;  %v3967_v29 = vpop.f32.mrf.mxu0 }
 0x1d0   :  { %v4025_v63 = vpop.f32.mrf.mxu1 }
 0x1d1   :  { %v6325_v44 = vadd.f32 %v4024_v43, %v3966_v6  ;;  %v3968_v41 = vpop.f32.mrf.mxu0  ;;  %v3565_v6 = vcombine.low %v3517_v50, %v3517_v50  ;;  %v4755_v43 = vld [vmem:[%s6642_s0 + $0x5ac] ss:$0 sps:$4 sm:$0xff]  }
 0x1d2   :  { %v3969_v13 = vadd.f32 %v3968_v41, %v3967_v29  ;;  %v4026_v40 = vpop.f32.mrf.mxu1 }
 0x1d3   :  { %v4027_v17 = vadd.f32 %v4026_v40, %v4025_v63  ;;  %v3970_v52 = vpop.f32.mrf.mxu0  ;;  %2978 = vmatmul.mubr.bf16.gmra.mxu0 %v4749_v5 }
 0x1d4   :  { %v4028_v22 = vpop.f32.mrf.mxu1  ;;  %4429 = vmatmul.mubr.msk.bf16.gmra.mxu1 %vm701_vm1, %v4752_v30  ;;  %2985 = vmatprep.mubr.bf16.mxu0 %v3566_v10 }
 0x1d5   :  { %v6328_v58 = vadd.f32 %v4027_v17, %v3969_v13  ;;  %v3971_v53 = vpop.f32.mrf.mxu0  ;;  %4432 = vmatprep.mubr.msk.bf16.mxu1 %vm4807_vm0, %v6685_v1 }
 0x1d6   :  { %v3972_v57 = vadd.f32 %v3971_v53, %v3970_v52  ;;  %v4029_v7 = vpop.f32.mrf.mxu1 }
 0x1d7   :  { %v4030_v31 = vadd.f32 %v4029_v7, %v4028_v22  ;;  %v3973_v60 = vpop.f32.mrf.mxu0 }
 0x1d8   :  { %v4031_v61 = vpop.f32.mrf.mxu1 }
 0x1d9   :  { %v6335_v29 = vadd.f32 %v4030_v31, %v3972_v57  ;;  %v3974_v5 = vpop.f32.mrf.mxu0 }
 0x1da   :  { %v3975_v63 = vadd.f32 %v3974_v5, %v3973_v60  ;;  %v4032_v30 = vpop.f32.mrf.mxu1 }
 0x1db   :  { %v4033_v10 = vadd.f32 %v4032_v30, %v4031_v61  ;;  %v3976_v41 = vpop.f32.mrf.mxu0  ;;  %2986 = vmatmul.mubr.bf16.gmra.mxu0 %v3565_v6 }
 0x1dc   :  { %v4034_v13 = vpop.f32.mrf.mxu1  ;;  %4433 = vmatmul.mubr.msk.bf16.gmra.mxu1 %vm701_vm1, %v4755_v43 }
 0x1dd   :  { %v6338_v1 = vadd.f32 %v4033_v10, %v3975_v63  ;;  %v3977_v40 = vpop.f32.mrf.mxu0 }
 0x1de   :  { %v3978_v50 = vadd.f32 %v3977_v40, %v3976_v41  ;;  %v4035_v17 = vpop.f32.mrf.mxu1 }
 0x1df   :  { %v4036_v52 = vadd.f32 %v4035_v17, %v4034_v13  ;;  %v3979_v22 = vpop.f32.mrf.mxu0 }
 0x1e0   :  { %v4037_v53 = vpop.f32.mrf.mxu1 }
 0x1e1   :  { %v6340_v7 = vadd.f32 %v4036_v52, %v3978_v50  ;;  %v3980_v57 = vpop.f32.mrf.mxu0 }
 0x1e2   :  { %v3981_v31 = vadd.f32 %v3980_v57, %v3979_v22  ;;  %v4038_v60 = vpop.f32.mrf.mxu1 }
 0x1e3   :  { %v4039_v5 = vadd.f32 %v4038_v60, %v4037_v53  ;;  %v3982_v61 = vpop.f32.mrf.mxu0 }
 0x1e4   :  { %v4040_v30 = vpop.f32.mrf.mxu1 }
 0x1e5   :  { %v6342_v6 = vadd.f32 %v4039_v5, %v3981_v31  ;;  %v3983_v49 = vpop.f32.mrf.mxu0 }
 0x1e6   :  { %v3984_v43 = vadd.f32 %v3983_v49, %v3982_v61  ;;  %v4041_v63 = vpop.f32.mrf.mxu1 }
 0x1e7   :  { %v4042_v10 = vadd.f32 %v4041_v63, %v4040_v30  ;;  %v3985_v28 = vpop.f32.mrf.mxu0 }
 0x1e8   :  { %v4043_v41 = vpop.f32.mrf.mxu1 }
 0x1e9   :  { %v6344_v40 = vadd.f32 %v4042_v10, %v3984_v43  ;;  %v3986_v13 = vpop.f32.mrf.mxu0 }
 0x1ea   :  { %v3987_v17 = vadd.f32 %v3986_v13, %v3985_v28  ;;  %v4044_v50 = vpop.f32.mrf.mxu1 }
 0x1eb   :  { %v4045_v52 = vadd.f32 %v4044_v50, %v4043_v41  ;;  %v3988_v21 = vpop.f32.mrf.mxu0 }
 0x1ec   :  { %v4046_v22 = vpop.f32.mrf.mxu1 }
 0x1ed   :  { %v6346_v57 = vadd.f32 %v4045_v52, %v3987_v17  ;;  %v3989_v53 = vpop.f32.mrf.mxu0 }
 0x1ee   :  { %v3990_v60 = vadd.f32 %v3989_v53, %v3988_v21  ;;  %v4047_v31 = vpop.f32.mrf.mxu1 }
 0x1ef   :  { %v4048_v5 = vadd.f32 %v4047_v31, %v4046_v22  ;;  %v3991_v14 = vpop.f32.mrf.mxu0 }
 0x1f0   :  { %v4049_v49 = vpop.f32.mrf.mxu1 }
 0x1f1   :  { %v6348_v61 = vadd.f32 %v4048_v5, %v3990_v60  ;;  %v3992_v30 = vpop.f32.mrf.mxu0 }
 0x1f2   :  { %v3993_v63 = vadd.f32 %v3992_v30, %v3991_v14  ;;  %v4050_v43 = vpop.f32.mrf.mxu1 }
 0x1f3   :  { %v4051_v10 = vadd.f32 %v4050_v43, %v4049_v49  ;;  %v3994_v47 = vpop.f32.mrf.mxu0 }
 0x1f4   :  { %v4052_v28 = vpop.f32.mrf.mxu1 }
 0x1f5   :  { %v6350_v13 = vadd.f32 %v4051_v10, %v3993_v63  ;;  %v3995_v41 = vpop.f32.mrf.mxu0 }
 0x1f6   :  { %v3996_v50 = vadd.f32 %v3995_v41, %v3994_v47  ;;  %v4053_v17 = vpop.f32.mrf.mxu1 }
 0x1f7   :  { %v4054_v52 = vadd.f32 %v4053_v17, %v4052_v28  ;;  %v3997_v38 = vpop.f32.mrf.mxu0 }
 0x1f8   :  { %v4055_v21 = vpop.f32.mrf.mxu1 }
 0x1f9   :  { %v6352_v53 = vadd.f32 %v4054_v52, %v3996_v50  ;;  %v3998_v22 = vpop.f32.mrf.mxu0 }
 0x1fa   :  { %v4056_v31 = vpop.f32.mrf.mxu1 }
 0x1fb   :  { %v4074_v60 = vpop.f32.mrf.mxu0 }
 0x1fc   :  { %v2354_v5 = vpop.f32.mrf.mxu1 }
 0x1fd   :  { %v4075_v36 = vpop.f32.mrf.mxu0 }
 0x1fe   :  { %v4076_v14 = vadd.f32 %v4075_v36, %v4074_v60  ;;  %v4378_v30 = vpop.f32.mrf.mxu1 }
 0x1ff   :  { %v4077_v49 = vpop.f32.mrf.mxu0 }
 0x200   :  { %v2267_v43 = vadd.f32 %v4076_v14, %v6309_v27  ;;  %v2357_v63 = vpop.f32.mrf.mxu1 }
 0x201   :  { %v4078_v10 = vpop.f32.mrf.mxu0 }
 0x202   :  { %v2355_v23 = vadd.f32 %v2354_v5, %v2267_v43  ;;  %v4079_v47 = vadd.f32 %v4078_v10, %v4077_v49  ;;  %v4379_v41 = vpop.f32.mrf.mxu1 }
 0x203   :  { %v4080_v28 = vpop.f32.mrf.mxu0 }
 0x204   :  { %v6358_v38 = vmax.f32 %v1735_v62, %v2355_v23  ;;  %v2270_v50 = vadd.f32 %v4079_v47, %v6312_v34  ;;  %v2362_v17 = vpop.f32.mrf.mxu1 }
 0x205   :  { %v4081_v52 = vpop.f32.mrf.mxu0 }
 0x206   :  { %v2358_v36 = vadd.f32 %v2357_v63, %v2270_v50  ;;  %v4082_v21 = vadd.f32 %v4081_v52, %v4080_v28  ;;  %v4382_v22 = vpop.f32.mrf.mxu1 }
 0x207   :  { %v4083_v31 = vpop.f32.mrf.mxu0 }
 0x208   :  { %v6364_v27 = vmax.f32 %v1736_v3, %v2358_v36  ;;  %v2275_v60 = vadd.f32 %v4082_v21, %v6325_v44  ;;  %v2365_v5 = vpop.f32.mrf.mxu1 }
 0x209   :  { %v4084_v14 = vpop.f32.mrf.mxu0 }
 0x20a   :  { %v2363_v45 = vadd.f32 %v2362_v17, %v2275_v60  ;;  %v4085_v59 = vadd.f32 %v4084_v14, %v4083_v31  ;;  %v4383_v62 = vpop.f32.mrf.mxu1 }
 0x20b   :  { %v4086_v23 = vpop.f32.mrf.mxu0 }
 0x20c   :  { %v6370_v34 = vmax.f32 %v1737_v42, %v2363_v45  ;;  %v2278_v30 = vadd.f32 %v4085_v59, %v6328_v58  ;;  %v2370_v49 = vpop.f32.mrf.mxu1 }
 0x20d   :  { %v4087_v43 = vpop.f32.mrf.mxu0 }
 0x20e   :  { %v2366_v48 = vadd.f32 %v2365_v5, %v2278_v30  ;;  %v4088_v2 = vadd.f32 %v4087_v43, %v4086_v23  ;;  %v4386_v3 = vpop.f32.mrf.mxu1 }
 0x20f   :  { %v4089_v63 = vpop.f32.mrf.mxu0 }
 0x210   :  { %v6376_v44 = vmax.f32 %v1738_v24, %v2366_v48  ;;  %v2283_v10 = vadd.f32 %v4088_v2, %v6335_v29  ;;  %v2373_v47 = vpop.f32.mrf.mxu1  ;;  %v6705_v29 = vmax.f32 %v5929_v18, %v6213_v35 }
 0x211   :  { %v4090_v41 = vpop.f32.mrf.mxu0 }
 0x212   :  { %v2371_v26 = vadd.f32 %v2370_v49, %v2283_v10  ;;  %v4091_v12 = vadd.f32 %v4090_v41, %v4089_v63  ;;  %v4387_v42 = vpop.f32.mrf.mxu1 }
 0x213   :  { %v4092_v28 = vpop.f32.mrf.mxu0 }
 0x214   :  { %v6382_v58 = vmax.f32 %v1739_v39, %v2371_v26  ;;  %v2286_v50 = vadd.f32 %v4091_v12, %v6338_v1  ;;  %v2378_v17 = vpop.f32.mrf.mxu1  ;;  %v6706_v1 = vmax.f32 %v5941_v19, %v6227_v11 }
 0x215   :  { %v4093_v52 = vpop.f32.mrf.mxu0 }
 0x216   :  { %v2374_v46 = vadd.f32 %v2373_v47, %v2286_v50  ;;  %v4094_v25 = vadd.f32 %v4093_v52, %v4092_v28  ;;  %v4390_v24 = vpop.f32.mrf.mxu1 }
 0x217   :  { %v4095_v36 = vpop.f32.mrf.mxu0 }
 0x218   :  { %v6388_v21 = vmax.f32 %v6705_v29, %v2374_v46  ;;  %v2291_v22 = vadd.f32 %v4094_v25, %v6340_v7  ;;  %v2381_v31 = vpop.f32.mrf.mxu1  ;;  %v6707_v7 = vmax.f32 %v5948_v16, %v6235_v20 }
 0x219   :  { %v4096_v60 = vpop.f32.mrf.mxu0 }
 0x21a   :  { %v2379_v32 = vadd.f32 %v2378_v17, %v2291_v22  ;;  %v4097_v54 = vadd.f32 %v4096_v60, %v4095_v36  ;;  %v4391_v39 = vpop.f32.mrf.mxu1 }
 0x21b   :  { %v4098_v5 = vpop.f32.mrf.mxu0 }
 0x21c   :  { %v6394_v14 = vmax.f32 %v6706_v1, %v2379_v32  ;;  %v2294_v45 = vadd.f32 %v4097_v54, %v6342_v6  ;;  %v2386_v59 = vpop.f32.mrf.mxu1  ;;  %v6709_v6 = vmax.f32 %v5965_v56, %v6249_v55 }
 0x21d   :  { %v4099_v62 = vpop.f32.mrf.mxu0 }
 0x21e   :  { %v2382_v18 = vadd.f32 %v2381_v31, %v2294_v45  ;;  %v4100_v35 = vadd.f32 %v4099_v62, %v4098_v5  ;;  %v4394_v23 = vpop.f32.mrf.mxu1 }
 0x21f   :  { %v4101_v30 = vpop.f32.mrf.mxu0 }
 0x220   :  { %v6400_v49 = vmax.f32 %v6707_v7, %v2382_v18  ;;  %v2299_v43 = vadd.f32 %v4100_v35, %v6344_v40  ;;  %v2389_v48 = vpop.f32.mrf.mxu1  ;;  %v6711_v40 = vmax.f32 %v5974_v33, %v6257_v8 }
 0x221   :  { %v4102_v2 = vpop.f32.mrf.mxu0 }
 0x222   :  { %6708 = vst [vmem:[#allocation2_spill] sm:$0xff] %v6400_v49  ;;  %v2387_v19 = vadd.f32 %v2386_v59, %v2299_v43  ;;  %v4103_v11 = vadd.f32 %v4102_v2, %v4101_v30  ;;  %v4395_v3 = vpop.f32.mrf.mxu1 }
 0x223   :  { %v4104_v63 = vpop.f32.mrf.mxu0 }
 0x224   :  { %v6406_v10 = vmax.f32 %v6709_v6, %v2387_v19  ;;  %v2302_v47 = vadd.f32 %v4103_v11, %v6346_v57  ;;  %v2394_v41 = vpop.f32.mrf.mxu1  ;;  %v6713_v57 = vmax.f32 %v5990_v4, %v6271_v37 }
 0x225   :  { %v4105_v26 = vpop.f32.mrf.mxu0 }
 0x226   :  { %6710 = vst [vmem:[#allocation3_spill] sm:$0xff] %v6406_v10  ;;  %v2390_v16 = vadd.f32 %v2389_v48, %v2302_v47  ;;  %v4106_v20 = vadd.f32 %v4105_v26, %v4104_v63  ;;  %v4398_v12 = vpop.f32.mrf.mxu1 }
 0x227   :  { %v4107_v42 = vpop.f32.mrf.mxu0 }
 0x228   :  { %v6412_v28 = vmax.f32 %v6711_v40, %v2390_v16  ;;  %v2307_v50 = vadd.f32 %v4106_v20, %v6348_v61  ;;  %v2397_v17 = vpop.f32.mrf.mxu1  ;;  %v6715_v61 = vmax.f32 %v6000_v9, %v6279_v51 }
 0x229   :  { %v4108_v52 = vpop.f32.mrf.mxu0 }
 0x22a   :  { %6712 = vst [vmem:[#allocation4_spill] sm:$0xff] %v6412_v28  ;;  %v2395_v56 = vadd.f32 %v2394_v41, %v2307_v50  ;;  %v4109_v55 = vadd.f32 %v4108_v52, %v4107_v42  ;;  %v4399_v46 = vpop.f32.mrf.mxu1 }
 0x22b   :  { %v4110_v25 = vpop.f32.mrf.mxu0 }
 0x22c   :  { %v6418_v24 = vmax.f32 %v6713_v57, %v2395_v56  ;;  %v2310_v36 = vadd.f32 %v4109_v55, %v6350_v13  ;;  %v2402_v29 = vpop.f32.mrf.mxu1  ;;  %v6717_v13 = vmax.f32 %v6016_v15, %v6293_v0 }
 0x22d   :  { %v4111_v22 = vpop.f32.mrf.mxu0 }
 0x22e   :  { %6714 = vst [vmem:[#allocation5_spill] sm:$0xff] %v6418_v24  ;;  %v2398_v33 = vadd.f32 %v2397_v17, %v2310_v36  ;;  %v4112_v8 = vadd.f32 %v4111_v22, %v4110_v25  ;;  %v4402_v31 = vpop.f32.mrf.mxu1 }
 0x22f   :  { %v4113_v60 = vpop.f32.mrf.mxu0 }
 0x230   :  { %v6424_v32 = vmax.f32 %v6715_v61, %v2398_v33  ;;  %v2315_v54 = vadd.f32 %v4112_v8, %v6352_v53  ;;  %v2405_v39 = vpop.f32.mrf.mxu1 }
 0x231   :  { %v4114_v5 = vpop.f32.mrf.mxu0 }
 0x232   :  { %6716 = vst [vmem:[#allocation6_spill] sm:$0xff] %v6424_v32  ;;  %v2403_v4 = vadd.f32 %v2402_v29, %v2315_v54  ;;  %v4403_v37 = vpop.f32.mrf.mxu1 }
 0x233   :  { %v4141_v1 = vpop.f32.mrf.mxu0 }
 0x234   :  { %v6430_v45 = vmax.f32 %v6717_v13, %v2403_v4  ;;  %v4199_v59 = vpop.f32.mrf.mxu1 }
 0x235   :  { %v4142_v62 = vpop.f32.mrf.mxu0 }
 0x236   :  { %6718 = vst [vmem:[#allocation7_spill] sm:$0xff] %v6430_v45  ;;  %v4200_v18 = vpop.f32.mrf.mxu1  ;;  %v4143_v10 = vadd.f32 %v4142_v62, %v4141_v1  ;;  %v6521_v62 = vld [vmem:[%s6643_s2] ss:$0 sm:$0xff] }
 0x237   :  { %v4144_v35 = vpop.f32.mrf.mxu0 }
 0x238   :  { %v4202_v23 = vpop.f32.mrf.mxu1 }
 0x239   :  { %v4145_v9 = vpop.f32.mrf.mxu0 }
 0x23a   :  { %v4203_v51 = vpop.f32.mrf.mxu1 }
 0x23b   :  { %v6432_v30 = vpop.f32.mrf.mxu0 }
 0x23c   :  { %v6434_v53 = vpop.f32.mrf.mxu1 }
 0x23d   :  { %v4148_v7 = vpop.f32.mrf.mxu0 }
 0x23e   :  { %v4206_v43 = vpop.f32.mrf.mxu1 }
 0x23f   :  { %v6436_v48 = vpop.f32.mrf.mxu0 }
 0x240   :  { %v6438_v2 = vpop.f32.mrf.mxu1 }
 0x241   :  { %v6440_v15 = vpop.f32.mrf.mxu0 }
 0x242   :  { %v6442_v0 = vpop.f32.mrf.mxu1 }
 0x243   :  { %v6444_v19 = vpop.f32.mrf.mxu0 }
 0x244   :  { %v6446_v11 = vpop.f32.mrf.mxu1 }
 0x245   :  { %v6448_v3 = vpop.f32.mrf.mxu0 }
 0x246   :  { %v6450_v63 = vpop.f32.mrf.mxu1 }
 0x247   :  { %v6452_v6 = vpop.f32.mrf.mxu0 }
 0x248   :  { %v6454_v47 = vpop.f32.mrf.mxu1 }
 0x249   :  { %v6456_v41 = vpop.f32.mrf.mxu0 }
 0x24a   :  { %v6458_v26 = vpop.f32.mrf.mxu1 }
 0x24b   :  { %v6460_v16 = vpop.f32.mrf.mxu0 }
 0x24c   :  { %v6462_v20 = vpop.f32.mrf.mxu1 }
 0x24d   :  { %v6464_v12 = vpop.f32.mrf.mxu0 }
 0x24e   :  { %v6466_v42 = vpop.f32.mrf.mxu1 }
 0x24f   :  { %v6468_v40 = vpop.f32.mrf.mxu0 }
 0x250   :  { %v6470_v50 = vpop.f32.mrf.mxu1 }
 0x251   :  { %v6472_v17 = vpop.f32.mrf.mxu0 }
 0x252   :  { %v6474_v52 = vpop.f32.mrf.mxu1 }
 0x253   :  { %v6476_v56 = vpop.f32.mrf.mxu0 }
 0x254   :  { %v6478_v55 = vpop.f32.mrf.mxu1 }
 0x255   :  { %v6480_v46 = vpop.f32.mrf.mxu0 }
 0x256   :  { %v6482_v25 = vpop.f32.mrf.mxu1 }
 0x257   :  { %v6484_v57 = vpop.f32.mrf.mxu0 }
 0x258   :  { %v6486_v36 = vpop.f32.mrf.mxu1 }
 0x259   :  { %6719 = vst [vmem:[#allocation8_spill] sm:$0xff] %v6486_v36  ;;  %v6488_v29 = vpop.f32.mrf.mxu0 }
 0x25a   :  { %6720 = vst [vmem:[#allocation9_spill] sm:$0xff] %v6488_v29  ;;  %v6490_v22 = vpop.f32.mrf.mxu1 }
 0x25b   :  { %6721 = vst [vmem:[#allocation10_spill] sm:$0xff] %v6490_v22  ;;  %v6492_v33 = vpop.f32.mrf.mxu0 }
 0x25c   :  { %6722 = vst [vmem:[#allocation11_spill] sm:$0xff] %v6492_v33  ;;  %v6494_v8 = vpop.f32.mrf.mxu1 }
 0x25d   :  { %6723 = vst [vmem:[#allocation12_spill] sm:$0xff] %v6494_v8  ;;  %v6496_v31 = vpop.f32.mrf.mxu0 }
 0x25e   :  { %6724 = vst [vmem:[#allocation13_spill] sm:$0xff] %v6496_v31  ;;  %v6498_v60 = vpop.f32.mrf.mxu1  ;;  %v4146_v31 = vadd.f32 %v4145_v9, %v4144_v35  ;;  %v4210_v9 = vadd.f32 %v6442_v0, %v6438_v2  ;;  %v4213_v2 = vadd.f32 %v6450_v63, %v6446_v11  ;;  %v4216_v11 = vadd.f32 %v6458_v26, %v6454_v47 }
 0x25f   :  { %6725 = vst [vmem:[#allocation14_spill] sm:$0xff] %v6498_v60  ;;  %v6500_v61 = vpop.f32.mrf.mxu0  ;;  %v4201_v60 = vadd.f32 %v4200_v18, %v4199_v59  ;;  %v4161_v47 = vadd.f32 %v6464_v12, %v6460_v16  ;;  %v4164_v12 = vadd.f32 %v6472_v17, %v6468_v40 }
 0x260   :  { %6726 = vst [vmem:[#allocation15_spill] sm:$0xff] %v6500_v61  ;;  %v6502_v54 = vpop.f32.mrf.mxu1 }
 0x261   :  { %6727 = vst [vmem:[#allocation16_spill] sm:$0xff] %v6502_v54  ;;  %v6504_v39 = vpop.f32.mrf.mxu0 }
 0x262   :  { %6728 = vst [vmem:[#allocation17_spill] sm:$0xff] %v6504_v39  ;;  %v6506_v5 = vpop.f32.mrf.mxu1  ;;  %v4204_v39 = vadd.f32 %v4203_v51, %v4202_v23  ;;  %v4152_v23 = vadd.f32 %v6440_v15, %v6436_v48  ;;  %v4155_v48 = vadd.f32 %v6448_v3, %v6444_v19  ;;  %v4158_v3 = vadd.f32 %v6456_v41, %v6452_v6 }
 0x263   :  { %6729 = vst [vmem:[#allocation18_spill] sm:$0xff] %v6506_v5  ;;  %v6508_v4 = vpop.f32.mrf.mxu0  ;;  %v2852_v5 = vadd.f32 %v4201_v60, %v4143_v10 }
 0x264   :  { %6730 = vst [vmem:[#allocation19_spill] sm:$0xff] %v6508_v4  ;;  %v6510_v37 = vpop.f32.mrf.mxu1  ;;  %v2863_v60 = vadd.f32 %v4210_v9, %v4152_v23 }
 0x265   :  { %6731 = vst [vmem:[#allocation20_spill] sm:$0xff] %v6510_v37  ;;  %v6512_v13 = vpop.f32.mrf.mxu0 }
 0x266   :  { %6732 = vst [vmem:[#allocation21_spill] sm:$0xff] %v6512_v13  ;;  %v6514_v45 = vpop.f32.mrf.mxu1  ;;  %v2855_v13 = vadd.f32 %v4204_v39, %v4146_v31 }
 0x267   :  { %v4180_v32 = vpop.f32.mrf.mxu0 }
 0x268   :  { %v4238_v24 = vpop.f32.mrf.mxu1  ;;  %v4149_v32 = vadd.f32 %v4148_v7, %v6432_v30 }
 0x269   :  { %v4181_v28 = vpop.f32.mrf.mxu0 }
 0x26a   :  { %v4239_v61 = vpop.f32.mrf.mxu1  ;;  %v4207_v28 = vadd.f32 %v4206_v43, %v6434_v53 }
 0x26b   :  { %v4257_v8 = vpop.f32.mrf.mxu0 }
 0x26c   :  { %v3027_v54 = vpop.f32.mrf.mxu1  ;;  %v2860_v30 = vadd.f32 %v4207_v28, %v4149_v32 }
 0x26d   :  { %v4258_v33 = vpop.f32.mrf.mxu0 }
 0x26e   :  { %v4259_v49 = vadd.f32 %v4258_v33, %v4257_v8  ;;  %v4410_v4 = vpop.f32.mrf.mxu1 }
 0x26f   :  { %v4260_v22 = vpop.f32.mrf.mxu0 }
 0x270   :  { %v2940_v37 = vadd.f32 %v4259_v49, %v2852_v5  ;;  %v3030_v36 = vpop.f32.mrf.mxu1 }
 0x271   :  { %v4261_v29 = vpop.f32.mrf.mxu0 }
 0x272   :  { %v3028_v24 = vadd.f32 %v3027_v54, %v2940_v37  ;;  %v4262_v1 = vadd.f32 %v4261_v29, %v4260_v22  ;;  %v4411_v59 = vpop.f32.mrf.mxu1  ;;  %v2868_v37 = vadd.f32 %v4213_v2, %v4155_v48 }
 0x273   :  { %v4263_v10 = vpop.f32.mrf.mxu0 }
 0x274   :  { %v3081_v18 = vmax.f32 %v6358_v38, %v3028_v24  ;;  %v2943_v35 = vadd.f32 %v4262_v1, %v2855_v13  ;;  %v3035_v49 = vpop.f32.mrf.mxu1 }
 0x275   :  { %v4264_v51 = vpop.f32.mrf.mxu0 }
 0x276   :  { %v3101_v53 = vadd.f32 %v6521_v62, %v3081_v18  ;;  %v3031_v7 = vadd.f32 %v3030_v36, %v2943_v35  ;;  %v4265_v43 = vadd.f32 %v4264_v51, %v4263_v10  ;;  %v4414_v29 = vpop.f32.mrf.mxu1  ;;  %v2871_v10 = vadd.f32 %v4216_v11, %v4158_v3 }
 0x277   :  { %v4266_v22 = vpop.f32.mrf.mxu0  ;;  %v4219_v18 = vadd.f32 %v6466_v42, %v6462_v20  ;;  %v4222_v20 = vadd.f32 %v6474_v52, %v6470_v50  ;;  %v4167_v50 = vadd.f32 %v6480_v46, %v6476_v56  ;;  %v6733_v46 = vld [vmem:[#allocation9_spill] sm:$0xff] }
 0x278   :  { %v3114_v33 = vmax.f32 %v3101_v53, 0.0  ;;  %v3082_v38 = vmax.f32 %v6364_v27, %v3031_v7  ;;  %v2948_v8 = vadd.f32 %v4265_v43, %v2860_v30  ;;  %v3038_v31 = vpop.f32.mrf.mxu1 }
 0x279   :  { %v4267_v15 = vpop.f32.mrf.mxu0  ;;  %v2876_v7 = vadd.f32 %v4219_v18, %v4161_v47 }
 0x27a   :  { %3128 = vst.msk [vmem:[%s6644_s3] sm:$0xff] %vm3127_vm2, %v3114_v33  ;;  %v3102_v0 = vadd.f32 %v6521_v62, %v3082_v38  ;;  %v3036_v36 = vadd.f32 %v3035_v49, %v2948_v8  ;;  %v4268_v61 = vadd.f32 %v4267_v15, %v4266_v22  ;;  %v4415_v27 = vpop.f32.mrf.mxu1 }
 0x27b   :  { %v4269_v54 = vpop.f32.mrf.mxu0 }
 0x27c   :  { %v3115_v39 = vmax.f32 %v3102_v0, 0.0  ;;  %v3083_v5 = vmax.f32 %v6370_v34, %v3036_v36  ;;  %v2951_v4 = vadd.f32 %v4268_v61, %v2863_v60  ;;  %v3043_v19 = vpop.f32.mrf.mxu1  ;;  %v4225_v60 = vadd.f32 %v6482_v25, %v6478_v55  ;;  %v6734_v55 = vld [vmem:[#allocation8_spill] sm:$0xff]  ;;  %v6735_v25 = vld [vmem:[#allocation10_spill] sm:$0xff] }
 0x27d   :  { %v4270_v63 = vpop.f32.mrf.mxu0 }
 0x27e   :  { %3129 = vst.msk [vmem:[%s6644_s3 + $0x8] sm:$0xff] %vm3127_vm2, %v3115_v39  ;;  %v3103_v13 = vadd.f32 %v6521_v62, %v3083_v5  ;;  %v3039_v32 = vadd.f32 %v3038_v31, %v2951_v4  ;;  %v4271_v28 = vadd.f32 %v4270_v63, %v4269_v54  ;;  %v4418_v34 = vpop.f32.mrf.mxu1  ;;  %v2879_v31 = vadd.f32 %v4222_v20, %v4164_v12  ;;  %v6743_v12 = vld [vmem:[#allocation17_spill] sm:$0xff] }
 0x27f   :  { %v4272_v24 = vpop.f32.mrf.mxu0  ;;  %v4170_v54 = vadd.f32 %v6733_v46, %v6484_v57  ;;  %v4228_v39 = vadd.f32 %v6735_v25, %v6734_v55  ;;  %v2884_v4 = vadd.f32 %v4225_v60, %v4167_v50 }
 0x280   :  { %v3116_v1 = vmax.f32 %v3103_v13, 0.0  ;;  %v3084_v59 = vmax.f32 %v6376_v44, %v3039_v32  ;;  %v2956_v6 = vadd.f32 %v4271_v28, %v2868_v37  ;;  %v3046_v41 = vpop.f32.mrf.mxu1  ;;  %v6736_v13 = vld [vmem:[#allocation2_spill] sm:$0xff] }
 0x281   :  { %v4273_v26 = vpop.f32.mrf.mxu0  ;;  %v2887_v34 = vadd.f32 %v4228_v39, %v4170_v54  ;;  %v6750_v39 = vld [vmem:[#allocation5_spill] sm:$0xff] }
 0x282   :  { %3130 = vst.msk [vmem:[%s6644_s3 + $0x10] sm:$0xff] %vm3127_vm2, %v3116_v1  ;;  %v3104_v35 = vadd.f32 %v6521_v62, %v3084_v59  ;;  %v3044_v49 = vadd.f32 %v3043_v19, %v2956_v6  ;;  %v4274_v23 = vadd.f32 %v4273_v26, %v4272_v24  ;;  %v4419_v44 = vpop.f32.mrf.mxu1  ;;  %v6737_v24 = vld [vmem:[#allocation11_spill] sm:$0xff]  ;;  %v6738_v1 = vld [vmem:[#allocation13_spill] sm:$0xff] }
 0x283   :  { %v4275_v9 = vpop.f32.mrf.mxu0  ;;  %v4173_v59 = vadd.f32 %v6738_v1, %v6737_v24 }
 0x284   :  { %v3117_v51 = vmax.f32 %v3104_v35, 0.0  ;;  %v3085_v30 = vmax.f32 %v6382_v58, %v3044_v49  ;;  %v2959_v53 = vadd.f32 %v4274_v23, %v2871_v10  ;;  %v3051_v16 = vpop.f32.mrf.mxu1  ;;  %v6740_v10 = vld [vmem:[#allocation14_spill] sm:$0xff] }
 0x285   :  { %v4276_v42 = vpop.f32.mrf.mxu0 }
 0x286   :  { %3131 = vst.msk [vmem:[%s6644_s3 + $0x18] sm:$0xff] %vm3127_vm2, %v3117_v51  ;;  %v3105_v43 = vadd.f32 %v6521_v62, %v3085_v30  ;;  %v3047_v29 = vadd.f32 %v3046_v41, %v2959_v53  ;;  %v4277_v22 = vadd.f32 %v4276_v42, %v4275_v9  ;;  %v4422_v58 = vpop.f32.mrf.mxu1  ;;  %v6739_v41 = vld [vmem:[#allocation12_spill] sm:$0xff]  ;;  %v6741_v9 = vld [vmem:[#allocation3_spill] sm:$0xff] }
 0x287   :  { %v4278_v33 = vpop.f32.mrf.mxu0  ;;  %v4231_v47 = vadd.f32 %v6740_v10, %v6739_v41  ;;  %v6744_v42 = vld [vmem:[#allocation16_spill] sm:$0xff] }
 0x288   :  { %v3118_v38 = vmax.f32 %v3105_v43, 0.0  ;;  %v3086_v8 = vmax.f32 %v6388_v21, %v3047_v29  ;;  %v2964_v40 = vadd.f32 %v4277_v22, %v2876_v7  ;;  %v3054_v17 = vpop.f32.mrf.mxu1  ;;  %v6745_v7 = vld [vmem:[#allocation18_spill] sm:$0xff] }
 0x289   :  { %v4279_v52 = vpop.f32.mrf.mxu0  ;;  %v4234_v43 = vadd.f32 %v6745_v7, %v6744_v42  ;;  %v2892_v22 = vadd.f32 %v4231_v47, %v4173_v59  ;;  %v6752_v47 = vld [vmem:[#allocation7_spill] sm:$0xff] }
 0x28a   :  { %3132 = vst.msk [vmem:[%s6644_s3 + $0x20] sm:$0xff] %vm3127_vm2, %v3118_v38  ;;  %v3106_v48 = vadd.f32 %v6521_v62, %v3086_v8  ;;  %v3052_v15 = vadd.f32 %v3051_v16, %v2964_v40  ;;  %v4280_v2 = vadd.f32 %v4279_v52, %v4278_v33  ;;  %v4423_v21 = vpop.f32.mrf.mxu1  ;;  %v6742_v16 = vld [vmem:[#allocation15_spill] sm:$0xff] }
 0x28b   :  { %v4281_v0 = vpop.f32.mrf.mxu0  ;;  %v4176_v20 = vadd.f32 %v6743_v12, %v6742_v16 }
 0x28c   :  { %v3119_v36 = vmax.f32 %v3106_v48, 0.0  ;;  %v3087_v61 = vmax.f32 %v6394_v14, %v3052_v15  ;;  %v2967_v27 = vadd.f32 %v4280_v2, %v2879_v31  ;;  %v3059_v56 = vpop.f32.mrf.mxu1  ;;  %v6746_v31 = vld [vmem:[#allocation4_spill] sm:$0xff]  ;;  %v6747_v15 = vld [vmem:[#allocation19_spill] sm:$0xff]  ;;  %v6748_v2 = vld [vmem:[#allocation21_spill] sm:$0xff] }
 0x28d   :  { %v4282_v5 = vpop.f32.mrf.mxu0  ;;  %v2895_v48 = vadd.f32 %v4234_v43, %v4176_v20  ;;  %v4179_v21 = vadd.f32 %v6748_v2, %v6747_v15 }
 0x28e   :  { %3133 = vst.msk [vmem:[%s6644_s3 + $0x28] sm:$0xff] %vm3127_vm2, %v3119_v36  ;;  %v3107_v19 = vadd.f32 %v6521_v62, %v3087_v61  ;;  %v3055_v3 = vadd.f32 %v3054_v17, %v2967_v27  ;;  %v4283_v11 = vadd.f32 %v4282_v5, %v4281_v0  ;;  %v4426_v14 = vpop.f32.mrf.mxu1  ;;  %v6749_v36 = vld [vmem:[#allocation20_spill] sm:$0xff] }
 0x28f   :  { %v4284_v63 = vpop.f32.mrf.mxu0  ;;  %v4237_v61 = vadd.f32 %v6514_v45, %v6749_v36 }
 0x290   :  { %v3120_v37 = vmax.f32 %v3107_v19, 0.0  ;;  %v3088_v32 = vmax.f32 %v6736_v13, %v3055_v3  ;;  %v2972_v57 = vadd.f32 %v4283_v11, %v2884_v4  ;;  %v3062_v28 = vpop.f32.mrf.mxu1 }
 0x291   :  { %v4285_v6 = vpop.f32.mrf.mxu0  ;;  %v2900_v11 = vadd.f32 %v4237_v61, %v4179_v21 }
 0x292   :  { %3134 = vst.msk [vmem:[%s6644_s3 + $0x30] sm:$0xff] %vm3127_vm2, %v3120_v37  ;;  %v3108_v26 = vadd.f32 %v6521_v62, %v3088_v32  ;;  %v3060_v18 = vadd.f32 %v3059_v56, %v2972_v57  ;;  %v4286_v35 = vadd.f32 %v4285_v6, %v4284_v63  ;;  %v4427_v49 = vpop.f32.mrf.mxu1  ;;  %v6751_v57 = vld [vmem:[#allocation6_spill] sm:$0xff] }
 0x293   :  { %v4287_v23 = vpop.f32.mrf.mxu0 }
 0x294   :  { %v3121_v44 = vmax.f32 %v3108_v26, 0.0  ;;  %v3089_v51 = vmax.f32 %v6741_v9, %v3060_v18  ;;  %v2975_v30 = vadd.f32 %v4286_v35, %v2887_v34  ;;  %v3067_v53 = vpop.f32.mrf.mxu1 }
 0x295   :  { %v4288_v29 = vpop.f32.mrf.mxu0 }
 0x296   :  { %3135 = vst.msk [vmem:[%s6644_s3 + $0x38] sm:$0xff] %vm3127_vm2, %v3121_v44  ;;  %v3109_v58 = vadd.f32 %v6521_v62, %v3089_v51  ;;  %v3063_v33 = vadd.f32 %v3062_v28, %v2975_v30  ;;  %v4289_v38 = vadd.f32 %v4288_v29, %v4287_v23  ;;  %v4430_v8 = vpop.f32.mrf.mxu1 }
 0x297   :  { %v4290_v40 = vpop.f32.mrf.mxu0 }
 0x298   :  { %v3122_v17 = vmax.f32 %v3109_v58, 0.0  ;;  %v3090_v50 = vmax.f32 %v6746_v31, %v3063_v33  ;;  %v2980_v52 = vadd.f32 %v4289_v38, %v2892_v22  ;;  %v3070_v60 = vpop.f32.mrf.mxu1 }
 0x299   :  { %v4291_v0 = vpop.f32.mrf.mxu0 }
 0x29a   :  { %3136 = vst.msk [vmem:[%s6644_s3 + $0x40] sm:$0xff] %vm3127_vm2, %v3122_v17  ;;  %v3110_v27 = vadd.f32 %v6521_v62, %v3090_v50  ;;  %v3068_v56 = vadd.f32 %v3067_v53, %v2980_v52  ;;  %v4292_v46 = vadd.f32 %v4291_v0, %v4290_v40  ;;  %v4431_v54 = vpop.f32.mrf.mxu1 }
 0x29b   :  { %v4293_v55 = vpop.f32.mrf.mxu0 }
 0x29c   :  { %v3123_v25 = vmax.f32 %v3110_v27, 0.0  ;;  %v3091_v5 = vmax.f32 %v6750_v39, %v3068_v56  ;;  %v2983_v4 = vadd.f32 %v4292_v46, %v2895_v48  ;;  %v3075_v19 = vpop.f32.mrf.mxu1 }
 0x29d   :  { %v4294_v3 = vpop.f32.mrf.mxu0 }
 0x29e   :  { %3137 = vst.msk [vmem:[%s6644_s3 + $0x48] sm:$0xff] %vm3127_vm2, %v3123_v25  ;;  %v3111_v45 = vadd.f32 %v6521_v62, %v3091_v5  ;;  %v3071_v14 = vadd.f32 %v3070_v60, %v2983_v4  ;;  %v4295_v63 = vadd.f32 %v4294_v3, %v4293_v55  ;;  %v4434_v37 = vpop.f32.mrf.mxu1 }
 0x29f   :  { %v4296_v13 = vpop.f32.mrf.mxu0 }
 0x2a0   :  { %v3124_v32 = vmax.f32 %v3111_v45, 0.0  ;;  %v3092_v28 = vmax.f32 %v6751_v57, %v3071_v14  ;;  %v2988_v34 = vadd.f32 %v4295_v63, %v2900_v11  ;;  %v3078_v24 = vpop.f32.mrf.mxu1 }
 0x2a1   :  { %v4297_v1 = vpop.f32.mrf.mxu0 }
 0x2a2   :  { %3138 = vst.msk [vmem:[%s6644_s3 + $0x50] sm:$0xff] %vm3127_vm2, %v3124_v32  ;;  %v3112_v59 = vadd.f32 %v6521_v62, %v3092_v28  ;;  %v3076_v6 = vadd.f32 %v3075_v19, %v2988_v34  ;;  %v4435_v41 = vpop.f32.mrf.mxu1 }
 0x2a4   :  { %v3125_v10 = vmax.f32 %v3112_v59, 0.0  ;;  %v3093_v26 = vmax.f32 %v6752_v47, %v3076_v6 }
 0x2a6   :  { %3139 = vst.msk [vmem:[%s6644_s3 + $0x58] sm:$0xff] %vm3127_vm2, %v3125_v10  ;;  %v3113_v18 = vadd.f32 %v6521_v62, %v3093_v26 }
 0x2a8   :  { %v3126_v35 = vmax.f32 %v3113_v18, 0.0 }
 0x2aa   :  { %3140 = vst.msk [vmem:[%s6644_s3 + $0x60] sm:$0xff] %vm3127_vm2, %v3126_v35 }

// kernel: forward.7
= control target key start
LH: loop header
LB: loop body
LE: loop exit
PB: predicated region body
PF: predicated region fallthrough
CT: control target
= control target key end

     0   :  { %vm262_vm0 = vcmask 80896   ;;  %s374_s1 = inlined_call_operand.vmem [shape: bf16[10,1024], index: 1, kind: input, shape index: {}]   ;;  %s375_s0 = inlined_call_operand.vmem [shape: bf16[8,1024], index: 0, kind: input, shape index: {}]   ;;  %s376_s2 = inlined_call_operand.vmem [shape: f32[1,10], index: 2, kind: input, shape index: {}]   ;;  %s377_s3 = inlined_call_operand.vmem [shape: f32[8,10], index: 3, kind: output, shape index: {}]  }
   0x1   :  { %v19_v0 = vld [vmem:[%s374_s1] sm:$0xff]  ;;  %v20_v2 = vld [vmem:[%s374_s1 + $0x8] sm:$0xff]  ;;  %v21_v11 = vld [vmem:[%s374_s1 + $0x10] sm:$0xff] }
   0x2   :  { %v23_v1 = vld [vmem:[%s374_s1 + $0x20] sm:$0x11]  ;;  %v24_v4 = vld [vmem:[%s374_s1 + $0x28] sm:$0x11]  ;;  %v25_v12 = vld [vmem:[%s374_s1 + $0x30] sm:$0x11] }
   0x3   :  { %v290_v3 = vcombine.high %v19_v0, %v23_v1  ;;  %v289_v5 = vcombine.low %v19_v0, %v23_v1  ;;  %v15_v6 = vld [vmem:[%s375_s0] sm:$0xff]  ;;  %v16_v7 = vld [vmem:[%s375_s0 + $0x8] sm:$0xff]  ;;  %v292_v8 = vcombine.high %v20_v2, %v24_v4  ;;  %v291_v9 = vcombine.low %v20_v2, %v24_v4  ;;  %v22_v13 = vld [vmem:[%s374_s1 + $0x18] sm:$0xff] }
   0x4   :  { %v282_v10 = vcombine.high %v15_v6, %v15_v6  ;;  %v284_v14 = vcombine.high %v16_v7, %v16_v7  ;;  %v294_v15 = vcombine.high %v21_v11, %v25_v12  ;;  %v26_v16 = vld [vmem:[%s374_s1 + $0x38] sm:$0x11]  ;;  %v17_v18 = vld [vmem:[%s375_s0 + $0x10] sm:$0xff]  ;;  %v281_v19 = vcombine.low %v15_v6, %v15_v6  ;;  %v280_v28 = vld [vmem:[%s376_s2] ss:$0 sm:$0xff] }
   0x5   :  { %116 = vmatprep.subr.bf16.mxu0 %v290_v3  ;;  %156 = vmatprep.subr.bf16.mxu1 %v292_v8  ;;  %v296_v17 = vcombine.high %v22_v13, %v26_v16  ;;  %v18_v20 = vld [vmem:[%s375_s0 + $0x18] sm:$0xff]  ;;  %v283_v21 = vcombine.low %v16_v7, %v16_v7  ;;  %v293_v22 = vcombine.low %v21_v11, %v25_v12 }
   0x6   :  { %117 = vmatpush1.bf16.xpose.msra.mxu0 %v289_v5  ;;  %157 = vmatpush1.bf16.xpose.msra.mxu1 %v291_v9  ;;  %v295_v23 = vcombine.low %v22_v13, %v26_v16  ;;  %v286_v24 = vcombine.high %v17_v18, %v17_v18  ;;  %v288_v25 = vcombine.high %v18_v20, %v18_v20 }
   0x7   :  { %134 = vmatprep.mubr.bf16.mxu0 %v282_v10  ;;  %174 = vmatprep.mubr.bf16.mxu1 %v284_v14  ;;  %v285_v26 = vcombine.low %v17_v18, %v17_v18  ;;  %v287_v27 = vcombine.low %v18_v20, %v18_v20 }
   0x8   :  { %196 = vmatprep.subr.bf16.mxu0 %v294_v15  ;;  %236 = vmatprep.subr.bf16.mxu1 %v296_v17 }
   0xd   :  { %135 = vmatmul.mubr.bf16.vlgmr.msra.gmra.mxu0 %v281_v19  ;;  %175 = vmatmul.mubr.bf16.vlgmr.msra.gmra.mxu1 %v283_v21 }
   0xe   :  { %197 = vmatpush1.bf16.xpose.msra.mxu0 %v293_v22  ;;  %237 = vmatpush1.bf16.xpose.msra.mxu1 %v295_v23 }
   0xf   :  { %214 = vmatprep.mubr.bf16.mxu0 %v286_v24  ;;  %254 = vmatprep.mubr.bf16.mxu1 %v288_v25 }
  0x15   :  { %215 = vmatmul.mubr.bf16.vlgmr.msra.gmra.mxu0 %v285_v26  ;;  %255 = vmatmul.mubr.bf16.vlgmr.msra.gmra.mxu1 %v287_v27 }
  0xcd   :  { %v136_v29 = vpop.f32.mrf.mxu0  ;;  %v176_v30 = vpop.f32.mrf.mxu1 }
  0xce   :  { %v137_v32 = vadd.f32 %v280_v28, %v136_v29 }
  0xcf   :  { %v138_v31 = vpop.f32.mrf.mxu0  ;;  %v178_v33 = vpop.f32.mrf.mxu1 }
  0xd0   :  { %v177_v37 = vadd.f32 %v176_v30, %v137_v32 }
  0xd1   :  { %v139_v34 = vpop.f32.mrf.mxu0  ;;  %v179_v35 = vpop.f32.mrf.mxu1 }
  0xd3   :  { %v140_v36 = vpop.f32.mrf.mxu0  ;;  %v180_v38 = vpop.f32.mrf.mxu1 }
  0xd5   :  { %v216_v39 = vpop.f32.mrf.mxu0  ;;  %v256_v41 = vpop.f32.mrf.mxu1 }
  0xd6   :  { %v217_v40 = vadd.f32 %v216_v39, %v177_v37 }
  0xd7   :  { %v218_v42 = vpop.f32.mrf.mxu0  ;;  %v258_v44 = vpop.f32.mrf.mxu1 }
  0xd8   :  { %v257_v43 = vadd.f32 %v256_v41, %v217_v40 }
  0xd9   :  { %v219_v45 = vpop.f32.mrf.mxu0  ;;  %v259_v46 = vpop.f32.mrf.mxu1 }
  0xda   :  { %v263_v47 = vsel %vm262_vm0, %v257_v43, -inf }
  0xdb   :  { %v220_v48 = vpop.f32.mrf.mxu0  ;;  %264 = vmax.xlane.f32.xlu0 %v263_v47  ;;  %v260_v49 = vpop.f32.mrf.mxu1 }
 0x164   :  { %v265_v50 = vpop.xlane.xlu0 %264 }
 0x165   :  { %v266_v51 = vsub.f32 %v257_v43, %v265_v50 }
 0x167   :  { %v267_v52 = vmul.f32 1.442695, %v266_v51 }
 0x169   :  { %305 = vpow2.f32 %v267_v52 }
 0x176   :  { %v306_v53 = vpop.eup %305 }
 0x177   :  { %v269_v54 = vsel %vm262_vm0, %v306_v53, 0.0 }
 0x178   :  { %270 = vadd.xlane.f32.xlu0 %v269_v54 }
 0x201   :  { %v271_v55 = vpop.xlane.xlu0 %270 }
 0x202   :  { %307 = vlog2.f32 %v271_v55 }
 0x20f   :  { %v308_v56 = vpop.eup %307 }
 0x210   :  { %v273_v57 = vmul.f32 0.6931472, %v308_v56 }
 0x212   :  { %v274_v58 = vsub.f32 %v266_v51, %v273_v57 }
 0x214   :  { %275 = vst.msk [vmem:[%s377_s3] sm:$0xff] %vm262_vm0, %v274_v58 }

// kernel: forward.6
= control target key start
LH: loop header
LB: loop body
LE: loop exit
PB: predicated region body
PF: predicated region fallthrough
CT: control target
= control target key end

     0   :  { %vm9821_vm0 = vcmask 523264   ;;  %s21717_s1 = inlined_call_operand.vmem [shape: bf16[1024,3136], index: 1, kind: input, shape index: {}]   ;;  %s21718_s0 = inlined_call_operand.vmem [shape: bf16[8,3136], index: 0, kind: input, shape index: {}]   ;;  %s21719_s2 = inlined_call_operand.vmem [shape: f32[1,1024], index: 2, kind: input, shape index: {}]   ;;  %s21720_s3 = inlined_call_operand.vmem [shape: f32[8,1024], index: 3, kind: output, shape index: {}]  }
   0x1   :  { %v13902_v0 = vld [vmem:[%s21717_s1 + $0x57c] ss:$100 sps:$4 sm:$0xff]   ;;  %v13904_v1 = vld [vmem:[%s21717_s1 + $0x584] ss:$100 sps:$4 sm:$0xff]   ;;  %v13908_v4 = vld [vmem:[%s21717_s1 + $0x4b4] ss:$100 sps:$4 sm:$0xff]  }
   0x2   :  { %10017 = vmatprep.subr.bf16.mxu0 %v13902_v0  ;;  %v13906_v2 = vld [vmem:[%s21717_s1 + $0x578] ss:$100 sps:$4 sm:$0xff]   ;;  %v13907_v3 = vld [vmem:[%s21717_s1 + $0x580] ss:$100 sps:$4 sm:$0xff]   ;;  %10058 = vmatprep.subr.bf16.mxu1 %v13904_v1  ;;  %v13912_v6 = vld [vmem:[%s21717_s1 + $0x4b0] ss:$100 sps:$4 sm:$0xff]  }
   0x3   :  { %10018 = vmatpush1.bf16.xpose.msra.mxu0 %v13906_v2  ;;  %10059 = vmatpush1.bf16.xpose.msra.mxu1 %v13907_v3  ;;  %v13910_v5 = vld [vmem:[%s21717_s1 + $0x4bc] ss:$100 sps:$4 sm:$0xff]   ;;  %v13914_v8 = vld [vmem:[%s21717_s1 + $0x3ec] ss:$100 sps:$4 sm:$0xff]   ;;  %v13916_v9 = vld [vmem:[%s21717_s1 + $0x3f4] ss:$100 sps:$4 sm:$0xff]  }
   0x4   :  { %10019 = vmatprep.subr.bf16.mxu0 %v13908_v4  ;;  %10060 = vmatprep.subr.bf16.mxu1 %v13910_v5  ;;  %v13913_v7 = vld [vmem:[%s21717_s1 + $0x4b8] ss:$100 sps:$4 sm:$0xff]   ;;  %v13918_v10 = vld [vmem:[%s21717_s1 + $0x3e8] ss:$100 sps:$4 sm:$0xff]   ;;  %v13919_v11 = vld [vmem:[%s21717_s1 + $0x3f0] ss:$100 sps:$4 sm:$0xff]  }
   0x5   :  { %v13920_v12 = vld [vmem:[%s21717_s1 + $0x324] ss:$100 sps:$4 sm:$0xff]   ;;  %v13922_v13 = vld [vmem:[%s21717_s1 + $0x32c] ss:$100 sps:$4 sm:$0xff]   ;;  %v13926_v16 = vld [vmem:[%s21717_s1 + $0x25c] ss:$100 sps:$4 sm:$0xff]  }
   0x6   :  { %v13924_v14 = vld [vmem:[%s21717_s1 + $0x320] ss:$100 sps:$4 sm:$0xff]   ;;  %v13925_v15 = vld [vmem:[%s21717_s1 + $0x328] ss:$100 sps:$4 sm:$0xff]   ;;  %v13930_v18 = vld [vmem:[%s21717_s1 + $0x258] ss:$100 sps:$4 sm:$0xff]  }
   0x7   :  { %v13928_v17 = vld [vmem:[%s21717_s1 + $0x264] ss:$100 sps:$4 sm:$0xff]   ;;  %v13932_v20 = vld [vmem:[%s21717_s1 + $0x194] ss:$100 sps:$4 sm:$0xff]   ;;  %v13934_v21 = vld [vmem:[%s21717_s1 + $0x19c] ss:$100 sps:$4 sm:$0xff]  }
   0x8   :  { %v13931_v19 = vld [vmem:[%s21717_s1 + $0x260] ss:$100 sps:$4 sm:$0xff]   ;;  %v13936_v22 = vld [vmem:[%s21717_s1 + $0x190] ss:$100 sps:$4 sm:$0xff]   ;;  %v13937_v23 = vld [vmem:[%s21717_s1 + $0x198] ss:$100 sps:$4 sm:$0xff]  }
   0x9   :  { %v13938_v24 = vld [vmem:[%s21717_s1 + $0xcc] ss:$100 sps:$4 sm:$0xff]   ;;  %v13940_v25 = vld [vmem:[%s21717_s1 + $0xd4] ss:$100 sps:$4 sm:$0xff]   ;;  %v16402_v26 = vld [vmem:[%s21718_s0] sm:$0xff] }
   0xa   :  { %v16406_v27 = vcombine.high %v16402_v26, %v16402_v26  ;;  %v16411_v28 = vld [vmem:[%s21718_s0 + $0x8] sm:$0xff]  ;;  %v13943_v31 = vld [vmem:[%s21717_s1 + $0xd0] ss:$100 sps:$4 sm:$0xff]   ;;  %v13948_v34 = vld [vmem:[%s21717_s1] ss:$100 sps:$4 sm:$0xff]  }
   0xb   :  { %10020 = vmatpush1.bf16.xpose.msra.mxu0 %v13912_v6  ;;  %10061 = vmatpush1.bf16.xpose.msra.mxu1 %v13913_v7  ;;  %v16415_v29 = vcombine.high %v16411_v28, %v16411_v28  ;;  %v13942_v30 = vld [vmem:[%s21717_s1 + $0xc8] ss:$100 sps:$4 sm:$0xff]   ;;  %v13950_v36 = vld [vmem:[%s21717_s1 + $0xbbc] ss:$100 sps:$4 sm:$0xff]   ;;  %v13956_v40 = vld [vmem:[%s21717_s1 + $0xaf4] ss:$100 sps:$4 sm:$0xff]  }
   0xc   :  { %10021 = vmatprep.subr.bf16.mxu0 %v13914_v8  ;;  %10062 = vmatprep.subr.bf16.mxu1 %v13916_v9  ;;  %v13944_v32 = vld [vmem:[%s21717_s1 + $0x4] ss:$100 sps:$4 sm:$0xff]   ;;  %v13946_v33 = vld [vmem:[%s21717_s1 + $0xc] ss:$100 sps:$4 sm:$0xff]   ;;  %v13954_v38 = vld [vmem:[%s21717_s1 + $0xbb8] ss:$100 sps:$4 sm:$0xff]  }
   0xd   :  { %10049 = vmatprep.mubr.bf16.mxu0 %v16406_v27  ;;  %10090 = vmatprep.mubr.bf16.mxu1 %v16415_v29  ;;  %v13949_v35 = vld [vmem:[%s21717_s1 + $0x8] ss:$100 sps:$4 sm:$0xff]   ;;  %v13955_v39 = vld [vmem:[%s21717_s1 + $0xbc0] ss:$100 sps:$4 sm:$0xff]   ;;  %v13960_v42 = vld [vmem:[%s21717_s1 + $0xaf0] ss:$100 sps:$4 sm:$0xff]  }
   0xe   :  { %v13952_v37 = vld [vmem:[%s21717_s1 + $0xbc4] ss:$100 sps:$4 sm:$0xff]   ;;  %v13958_v41 = vld [vmem:[%s21717_s1 + $0xafc] ss:$100 sps:$4 sm:$0xff]   ;;  %v13962_v44 = vld [vmem:[%s21717_s1 + $0xa2c] ss:$100 sps:$4 sm:$0xff]  }
   0xf   :  { %v13961_v43 = vld [vmem:[%s21717_s1 + $0xaf8] ss:$100 sps:$4 sm:$0xff]   ;;  %v13966_v46 = vld [vmem:[%s21717_s1 + $0xa28] ss:$100 sps:$4 sm:$0xff]   ;;  %v13967_v47 = vld [vmem:[%s21717_s1 + $0xa30] ss:$100 sps:$4 sm:$0xff]  }
  0x10   :  { %v13964_v45 = vld [vmem:[%s21717_s1 + $0xa34] ss:$100 sps:$4 sm:$0xff]   ;;  %v13968_v48 = vld [vmem:[%s21717_s1 + $0x964] ss:$100 sps:$4 sm:$0xff]   ;;  %v13970_v49 = vld [vmem:[%s21717_s1 + $0x96c] ss:$100 sps:$4 sm:$0xff]  }
  0x11   :  { %v13972_v50 = vld [vmem:[%s21717_s1 + $0x960] ss:$100 sps:$4 sm:$0xff]   ;;  %v13973_v51 = vld [vmem:[%s21717_s1 + $0x968] ss:$100 sps:$4 sm:$0xff]   ;;  %v13978_v54 = vld [vmem:[%s21717_s1 + $0x898] ss:$100 sps:$4 sm:$0xff]  }
  0x12   :  { %v13974_v52 = vld [vmem:[%s21717_s1 + $0x89c] ss:$100 sps:$4 sm:$0xff]   ;;  %v13976_v53 = vld [vmem:[%s21717_s1 + $0x8a4] ss:$100 sps:$4 sm:$0xff]   ;;  %v13980_v56 = vld [vmem:[%s21717_s1 + $0x7d4] ss:$100 sps:$4 sm:$0xff]  }
  0x13   :  { %10022 = vmatpush1.bf16.xpose.msra.mxu0 %v13918_v10  ;;  %10063 = vmatpush1.bf16.xpose.msra.mxu1 %v13919_v11  ;;  %v13979_v55 = vld [vmem:[%s21717_s1 + $0x8a0] ss:$100 sps:$4 sm:$0xff]   ;;  %v13984_v58 = vld [vmem:[%s21717_s1 + $0x7d0] ss:$100 sps:$4 sm:$0xff]   ;;  %v13985_v59 = vld [vmem:[%s21717_s1 + $0x7d8] ss:$100 sps:$4 sm:$0xff]   ;;  %v16557_v10 = vcombine.low %v16402_v26, %v16402_v26  ;;  %v16561_v11 = vcombine.low %v16411_v28, %v16411_v28 }
  0x14   :  { %10023 = vmatprep.subr.bf16.mxu0 %v13920_v12  ;;  %10064 = vmatprep.subr.bf16.mxu1 %v13922_v13  ;;  %v13982_v57 = vld [vmem:[%s21717_s1 + $0x7dc] ss:$100 sps:$4 sm:$0xff]   ;;  %v13986_v60 = vld [vmem:[%s21717_s1 + $0x70c] ss:$100 sps:$4 sm:$0xff]   ;;  %v13988_v61 = vld [vmem:[%s21717_s1 + $0x714] ss:$100 sps:$4 sm:$0xff]  }
  0x15   :  { %v13990_v62 = vld [vmem:[%s21717_s1 + $0x708] ss:$100 sps:$4 sm:$0xff]   ;;  %v13991_v63 = vld [vmem:[%s21717_s1 + $0x710] ss:$100 sps:$4 sm:$0xff]   ;;  %v13996_v2 = vld [vmem:[%s21717_s1 + $0x640] ss:$100 sps:$4 sm:$0xff]  }
  0x16   :  { %v13992_v0 = vld [vmem:[%s21717_s1 + $0x644] ss:$100 sps:$4 sm:$0xff]   ;;  %v13994_v1 = vld [vmem:[%s21717_s1 + $0x64c] ss:$100 sps:$4 sm:$0xff]   ;;  %v14007_v5 = vld [vmem:[%s21717_s1 + $0x594] ss:$100 sps:$4 sm:$0xff]  }
  0x17   :  { %v13997_v3 = vld [vmem:[%s21717_s1 + $0x648] ss:$100 sps:$4 sm:$0xff]   ;;  %v16542_v6 = vld [vmem:[%s21718_s0 + $0x10] sm:$0xff]  ;;  %v16547_v7 = vld [vmem:[%s21718_s0 + $0x18] sm:$0xff] }
  0x18   :  { %v14004_v4 = vld [vmem:[%s21717_s1 + $0x58c] ss:$100 sps:$4 sm:$0xff]   ;;  %v14010_v12 = vld [vmem:[%s21717_s1 + $0x4c4] ss:$100 sps:$4 sm:$0xff]   ;;  %v14031_v28 = vld [vmem:[%s21717_s1 + $0x274] ss:$100 sps:$4 sm:$0xff]  }
  0x19   :  { %v14002_v8 = vld [vmem:[%s21717_s1 + $0x588] ss:$100 sps:$4 sm:$0xff]   ;;  %v14005_v9 = vld [vmem:[%s21717_s1 + $0x590] ss:$100 sps:$4 sm:$0xff]  }
  0x1a   :  { %v14013_v13 = vld [vmem:[%s21717_s1 + $0x4cc] ss:$100 sps:$4 sm:$0xff]  }
  0x1b   :  { %10024 = vmatpush1.bf16.xpose.msra.mxu0 %v13924_v14  ;;  %10065 = vmatpush1.bf16.xpose.msra.mxu1 %v13925_v15  ;;  %v16571_v14 = vcombine.high %v16542_v6, %v16542_v6  ;;  %v16575_v15 = vcombine.high %v16547_v7, %v16547_v7  ;;  %v14028_v26 = vld [vmem:[%s21717_s1 + $0x26c] ss:$100 sps:$4 sm:$0xff]  }
  0x1c   :  { %10025 = vmatprep.subr.bf16.mxu0 %v13926_v16  ;;  %10066 = vmatprep.subr.bf16.mxu1 %v13928_v17  ;;  %v14008_v16 = vld [vmem:[%s21717_s1 + $0x4c0] ss:$100 sps:$4 sm:$0xff]   ;;  %v14011_v17 = vld [vmem:[%s21717_s1 + $0x4c8] ss:$100 sps:$4 sm:$0xff]  }
  0x23   :  { %10026 = vmatpush1.bf16.xpose.msra.mxu0 %v13930_v18  ;;  %10067 = vmatpush1.bf16.xpose.msra.mxu1 %v13931_v19  ;;  %v14016_v18 = vld [vmem:[%s21717_s1 + $0x3fc] ss:$100 sps:$4 sm:$0xff]   ;;  %v14019_v19 = vld [vmem:[%s21717_s1 + $0x404] ss:$100 sps:$4 sm:$0xff]  }
  0x24   :  { %10027 = vmatprep.subr.bf16.mxu0 %v13932_v20  ;;  %10068 = vmatprep.subr.bf16.mxu1 %v13934_v21  ;;  %v14014_v20 = vld [vmem:[%s21717_s1 + $0x3f8] ss:$100 sps:$4 sm:$0xff]   ;;  %v14017_v21 = vld [vmem:[%s21717_s1 + $0x400] ss:$100 sps:$4 sm:$0xff]  }
  0x2b   :  { %10028 = vmatpush1.bf16.xpose.msra.mxu0 %v13936_v22  ;;  %10069 = vmatpush1.bf16.xpose.msra.mxu1 %v13937_v23  ;;  %v14022_v22 = vld [vmem:[%s21717_s1 + $0x334] ss:$100 sps:$4 sm:$0xff]   ;;  %v14025_v23 = vld [vmem:[%s21717_s1 + $0x33c] ss:$100 sps:$4 sm:$0xff]  }
  0x2c   :  { %10029 = vmatprep.subr.bf16.mxu0 %v13938_v24  ;;  %10070 = vmatprep.subr.bf16.mxu1 %v13940_v25  ;;  %v14020_v24 = vld [vmem:[%s21717_s1 + $0x330] ss:$100 sps:$4 sm:$0xff]   ;;  %v14023_v25 = vld [vmem:[%s21717_s1 + $0x338] ss:$100 sps:$4 sm:$0xff]  }
  0x33   :  { %10030 = vmatpush1.bf16.xpose.msra.mxu0 %v13942_v30  ;;  %10071 = vmatpush1.bf16.xpose.msra.mxu1 %v13943_v31  ;;  %v14026_v30 = vld [vmem:[%s21717_s1 + $0x268] ss:$100 sps:$4 sm:$0xff]   ;;  %v14029_v31 = vld [vmem:[%s21717_s1 + $0x270] ss:$100 sps:$4 sm:$0xff]  }
  0x34   :  { %10031 = vmatprep.subr.bf16.mxu0 %v13944_v32  ;;  %10072 = vmatprep.subr.bf16.mxu1 %v13946_v33  ;;  %v14034_v32 = vld [vmem:[%s21717_s1 + $0x1a4] ss:$100 sps:$4 sm:$0xff]   ;;  %v14037_v33 = vld [vmem:[%s21717_s1 + $0x1ac] ss:$100 sps:$4 sm:$0xff]  }
  0x3b   :  { %10032 = vmatpush1.bf16.xpose.msra.mxu0 %v13948_v34  ;;  %10073 = vmatpush1.bf16.xpose.msra.mxu1 %v13949_v35  ;;  %v14032_v34 = vld [vmem:[%s21717_s1 + $0x1a0] ss:$100 sps:$4 sm:$0xff]   ;;  %v14035_v35 = vld [vmem:[%s21717_s1 + $0x1a8] ss:$100 sps:$4 sm:$0xff]  }
  0x3c   :  { %10033 = vmatprep.subr.bf16.mxu0 %v13950_v36  ;;  %10074 = vmatprep.subr.bf16.mxu1 %v13952_v37  ;;  %v14040_v36 = vld [vmem:[%s21717_s1 + $0xdc] ss:$100 sps:$4 sm:$0xff]   ;;  %v14043_v37 = vld [vmem:[%s21717_s1 + $0xe4] ss:$100 sps:$4 sm:$0xff]  }
  0x43   :  { %10034 = vmatpush2.bf16.xpose.msra.mxu0 %v13954_v38  ;;  %10075 = vmatpush2.bf16.xpose.msra.mxu1 %v13955_v39  ;;  %v14038_v38 = vld [vmem:[%s21717_s1 + $0xd8] ss:$100 sps:$4 sm:$0xff]   ;;  %v14041_v39 = vld [vmem:[%s21717_s1 + $0xe0] ss:$100 sps:$4 sm:$0xff]  }
  0x44   :  { %10035 = vmatprep.subr.bf16.mxu0 %v13956_v40  ;;  %10076 = vmatprep.subr.bf16.mxu1 %v13958_v41  ;;  %v14046_v40 = vld [vmem:[%s21717_s1 + $0x14] ss:$100 sps:$4 sm:$0xff]   ;;  %v14049_v41 = vld [vmem:[%s21717_s1 + $0x1c] ss:$100 sps:$4 sm:$0xff]  }
  0x4b   :  { %10036 = vmatpush2.bf16.xpose.msra.mxu0 %v13960_v42  ;;  %10077 = vmatpush2.bf16.xpose.msra.mxu1 %v13961_v43  ;;  %v14044_v42 = vld [vmem:[%s21717_s1 + $0x10] ss:$100 sps:$4 sm:$0xff]   ;;  %v14047_v43 = vld [vmem:[%s21717_s1 + $0x18] ss:$100 sps:$4 sm:$0xff]  }
  0x4c   :  { %10037 = vmatprep.subr.bf16.mxu0 %v13962_v44  ;;  %10078 = vmatprep.subr.bf16.mxu1 %v13964_v45  ;;  %v14052_v44 = vld [vmem:[%s21717_s1 + $0xbcc] ss:$100 sps:$4 sm:$0xff]   ;;  %v14055_v45 = vld [vmem:[%s21717_s1 + $0xbd4] ss:$100 sps:$4 sm:$0xff]  }
  0x53   :  { %10038 = vmatpush2.bf16.xpose.msra.mxu0 %v13966_v46  ;;  %10079 = vmatpush2.bf16.xpose.msra.mxu1 %v13967_v47  ;;  %v14050_v46 = vld [vmem:[%s21717_s1 + $0xbc8] ss:$100 sps:$4 sm:$0xff]   ;;  %v14053_v47 = vld [vmem:[%s21717_s1 + $0xbd0] ss:$100 sps:$4 sm:$0xff]  }
  0x54   :  { %10039 = vmatprep.subr.bf16.mxu0 %v13968_v48  ;;  %10080 = vmatprep.subr.bf16.mxu1 %v13970_v49  ;;  %v14058_v48 = vld [vmem:[%s21717_s1 + $0xb04] ss:$100 sps:$4 sm:$0xff]   ;;  %v14061_v49 = vld [vmem:[%s21717_s1 + $0xb0c] ss:$100 sps:$4 sm:$0xff]  }
  0x5b   :  { %10040 = vmatpush2.bf16.xpose.msra.mxu0 %v13972_v50  ;;  %10081 = vmatpush2.bf16.xpose.msra.mxu1 %v13973_v51  ;;  %v14056_v50 = vld [vmem:[%s21717_s1 + $0xb00] ss:$100 sps:$4 sm:$0xff]   ;;  %v14059_v51 = vld [vmem:[%s21717_s1 + $0xb08] ss:$100 sps:$4 sm:$0xff]  }
  0x5c   :  { %10041 = vmatprep.subr.bf16.mxu0 %v13974_v52  ;;  %10082 = vmatprep.subr.bf16.mxu1 %v13976_v53  ;;  %v14064_v52 = vld [vmem:[%s21717_s1 + $0xa3c] ss:$100 sps:$4 sm:$0xff]   ;;  %v14067_v53 = vld [vmem:[%s21717_s1 + $0xa44] ss:$100 sps:$4 sm:$0xff]  }
  0x63   :  { %10042 = vmatpush2.bf16.xpose.msra.mxu0 %v13978_v54  ;;  %10083 = vmatpush2.bf16.xpose.msra.mxu1 %v13979_v55  ;;  %v14062_v54 = vld [vmem:[%s21717_s1 + $0xa38] ss:$100 sps:$4 sm:$0xff]   ;;  %v14065_v55 = vld [vmem:[%s21717_s1 + $0xa40] ss:$100 sps:$4 sm:$0xff]  }
  0x64   :  { %10043 = vmatprep.subr.bf16.mxu0 %v13980_v56  ;;  %10084 = vmatprep.subr.bf16.mxu1 %v13982_v57  ;;  %v14070_v56 = vld [vmem:[%s21717_s1 + $0x974] ss:$100 sps:$4 sm:$0xff]   ;;  %v14073_v57 = vld [vmem:[%s21717_s1 + $0x97c] ss:$100 sps:$4 sm:$0xff]  }
  0x6b   :  { %10044 = vmatpush2.bf16.xpose.msra.mxu0 %v13984_v58  ;;  %10085 = vmatpush2.bf16.xpose.msra.mxu1 %v13985_v59  ;;  %v14068_v58 = vld [vmem:[%s21717_s1 + $0x970] ss:$100 sps:$4 sm:$0xff]   ;;  %v14071_v59 = vld [vmem:[%s21717_s1 + $0x978] ss:$100 sps:$4 sm:$0xff]  }
  0x6c   :  { %10045 = vmatprep.subr.bf16.mxu0 %v13986_v60  ;;  %10086 = vmatprep.subr.bf16.mxu1 %v13988_v61  ;;  %v14076_v60 = vld [vmem:[%s21717_s1 + $0x8ac] ss:$100 sps:$4 sm:$0xff]   ;;  %v14079_v61 = vld [vmem:[%s21717_s1 + $0x8b4] ss:$100 sps:$4 sm:$0xff]  }
  0x73   :  { %10046 = vmatpush2.bf16.xpose.msra.mxu0 %v13990_v62  ;;  %10087 = vmatpush2.bf16.xpose.msra.mxu1 %v13991_v63  ;;  %v14074_v62 = vld [vmem:[%s21717_s1 + $0x8a8] ss:$100 sps:$4 sm:$0xff]   ;;  %v14077_v63 = vld [vmem:[%s21717_s1 + $0x8b0] ss:$100 sps:$4 sm:$0xff]  }
  0x74   :  { %10047 = vmatprep.subr.bf16.mxu0 %v13992_v0  ;;  %10088 = vmatprep.subr.bf16.mxu1 %v13994_v1  ;;  %v14082_v0 = vld [vmem:[%s21717_s1 + $0x7e4] ss:$100 sps:$4 sm:$0xff]   ;;  %v14085_v1 = vld [vmem:[%s21717_s1 + $0x7ec] ss:$100 sps:$4 sm:$0xff]  }
  0x7b   :  { %10048 = vmatpush2.bf16.xpose.msra.mxu0 %v13996_v2  ;;  %10089 = vmatpush2.bf16.xpose.msra.mxu1 %v13997_v3  ;;  %v14080_v2 = vld [vmem:[%s21717_s1 + $0x7e0] ss:$100 sps:$4 sm:$0xff]   ;;  %v14083_v3 = vld [vmem:[%s21717_s1 + $0x7e8] ss:$100 sps:$4 sm:$0xff]  }
  0x7c   :  { %10099 = vmatprep.subr.bf16.mxu0 %v14004_v4  ;;  %10140 = vmatprep.subr.bf16.mxu1 %v14007_v5  ;;  %v14088_v4 = vld [vmem:[%s21717_s1 + $0x71c] ss:$100 sps:$4 sm:$0xff]   ;;  %v14091_v5 = vld [vmem:[%s21717_s1 + $0x724] ss:$100 sps:$4 sm:$0xff]  }
  0x82   :  { %10050 = vmatmul.mubr.bf16.vlgmr.msra.gmra.mxu0 %v16557_v10  ;;  %10091 = vmatmul.mubr.bf16.vlgmr.msra.gmra.mxu1 %v16561_v11 }
  0x83   :  { %10100 = vmatpush1.bf16.xpose.msra.mxu0 %v14002_v8  ;;  %10141 = vmatpush1.bf16.xpose.msra.mxu1 %v14005_v9  ;;  %v14086_v8 = vld [vmem:[%s21717_s1 + $0x718] ss:$100 sps:$4 sm:$0xff]   ;;  %v14089_v9 = vld [vmem:[%s21717_s1 + $0x720] ss:$100 sps:$4 sm:$0xff]  }
  0x84   :  { %10101 = vmatprep.subr.bf16.mxu0 %v14010_v12  ;;  %10142 = vmatprep.subr.bf16.mxu1 %v14013_v13  ;;  %v14094_v12 = vld [vmem:[%s21717_s1 + $0x654] ss:$100 sps:$4 sm:$0xff]   ;;  %v14097_v13 = vld [vmem:[%s21717_s1 + $0x65c] ss:$100 sps:$4 sm:$0xff]  }
  0x85   :  { %10131 = vmatprep.mubr.bf16.mxu0 %v16571_v14  ;;  %10172 = vmatprep.mubr.bf16.mxu1 %v16575_v15 }
  0x8b   :  { %10102 = vmatpush1.bf16.xpose.msra.mxu0 %v14008_v16  ;;  %10143 = vmatpush1.bf16.xpose.msra.mxu1 %v14011_v17  ;;  %v14092_v16 = vld [vmem:[%s21717_s1 + $0x650] ss:$100 sps:$4 sm:$0xff]   ;;  %v14095_v17 = vld [vmem:[%s21717_s1 + $0x658] ss:$100 sps:$4 sm:$0xff]  }
  0x8c   :  { %10103 = vmatprep.subr.bf16.mxu0 %v14016_v18  ;;  %10144 = vmatprep.subr.bf16.mxu1 %v14019_v19  ;;  %v14104_v18 = vld [vmem:[%s21717_s1 + $0x59c] ss:$100 sps:$4 sm:$0xff]   ;;  %v14107_v19 = vld [vmem:[%s21717_s1 + $0x5a4] ss:$100 sps:$4 sm:$0xff]  }
  0x93   :  { %10104 = vmatpush1.bf16.xpose.msra.mxu0 %v14014_v20  ;;  %10145 = vmatpush1.bf16.xpose.msra.mxu1 %v14017_v21  ;;  %v16764_v20 = vld [vmem:[%s21718_s0 + $0x20] sm:$0xff]  ;;  %v16769_v21 = vld [vmem:[%s21718_s0 + $0x28] sm:$0xff] }
  0x94   :  { %10105 = vmatprep.subr.bf16.mxu0 %v14022_v22  ;;  %10146 = vmatprep.subr.bf16.mxu1 %v14025_v23  ;;  %v14102_v22 = vld [vmem:[%s21717_s1 + $0x598] ss:$100 sps:$4 sm:$0xff]   ;;  %v14105_v23 = vld [vmem:[%s21717_s1 + $0x5a0] ss:$100 sps:$4 sm:$0xff]  }
  0x9b   :  { %10106 = vmatpush1.bf16.xpose.msra.mxu0 %v14020_v24  ;;  %10147 = vmatpush1.bf16.xpose.msra.mxu1 %v14023_v25  ;;  %v16779_v24 = vcombine.low %v16542_v6, %v16542_v6  ;;  %v16783_v25 = vcombine.low %v16547_v7, %v16547_v7  ;;  %v16797_v6 = vcombine.high %v16769_v21, %v16769_v21  ;;  %v14108_v7 = vld [vmem:[%s21717_s1 + $0x4d0] ss:$100 sps:$4 sm:$0xff]  }
  0x9c   :  { %10107 = vmatprep.subr.bf16.mxu0 %v14028_v26  ;;  %10148 = vmatprep.subr.bf16.mxu1 %v14031_v28  ;;  %v14110_v26 = vld [vmem:[%s21717_s1 + $0x4d4] ss:$100 sps:$4 sm:$0xff]   ;;  %v14113_v28 = vld [vmem:[%s21717_s1 + $0x4dc] ss:$100 sps:$4 sm:$0xff]  }
  0xa3   :  { %10108 = vmatpush1.bf16.xpose.msra.mxu0 %v14026_v30  ;;  %10149 = vmatpush1.bf16.xpose.msra.mxu1 %v14029_v31  ;;  %v16793_v30 = vcombine.high %v16764_v20, %v16764_v20  ;;  %v14111_v31 = vld [vmem:[%s21717_s1 + $0x4d8] ss:$100 sps:$4 sm:$0xff]  }
  0xa4   :  { %10109 = vmatprep.subr.bf16.mxu0 %v14034_v32  ;;  %10150 = vmatprep.subr.bf16.mxu1 %v14037_v33  ;;  %v14116_v32 = vld [vmem:[%s21717_s1 + $0x40c] ss:$100 sps:$4 sm:$0xff]   ;;  %v14119_v33 = vld [vmem:[%s21717_s1 + $0x414] ss:$100 sps:$4 sm:$0xff]  }
  0xab   :  { %10110 = vmatpush1.bf16.xpose.msra.mxu0 %v14032_v34  ;;  %10151 = vmatpush1.bf16.xpose.msra.mxu1 %v14035_v35  ;;  %v14114_v34 = vld [vmem:[%s21717_s1 + $0x408] ss:$100 sps:$4 sm:$0xff]   ;;  %v14117_v35 = vld [vmem:[%s21717_s1 + $0x410] ss:$100 sps:$4 sm:$0xff]  }
  0xac   :  { %10111 = vmatprep.subr.bf16.mxu0 %v14040_v36  ;;  %10152 = vmatprep.subr.bf16.mxu1 %v14043_v37  ;;  %v14122_v36 = vld [vmem:[%s21717_s1 + $0x344] ss:$100 sps:$4 sm:$0xff]   ;;  %v14125_v37 = vld [vmem:[%s21717_s1 + $0x34c] ss:$100 sps:$4 sm:$0xff]  }
  0xb3   :  { %10112 = vmatpush1.bf16.xpose.msra.mxu0 %v14038_v38  ;;  %10153 = vmatpush1.bf16.xpose.msra.mxu1 %v14041_v39  ;;  %v14120_v38 = vld [vmem:[%s21717_s1 + $0x340] ss:$100 sps:$4 sm:$0xff]   ;;  %v14123_v39 = vld [vmem:[%s21717_s1 + $0x348] ss:$100 sps:$4 sm:$0xff]  }
  0xb4   :  { %10113 = vmatprep.subr.bf16.mxu0 %v14046_v40  ;;  %10154 = vmatprep.subr.bf16.mxu1 %v14049_v41  ;;  %v14128_v40 = vld [vmem:[%s21717_s1 + $0x27c] ss:$100 sps:$4 sm:$0xff]   ;;  %v14131_v41 = vld [vmem:[%s21717_s1 + $0x284] ss:$100 sps:$4 sm:$0xff]  }
  0xbb   :  { %10114 = vmatpush1.bf16.xpose.msra.mxu0 %v14044_v42  ;;  %10155 = vmatpush1.bf16.xpose.msra.mxu1 %v14047_v43  ;;  %v14126_v42 = vld [vmem:[%s21717_s1 + $0x278] ss:$100 sps:$4 sm:$0xff]   ;;  %v14129_v43 = vld [vmem:[%s21717_s1 + $0x280] ss:$100 sps:$4 sm:$0xff]  }
  0xbc   :  { %10115 = vmatprep.subr.bf16.mxu0 %v14052_v44  ;;  %10156 = vmatprep.subr.bf16.mxu1 %v14055_v45  ;;  %v14134_v44 = vld [vmem:[%s21717_s1 + $0x1b4] ss:$100 sps:$4 sm:$0xff]   ;;  %v14137_v45 = vld [vmem:[%s21717_s1 + $0x1bc] ss:$100 sps:$4 sm:$0xff]  }
  0xc3   :  { %10116 = vmatpush2.bf16.xpose.msra.mxu0 %v14050_v46  ;;  %10157 = vmatpush2.bf16.xpose.msra.mxu1 %v14053_v47  ;;  %v14132_v46 = vld [vmem:[%s21717_s1 + $0x1b0] ss:$100 sps:$4 sm:$0xff]   ;;  %v14135_v47 = vld [vmem:[%s21717_s1 + $0x1b8] ss:$100 sps:$4 sm:$0xff]  }
  0xc4   :  { %10117 = vmatprep.subr.bf16.mxu0 %v14058_v48  ;;  %10158 = vmatprep.subr.bf16.mxu1 %v14061_v49  ;;  %v14140_v48 = vld [vmem:[%s21717_s1 + $0xec] ss:$100 sps:$4 sm:$0xff]   ;;  %v14143_v49 = vld [vmem:[%s21717_s1 + $0xf4] ss:$100 sps:$4 sm:$0xff]  }
  0xcb   :  { %10118 = vmatpush2.bf16.xpose.msra.mxu0 %v14056_v50  ;;  %10159 = vmatpush2.bf16.xpose.msra.mxu1 %v14059_v51  ;;  %v14138_v50 = vld [vmem:[%s21717_s1 + $0xe8] ss:$100 sps:$4 sm:$0xff]   ;;  %v14141_v51 = vld [vmem:[%s21717_s1 + $0xf0] ss:$100 sps:$4 sm:$0xff]  }
  0xcc   :  { %10119 = vmatprep.subr.bf16.mxu0 %v14064_v52  ;;  %10160 = vmatprep.subr.bf16.mxu1 %v14067_v53  ;;  %v14146_v52 = vld [vmem:[%s21717_s1 + $0x24] ss:$100 sps:$4 sm:$0xff]   ;;  %v14149_v53 = vld [vmem:[%s21717_s1 + $0x2c] ss:$100 sps:$4 sm:$0xff]  }
  0xd3   :  { %10120 = vmatpush2.bf16.xpose.msra.mxu0 %v14062_v54  ;;  %10161 = vmatpush2.bf16.xpose.msra.mxu1 %v14065_v55  ;;  %v1694_v54 = vlaneseq  ;;  %v14144_v55 = vld [vmem:[%s21717_s1 + $0x20] ss:$100 sps:$4 sm:$0xff]  }
  0xd4   :  { %10121 = vmatprep.subr.bf16.mxu0 %v14070_v56  ;;  %10162 = vmatprep.subr.bf16.mxu1 %v14073_v57  ;;  %v14147_v56 = vld [vmem:[%s21717_s1 + $0x28] ss:$100 sps:$4 sm:$0xff]   ;;  %v14152_v57 = vld [vmem:[%s21717_s1 + $0xbdc] ss:$100 sps:$4 sm:$0xff]  }
  0xdb   :  { %10122 = vmatpush2.bf16.xpose.msra.mxu0 %v14068_v58  ;;  %10163 = vmatpush2.bf16.xpose.msra.mxu1 %v14071_v59  ;;  %v14155_v58 = vld [vmem:[%s21717_s1 + $0xbe4] ss:$100 sps:$4 sm:$0xff]   ;;  %v16887_v59 = vshrl.u32 %v1694_v54, 7 }
  0xdc   :  { %10123 = vmatprep.subr.bf16.mxu0 %v14076_v60  ;;  %10164 = vmatprep.subr.bf16.mxu1 %v14079_v61  ;;  %v1692_v60 = vld [vmem:[%s21719_s2] sm:$0xff]  ;;  %v14195_v54 = vld [vmem:[%s21717_s1 + $0x668] ss:$100 sps:$4 sm:$0xff]  }
  0xdd   :  { %v1696_v61 = vsub.s32 0, %v16887_v59 }
  0xe3   :  { %10124 = vmatpush2.bf16.xpose.msra.mxu0 %v14074_v62  ;;  %10165 = vmatpush2.bf16.xpose.msra.mxu1 %v14077_v63  ;;  %v14150_v62 = vld [vmem:[%s21717_s1 + $0xbd8] ss:$100 sps:$4 sm:$0xff]   ;;  %v14153_v63 = vld [vmem:[%s21717_s1 + $0xbe0] ss:$100 sps:$4 sm:$0xff]  }
  0xe4   :  { %10125 = vmatprep.subr.bf16.mxu0 %v14082_v0  ;;  %10166 = vmatprep.subr.bf16.mxu1 %v14085_v1  ;;  %v1700_v0 = vsub.s32 1, %v16887_v59  ;;  %v1697_v1 = vrot.slane %v1692_v60, %v1696_v61  ;;  %v14205_v61 = vld [vmem:[%s21717_s1 + $0x5b0] ss:$100 sps:$4 sm:$0xff]  }
  0xeb   :  { %10126 = vmatpush2.bf16.xpose.msra.mxu0 %v14080_v2  ;;  %10167 = vmatpush2.bf16.xpose.msra.mxu1 %v14083_v3  ;;  %v14158_v2 = vld [vmem:[%s21717_s1 + $0xb14] ss:$100 sps:$4 sm:$0xff]   ;;  %v14161_v3 = vld [vmem:[%s21717_s1 + $0xb1c] ss:$100 sps:$4 sm:$0xff]  }
  0xec   :  { %10127 = vmatprep.subr.bf16.mxu0 %v14088_v4  ;;  %10168 = vmatprep.subr.bf16.mxu1 %v14091_v5  ;;  %v1701_v4 = vrot.slane %v1692_v60, %v1700_v0  ;;  %v14202_v60 = vld [vmem:[%s21717_s1 + $0x5a8] ss:$100 sps:$4 sm:$0xff]  }
  0xed   :  { %v14210_v0 = vld [vmem:[%s21717_s1 + $0x4e4] ss:$100 sps:$4 sm:$0xff]  }
  0xf3   :  { %10128 = vmatpush2.bf16.xpose.msra.mxu0 %v14086_v8  ;;  %10169 = vmatpush2.bf16.xpose.msra.mxu1 %v14089_v9 }
  0xf4   :  { %10129 = vmatprep.subr.bf16.mxu0 %v14094_v12  ;;  %10170 = vmatprep.subr.bf16.mxu1 %v14097_v13 }
  0xfb   :  { %10130 = vmatpush2.bf16.xpose.msra.mxu0 %v14092_v16  ;;  %10171 = vmatpush2.bf16.xpose.msra.mxu1 %v14095_v17 }
  0xfc   :  { %10181 = vmatprep.subr.bf16.mxu0 %v14104_v18  ;;  %10222 = vmatprep.subr.bf16.mxu1 %v14107_v19  ;;  %v14156_v18 = vld [vmem:[%s21717_s1 + $0xb10] ss:$100 sps:$4 sm:$0xff]   ;;  %v14159_v19 = vld [vmem:[%s21717_s1 + $0xb18] ss:$100 sps:$4 sm:$0xff]  }
 0x102   :  { %10132 = vmatmul.mubr.bf16.vlgmr.msra.gmra.mxu0 %v16779_v24  ;;  %10173 = vmatmul.mubr.bf16.vlgmr.msra.gmra.mxu1 %v16783_v25 }
 0x103   :  { %10182 = vmatpush1.bf16.xpose.msra.mxu0 %v14102_v22  ;;  %10223 = vmatpush1.bf16.xpose.msra.mxu1 %v14105_v23 }
 0x104   :  { %10183 = vmatprep.subr.bf16.mxu0 %v14110_v26  ;;  %10224 = vmatprep.subr.bf16.mxu1 %v14113_v28 }
 0x105   :  { %10213 = vmatprep.mubr.bf16.mxu0 %v16793_v30  ;;  %10254 = vmatprep.mubr.bf16.mxu1 %v16797_v6 }
 0x10b   :  { %10184 = vmatpush1.bf16.xpose.msra.mxu0 %v14108_v7  ;;  %10225 = vmatpush1.bf16.xpose.msra.mxu1 %v14111_v31  ;;  %v14164_v31 = vld [vmem:[%s21717_s1 + $0xa4c] ss:$100 sps:$4 sm:$0xff]  }
 0x10c   :  { %10185 = vmatprep.subr.bf16.mxu0 %v14116_v32  ;;  %10226 = vmatprep.subr.bf16.mxu1 %v14119_v33  ;;  %v14167_v32 = vld [vmem:[%s21717_s1 + $0xa54] ss:$100 sps:$4 sm:$0xff]   ;;  %v14162_v33 = vld [vmem:[%s21717_s1 + $0xa48] ss:$100 sps:$4 sm:$0xff]  }
 0x113   :  { %10186 = vmatpush1.bf16.xpose.msra.mxu0 %v14114_v34  ;;  %10227 = vmatpush1.bf16.xpose.msra.mxu1 %v14117_v35  ;;  %v14165_v34 = vld [vmem:[%s21717_s1 + $0xa50] ss:$100 sps:$4 sm:$0xff]   ;;  %v14170_v35 = vld [vmem:[%s21717_s1 + $0x984] ss:$100 sps:$4 sm:$0xff]  }
 0x114   :  { %10187 = vmatprep.subr.bf16.mxu0 %v14122_v36  ;;  %10228 = vmatprep.subr.bf16.mxu1 %v14125_v37  ;;  %v14173_v36 = vld [vmem:[%s21717_s1 + $0x98c] ss:$100 sps:$4 sm:$0xff]   ;;  %v14168_v37 = vld [vmem:[%s21717_s1 + $0x980] ss:$100 sps:$4 sm:$0xff]  }
 0x11b   :  { %10188 = vmatpush1.bf16.xpose.msra.mxu0 %v14120_v38  ;;  %10229 = vmatpush1.bf16.xpose.msra.mxu1 %v14123_v39  ;;  %v14171_v38 = vld [vmem:[%s21717_s1 + $0x988] ss:$100 sps:$4 sm:$0xff]   ;;  %v14176_v39 = vld [vmem:[%s21717_s1 + $0x8bc] ss:$100 sps:$4 sm:$0xff]  }
 0x11c   :  { %10189 = vmatprep.subr.bf16.mxu0 %v14128_v40  ;;  %10230 = vmatprep.subr.bf16.mxu1 %v14131_v41  ;;  %v14179_v40 = vld [vmem:[%s21717_s1 + $0x8c4] ss:$100 sps:$4 sm:$0xff]   ;;  %v14174_v41 = vld [vmem:[%s21717_s1 + $0x8b8] ss:$100 sps:$4 sm:$0xff]  }
 0x123   :  { %10190 = vmatpush1.bf16.xpose.msra.mxu0 %v14126_v42  ;;  %10231 = vmatpush1.bf16.xpose.msra.mxu1 %v14129_v43  ;;  %v14177_v42 = vld [vmem:[%s21717_s1 + $0x8c0] ss:$100 sps:$4 sm:$0xff]   ;;  %v14182_v43 = vld [vmem:[%s21717_s1 + $0x7f4] ss:$100 sps:$4 sm:$0xff]  }
 0x124   :  { %10191 = vmatprep.subr.bf16.mxu0 %v14134_v44  ;;  %10232 = vmatprep.subr.bf16.mxu1 %v14137_v45  ;;  %v14185_v44 = vld [vmem:[%s21717_s1 + $0x7fc] ss:$100 sps:$4 sm:$0xff]   ;;  %v14180_v45 = vld [vmem:[%s21717_s1 + $0x7f0] ss:$100 sps:$4 sm:$0xff]  }
 0x12b   :  { %10192 = vmatpush1.bf16.xpose.msra.mxu0 %v14132_v46  ;;  %10233 = vmatpush1.bf16.xpose.msra.mxu1 %v14135_v47  ;;  %v14183_v46 = vld [vmem:[%s21717_s1 + $0x7f8] ss:$100 sps:$4 sm:$0xff]   ;;  %v14188_v47 = vld [vmem:[%s21717_s1 + $0x72c] ss:$100 sps:$4 sm:$0xff]  }
 0x12c   :  { %10193 = vmatprep.subr.bf16.mxu0 %v14140_v48  ;;  %10234 = vmatprep.subr.bf16.mxu1 %v14143_v49  ;;  %v14191_v48 = vld [vmem:[%s21717_s1 + $0x734] ss:$100 sps:$4 sm:$0xff]   ;;  %v14186_v49 = vld [vmem:[%s21717_s1 + $0x728] ss:$100 sps:$4 sm:$0xff]  }
 0x133   :  { %10194 = vmatpush1.bf16.xpose.msra.mxu0 %v14138_v50  ;;  %10235 = vmatpush1.bf16.xpose.msra.mxu1 %v14141_v51  ;;  %v14189_v50 = vld [vmem:[%s21717_s1 + $0x730] ss:$100 sps:$4 sm:$0xff]   ;;  %v14194_v51 = vld [vmem:[%s21717_s1 + $0x664] ss:$100 sps:$4 sm:$0xff]  }
 0x134   :  { %10195 = vmatprep.subr.bf16.mxu0 %v14146_v52  ;;  %10236 = vmatprep.subr.bf16.mxu1 %v14149_v53  ;;  %v14197_v52 = vld [vmem:[%s21717_s1 + $0x66c] ss:$100 sps:$4 sm:$0xff]   ;;  %v14192_v53 = vld [vmem:[%s21717_s1 + $0x660] ss:$100 sps:$4 sm:$0xff]  }
 0x13b   :  { %10196 = vmatpush1.bf16.xpose.msra.mxu0 %v14144_v55  ;;  %10237 = vmatpush1.bf16.xpose.msra.mxu1 %v14147_v56  ;;  %v14204_v55 = vld [vmem:[%s21717_s1 + $0x5ac] ss:$100 sps:$4 sm:$0xff]   ;;  %v14207_v56 = vld [vmem:[%s21717_s1 + $0x5b4] ss:$100 sps:$4 sm:$0xff]  }
 0x13c   :  { %10197 = vmatprep.subr.bf16.mxu0 %v14152_v57  ;;  %10238 = vmatprep.subr.bf16.mxu1 %v14155_v58  ;;  %v16997_v57 = vld [vmem:[%s21718_s0 + $0x30] sm:$0xff]  ;;  %v17002_v58 = vld [vmem:[%s21718_s0 + $0x38] sm:$0xff] }
 0x142   :  { %v10051_v5 = vpop.f32.mrf.mxu0  ;;  %v10092_v8 = vpop.f32.mrf.mxu1 }
 0x143   :  { %v10052_v9 = vadd.f32 %v10051_v5, %v1697_v1  ;;  %10198 = vmatpush2.bf16.xpose.msra.mxu0 %v14150_v62  ;;  %10239 = vmatpush2.bf16.xpose.msra.mxu1 %v14153_v63  ;;  %v17012_v62 = vcombine.low %v16764_v20, %v16764_v20  ;;  %v17016_v63 = vcombine.low %v16769_v21, %v16769_v21  ;;  %v14213_v1 = vld [vmem:[%s21717_s1 + $0x4ec] ss:$100 sps:$4 sm:$0xff]   ;;  %v14208_v21 = vld [vmem:[%s21717_s1 + $0x4e0] ss:$100 sps:$4 sm:$0xff]  }
 0x144   :  { %v10053_v12 = vpop.f32.mrf.mxu0  ;;  %v10094_v13 = vpop.f32.mrf.mxu1  ;;  %10199 = vmatprep.subr.bf16.mxu0 %v14158_v2  ;;  %10240 = vmatprep.subr.bf16.mxu1 %v14161_v3  ;;  %v17026_v2 = vcombine.high %v16997_v57, %v16997_v57  ;;  %v17030_v20 = vcombine.high %v17002_v58, %v17002_v58  ;;  %v14211_v3 = vld [vmem:[%s21717_s1 + $0x4e8] ss:$100 sps:$4 sm:$0xff]  }
 0x145   :  { %v16906_v16 = vadd.f32 %v10092_v8, %v10052_v9  ;;  %v10054_v17 = vadd.f32 %v10053_v12, %v1701_v4  ;;  %v14216_v4 = vld [vmem:[%s21717_s1 + $0x41c] ss:$100 sps:$4 sm:$0xff]   ;;  %v14219_v5 = vld [vmem:[%s21717_s1 + $0x424] ss:$100 sps:$4 sm:$0xff]   ;;  %v14222_v12 = vld [vmem:[%s21717_s1 + $0x354] ss:$100 sps:$4 sm:$0xff]  }
 0x146   :  { %v10055_v22 = vpop.f32.mrf.mxu0  ;;  %v10096_v23 = vpop.f32.mrf.mxu1  ;;  %v14214_v8 = vld [vmem:[%s21717_s1 + $0x418] ss:$100 sps:$4 sm:$0xff]   ;;  %v14217_v9 = vld [vmem:[%s21717_s1 + $0x420] ss:$100 sps:$4 sm:$0xff]  }
 0x147   :  { %v16914_v26 = vadd.f32 %v10094_v13, %v10054_v17  ;;  %v14225_v13 = vld [vmem:[%s21717_s1 + $0x35c] ss:$100 sps:$4 sm:$0xff]   ;;  %v14220_v17 = vld [vmem:[%s21717_s1 + $0x350] ss:$100 sps:$4 sm:$0xff]   ;;  %v14226_v23 = vld [vmem:[%s21717_s1 + $0x288] ss:$100 sps:$4 sm:$0xff]  }
 0x148   :  { %v10056_v28 = vpop.f32.mrf.mxu0  ;;  %v10097_v7 = vpop.f32.mrf.mxu1  ;;  %v14231_v22 = vld [vmem:[%s21717_s1 + $0x294] ss:$100 sps:$4 sm:$0xff]  }
 0x149   :  { %v14229_v28 = vld [vmem:[%s21717_s1 + $0x290] ss:$100 sps:$4 sm:$0xff]   ;;  %v14234_v7 = vld [vmem:[%s21717_s1 + $0x1c4] ss:$100 sps:$4 sm:$0xff]  }
 0x14b   :  { %10200 = vmatpush2.bf16.xpose.msra.mxu0 %v14156_v18  ;;  %10241 = vmatpush2.bf16.xpose.msra.mxu1 %v14159_v19  ;;  %v14223_v18 = vld [vmem:[%s21717_s1 + $0x358] ss:$100 sps:$4 sm:$0xff]   ;;  %v14228_v19 = vld [vmem:[%s21717_s1 + $0x28c] ss:$100 sps:$4 sm:$0xff]  }
 0x14c   :  { %10201 = vmatprep.subr.bf16.mxu0 %v14164_v31  ;;  %10242 = vmatprep.subr.bf16.mxu1 %v14167_v32  ;;  %v14237_v31 = vld [vmem:[%s21717_s1 + $0x1cc] ss:$100 sps:$4 sm:$0xff]   ;;  %v14232_v32 = vld [vmem:[%s21717_s1 + $0x1c0] ss:$100 sps:$4 sm:$0xff]  }
 0x153   :  { %10202 = vmatpush2.bf16.xpose.msra.mxu0 %v14162_v33  ;;  %10243 = vmatpush2.bf16.xpose.msra.mxu1 %v14165_v34  ;;  %v14235_v33 = vld [vmem:[%s21717_s1 + $0x1c8] ss:$100 sps:$4 sm:$0xff]   ;;  %v14240_v34 = vld [vmem:[%s21717_s1 + $0xfc] ss:$100 sps:$4 sm:$0xff]  }
 0x154   :  { %10203 = vmatprep.subr.bf16.mxu0 %v14170_v35  ;;  %10244 = vmatprep.subr.bf16.mxu1 %v14173_v36  ;;  %v14243_v35 = vld [vmem:[%s21717_s1 + $0x104] ss:$100 sps:$4 sm:$0xff]   ;;  %v14238_v36 = vld [vmem:[%s21717_s1 + $0xf8] ss:$100 sps:$4 sm:$0xff]  }
 0x15b   :  { %10204 = vmatpush2.bf16.xpose.msra.mxu0 %v14168_v37  ;;  %10245 = vmatpush2.bf16.xpose.msra.mxu1 %v14171_v38  ;;  %v14241_v37 = vld [vmem:[%s21717_s1 + $0x100] ss:$100 sps:$4 sm:$0xff]   ;;  %v14246_v38 = vld [vmem:[%s21717_s1 + $0x34] ss:$100 sps:$4 sm:$0xff]  }
 0x15c   :  { %10205 = vmatprep.subr.bf16.mxu0 %v14176_v39  ;;  %10246 = vmatprep.subr.bf16.mxu1 %v14179_v40  ;;  %v14249_v39 = vld [vmem:[%s21717_s1 + $0x3c] ss:$100 sps:$4 sm:$0xff]   ;;  %v14244_v40 = vld [vmem:[%s21717_s1 + $0x30] ss:$100 sps:$4 sm:$0xff]  }
 0x163   :  { %10206 = vmatpush2.bf16.xpose.msra.mxu0 %v14174_v41  ;;  %10247 = vmatpush2.bf16.xpose.msra.mxu1 %v14177_v42  ;;  %v14247_v41 = vld [vmem:[%s21717_s1 + $0x38] ss:$100 sps:$4 sm:$0xff]   ;;  %v14252_v42 = vld [vmem:[%s21717_s1 + $0xbec] ss:$100 sps:$4 sm:$0xff]  }
 0x164   :  { %10207 = vmatprep.subr.bf16.mxu0 %v14182_v43  ;;  %10248 = vmatprep.subr.bf16.mxu1 %v14185_v44  ;;  %v14255_v43 = vld [vmem:[%s21717_s1 + $0xbf4] ss:$100 sps:$4 sm:$0xff]   ;;  %v14250_v44 = vld [vmem:[%s21717_s1 + $0xbe8] ss:$100 sps:$4 sm:$0xff]  }
 0x16b   :  { %10208 = vmatpush2.bf16.xpose.msra.mxu0 %v14180_v45  ;;  %10249 = vmatpush2.bf16.xpose.msra.mxu1 %v14183_v46  ;;  %v14253_v45 = vld [vmem:[%s21717_s1 + $0xbf0] ss:$100 sps:$4 sm:$0xff]   ;;  %v14258_v46 = vld [vmem:[%s21717_s1 + $0xb24] ss:$100 sps:$4 sm:$0xff]  }
 0x16c   :  { %10209 = vmatprep.subr.bf16.mxu0 %v14188_v47  ;;  %10250 = vmatprep.subr.bf16.mxu1 %v14191_v48  ;;  %v14261_v47 = vld [vmem:[%s21717_s1 + $0xb2c] ss:$100 sps:$4 sm:$0xff]  }
 0x173   :  { %10210 = vmatpush2.bf16.xpose.msra.mxu0 %v14186_v49  ;;  %10251 = vmatpush2.bf16.xpose.msra.mxu1 %v14189_v50 }
 0x174   :  { %10211 = vmatprep.subr.bf16.mxu0 %v14194_v51  ;;  %10252 = vmatprep.subr.bf16.mxu1 %v14197_v52 }
 0x17b   :  { %10212 = vmatpush2.bf16.xpose.msra.mxu0 %v14192_v53  ;;  %10253 = vmatpush2.bf16.xpose.msra.mxu1 %v14195_v54 }
 0x17c   :  { %10263 = vmatprep.subr.bf16.mxu0 %v14204_v55  ;;  %10304 = vmatprep.subr.bf16.mxu1 %v14207_v56  ;;  %v14256_v55 = vld [vmem:[%s21717_s1 + $0xb20] ss:$100 sps:$4 sm:$0xff]   ;;  %v14259_v56 = vld [vmem:[%s21717_s1 + $0xb28] ss:$100 sps:$4 sm:$0xff]  }
 0x182   :  { %10214 = vmatmul.mubr.bf16.vlgmr.msra.gmra.mxu0 %v17012_v62  ;;  %10255 = vmatmul.mubr.bf16.vlgmr.msra.gmra.mxu1 %v17016_v63 }
 0x183   :  { %10264 = vmatpush1.bf16.xpose.msra.mxu0 %v14202_v60  ;;  %10305 = vmatpush1.bf16.xpose.msra.mxu1 %v14205_v61 }
 0x184   :  { %10265 = vmatprep.subr.bf16.mxu0 %v14210_v0  ;;  %10306 = vmatprep.subr.bf16.mxu1 %v14213_v1 }
 0x185   :  { %10295 = vmatprep.mubr.bf16.mxu0 %v17026_v2  ;;  %10336 = vmatprep.mubr.bf16.mxu1 %v17030_v20 }
 0x18b   :  { %10266 = vmatpush1.bf16.xpose.msra.mxu0 %v14208_v21  ;;  %10307 = vmatpush1.bf16.xpose.msra.mxu1 %v14211_v3  ;;  %v14264_v21 = vld [vmem:[%s21717_s1 + $0xa5c] ss:$100 sps:$4 sm:$0xff]  }
 0x18c   :  { %10267 = vmatprep.subr.bf16.mxu0 %v14216_v4  ;;  %10308 = vmatprep.subr.bf16.mxu1 %v14219_v5  ;;  %v14262_v3 = vld [vmem:[%s21717_s1 + $0xa58] ss:$100 sps:$4 sm:$0xff]   ;;  %v14265_v4 = vld [vmem:[%s21717_s1 + $0xa60] ss:$100 sps:$4 sm:$0xff]  }
 0x18d   :  { %v14270_v5 = vld [vmem:[%s21717_s1 + $0x994] ss:$100 sps:$4 sm:$0xff]  }
 0x193   :  { %10268 = vmatpush1.bf16.xpose.msra.mxu0 %v14214_v8  ;;  %10309 = vmatpush1.bf16.xpose.msra.mxu1 %v14217_v9  ;;  %v14273_v8 = vld [vmem:[%s21717_s1 + $0x99c] ss:$100 sps:$4 sm:$0xff]   ;;  %v14268_v9 = vld [vmem:[%s21717_s1 + $0x990] ss:$100 sps:$4 sm:$0xff]  }
 0x194   :  { %10269 = vmatprep.subr.bf16.mxu0 %v14222_v12  ;;  %10310 = vmatprep.subr.bf16.mxu1 %v14225_v13  ;;  %v14271_v12 = vld [vmem:[%s21717_s1 + $0x998] ss:$100 sps:$4 sm:$0xff]   ;;  %v14276_v13 = vld [vmem:[%s21717_s1 + $0x8cc] ss:$100 sps:$4 sm:$0xff]  }
 0x19b   :  { %10270 = vmatpush1.bf16.xpose.msra.mxu0 %v14220_v17  ;;  %10311 = vmatpush1.bf16.xpose.msra.mxu1 %v14223_v18  ;;  %v14279_v17 = vld [vmem:[%s21717_s1 + $0x8d4] ss:$100 sps:$4 sm:$0xff]   ;;  %v14274_v18 = vld [vmem:[%s21717_s1 + $0x8c8] ss:$100 sps:$4 sm:$0xff]  }
 0x19c   :  { %10271 = vmatprep.subr.bf16.mxu0 %v14228_v19  ;;  %10312 = vmatprep.subr.bf16.mxu1 %v14231_v22  ;;  %v14277_v19 = vld [vmem:[%s21717_s1 + $0x8d0] ss:$100 sps:$4 sm:$0xff]   ;;  %v14282_v22 = vld [vmem:[%s21717_s1 + $0x804] ss:$100 sps:$4 sm:$0xff]  }
 0x1a3   :  { %10272 = vmatpush1.bf16.xpose.msra.mxu0 %v14226_v23  ;;  %10313 = vmatpush1.bf16.xpose.msra.mxu1 %v14229_v28  ;;  %v14285_v23 = vld [vmem:[%s21717_s1 + $0x80c] ss:$100 sps:$4 sm:$0xff]   ;;  %v14280_v28 = vld [vmem:[%s21717_s1 + $0x800] ss:$100 sps:$4 sm:$0xff]  }
 0x1a4   :  { %10273 = vmatprep.subr.bf16.mxu0 %v14234_v7  ;;  %10314 = vmatprep.subr.bf16.mxu1 %v14237_v31  ;;  %v14283_v7 = vld [vmem:[%s21717_s1 + $0x808] ss:$100 sps:$4 sm:$0xff]   ;;  %v14288_v31 = vld [vmem:[%s21717_s1 + $0x73c] ss:$100 sps:$4 sm:$0xff]  }
 0x1ab   :  { %10274 = vmatpush1.bf16.xpose.msra.mxu0 %v14232_v32  ;;  %10315 = vmatpush1.bf16.xpose.msra.mxu1 %v14235_v33  ;;  %v14291_v32 = vld [vmem:[%s21717_s1 + $0x744] ss:$100 sps:$4 sm:$0xff]   ;;  %v14286_v33 = vld [vmem:[%s21717_s1 + $0x738] ss:$100 sps:$4 sm:$0xff]  }
 0x1ac   :  { %10275 = vmatprep.subr.bf16.mxu0 %v14240_v34  ;;  %10316 = vmatprep.subr.bf16.mxu1 %v14243_v35  ;;  %v14289_v34 = vld [vmem:[%s21717_s1 + $0x740] ss:$100 sps:$4 sm:$0xff]   ;;  %v14294_v35 = vld [vmem:[%s21717_s1 + $0x674] ss:$100 sps:$4 sm:$0xff]  }
 0x1b3   :  { %10276 = vmatpush1.bf16.xpose.msra.mxu0 %v14238_v36  ;;  %10317 = vmatpush1.bf16.xpose.msra.mxu1 %v14241_v37  ;;  %v14297_v36 = vld [vmem:[%s21717_s1 + $0x67c] ss:$100 sps:$4 sm:$0xff]   ;;  %v14292_v37 = vld [vmem:[%s21717_s1 + $0x670] ss:$100 sps:$4 sm:$0xff]  }
 0x1b4   :  { %10277 = vmatprep.subr.bf16.mxu0 %v14246_v38  ;;  %10318 = vmatprep.subr.bf16.mxu1 %v14249_v39  ;;  %v14295_v38 = vld [vmem:[%s21717_s1 + $0x678] ss:$100 sps:$4 sm:$0xff]  }
 0x1b5   :  { %v14304_v39 = vld [vmem:[%s21717_s1 + $0x5bc] ss:$100 sps:$4 sm:$0xff]  }
 0x1bb   :  { %10278 = vmatpush1.bf16.xpose.msra.mxu0 %v14244_v40  ;;  %10319 = vmatpush1.bf16.xpose.msra.mxu1 %v14247_v41  ;;  %v14307_v40 = vld [vmem:[%s21717_s1 + $0x5c4] ss:$100 sps:$4 sm:$0xff]  }
 0x1bc   :  { %10279 = vmatprep.subr.bf16.mxu0 %v14252_v42  ;;  %10320 = vmatprep.subr.bf16.mxu1 %v14255_v43  ;;  %v17225_v41 = vld [vmem:[%s21718_s0 + $0x40] sm:$0xff]  ;;  %v17230_v42 = vld [vmem:[%s21718_s0 + $0x48] sm:$0xff]  ;;  %v14302_v43 = vld [vmem:[%s21717_s1 + $0x5b8] ss:$100 sps:$4 sm:$0xff]  }
 0x1c2   :  { %v10133_v48 = vpop.f32.mrf.mxu0  ;;  %v10174_v49 = vpop.f32.mrf.mxu1 }
 0x1c3   :  { %v10134_v50 = vadd.f32 %v10133_v48, %v16906_v16  ;;  %10280 = vmatpush2.bf16.xpose.msra.mxu0 %v14250_v44  ;;  %10321 = vmatpush2.bf16.xpose.msra.mxu1 %v14253_v45  ;;  %v14305_v44 = vld [vmem:[%s21717_s1 + $0x5c0] ss:$100 sps:$4 sm:$0xff]   ;;  %v17240_v45 = vcombine.low %v16997_v57, %v16997_v57  ;;  %v17258_v57 = vcombine.high %v17230_v42, %v17230_v42 }
 0x1c4   :  { %v10135_v51 = vpop.f32.mrf.mxu0  ;;  %v10176_v52 = vpop.f32.mrf.mxu1  ;;  %10281 = vmatprep.subr.bf16.mxu0 %v14258_v46  ;;  %10322 = vmatprep.subr.bf16.mxu1 %v14261_v47  ;;  %v17244_v46 = vcombine.low %v17002_v58, %v17002_v58  ;;  %v14310_v47 = vld [vmem:[%s21717_s1 + $0x4f4] ss:$100 sps:$4 sm:$0xff]   ;;  %v14313_v48 = vld [vmem:[%s21717_s1 + $0x4fc] ss:$100 sps:$4 sm:$0xff]  }
 0x1c5   :  { %v17133_v53 = vadd.f32 %v10174_v49, %v10134_v50  ;;  %v10136_v54 = vadd.f32 %v10135_v51, %v16914_v26  ;;  %v14267_v26 = vld [vmem:[%s21717_s1 + $0xa64] ss:$100 sps:$4 sm:$0xff]   ;;  %v17254_v49 = vcombine.high %v17225_v41, %v17225_v41  ;;  %v14308_v58 = vld [vmem:[%s21717_s1 + $0x4f0] ss:$100 sps:$4 sm:$0xff]   ;;  %v14311_v50 = vld [vmem:[%s21717_s1 + $0x4f8] ss:$100 sps:$4 sm:$0xff]  }
 0x1c6   :  { %v10137_v60 = vpop.f32.mrf.mxu0  ;;  %v10178_v16 = vpop.f32.mrf.mxu1  ;;  %v14316_v51 = vld [vmem:[%s21717_s1 + $0x42c] ss:$100 sps:$4 sm:$0xff]  }
 0x1c7   :  { %v17142_v61 = vadd.f32 %v10176_v52, %v10136_v54  ;;  %v14319_v52 = vld [vmem:[%s21717_s1 + $0x434] ss:$100 sps:$4 sm:$0xff]   ;;  %v14314_v54 = vld [vmem:[%s21717_s1 + $0x428] ss:$100 sps:$4 sm:$0xff]   ;;  %v14320_v16 = vld [vmem:[%s21717_s1 + $0x360] ss:$100 sps:$4 sm:$0xff]  }
 0x1c8   :  { %v10138_v0 = vpop.f32.mrf.mxu0  ;;  %v10179_v1 = vpop.f32.mrf.mxu1  ;;  %v14325_v60 = vld [vmem:[%s21717_s1 + $0x36c] ss:$100 sps:$4 sm:$0xff]  }
 0x1c9   :  { %v14323_v0 = vld [vmem:[%s21717_s1 + $0x368] ss:$100 sps:$4 sm:$0xff]   ;;  %v14328_v1 = vld [vmem:[%s21717_s1 + $0x29c] ss:$100 sps:$4 sm:$0xff]  }
 0x1cb   :  { %10282 = vmatpush2.bf16.xpose.msra.mxu0 %v14256_v55  ;;  %10323 = vmatpush2.bf16.xpose.msra.mxu1 %v14259_v56  ;;  %v14317_v55 = vld [vmem:[%s21717_s1 + $0x430] ss:$100 sps:$4 sm:$0xff]   ;;  %v14322_v56 = vld [vmem:[%s21717_s1 + $0x364] ss:$100 sps:$4 sm:$0xff]  }
 0x1cc   :  { %10283 = vmatprep.subr.bf16.mxu0 %v14264_v21  ;;  %10324 = vmatprep.subr.bf16.mxu1 %v14267_v26  ;;  %v14331_v21 = vld [vmem:[%s21717_s1 + $0x2a4] ss:$100 sps:$4 sm:$0xff]   ;;  %v14326_v26 = vld [vmem:[%s21717_s1 + $0x298] ss:$100 sps:$4 sm:$0xff]  }
 0x1d3   :  { %10284 = vmatpush2.bf16.xpose.msra.mxu0 %v14262_v3  ;;  %10325 = vmatpush2.bf16.xpose.msra.mxu1 %v14265_v4  ;;  %v14329_v3 = vld [vmem:[%s21717_s1 + $0x2a0] ss:$100 sps:$4 sm:$0xff]   ;;  %v14334_v4 = vld [vmem:[%s21717_s1 + $0x1d4] ss:$100 sps:$4 sm:$0xff]  }
 0x1d4   :  { %10285 = vmatprep.subr.bf16.mxu0 %v14270_v5  ;;  %10326 = vmatprep.subr.bf16.mxu1 %v14273_v8  ;;  %v14337_v5 = vld [vmem:[%s21717_s1 + $0x1dc] ss:$100 sps:$4 sm:$0xff]   ;;  %v14332_v8 = vld [vmem:[%s21717_s1 + $0x1d0] ss:$100 sps:$4 sm:$0xff]  }
 0x1db   :  { %10286 = vmatpush2.bf16.xpose.msra.mxu0 %v14268_v9  ;;  %10327 = vmatpush2.bf16.xpose.msra.mxu1 %v14271_v12  ;;  %v14335_v9 = vld [vmem:[%s21717_s1 + $0x1d8] ss:$100 sps:$4 sm:$0xff]   ;;  %v14340_v12 = vld [vmem:[%s21717_s1 + $0x10c] ss:$100 sps:$4 sm:$0xff]  }
 0x1dc   :  { %10287 = vmatprep.subr.bf16.mxu0 %v14276_v13  ;;  %10328 = vmatprep.subr.bf16.mxu1 %v14279_v17  ;;  %v14343_v13 = vld [vmem:[%s21717_s1 + $0x114] ss:$100 sps:$4 sm:$0xff]   ;;  %v14338_v17 = vld [vmem:[%s21717_s1 + $0x108] ss:$100 sps:$4 sm:$0xff]  }
 0x1e3   :  { %10288 = vmatpush2.bf16.xpose.msra.mxu0 %v14274_v18  ;;  %10329 = vmatpush2.bf16.xpose.msra.mxu1 %v14277_v19  ;;  %v14341_v18 = vld [vmem:[%s21717_s1 + $0x110] ss:$100 sps:$4 sm:$0xff]   ;;  %v14346_v19 = vld [vmem:[%s21717_s1 + $0x44] ss:$100 sps:$4 sm:$0xff]  }
 0x1e4   :  { %10289 = vmatprep.subr.bf16.mxu0 %v14282_v22  ;;  %10330 = vmatprep.subr.bf16.mxu1 %v14285_v23  ;;  %v14349_v22 = vld [vmem:[%s21717_s1 + $0x4c] ss:$100 sps:$4 sm:$0xff]   ;;  %v14344_v23 = vld [vmem:[%s21717_s1 + $0x40] ss:$100 sps:$4 sm:$0xff]  }
 0x1eb   :  { %10290 = vmatpush2.bf16.xpose.msra.mxu0 %v14280_v28  ;;  %10331 = vmatpush2.bf16.xpose.msra.mxu1 %v14283_v7  ;;  %v14347_v28 = vld [vmem:[%s21717_s1 + $0x48] ss:$100 sps:$4 sm:$0xff]   ;;  %v14352_v7 = vld [vmem:[%s21717_s1 + $0xbfc] ss:$100 sps:$4 sm:$0xff]  }
 0x1ec   :  { %10291 = vmatprep.subr.bf16.mxu0 %v14288_v31  ;;  %10332 = vmatprep.subr.bf16.mxu1 %v14291_v32  ;;  %v14355_v31 = vld [vmem:[%s21717_s1 + $0xc04] ss:$100 sps:$4 sm:$0xff]   ;;  %v14350_v32 = vld [vmem:[%s21717_s1 + $0xbf8] ss:$100 sps:$4 sm:$0xff]  }
 0x1f3   :  { %10292 = vmatpush2.bf16.xpose.msra.mxu0 %v14286_v33  ;;  %10333 = vmatpush2.bf16.xpose.msra.mxu1 %v14289_v34  ;;  %v14353_v33 = vld [vmem:[%s21717_s1 + $0xc00] ss:$100 sps:$4 sm:$0xff]   ;;  %v14358_v34 = vld [vmem:[%s21717_s1 + $0xb34] ss:$100 sps:$4 sm:$0xff]  }
 0x1f4   :  { %10293 = vmatprep.subr.bf16.mxu0 %v14294_v35  ;;  %10334 = vmatprep.subr.bf16.mxu1 %v14297_v36  ;;  %v14361_v35 = vld [vmem:[%s21717_s1 + $0xb3c] ss:$100 sps:$4 sm:$0xff]  }
 0x1fb   :  { %10294 = vmatpush2.bf16.xpose.msra.mxu0 %v14292_v37  ;;  %10335 = vmatpush2.bf16.xpose.msra.mxu1 %v14295_v38 }
 0x1fc   :  { %10345 = vmatprep.subr.bf16.mxu0 %v14304_v39  ;;  %10386 = vmatprep.subr.bf16.mxu1 %v14307_v40 }
 0x202   :  { %10296 = vmatmul.mubr.bf16.vlgmr.msra.gmra.mxu0 %v17240_v45  ;;  %10337 = vmatmul.mubr.bf16.vlgmr.msra.gmra.mxu1 %v17244_v46 }
 0x203   :  { %10346 = vmatpush1.bf16.xpose.msra.mxu0 %v14302_v43  ;;  %10387 = vmatpush1.bf16.xpose.msra.mxu1 %v14305_v44 }
 0x204   :  { %10347 = vmatprep.subr.bf16.mxu0 %v14310_v47  ;;  %10388 = vmatprep.subr.bf16.mxu1 %v14313_v48  ;;  %v14356_v47 = vld [vmem:[%s21717_s1 + $0xb30] ss:$100 sps:$4 sm:$0xff]   ;;  %v14359_v48 = vld [vmem:[%s21717_s1 + $0xb38] ss:$100 sps:$4 sm:$0xff]  }
 0x205   :  { %10377 = vmatprep.mubr.bf16.mxu0 %v17254_v49  ;;  %10418 = vmatprep.mubr.bf16.mxu1 %v17258_v57 }
 0x20b   :  { %10348 = vmatpush1.bf16.xpose.msra.mxu0 %v14308_v58  ;;  %10389 = vmatpush1.bf16.xpose.msra.mxu1 %v14311_v50 }
 0x20c   :  { %10349 = vmatprep.subr.bf16.mxu0 %v14316_v51  ;;  %10390 = vmatprep.subr.bf16.mxu1 %v14319_v52 }
 0x213   :  { %10350 = vmatpush1.bf16.xpose.msra.mxu0 %v14314_v54  ;;  %10391 = vmatpush1.bf16.xpose.msra.mxu1 %v14317_v55  ;;  %v14364_v54 = vld [vmem:[%s21717_s1 + $0xa6c] ss:$100 sps:$4 sm:$0xff]  }
 0x214   :  { %10351 = vmatprep.subr.bf16.mxu0 %v14322_v56  ;;  %10392 = vmatprep.subr.bf16.mxu1 %v14325_v60  ;;  %v14362_v55 = vld [vmem:[%s21717_s1 + $0xa68] ss:$100 sps:$4 sm:$0xff]   ;;  %v14365_v56 = vld [vmem:[%s21717_s1 + $0xa70] ss:$100 sps:$4 sm:$0xff]  }
 0x215   :  { %v14370_v60 = vld [vmem:[%s21717_s1 + $0x9a4] ss:$100 sps:$4 sm:$0xff]  }
 0x21b   :  { %10352 = vmatpush1.bf16.xpose.msra.mxu0 %v14320_v16  ;;  %10393 = vmatpush1.bf16.xpose.msra.mxu1 %v14323_v0  ;;  %v14373_v16 = vld [vmem:[%s21717_s1 + $0x9ac] ss:$100 sps:$4 sm:$0xff]   ;;  %v14368_v0 = vld [vmem:[%s21717_s1 + $0x9a0] ss:$100 sps:$4 sm:$0xff]  }
 0x21c   :  { %10353 = vmatprep.subr.bf16.mxu0 %v14328_v1  ;;  %10394 = vmatprep.subr.bf16.mxu1 %v14331_v21  ;;  %v14371_v1 = vld [vmem:[%s21717_s1 + $0x9a8] ss:$100 sps:$4 sm:$0xff]   ;;  %v14376_v21 = vld [vmem:[%s21717_s1 + $0x8dc] ss:$100 sps:$4 sm:$0xff]  }
 0x223   :  { %10354 = vmatpush1.bf16.xpose.msra.mxu0 %v14326_v26  ;;  %10395 = vmatpush1.bf16.xpose.msra.mxu1 %v14329_v3  ;;  %v14379_v26 = vld [vmem:[%s21717_s1 + $0x8e4] ss:$100 sps:$4 sm:$0xff]   ;;  %v14374_v3 = vld [vmem:[%s21717_s1 + $0x8d8] ss:$100 sps:$4 sm:$0xff]  }
 0x224   :  { %10355 = vmatprep.subr.bf16.mxu0 %v14334_v4  ;;  %10396 = vmatprep.subr.bf16.mxu1 %v14337_v5  ;;  %v14377_v4 = vld [vmem:[%s21717_s1 + $0x8e0] ss:$100 sps:$4 sm:$0xff]   ;;  %v14382_v5 = vld [vmem:[%s21717_s1 + $0x814] ss:$100 sps:$4 sm:$0xff]  }
 0x22b   :  { %10356 = vmatpush1.bf16.xpose.msra.mxu0 %v14332_v8  ;;  %10397 = vmatpush1.bf16.xpose.msra.mxu1 %v14335_v9  ;;  %v14385_v8 = vld [vmem:[%s21717_s1 + $0x81c] ss:$100 sps:$4 sm:$0xff]   ;;  %v14380_v9 = vld [vmem:[%s21717_s1 + $0x810] ss:$100 sps:$4 sm:$0xff]  }
 0x22c   :  { %10357 = vmatprep.subr.bf16.mxu0 %v14340_v12  ;;  %10398 = vmatprep.subr.bf16.mxu1 %v14343_v13  ;;  %v14383_v12 = vld [vmem:[%s21717_s1 + $0x818] ss:$100 sps:$4 sm:$0xff]   ;;  %v14388_v13 = vld [vmem:[%s21717_s1 + $0x74c] ss:$100 sps:$4 sm:$0xff]  }
 0x233   :  { %10358 = vmatpush1.bf16.xpose.msra.mxu0 %v14338_v17  ;;  %10399 = vmatpush1.bf16.xpose.msra.mxu1 %v14341_v18  ;;  %v14391_v17 = vld [vmem:[%s21717_s1 + $0x754] ss:$100 sps:$4 sm:$0xff]   ;;  %v14386_v18 = vld [vmem:[%s21717_s1 + $0x748] ss:$100 sps:$4 sm:$0xff]  }
 0x234   :  { %10359 = vmatprep.subr.bf16.mxu0 %v14346_v19  ;;  %10400 = vmatprep.subr.bf16.mxu1 %v14349_v22  ;;  %v14389_v19 = vld [vmem:[%s21717_s1 + $0x750] ss:$100 sps:$4 sm:$0xff]   ;;  %v14394_v22 = vld [vmem:[%s21717_s1 + $0x684] ss:$100 sps:$4 sm:$0xff]  }
 0x23b   :  { %10360 = vmatpush1.bf16.xpose.msra.mxu0 %v14344_v23  ;;  %10401 = vmatpush1.bf16.xpose.msra.mxu1 %v14347_v28  ;;  %v14397_v23 = vld [vmem:[%s21717_s1 + $0x68c] ss:$100 sps:$4 sm:$0xff]   ;;  %v14392_v28 = vld [vmem:[%s21717_s1 + $0x680] ss:$100 sps:$4 sm:$0xff]  }
 0x23c   :  { %10361 = vmatprep.subr.bf16.mxu0 %v14352_v7  ;;  %10402 = vmatprep.subr.bf16.mxu1 %v14355_v31  ;;  %v14395_v7 = vld [vmem:[%s21717_s1 + $0x688] ss:$100 sps:$4 sm:$0xff]  }
 0x23d   :  { %v14404_v31 = vld [vmem:[%s21717_s1 + $0x5cc] ss:$100 sps:$4 sm:$0xff]  }
 0x242   :  { %v10215_v36 = vpop.f32.mrf.mxu0  ;;  %v10256_v37 = vpop.f32.mrf.mxu1 }
 0x243   :  { %v10216_v38 = vadd.f32 %v10215_v36, %v17133_v53  ;;  %10362 = vmatpush2.bf16.xpose.msra.mxu0 %v14350_v32  ;;  %10403 = vmatpush2.bf16.xpose.msra.mxu1 %v14353_v33  ;;  %v14407_v32 = vld [vmem:[%s21717_s1 + $0x5d4] ss:$100 sps:$4 sm:$0xff]  }
 0x244   :  { %v10217_v39 = vpop.f32.mrf.mxu0  ;;  %v10258_v40 = vpop.f32.mrf.mxu1  ;;  %10363 = vmatprep.subr.bf16.mxu0 %v14358_v34  ;;  %10404 = vmatprep.subr.bf16.mxu1 %v14361_v35  ;;  %v17453_v33 = vld [vmem:[%s21718_s0 + $0x50] sm:$0xff]  ;;  %v17458_v34 = vld [vmem:[%s21718_s0 + $0x58] sm:$0xff]  ;;  %v14402_v35 = vld [vmem:[%s21717_s1 + $0x5c8] ss:$100 sps:$4 sm:$0xff]  }
 0x245   :  { %v17361_v43 = vadd.f32 %v10256_v37, %v10216_v38  ;;  %v10218_v44 = vadd.f32 %v10217_v39, %v17142_v61  ;;  %v14367_v61 = vld [vmem:[%s21717_s1 + $0xa74] ss:$100 sps:$4 sm:$0xff]   ;;  %v17468_v37 = vcombine.low %v17225_v41, %v17225_v41  ;;  %v17472_v38 = vcombine.low %v17230_v42, %v17230_v42  ;;  %v14410_v39 = vld [vmem:[%s21717_s1 + $0x504] ss:$100 sps:$4 sm:$0xff]  }
 0x246   :  { %v10219_v58 = vpop.f32.mrf.mxu0  ;;  %v10260_v53 = vpop.f32.mrf.mxu1  ;;  %v14405_v36 = vld [vmem:[%s21717_s1 + $0x5d0] ss:$100 sps:$4 sm:$0xff]   ;;  %v17486_v41 = vcombine.high %v17458_v34, %v17458_v34  ;;  %v14408_v42 = vld [vmem:[%s21717_s1 + $0x500] ss:$100 sps:$4 sm:$0xff]  }
 0x247   :  { %v17370_v50 = vadd.f32 %v10258_v40, %v10218_v44  ;;  %v14413_v40 = vld [vmem:[%s21717_s1 + $0x50c] ss:$100 sps:$4 sm:$0xff]   ;;  %v17482_v44 = vcombine.high %v17453_v33, %v17453_v33  ;;  %v14419_v58 = vld [vmem:[%s21717_s1 + $0x444] ss:$100 sps:$4 sm:$0xff]   ;;  %v14414_v53 = vld [vmem:[%s21717_s1 + $0x438] ss:$100 sps:$4 sm:$0xff]  }
 0x248   :  { %v10220_v51 = vpop.f32.mrf.mxu0  ;;  %v10261_v52 = vpop.f32.mrf.mxu1 }
 0x249   :  { %v14417_v51 = vld [vmem:[%s21717_s1 + $0x440] ss:$100 sps:$4 sm:$0xff]   ;;  %v14422_v52 = vld [vmem:[%s21717_s1 + $0x374] ss:$100 sps:$4 sm:$0xff]  }
 0x24b   :  { %10364 = vmatpush2.bf16.xpose.msra.mxu0 %v14356_v47  ;;  %10405 = vmatpush2.bf16.xpose.msra.mxu1 %v14359_v48  ;;  %v14411_v47 = vld [vmem:[%s21717_s1 + $0x508] ss:$100 sps:$4 sm:$0xff]   ;;  %v14416_v48 = vld [vmem:[%s21717_s1 + $0x43c] ss:$100 sps:$4 sm:$0xff]  }
 0x24c   :  { %10365 = vmatprep.subr.bf16.mxu0 %v14364_v54  ;;  %10406 = vmatprep.subr.bf16.mxu1 %v14367_v61  ;;  %v14425_v54 = vld [vmem:[%s21717_s1 + $0x37c] ss:$100 sps:$4 sm:$0xff]   ;;  %v14420_v61 = vld [vmem:[%s21717_s1 + $0x370] ss:$100 sps:$4 sm:$0xff]  }
 0x253   :  { %10366 = vmatpush2.bf16.xpose.msra.mxu0 %v14362_v55  ;;  %10407 = vmatpush2.bf16.xpose.msra.mxu1 %v14365_v56  ;;  %v14423_v55 = vld [vmem:[%s21717_s1 + $0x378] ss:$100 sps:$4 sm:$0xff]   ;;  %v14428_v56 = vld [vmem:[%s21717_s1 + $0x2ac] ss:$100 sps:$4 sm:$0xff]  }
 0x254   :  { %10367 = vmatprep.subr.bf16.mxu0 %v14370_v60  ;;  %10408 = vmatprep.subr.bf16.mxu1 %v14373_v16  ;;  %v14431_v60 = vld [vmem:[%s21717_s1 + $0x2b4] ss:$100 sps:$4 sm:$0xff]   ;;  %v14426_v16 = vld [vmem:[%s21717_s1 + $0x2a8] ss:$100 sps:$4 sm:$0xff]  }
 0x25b   :  { %10368 = vmatpush2.bf16.xpose.msra.mxu0 %v14368_v0  ;;  %10409 = vmatpush2.bf16.xpose.msra.mxu1 %v14371_v1  ;;  %v14429_v0 = vld [vmem:[%s21717_s1 + $0x2b0] ss:$100 sps:$4 sm:$0xff]   ;;  %v14434_v1 = vld [vmem:[%s21717_s1 + $0x1e4] ss:$100 sps:$4 sm:$0xff]  }
 0x25c   :  { %10369 = vmatprep.subr.bf16.mxu0 %v14376_v21  ;;  %10410 = vmatprep.subr.bf16.mxu1 %v14379_v26  ;;  %v14437_v21 = vld [vmem:[%s21717_s1 + $0x1ec] ss:$100 sps:$4 sm:$0xff]   ;;  %v14432_v26 = vld [vmem:[%s21717_s1 + $0x1e0] ss:$100 sps:$4 sm:$0xff]  }
 0x263   :  { %10370 = vmatpush2.bf16.xpose.msra.mxu0 %v14374_v3  ;;  %10411 = vmatpush2.bf16.xpose.msra.mxu1 %v14377_v4  ;;  %v14435_v3 = vld [vmem:[%s21717_s1 + $0x1e8] ss:$100 sps:$4 sm:$0xff]   ;;  %v14440_v4 = vld [vmem:[%s21717_s1 + $0x11c] ss:$100 sps:$4 sm:$0xff]  }
 0x264   :  { %10371 = vmatprep.subr.bf16.mxu0 %v14382_v5  ;;  %10412 = vmatprep.subr.bf16.mxu1 %v14385_v8  ;;  %v14443_v5 = vld [vmem:[%s21717_s1 + $0x124] ss:$100 sps:$4 sm:$0xff]   ;;  %v14438_v8 = vld [vmem:[%s21717_s1 + $0x118] ss:$100 sps:$4 sm:$0xff]  }
 0x26b   :  { %10372 = vmatpush2.bf16.xpose.msra.mxu0 %v14380_v9  ;;  %10413 = vmatpush2.bf16.xpose.msra.mxu1 %v14383_v12  ;;  %v14441_v9 = vld [vmem:[%s21717_s1 + $0x120] ss:$100 sps:$4 sm:$0xff]   ;;  %v14446_v12 = vld [vmem:[%s21717_s1 + $0x54] ss:$100 sps:$4 sm:$0xff]  }
 0x26c   :  { %10373 = vmatprep.subr.bf16.mxu0 %v14388_v13  ;;  %10414 = vmatprep.subr.bf16.mxu1 %v14391_v17  ;;  %v14449_v13 = vld [vmem:[%s21717_s1 + $0x5c] ss:$100 sps:$4 sm:$0xff]   ;;  %v14444_v17 = vld [vmem:[%s21717_s1 + $0x50] ss:$100 sps:$4 sm:$0xff]  }
 0x273   :  { %10374 = vmatpush2.bf16.xpose.msra.mxu0 %v14386_v18  ;;  %10415 = vmatpush2.bf16.xpose.msra.mxu1 %v14389_v19  ;;  %v14447_v18 = vld [vmem:[%s21717_s1 + $0x58] ss:$100 sps:$4 sm:$0xff]   ;;  %v14452_v19 = vld [vmem:[%s21717_s1 + $0xc0c] ss:$100 sps:$4 sm:$0xff]  }
 0x274   :  { %10375 = vmatprep.subr.bf16.mxu0 %v14394_v22  ;;  %10416 = vmatprep.subr.bf16.mxu1 %v14397_v23  ;;  %v14455_v22 = vld [vmem:[%s21717_s1 + $0xc14] ss:$100 sps:$4 sm:$0xff]   ;;  %v14450_v23 = vld [vmem:[%s21717_s1 + $0xc08] ss:$100 sps:$4 sm:$0xff]  }
 0x27b   :  { %10376 = vmatpush2.bf16.xpose.msra.mxu0 %v14392_v28  ;;  %10417 = vmatpush2.bf16.xpose.msra.mxu1 %v14395_v7  ;;  %v14453_v28 = vld [vmem:[%s21717_s1 + $0xc10] ss:$100 sps:$4 sm:$0xff]   ;;  %v14458_v7 = vld [vmem:[%s21717_s1 + $0xb44] ss:$100 sps:$4 sm:$0xff]  }
 0x27c   :  { %10427 = vmatprep.subr.bf16.mxu0 %v14404_v31  ;;  %10468 = vmatprep.subr.bf16.mxu1 %v14407_v32  ;;  %v14461_v31 = vld [vmem:[%s21717_s1 + $0xb4c] ss:$100 sps:$4 sm:$0xff]  }
 0x282   :  { %10378 = vmatmul.mubr.bf16.vlgmr.msra.gmra.mxu0 %v17468_v37  ;;  %10419 = vmatmul.mubr.bf16.vlgmr.msra.gmra.mxu1 %v17472_v38 }
 0x283   :  { %10428 = vmatpush1.bf16.xpose.msra.mxu0 %v14402_v35  ;;  %10469 = vmatpush1.bf16.xpose.msra.mxu1 %v14405_v36 }
 0x284   :  { %10429 = vmatprep.subr.bf16.mxu0 %v14410_v39  ;;  %10470 = vmatprep.subr.bf16.mxu1 %v14413_v40 }
 0x285   :  { %10459 = vmatprep.mubr.bf16.mxu0 %v17482_v44  ;;  %10500 = vmatprep.mubr.bf16.mxu1 %v17486_v41 }
 0x28b   :  { %10430 = vmatpush1.bf16.xpose.msra.mxu0 %v14408_v42  ;;  %10471 = vmatpush1.bf16.xpose.msra.mxu1 %v14411_v47 }
 0x28c   :  { %10431 = vmatprep.subr.bf16.mxu0 %v14416_v48  ;;  %10472 = vmatprep.subr.bf16.mxu1 %v14419_v58 }
 0x293   :  { %10432 = vmatpush1.bf16.xpose.msra.mxu0 %v14414_v53  ;;  %10473 = vmatpush1.bf16.xpose.msra.mxu1 %v14417_v51  ;;  %v14456_v51 = vld [vmem:[%s21717_s1 + $0xb40] ss:$100 sps:$4 sm:$0xff]  }
 0x294   :  { %10433 = vmatprep.subr.bf16.mxu0 %v14422_v52  ;;  %10474 = vmatprep.subr.bf16.mxu1 %v14425_v54 }
 0x29b   :  { %10434 = vmatpush1.bf16.xpose.msra.mxu0 %v14420_v61  ;;  %10475 = vmatpush1.bf16.xpose.msra.mxu1 %v14423_v55  ;;  %v14464_v61 = vld [vmem:[%s21717_s1 + $0xa7c] ss:$100 sps:$4 sm:$0xff]  }
 0x29c   :  { %10435 = vmatprep.subr.bf16.mxu0 %v14428_v56  ;;  %10476 = vmatprep.subr.bf16.mxu1 %v14431_v60  ;;  %v14462_v55 = vld [vmem:[%s21717_s1 + $0xa78] ss:$100 sps:$4 sm:$0xff]   ;;  %v14465_v56 = vld [vmem:[%s21717_s1 + $0xa80] ss:$100 sps:$4 sm:$0xff]  }
 0x29d   :  { %v14470_v60 = vld [vmem:[%s21717_s1 + $0x9b4] ss:$100 sps:$4 sm:$0xff]  }
 0x2a3   :  { %10436 = vmatpush1.bf16.xpose.msra.mxu0 %v14426_v16  ;;  %10477 = vmatpush1.bf16.xpose.msra.mxu1 %v14429_v0  ;;  %v14473_v16 = vld [vmem:[%s21717_s1 + $0x9bc] ss:$100 sps:$4 sm:$0xff]   ;;  %v14468_v0 = vld [vmem:[%s21717_s1 + $0x9b0] ss:$100 sps:$4 sm:$0xff]  }
 0x2a4   :  { %10437 = vmatprep.subr.bf16.mxu0 %v14434_v1  ;;  %10478 = vmatprep.subr.bf16.mxu1 %v14437_v21  ;;  %v14471_v1 = vld [vmem:[%s21717_s1 + $0x9b8] ss:$100 sps:$4 sm:$0xff]   ;;  %v14476_v21 = vld [vmem:[%s21717_s1 + $0x8ec] ss:$100 sps:$4 sm:$0xff]  }
 0x2ab   :  { %10438 = vmatpush1.bf16.xpose.msra.mxu0 %v14432_v26  ;;  %10479 = vmatpush1.bf16.xpose.msra.mxu1 %v14435_v3  ;;  %v14479_v26 = vld [vmem:[%s21717_s1 + $0x8f4] ss:$100 sps:$4 sm:$0xff]   ;;  %v14474_v3 = vld [vmem:[%s21717_s1 + $0x8e8] ss:$100 sps:$4 sm:$0xff]  }
 0x2ac   :  { %10439 = vmatprep.subr.bf16.mxu0 %v14440_v4  ;;  %10480 = vmatprep.subr.bf16.mxu1 %v14443_v5  ;;  %v14477_v4 = vld [vmem:[%s21717_s1 + $0x8f0] ss:$100 sps:$4 sm:$0xff]   ;;  %v14482_v5 = vld [vmem:[%s21717_s1 + $0x824] ss:$100 sps:$4 sm:$0xff]  }
 0x2b3   :  { %10440 = vmatpush1.bf16.xpose.msra.mxu0 %v14438_v8  ;;  %10481 = vmatpush1.bf16.xpose.msra.mxu1 %v14441_v9  ;;  %v14485_v8 = vld [vmem:[%s21717_s1 + $0x82c] ss:$100 sps:$4 sm:$0xff]   ;;  %v14480_v9 = vld [vmem:[%s21717_s1 + $0x820] ss:$100 sps:$4 sm:$0xff]  }
 0x2b4   :  { %10441 = vmatprep.subr.bf16.mxu0 %v14446_v12  ;;  %10482 = vmatprep.subr.bf16.mxu1 %v14449_v13  ;;  %v14483_v12 = vld [vmem:[%s21717_s1 + $0x828] ss:$100 sps:$4 sm:$0xff]   ;;  %v14488_v13 = vld [vmem:[%s21717_s1 + $0x75c] ss:$100 sps:$4 sm:$0xff]  }
 0x2bb   :  { %10442 = vmatpush1.bf16.xpose.msra.mxu0 %v14444_v17  ;;  %10483 = vmatpush1.bf16.xpose.msra.mxu1 %v14447_v18  ;;  %v14491_v17 = vld [vmem:[%s21717_s1 + $0x764] ss:$100 sps:$4 sm:$0xff]   ;;  %v14486_v18 = vld [vmem:[%s21717_s1 + $0x758] ss:$100 sps:$4 sm:$0xff]  }
 0x2bc   :  { %10443 = vmatprep.subr.bf16.mxu0 %v14452_v19  ;;  %10484 = vmatprep.subr.bf16.mxu1 %v14455_v22  ;;  %v14489_v19 = vld [vmem:[%s21717_s1 + $0x760] ss:$100 sps:$4 sm:$0xff]   ;;  %v14494_v22 = vld [vmem:[%s21717_s1 + $0x694] ss:$100 sps:$4 sm:$0xff]  }
 0x2c2   :  { %v10297_v32 = vpop.f32.mrf.mxu0  ;;  %v10338_v35 = vpop.f32.mrf.mxu1 }
 0x2c3   :  { %v10298_v36 = vadd.f32 %v10297_v32, %v17361_v43  ;;  %10444 = vmatpush2.bf16.xpose.msra.mxu0 %v14450_v23  ;;  %10485 = vmatpush2.bf16.xpose.msra.mxu1 %v14453_v28  ;;  %v14459_v43 = vld [vmem:[%s21717_s1 + $0xb48] ss:$100 sps:$4 sm:$0xff]   ;;  %v14497_v23 = vld [vmem:[%s21717_s1 + $0x69c] ss:$100 sps:$4 sm:$0xff]   ;;  %v14492_v28 = vld [vmem:[%s21717_s1 + $0x690] ss:$100 sps:$4 sm:$0xff]  }
 0x2c4   :  { %v10299_v39 = vpop.f32.mrf.mxu0  ;;  %v10340_v40 = vpop.f32.mrf.mxu1  ;;  %10445 = vmatprep.subr.bf16.mxu0 %v14458_v7  ;;  %10486 = vmatprep.subr.bf16.mxu1 %v14461_v31  ;;  %v14495_v7 = vld [vmem:[%s21717_s1 + $0x698] ss:$100 sps:$4 sm:$0xff]  }
 0x2c5   :  { %v17589_v42 = vadd.f32 %v10338_v35, %v10298_v36  ;;  %v10300_v47 = vadd.f32 %v10299_v39, %v17370_v50  ;;  %v14467_v50 = vld [vmem:[%s21717_s1 + $0xa84] ss:$100 sps:$4 sm:$0xff]   ;;  %v14502_v31 = vld [vmem:[%s21717_s1 + $0xc18] ss:$100 sps:$4 sm:$0xff]   ;;  %v17684_v36 = vcombine.low %v17453_v33, %v17453_v33  ;;  %v17688_v39 = vcombine.low %v17458_v34, %v17458_v34  ;;  %v17703_v33 = vld [vmem:[%s21718_s0 + $0x60] ss:$0 sps:$4 sm:$0xff]  }
 0x2c6   :  { %v10301_v48 = vpop.f32.mrf.mxu0  ;;  %v10342_v58 = vpop.f32.mrf.mxu1  ;;  %v14505_v32 = vld [vmem:[%s21717_s1 + $0x11fc] ss:$100 sps:$4 sm:$0xff]   ;;  %v14511_v34 = vld [vmem:[%s21717_s1 + $0x510] ss:$100 sps:$4 sm:$0xff]  }
 0x2c7   :  { %v17592_v53 = vadd.f32 %v10340_v40, %v10300_v47  ;;  %v14506_v35 = vld [vmem:[%s21717_s1 + $0x5d8] ss:$100 sps:$4 sm:$0xff]   ;;  %v14507_v48 = vld [vmem:[%s21717_s1 + $0xb50] ss:$100 sps:$4 sm:$0xff]  }
 0x2c8   :  { %v10302_v52 = vpop.f32.mrf.mxu0  ;;  %v10343_v54 = vpop.f32.mrf.mxu1  ;;  %v14503_v40 = vld [vmem:[%s21717_s1 + $0x11f8] ss:$100 sps:$4 sm:$0xff]   ;;  %v9847_v47 = vsel %vm9821_vm0, %v14506_v35, 0  ;;  %v14538_v35 = vld [vmem:[%s21717_s1 + $0xc80] ss:$100 sps:$4 sm:$0xff]  }
 0x2c9   :  { %v14510_v58 = vld [vmem:[%s21717_s1 + $0x1134] ss:$100 sps:$4 sm:$0xff]   ;;  %v14512_v52 = vld [vmem:[%s21717_s1 + $0xa88] ss:$100 sps:$4 sm:$0xff]  }
 0x2ca   :  { %v14515_v54 = vld [vmem:[%s21717_s1 + $0x106c] ss:$100 sps:$4 sm:$0xff]  }
 0x2cb   :  { %10446 = vmatpush2.bf16.xpose.msra.mxu0 %v14456_v51  ;;  %10487 = vmatpush2.bf16.xpose.msra.mxu1 %v14459_v43  ;;  %v14508_v51 = vld [vmem:[%s21717_s1 + $0x1130] ss:$100 sps:$4 sm:$0xff]   ;;  %v9844_v43 = vsel %vm9821_vm0, %v14511_v34, 0  ;;  %v14546_v34 = vld [vmem:[%s21717_s1 + $0x1200] ss:$100 sps:$4 sm:$0xff]  }
 0x2cc   :  { %10447 = vmatprep.subr.bf16.mxu0 %v14464_v61  ;;  %10488 = vmatprep.subr.bf16.mxu1 %v14467_v50  ;;  %v14516_v61 = vld [vmem:[%s21717_s1 + $0x448] ss:$100 sps:$4 sm:$0xff]  }
 0x2cd   :  { %v14513_v50 = vld [vmem:[%s21717_s1 + $0x1068] ss:$100 sps:$4 sm:$0xff]  }
 0x2d3   :  { %10448 = vmatpush2.bf16.xpose.msra.mxu0 %v14462_v55  ;;  %10489 = vmatpush2.bf16.xpose.msra.mxu1 %v14465_v56  ;;  %v9841_v55 = vsel %vm9821_vm0, %v14516_v61, 0  ;;  %v14517_v56 = vld [vmem:[%s21717_s1 + $0x9c0] ss:$100 sps:$4 sm:$0xff]  }
 0x2d4   :  { %10449 = vmatprep.subr.bf16.mxu0 %v14470_v60  ;;  %10490 = vmatprep.subr.bf16.mxu1 %v14473_v16  ;;  %v14520_v60 = vld [vmem:[%s21717_s1 + $0xfa4] ss:$100 sps:$4 sm:$0xff]  }
 0x2d5   :  { %v14521_v16 = vld [vmem:[%s21717_s1 + $0x380] ss:$100 sps:$4 sm:$0xff]  }
 0x2db   :  { %10450 = vmatpush2.bf16.xpose.msra.mxu0 %v14468_v0  ;;  %10491 = vmatpush2.bf16.xpose.msra.mxu1 %v14471_v1  ;;  %v14518_v0 = vld [vmem:[%s21717_s1 + $0xfa0] ss:$100 sps:$4 sm:$0xff]   ;;  %v9838_v1 = vsel %vm9821_vm0, %v14521_v16, 0 }
 0x2dc   :  { %10451 = vmatprep.subr.bf16.mxu0 %v14476_v21  ;;  %10492 = vmatprep.subr.bf16.mxu1 %v14479_v26  ;;  %v14522_v21 = vld [vmem:[%s21717_s1 + $0x8f8] ss:$100 sps:$4 sm:$0xff]  }
 0x2dd   :  { %v14525_v26 = vld [vmem:[%s21717_s1 + $0xedc] ss:$100 sps:$4 sm:$0xff]  }
 0x2e3   :  { %10452 = vmatpush2.bf16.xpose.msra.mxu0 %v14474_v3  ;;  %10493 = vmatpush2.bf16.xpose.msra.mxu1 %v14477_v4  ;;  %v14526_v3 = vld [vmem:[%s21717_s1 + $0x2b8] ss:$100 sps:$4 sm:$0xff]  }
 0x2e4   :  { %10453 = vmatprep.subr.bf16.mxu0 %v14482_v5  ;;  %10494 = vmatprep.subr.bf16.mxu1 %v14485_v8  ;;  %v14523_v4 = vld [vmem:[%s21717_s1 + $0xed8] ss:$100 sps:$4 sm:$0xff]   ;;  %v9835_v5 = vsel %vm9821_vm0, %v14526_v3, 0  ;;  %v14527_v8 = vld [vmem:[%s21717_s1 + $0x830] ss:$100 sps:$4 sm:$0xff]  }
 0x2e5   :  { %v14560_v3 = vld [vmem:[%s21717_s1 + $0x1074] ss:$100 sps:$4 sm:$0xff]  }
 0x2eb   :  { %10454 = vmatpush2.bf16.xpose.msra.mxu0 %v14480_v9  ;;  %10495 = vmatpush2.bf16.xpose.msra.mxu1 %v14483_v12  ;;  %v14530_v9 = vld [vmem:[%s21717_s1 + $0xe14] ss:$100 sps:$4 sm:$0xff]  }
 0x2ec   :  { %10455 = vmatprep.subr.bf16.mxu0 %v14488_v13  ;;  %10496 = vmatprep.subr.bf16.mxu1 %v14491_v17  ;;  %v14531_v12 = vld [vmem:[%s21717_s1 + $0x1f0] ss:$100 sps:$4 sm:$0xff]  }
 0x2ed   :  { %v14528_v13 = vld [vmem:[%s21717_s1 + $0xe10] ss:$100 sps:$4 sm:$0xff]   ;;  %v9832_v17 = vsel %vm9821_vm0, %v14531_v12, 0  ;;  %v14561_v12 = vld [vmem:[%s21717_s1 + $0x15e0] ss:$100 sps:$4 sm:$0xff]  }
 0x2f3   :  { %10456 = vmatpush2.bf16.xpose.msra.mxu0 %v14486_v18  ;;  %10497 = vmatpush2.bf16.xpose.msra.mxu1 %v14489_v19  ;;  %v14532_v18 = vld [vmem:[%s21717_s1 + $0x768] ss:$100 sps:$4 sm:$0xff]  }
 0x2f4   :  { %10457 = vmatprep.subr.bf16.mxu0 %v14494_v22  ;;  %10498 = vmatprep.subr.bf16.mxu1 %v14497_v23  ;;  %v14535_v19 = vld [vmem:[%s21717_s1 + $0xd4c] ss:$100 sps:$4 sm:$0xff]  }
 0x2f5   :  { %v14536_v22 = vld [vmem:[%s21717_s1 + $0x128] ss:$100 sps:$4 sm:$0xff]  }
 0x2f6   :  { %v14533_v23 = vld [vmem:[%s21717_s1 + $0xd48] ss:$100 sps:$4 sm:$0xff]  }
 0x2fb   :  { %10458 = vmatpush2.bf16.xpose.msra.mxu0 %v14492_v28  ;;  %10499 = vmatpush2.bf16.xpose.msra.mxu1 %v14495_v7  ;;  %v9829_v28 = vsel %vm9821_vm0, %v14536_v22, 0  ;;  %v14537_v7 = vld [vmem:[%s21717_s1 + $0x6a0] ss:$100 sps:$4 sm:$0xff]  }
 0x2fc   :  { %13870 = vmatprep.subr.msk.bf16.mxu0 %vm9821_vm0, %v14502_v31  ;;  %10550 = vmatprep.subr.bf16.mxu1 %v14505_v32  ;;  %v14540_v31 = vld [vmem:[%s21717_s1 + $0xc84] ss:$100 sps:$4 sm:$0xff]  }
 0x2fd   :  { %v14541_v32 = vld [vmem:[%s21717_s1 + $0x60] ss:$100 sps:$4 sm:$0xff]  }
 0x2fe   :  { %v14570_v22 = vld [vmem:[%s21717_s1 + $0xee0] ss:$100 sps:$4 sm:$0xff]  }
 0x302   :  { %10460 = vmatmul.mubr.bf16.vlgmr.msra.gmra.mxu0 %v17684_v36  ;;  %10501 = vmatmul.mubr.bf16.vlgmr.msra.gmra.mxu1 %v17688_v39 }
 0x303   :  { %13799 = vmatpush3.bf16.xpose.msra.mxu0 %v9847_v47  ;;  %10551 = vmatpush1.bf16.xpose.msra.mxu1 %v14503_v40  ;;  %v9826_v40 = vsel %vm9821_vm0, %v14541_v32, 0  ;;  %v14545_v47 = vld [vmem:[%s21717_s1 + $0x183c] ss:$100 sps:$4 sm:$0xff]   ;;  %v14581_v32 = vld [vmem:[%s21717_s1 + $0x138c] ss:$100 sps:$4 sm:$0xff]  }
 0x304   :  { %13871 = vmatprep.subr.msk.bf16.mxu0 %vm9821_vm0, %v14507_v48  ;;  %10552 = vmatprep.subr.bf16.mxu1 %v14510_v58  ;;  %v14548_v48 = vld [vmem:[%s21717_s1 + $0x1204] ss:$100 sps:$4 sm:$0xff]   ;;  %v14543_v58 = vld [vmem:[%s21717_s1 + $0x1838] ss:$100 sps:$4 sm:$0xff]  }
 0x305   :  { %13814 = vmatprep.mubr.msk.bf16.mxu0 %vm9821_vm0, %v17703_v33  ;;  %10582 = vmatprep.mubr.bf16.mxu1 %v16406_v27 }
 0x30b   :  { %13801 = vmatpush3.bf16.xpose.msra.mxu0 %v9844_v43  ;;  %10553 = vmatpush1.bf16.xpose.msra.mxu1 %v14508_v51  ;;  %v14551_v51 = vld [vmem:[%s21717_s1 + $0x1774] ss:$100 sps:$4 sm:$0xff]   ;;  %v14554_v43 = vld [vmem:[%s21717_s1 + $0x113c] ss:$100 sps:$4 sm:$0xff]  }
 0x30c   :  { %13872 = vmatprep.subr.msk.bf16.mxu0 %vm9821_vm0, %v14512_v52  ;;  %10554 = vmatprep.subr.bf16.mxu1 %v14515_v54 }
 0x313   :  { %13803 = vmatpush3.bf16.xpose.msra.mxu0 %v9841_v55  ;;  %10555 = vmatpush1.bf16.xpose.msra.mxu1 %v14513_v50 }
 0x314   :  { %13873 = vmatprep.subr.msk.bf16.mxu0 %vm9821_vm0, %v14517_v56  ;;  %10556 = vmatprep.subr.bf16.mxu1 %v14520_v60 }
 0x31b   :  { %13805 = vmatpush3.bf16.xpose.msra.mxu0 %v9838_v1  ;;  %10557 = vmatpush1.bf16.xpose.msra.mxu1 %v14518_v0 }
 0x31c   :  { %13874 = vmatprep.subr.msk.bf16.mxu0 %vm9821_vm0, %v14522_v21  ;;  %10558 = vmatprep.subr.bf16.mxu1 %v14525_v26 }
 0x323   :  { %13807 = vmatpush3.bf16.xpose.msra.mxu0 %v9835_v5  ;;  %10559 = vmatpush1.bf16.xpose.msra.mxu1 %v14523_v4  ;;  %v14555_v4 = vld [vmem:[%s21717_s1 + $0x16a8] ss:$100 sps:$4 sm:$0xff]   ;;  %v14558_v5 = vld [vmem:[%s21717_s1 + $0x1070] ss:$100 sps:$4 sm:$0xff]  }
 0x324   :  { %13875 = vmatprep.subr.msk.bf16.mxu0 %vm9821_vm0, %v14527_v8  ;;  %10560 = vmatprep.subr.bf16.mxu1 %v14530_v9  ;;  %v14563_v8 = vld [vmem:[%s21717_s1 + $0x15e4] ss:$100 sps:$4 sm:$0xff]   ;;  %v14566_v9 = vld [vmem:[%s21717_s1 + $0xfac] ss:$100 sps:$4 sm:$0xff]  }
 0x32b   :  { %13809 = vmatpush3.bf16.xpose.msra.mxu0 %v9832_v17  ;;  %10561 = vmatpush1.bf16.xpose.msra.mxu1 %v14528_v13  ;;  %v14564_v13 = vld [vmem:[%s21717_s1 + $0xfa8] ss:$100 sps:$4 sm:$0xff]   ;;  %v14569_v17 = vld [vmem:[%s21717_s1 + $0x151c] ss:$100 sps:$4 sm:$0xff]  }
 0x32c   :  { %13876 = vmatprep.subr.msk.bf16.mxu0 %vm9821_vm0, %v14532_v18  ;;  %10562 = vmatprep.subr.bf16.mxu1 %v14535_v19  ;;  %v14572_v18 = vld [vmem:[%s21717_s1 + $0xee4] ss:$100 sps:$4 sm:$0xff]   ;;  %v14567_v19 = vld [vmem:[%s21717_s1 + $0x1518] ss:$100 sps:$4 sm:$0xff]  }
 0x333   :  { %13811 = vmatpush3.bf16.xpose.msra.mxu0 %v9829_v28  ;;  %10563 = vmatpush1.bf16.xpose.msra.mxu1 %v14533_v23  ;;  %v14575_v23 = vld [vmem:[%s21717_s1 + $0x1454] ss:$100 sps:$4 sm:$0xff]   ;;  %v14578_v28 = vld [vmem:[%s21717_s1 + $0xe1c] ss:$100 sps:$4 sm:$0xff]  }
 0x334   :  { %13877 = vmatprep.subr.msk.bf16.mxu0 %vm9821_vm0, %v14537_v7  ;;  %10564 = vmatprep.subr.bf16.mxu1 %v14540_v31  ;;  %v14573_v7 = vld [vmem:[%s21717_s1 + $0x1450] ss:$100 sps:$4 sm:$0xff]   ;;  %v14576_v31 = vld [vmem:[%s21717_s1 + $0xe18] ss:$100 sps:$4 sm:$0xff]  }
 0x33b   :  { %13813 = vmatpush3.bf16.xpose.msra.mxu0 %v9826_v40  ;;  %10565 = vmatpush1.bf16.xpose.msra.mxu1 %v14538_v35  ;;  %v14584_v35 = vld [vmem:[%s21717_s1 + $0xd54] ss:$100 sps:$4 sm:$0xff]   ;;  %v14579_v40 = vld [vmem:[%s21717_s1 + $0x1388] ss:$100 sps:$4 sm:$0xff]  }
 0x33c   :  { %10566 = vmatprep.subr.bf16.mxu1 %v14545_v47  ;;  %10591 = vmatprep.subr.bf16.mxu0 %v14548_v48  ;;  %v14582_v47 = vld [vmem:[%s21717_s1 + $0xd50] ss:$100 sps:$4 sm:$0xff]   ;;  %v14587_v48 = vld [vmem:[%s21717_s1 + $0x12c4] ss:$100 sps:$4 sm:$0xff]  }
 0x342   :  { %v10379_v52 = vpop.f32.mrf.mxu0  ;;  %v10420_v54 = vpop.f32.mrf.mxu1  ;;  %13815 = vmatmul.mubr.msk.bf16.vlgmr.msra.gmra.mxu0 %vm9821_vm0, %v17703_v33  ;;  %v14552_v33 = vld [vmem:[%s21717_s1 + $0x1138] ss:$100 sps:$4 sm:$0xff]  }
 0x343   :  { %v10380_v61 = vadd.f32 %v10379_v52, %v17589_v42  ;;  %10567 = vmatpush2.bf16.xpose.msra.mxu1 %v14543_v58  ;;  %10592 = vmatpush1.bf16.xpose.msra.mxu0 %v14546_v34  ;;  %v14549_v42 = vld [vmem:[%s21717_s1 + $0x1770] ss:$100 sps:$4 sm:$0xff]   ;;  %v14585_v34 = vld [vmem:[%s21717_s1 + $0x12c0] ss:$100 sps:$4 sm:$0xff]  }
 0x344   :  { %v10381_v50 = vpop.f32.mrf.mxu0  ;;  %v10422_v55 = vpop.f32.mrf.mxu1  ;;  %10568 = vmatprep.subr.bf16.mxu1 %v14551_v51  ;;  %10593 = vmatprep.subr.bf16.mxu0 %v14554_v43  ;;  %v14590_v58 = vld [vmem:[%s21717_s1 + $0xc8c] ss:$100 sps:$4 sm:$0xff]   ;;  %v14593_v43 = vld [vmem:[%s21717_s1 + $0x1844] ss:$100 sps:$4 sm:$0xff]  }
 0x345   :  { %v17823_v56 = vadd.f32 %v10420_v54, %v10380_v61  ;;  %v10382_v60 = vadd.f32 %v10381_v50, %v17592_v53  ;;  %10623 = vmatprep.mubr.bf16.mxu0 %v16415_v29  ;;  %v14557_v53 = vld [vmem:[%s21717_s1 + $0x16ac] ss:$100 sps:$4 sm:$0xff]   ;;  %v14591_v54 = vld [vmem:[%s21717_s1 + $0x1840] ss:$100 sps:$4 sm:$0xff]  }
 0x346   :  { %v10383_v16 = vpop.f32.mrf.mxu0  ;;  %v10424_v0 = vpop.f32.mrf.mxu1  ;;  %v14588_v51 = vld [vmem:[%s21717_s1 + $0xc88] ss:$100 sps:$4 sm:$0xff]   ;;  %v14599_v50 = vld [vmem:[%s21717_s1 + $0x177c] ss:$100 sps:$4 sm:$0xff]  }
 0x347   :  { %v17827_v1 = vadd.f32 %v10422_v55, %v10382_v60  ;;  %v14596_v52 = vld [vmem:[%s21717_s1 + $0x120c] ss:$100 sps:$4 sm:$0xff]   ;;  %v14602_v55 = vld [vmem:[%s21717_s1 + $0x1144] ss:$100 sps:$4 sm:$0xff]   ;;  %v14597_v60 = vld [vmem:[%s21717_s1 + $0x1778] ss:$100 sps:$4 sm:$0xff]  }
 0x348   :  { %v10384_v21 = vpop.f32.mrf.mxu0  ;;  %v10425_v26 = vpop.f32.mrf.mxu1  ;;  %v14594_v61 = vld [vmem:[%s21717_s1 + $0x1208] ss:$100 sps:$4 sm:$0xff]   ;;  %v14600_v16 = vld [vmem:[%s21717_s1 + $0x1140] ss:$100 sps:$4 sm:$0xff]   ;;  %v14605_v0 = vld [vmem:[%s21717_s1 + $0x16b4] ss:$100 sps:$4 sm:$0xff]  }
 0x349   :  { %v14606_v21 = vld [vmem:[%s21717_s1 + $0x1078] ss:$100 sps:$4 sm:$0xff]   ;;  %v14611_v26 = vld [vmem:[%s21717_s1 + $0x15ec] ss:$100 sps:$4 sm:$0xff]  }
 0x34b   :  { %10569 = vmatpush2.bf16.xpose.msra.mxu1 %v14549_v42  ;;  %10594 = vmatpush1.bf16.xpose.msra.mxu0 %v14552_v33  ;;  %v14608_v42 = vld [vmem:[%s21717_s1 + $0x107c] ss:$100 sps:$4 sm:$0xff]   ;;  %v14603_v33 = vld [vmem:[%s21717_s1 + $0x16b0] ss:$100 sps:$4 sm:$0xff]  }
 0x34c   :  { %10570 = vmatprep.subr.bf16.mxu1 %v14557_v53  ;;  %10595 = vmatprep.subr.bf16.mxu0 %v14560_v3  ;;  %v14614_v53 = vld [vmem:[%s21717_s1 + $0xfb4] ss:$100 sps:$4 sm:$0xff]   ;;  %v14609_v3 = vld [vmem:[%s21717_s1 + $0x15e8] ss:$100 sps:$4 sm:$0xff]  }
 0x353   :  { %10571 = vmatpush2.bf16.xpose.msra.mxu1 %v14555_v4  ;;  %10596 = vmatpush1.bf16.xpose.msra.mxu0 %v14558_v5  ;;  %v14612_v4 = vld [vmem:[%s21717_s1 + $0xfb0] ss:$100 sps:$4 sm:$0xff]   ;;  %v14617_v5 = vld [vmem:[%s21717_s1 + $0x1524] ss:$100 sps:$4 sm:$0xff]  }
 0x354   :  { %10572 = vmatprep.subr.bf16.mxu1 %v14563_v8  ;;  %10597 = vmatprep.subr.bf16.mxu0 %v14566_v9  ;;  %v14620_v8 = vld [vmem:[%s21717_s1 + $0xeec] ss:$100 sps:$4 sm:$0xff]   ;;  %v14615_v9 = vld [vmem:[%s21717_s1 + $0x1520] ss:$100 sps:$4 sm:$0xff]  }
 0x35b   :  { %10573 = vmatpush2.bf16.xpose.msra.mxu1 %v14561_v12  ;;  %10598 = vmatpush1.bf16.xpose.msra.mxu0 %v14564_v13  ;;  %v14618_v12 = vld [vmem:[%s21717_s1 + $0xee8] ss:$100 sps:$4 sm:$0xff]   ;;  %v14623_v13 = vld [vmem:[%s21717_s1 + $0x145c] ss:$100 sps:$4 sm:$0xff]  }
 0x35c   :  { %10574 = vmatprep.subr.bf16.mxu1 %v14569_v17  ;;  %10599 = vmatprep.subr.bf16.mxu0 %v14572_v18  ;;  %v14626_v17 = vld [vmem:[%s21717_s1 + $0xe24] ss:$100 sps:$4 sm:$0xff]   ;;  %v14621_v18 = vld [vmem:[%s21717_s1 + $0x1458] ss:$100 sps:$4 sm:$0xff]  }
 0x363   :  { %10575 = vmatpush2.bf16.xpose.msra.mxu1 %v14567_v19  ;;  %10600 = vmatpush1.bf16.xpose.msra.mxu0 %v14570_v22  ;;  %v14624_v19 = vld [vmem:[%s21717_s1 + $0xe20] ss:$100 sps:$4 sm:$0xff]   ;;  %v14629_v22 = vld [vmem:[%s21717_s1 + $0x1394] ss:$100 sps:$4 sm:$0xff]  }
 0x364   :  { %10576 = vmatprep.subr.bf16.mxu1 %v14575_v23  ;;  %10601 = vmatprep.subr.bf16.mxu0 %v14578_v28  ;;  %v14632_v23 = vld [vmem:[%s21717_s1 + $0xd5c] ss:$100 sps:$4 sm:$0xff]   ;;  %v14627_v28 = vld [vmem:[%s21717_s1 + $0x1390] ss:$100 sps:$4 sm:$0xff]  }
 0x36b   :  { %10577 = vmatpush2.bf16.xpose.msra.mxu1 %v14573_v7  ;;  %10602 = vmatpush1.bf16.xpose.msra.mxu0 %v14576_v31  ;;  %v14630_v7 = vld [vmem:[%s21717_s1 + $0xd58] ss:$100 sps:$4 sm:$0xff]   ;;  %v14635_v31 = vld [vmem:[%s21717_s1 + $0x12cc] ss:$100 sps:$4 sm:$0xff]  }
 0x36c   :  { %10578 = vmatprep.subr.bf16.mxu1 %v14581_v32  ;;  %10603 = vmatprep.subr.bf16.mxu0 %v14584_v35  ;;  %v14638_v32 = vld [vmem:[%s21717_s1 + $0xc94] ss:$100 sps:$4 sm:$0xff]   ;;  %v14633_v35 = vld [vmem:[%s21717_s1 + $0x12c8] ss:$100 sps:$4 sm:$0xff]  }
 0x373   :  { %10579 = vmatpush2.bf16.xpose.msra.mxu1 %v14579_v40  ;;  %10604 = vmatpush1.bf16.xpose.msra.mxu0 %v14582_v47  ;;  %v14636_v40 = vld [vmem:[%s21717_s1 + $0xc90] ss:$100 sps:$4 sm:$0xff]  }
 0x374   :  { %10580 = vmatprep.subr.bf16.mxu1 %v14587_v48  ;;  %10605 = vmatprep.subr.bf16.mxu0 %v14590_v58  ;;  %v14641_v47 = vld [vmem:[%s21717_s1 + $0x184c] ss:$100 sps:$4 sm:$0xff]   ;;  %v14644_v48 = vld [vmem:[%s21717_s1 + $0x1214] ss:$100 sps:$4 sm:$0xff]  }
 0x375   :  { %v14639_v58 = vld [vmem:[%s21717_s1 + $0x1848] ss:$100 sps:$4 sm:$0xff]  }
 0x37b   :  { %10581 = vmatpush2.bf16.xpose.msra.mxu1 %v14585_v34  ;;  %10606 = vmatpush1.bf16.xpose.msra.mxu0 %v14588_v51  ;;  %v14642_v34 = vld [vmem:[%s21717_s1 + $0x1210] ss:$100 sps:$4 sm:$0xff]   ;;  %v14647_v51 = vld [vmem:[%s21717_s1 + $0x1784] ss:$100 sps:$4 sm:$0xff]  }
 0x37c   :  { %10607 = vmatprep.subr.bf16.mxu0 %v14593_v43  ;;  %10632 = vmatprep.subr.bf16.mxu1 %v14596_v52  ;;  %v14650_v43 = vld [vmem:[%s21717_s1 + $0x114c] ss:$100 sps:$4 sm:$0xff]  }
 0x382   :  { %10583 = vmatmul.mubr.bf16.vlgmr.msra.gmra.mxu1 %v16557_v10 }
 0x383   :  { %10608 = vmatpush2.bf16.xpose.msra.mxu0 %v14591_v54  ;;  %10633 = vmatpush1.bf16.xpose.msra.mxu1 %v14594_v61 }
 0x384   :  { %10609 = vmatprep.subr.bf16.mxu0 %v14599_v50  ;;  %10634 = vmatprep.subr.bf16.mxu1 %v14602_v55 }
 0x385   :  { %10664 = vmatprep.mubr.bf16.mxu1 %v16571_v14 }
 0x38b   :  { %10610 = vmatpush2.bf16.xpose.msra.mxu0 %v14597_v60  ;;  %10635 = vmatpush1.bf16.xpose.msra.mxu1 %v14600_v16  ;;  %v14645_v16 = vld [vmem:[%s21717_s1 + $0x1780] ss:$100 sps:$4 sm:$0xff]  }
 0x38c   :  { %10611 = vmatprep.subr.bf16.mxu0 %v14605_v0  ;;  %10636 = vmatprep.subr.bf16.mxu1 %v14608_v42  ;;  %v14648_v0 = vld [vmem:[%s21717_s1 + $0x1148] ss:$100 sps:$4 sm:$0xff]  }
 0x393   :  { %10612 = vmatpush2.bf16.xpose.msra.mxu0 %v14603_v33  ;;  %10637 = vmatpush1.bf16.xpose.msra.mxu1 %v14606_v21  ;;  %v14653_v21 = vld [vmem:[%s21717_s1 + $0x16bc] ss:$100 sps:$4 sm:$0xff]  }
 0x394   :  { %10613 = vmatprep.subr.bf16.mxu0 %v14611_v26  ;;  %10638 = vmatprep.subr.bf16.mxu1 %v14614_v53  ;;  %v14656_v26 = vld [vmem:[%s21717_s1 + $0x1084] ss:$100 sps:$4 sm:$0xff]   ;;  %v14651_v53 = vld [vmem:[%s21717_s1 + $0x16b8] ss:$100 sps:$4 sm:$0xff]  }
 0x39b   :  { %10614 = vmatpush2.bf16.xpose.msra.mxu0 %v14609_v3  ;;  %10639 = vmatpush1.bf16.xpose.msra.mxu1 %v14612_v4  ;;  %v14654_v3 = vld [vmem:[%s21717_s1 + $0x1080] ss:$100 sps:$4 sm:$0xff]   ;;  %v14659_v4 = vld [vmem:[%s21717_s1 + $0x15f4] ss:$100 sps:$4 sm:$0xff]  }
 0x39c   :  { %10615 = vmatprep.subr.bf16.mxu0 %v14617_v5  ;;  %10640 = vmatprep.subr.bf16.mxu1 %v14620_v8  ;;  %v14662_v5 = vld [vmem:[%s21717_s1 + $0xfbc] ss:$100 sps:$4 sm:$0xff]   ;;  %v14657_v8 = vld [vmem:[%s21717_s1 + $0x15f0] ss:$100 sps:$4 sm:$0xff]  }
 0x3a3   :  { %10616 = vmatpush2.bf16.xpose.msra.mxu0 %v14615_v9  ;;  %10641 = vmatpush1.bf16.xpose.msra.mxu1 %v14618_v12  ;;  %v14660_v9 = vld [vmem:[%s21717_s1 + $0xfb8] ss:$100 sps:$4 sm:$0xff]   ;;  %v14665_v12 = vld [vmem:[%s21717_s1 + $0x152c] ss:$100 sps:$4 sm:$0xff]  }
 0x3a4   :  { %10617 = vmatprep.subr.bf16.mxu0 %v14623_v13  ;;  %10642 = vmatprep.subr.bf16.mxu1 %v14626_v17  ;;  %v14668_v13 = vld [vmem:[%s21717_s1 + $0xef4] ss:$100 sps:$4 sm:$0xff]   ;;  %v14663_v17 = vld [vmem:[%s21717_s1 + $0x1528] ss:$100 sps:$4 sm:$0xff]  }
 0x3ab   :  { %10618 = vmatpush2.bf16.xpose.msra.mxu0 %v14621_v18  ;;  %10643 = vmatpush1.bf16.xpose.msra.mxu1 %v14624_v19  ;;  %v14666_v18 = vld [vmem:[%s21717_s1 + $0xef0] ss:$100 sps:$4 sm:$0xff]   ;;  %v14671_v19 = vld [vmem:[%s21717_s1 + $0x1464] ss:$100 sps:$4 sm:$0xff]  }
 0x3ac   :  { %10619 = vmatprep.subr.bf16.mxu0 %v14629_v22  ;;  %10644 = vmatprep.subr.bf16.mxu1 %v14632_v23  ;;  %v14674_v22 = vld [vmem:[%s21717_s1 + $0xe2c] ss:$100 sps:$4 sm:$0xff]   ;;  %v14669_v23 = vld [vmem:[%s21717_s1 + $0x1460] ss:$100 sps:$4 sm:$0xff]  }
 0x3b3   :  { %10620 = vmatpush2.bf16.xpose.msra.mxu0 %v14627_v28  ;;  %10645 = vmatpush1.bf16.xpose.msra.mxu1 %v14630_v7  ;;  %v14672_v28 = vld [vmem:[%s21717_s1 + $0xe28] ss:$100 sps:$4 sm:$0xff]   ;;  %v14677_v7 = vld [vmem:[%s21717_s1 + $0x139c] ss:$100 sps:$4 sm:$0xff]  }
 0x3b4   :  { %10621 = vmatprep.subr.bf16.mxu0 %v14635_v31  ;;  %10646 = vmatprep.subr.bf16.mxu1 %v14638_v32  ;;  %v14680_v31 = vld [vmem:[%s21717_s1 + $0xd64] ss:$100 sps:$4 sm:$0xff]   ;;  %v14675_v32 = vld [vmem:[%s21717_s1 + $0x1398] ss:$100 sps:$4 sm:$0xff]  }
 0x3bb   :  { %10622 = vmatpush2.bf16.xpose.msra.mxu0 %v14633_v35  ;;  %10647 = vmatpush1.bf16.xpose.msra.mxu1 %v14636_v40  ;;  %v14678_v35 = vld [vmem:[%s21717_s1 + $0xd60] ss:$100 sps:$4 sm:$0xff]   ;;  %v14683_v40 = vld [vmem:[%s21717_s1 + $0x12d4] ss:$100 sps:$4 sm:$0xff]  }
 0x3bc   :  { %10648 = vmatprep.subr.bf16.mxu1 %v14641_v47  ;;  %10673 = vmatprep.subr.bf16.mxu0 %v14644_v48  ;;  %v14686_v47 = vld [vmem:[%s21717_s1 + $0xc9c] ss:$100 sps:$4 sm:$0xff]   ;;  %v14681_v48 = vld [vmem:[%s21717_s1 + $0x12d0] ss:$100 sps:$4 sm:$0xff]  }
 0x3c2   :  { %v18023_v52 = vpop.f32.mrf.mxu0  ;;  %v18025_v54 = vpop.f32.mrf.mxu1  ;;  %10624 = vmatmul.mubr.bf16.vlgmr.msra.gmra.mxu0 %v16561_v11 }
 0x3c3   :  { %10649 = vmatpush2.bf16.xpose.msra.mxu1 %v14639_v58  ;;  %10674 = vmatpush1.bf16.xpose.msra.mxu0 %v14642_v34  ;;  %v14684_v58 = vld [vmem:[%s21717_s1 + $0xc98] ss:$100 sps:$4 sm:$0xff]  }
 0x3c4   :  { %v18028_v61 = vpop.f32.mrf.mxu0  ;;  %v18030_v50 = vpop.f32.mrf.mxu1  ;;  %10650 = vmatprep.subr.bf16.mxu1 %v14647_v51  ;;  %10675 = vmatprep.subr.bf16.mxu0 %v14650_v43  ;;  %v14689_v34 = vld [vmem:[%s21717_s1 + $0x1854] ss:$100 sps:$4 sm:$0xff]   ;;  %v14692_v51 = vld [vmem:[%s21717_s1 + $0x121c] ss:$100 sps:$4 sm:$0xff]   ;;  %v10462_v43 = vadd.f32 %v18023_v52, %v17823_v56 }
 0x3c5   :  { %10705 = vmatprep.mubr.bf16.mxu0 %v16575_v15 }
 0x3c6   :  { %v10465_v55 = vpop.f32.mrf.mxu0  ;;  %v10506_v60 = vpop.f32.mrf.mxu1  ;;  %v10503_v56 = vadd.f32 %v18025_v54, %v10462_v43  ;;  %v14734_v43 = vld [vmem:[%s21717_s1 + $0xca4] ss:$100 sps:$4 sm:$0xff]  }
 0x3c7   :  { %v10464_v55 = vadd.f32 %v18028_v61, %v17827_v1  ;;  %v14687_v60 = vld [vmem:[%s21717_s1 + $0x1850] ss:$100 sps:$4 sm:$0xff]  }
 0x3c8   :  { %v10466_v42 = vpop.f32.mrf.mxu0  ;;  %v10507_v33 = vpop.f32.mrf.mxu1 }
 0x3c9   :  { %v14698_v42 = vld [vmem:[%s21717_s1 + $0x1154] ss:$100 sps:$4 sm:$0xff]   ;;  %v10505_v1 = vadd.f32 %v18030_v50, %v10464_v55  ;;  %v14693_v50 = vld [vmem:[%s21717_s1 + $0x1788] ss:$100 sps:$4 sm:$0xff]  }
 0x3ca   :  { %v14729_v55 = vld [vmem:[%s21717_s1 + $0x12d8] ss:$100 sps:$4 sm:$0xff]  }
 0x3cb   :  { %10651 = vmatpush2.bf16.xpose.msra.mxu1 %v14645_v16  ;;  %10676 = vmatpush1.bf16.xpose.msra.mxu0 %v14648_v0  ;;  %v14690_v16 = vld [vmem:[%s21717_s1 + $0x1218] ss:$100 sps:$4 sm:$0xff]   ;;  %v14695_v0 = vld [vmem:[%s21717_s1 + $0x178c] ss:$100 sps:$4 sm:$0xff]  }
 0x3cc   :  { %10652 = vmatprep.subr.bf16.mxu1 %v14653_v21  ;;  %10677 = vmatprep.subr.bf16.mxu0 %v14656_v26 }
 0x3d3   :  { %10653 = vmatpush2.bf16.xpose.msra.mxu1 %v14651_v53  ;;  %10678 = vmatpush1.bf16.xpose.msra.mxu0 %v14654_v3  ;;  %v14696_v3 = vld [vmem:[%s21717_s1 + $0x1150] ss:$100 sps:$4 sm:$0xff]  }
 0x3d4   :  { %10654 = vmatprep.subr.bf16.mxu1 %v14659_v4  ;;  %10679 = vmatprep.subr.bf16.mxu0 %v14662_v5  ;;  %v14701_v5 = vld [vmem:[%s21717_s1 + $0x16c4] ss:$100 sps:$4 sm:$0xff]  }
 0x3db   :  { %10655 = vmatpush2.bf16.xpose.msra.mxu1 %v14657_v8  ;;  %10680 = vmatpush1.bf16.xpose.msra.mxu0 %v14660_v9  ;;  %v14704_v8 = vld [vmem:[%s21717_s1 + $0x108c] ss:$100 sps:$4 sm:$0xff]   ;;  %v14699_v9 = vld [vmem:[%s21717_s1 + $0x16c0] ss:$100 sps:$4 sm:$0xff]  }
 0x3dc   :  { %10656 = vmatprep.subr.bf16.mxu1 %v14665_v12  ;;  %10681 = vmatprep.subr.bf16.mxu0 %v14668_v13  ;;  %v14702_v12 = vld [vmem:[%s21717_s1 + $0x1088] ss:$100 sps:$4 sm:$0xff]   ;;  %v14707_v13 = vld [vmem:[%s21717_s1 + $0x15fc] ss:$100 sps:$4 sm:$0xff]  }
 0x3e3   :  { %10657 = vmatpush2.bf16.xpose.msra.mxu1 %v14663_v17  ;;  %10682 = vmatpush1.bf16.xpose.msra.mxu0 %v14666_v18  ;;  %v14710_v17 = vld [vmem:[%s21717_s1 + $0xfc4] ss:$100 sps:$4 sm:$0xff]   ;;  %v14705_v18 = vld [vmem:[%s21717_s1 + $0x15f8] ss:$100 sps:$4 sm:$0xff]  }
 0x3e4   :  { %10658 = vmatprep.subr.bf16.mxu1 %v14671_v19  ;;  %10683 = vmatprep.subr.bf16.mxu0 %v14674_v22  ;;  %v14708_v19 = vld [vmem:[%s21717_s1 + $0xfc0] ss:$100 sps:$4 sm:$0xff]   ;;  %v14713_v22 = vld [vmem:[%s21717_s1 + $0x1534] ss:$100 sps:$4 sm:$0xff]  }
 0x3eb   :  { %10659 = vmatpush2.bf16.xpose.msra.mxu1 %v14669_v23  ;;  %10684 = vmatpush1.bf16.xpose.msra.mxu0 %v14672_v28  ;;  %v14716_v23 = vld [vmem:[%s21717_s1 + $0xefc] ss:$100 sps:$4 sm:$0xff]   ;;  %v14711_v28 = vld [vmem:[%s21717_s1 + $0x1530] ss:$100 sps:$4 sm:$0xff]  }
 0x3ec   :  { %10660 = vmatprep.subr.bf16.mxu1 %v14677_v7  ;;  %10685 = vmatprep.subr.bf16.mxu0 %v14680_v31  ;;  %v14714_v7 = vld [vmem:[%s21717_s1 + $0xef8] ss:$100 sps:$4 sm:$0xff]   ;;  %v14719_v31 = vld [vmem:[%s21717_s1 + $0x146c] ss:$100 sps:$4 sm:$0xff]  }
 0x3f3   :  { %10661 = vmatpush2.bf16.xpose.msra.mxu1 %v14675_v32  ;;  %10686 = vmatpush1.bf16.xpose.msra.mxu0 %v14678_v35  ;;  %v14722_v32 = vld [vmem:[%s21717_s1 + $0xe34] ss:$100 sps:$4 sm:$0xff]   ;;  %v14717_v35 = vld [vmem:[%s21717_s1 + $0x1468] ss:$100 sps:$4 sm:$0xff]  }
 0x3f4   :  { %10662 = vmatprep.subr.bf16.mxu1 %v14683_v40  ;;  %10687 = vmatprep.subr.bf16.mxu0 %v14686_v47  ;;  %v14720_v40 = vld [vmem:[%s21717_s1 + $0xe30] ss:$100 sps:$4 sm:$0xff]   ;;  %v14725_v47 = vld [vmem:[%s21717_s1 + $0x13a4] ss:$100 sps:$4 sm:$0xff]  }
 0x3fb   :  { %10663 = vmatpush2.bf16.xpose.msra.mxu1 %v14681_v48  ;;  %10688 = vmatpush1.bf16.xpose.msra.mxu0 %v14684_v58  ;;  %v14728_v48 = vld [vmem:[%s21717_s1 + $0xd6c] ss:$100 sps:$4 sm:$0xff]   ;;  %v14723_v58 = vld [vmem:[%s21717_s1 + $0x13a0] ss:$100 sps:$4 sm:$0xff]  }
 0x3fc   :  { %10689 = vmatprep.subr.bf16.mxu0 %v14689_v34  ;;  %10714 = vmatprep.subr.bf16.mxu1 %v14692_v51  ;;  %v14726_v34 = vld [vmem:[%s21717_s1 + $0xd68] ss:$100 sps:$4 sm:$0xff]   ;;  %v14731_v51 = vld [vmem:[%s21717_s1 + $0x12dc] ss:$100 sps:$4 sm:$0xff]  }
 0x402   :  { %v10543_v52 = vpop.f32.mrf.mxu0  ;;  %10665 = vmatmul.mubr.bf16.vlgmr.msra.gmra.mxu1 %v16779_v24 }
 0x403   :  { %v10544_v61 = vadd.f32 %v10543_v52, %v10503_v56  ;;  %10690 = vmatpush2.bf16.xpose.msra.mxu0 %v14687_v60  ;;  %10715 = vmatpush1.bf16.xpose.msra.mxu1 %v14690_v16  ;;  %v14732_v60 = vld [vmem:[%s21717_s1 + $0xca0] ss:$100 sps:$4 sm:$0xff]   ;;  %v14743_v52 = vld [vmem:[%s21717_s1 + $0x1794] ss:$100 sps:$4 sm:$0xff]  }
 0x404   :  { %v10545_v33 = vpop.f32.mrf.mxu0  ;;  %10691 = vmatprep.subr.bf16.mxu0 %v14695_v0  ;;  %10716 = vmatprep.subr.bf16.mxu1 %v14698_v42  ;;  %v14737_v16 = vld [vmem:[%s21717_s1 + $0x185c] ss:$100 sps:$4 sm:$0xff]   ;;  %v14740_v0 = vld [vmem:[%s21717_s1 + $0x1224] ss:$100 sps:$4 sm:$0xff]  }
 0x405   :  { %v12149_v21 = vmax.f32 %v10544_v61, 0.0  ;;  %v10546_v26 = vadd.f32 %v10545_v33, %v10505_v1  ;;  %10746 = vmatprep.mubr.bf16.mxu1 %v16793_v30  ;;  %v14735_v42 = vld [vmem:[%s21717_s1 + $0x1858] ss:$100 sps:$4 sm:$0xff]   ;;  %v14738_v56 = vld [vmem:[%s21717_s1 + $0x1220] ss:$100 sps:$4 sm:$0xff]  }
 0x406   :  { %v10547_v53 = vpop.f32.mrf.mxu0  ;;  %v14746_v1 = vld [vmem:[%s21717_s1 + $0x115c] ss:$100 sps:$4 sm:$0xff]  }
 0x407   :  { %12157 = vst [vmem:[%s21720_s3] sm:$0xff] %v12149_v21  ;;  %v12150_v54 = vmax.f32 %v10546_v26, 0.0  ;;  %v14741_v26 = vld [vmem:[%s21717_s1 + $0x1790] ss:$100 sps:$4 sm:$0xff]   ;;  %v14744_v53 = vld [vmem:[%s21717_s1 + $0x1158] ss:$100 sps:$4 sm:$0xff]  }
 0x408   :  { %v10548_v4 = vpop.f32.mrf.mxu0 }
 0x409   :  { %12158 = vst [vmem:[%s21720_s3 + $0x8] sm:$0xff] %v12150_v54  ;;  %v14747_v4 = vld [vmem:[%s21717_s1 + $0x16c8] ss:$100 sps:$4 sm:$0xff]  }
 0x40b   :  { %10692 = vmatpush2.bf16.xpose.msra.mxu0 %v14693_v50  ;;  %10717 = vmatpush1.bf16.xpose.msra.mxu1 %v14696_v3  ;;  %v14749_v50 = vld [vmem:[%s21717_s1 + $0x16cc] ss:$100 sps:$4 sm:$0xff]   ;;  %v14752_v3 = vld [vmem:[%s21717_s1 + $0x1094] ss:$100 sps:$4 sm:$0xff]  }
 0x40c   :  { %10693 = vmatprep.subr.bf16.mxu0 %v14701_v5  ;;  %10718 = vmatprep.subr.bf16.mxu1 %v14704_v8  ;;  %v14750_v5 = vld [vmem:[%s21717_s1 + $0x1090] ss:$100 sps:$4 sm:$0xff]   ;;  %v14755_v8 = vld [vmem:[%s21717_s1 + $0x1604] ss:$100 sps:$4 sm:$0xff]  }
 0x413   :  { %10694 = vmatpush2.bf16.xpose.msra.mxu0 %v14699_v9  ;;  %10719 = vmatpush1.bf16.xpose.msra.mxu1 %v14702_v12  ;;  %v14758_v9 = vld [vmem:[%s21717_s1 + $0xfcc] ss:$100 sps:$4 sm:$0xff]   ;;  %v14753_v12 = vld [vmem:[%s21717_s1 + $0x1600] ss:$100 sps:$4 sm:$0xff]  }
 0x414   :  { %10695 = vmatprep.subr.bf16.mxu0 %v14707_v13  ;;  %10720 = vmatprep.subr.bf16.mxu1 %v14710_v17  ;;  %v14756_v13 = vld [vmem:[%s21717_s1 + $0xfc8] ss:$100 sps:$4 sm:$0xff]   ;;  %v14761_v17 = vld [vmem:[%s21717_s1 + $0x153c] ss:$100 sps:$4 sm:$0xff]  }
 0x41b   :  { %10696 = vmatpush2.bf16.xpose.msra.mxu0 %v14705_v18  ;;  %10721 = vmatpush1.bf16.xpose.msra.mxu1 %v14708_v19  ;;  %v14764_v18 = vld [vmem:[%s21717_s1 + $0xf04] ss:$100 sps:$4 sm:$0xff]   ;;  %v14759_v19 = vld [vmem:[%s21717_s1 + $0x1538] ss:$100 sps:$4 sm:$0xff]  }
 0x41c   :  { %10697 = vmatprep.subr.bf16.mxu0 %v14713_v22  ;;  %10722 = vmatprep.subr.bf16.mxu1 %v14716_v23  ;;  %v14762_v22 = vld [vmem:[%s21717_s1 + $0xf00] ss:$100 sps:$4 sm:$0xff]   ;;  %v14767_v23 = vld [vmem:[%s21717_s1 + $0x1474] ss:$100 sps:$4 sm:$0xff]  }
 0x423   :  { %10698 = vmatpush2.bf16.xpose.msra.mxu0 %v14711_v28  ;;  %10723 = vmatpush1.bf16.xpose.msra.mxu1 %v14714_v7  ;;  %v14770_v28 = vld [vmem:[%s21717_s1 + $0xe3c] ss:$100 sps:$4 sm:$0xff]   ;;  %v14765_v7 = vld [vmem:[%s21717_s1 + $0x1470] ss:$100 sps:$4 sm:$0xff]  }
 0x424   :  { %10699 = vmatprep.subr.bf16.mxu0 %v14719_v31  ;;  %10724 = vmatprep.subr.bf16.mxu1 %v14722_v32  ;;  %v14768_v31 = vld [vmem:[%s21717_s1 + $0xe38] ss:$100 sps:$4 sm:$0xff]   ;;  %v14773_v32 = vld [vmem:[%s21717_s1 + $0x13ac] ss:$100 sps:$4 sm:$0xff]  }
 0x42b   :  { %10700 = vmatpush2.bf16.xpose.msra.mxu0 %v14717_v35  ;;  %10725 = vmatpush1.bf16.xpose.msra.mxu1 %v14720_v40  ;;  %v14776_v35 = vld [vmem:[%s21717_s1 + $0xd74] ss:$100 sps:$4 sm:$0xff]   ;;  %v14771_v40 = vld [vmem:[%s21717_s1 + $0x13a8] ss:$100 sps:$4 sm:$0xff]  }
 0x42c   :  { %10701 = vmatprep.subr.bf16.mxu0 %v14725_v47  ;;  %10726 = vmatprep.subr.bf16.mxu1 %v14728_v48  ;;  %v14774_v47 = vld [vmem:[%s21717_s1 + $0xd70] ss:$100 sps:$4 sm:$0xff]   ;;  %v14779_v48 = vld [vmem:[%s21717_s1 + $0x12e4] ss:$100 sps:$4 sm:$0xff]  }
 0x433   :  { %10702 = vmatpush2.bf16.xpose.msra.mxu0 %v14723_v58  ;;  %10727 = vmatpush1.bf16.xpose.msra.mxu1 %v14726_v34  ;;  %v14782_v58 = vld [vmem:[%s21717_s1 + $0xcac] ss:$100 sps:$4 sm:$0xff]   ;;  %v14777_v34 = vld [vmem:[%s21717_s1 + $0x12e0] ss:$100 sps:$4 sm:$0xff]  }
 0x434   :  { %10703 = vmatprep.subr.bf16.mxu0 %v14731_v51  ;;  %10728 = vmatprep.subr.bf16.mxu1 %v14734_v43  ;;  %v14780_v51 = vld [vmem:[%s21717_s1 + $0xca8] ss:$100 sps:$4 sm:$0xff]  }
 0x435   :  { %v14785_v43 = vld [vmem:[%s21717_s1 + $0x1864] ss:$100 sps:$4 sm:$0xff]  }
 0x43b   :  { %10704 = vmatpush2.bf16.xpose.msra.mxu0 %v14729_v55  ;;  %10729 = vmatpush1.bf16.xpose.msra.mxu1 %v14732_v60  ;;  %v14788_v55 = vld [vmem:[%s21717_s1 + $0x122c] ss:$100 sps:$4 sm:$0xff]   ;;  %v1704_v60 = vsub.s32 2, %v16887_v59 }
 0x43c   :  { %10730 = vmatprep.subr.bf16.mxu1 %v14737_v16  ;;  %10755 = vmatprep.subr.bf16.mxu0 %v14740_v0  ;;  %v1708_v16 = vsub.s32 3, %v16887_v59  ;;  %v16295_v0 = vld [vmem:[%s21719_s2] sm:$0xff] }
 0x442   :  { %v18239_v61 = vpop.f32.mrf.mxu1  ;;  %10706 = vmatmul.mubr.bf16.vlgmr.msra.gmra.mxu0 %v16783_v25 }
 0x443   :  { %10731 = vmatpush2.bf16.xpose.msra.mxu1 %v14735_v42  ;;  %10756 = vmatpush1.bf16.xpose.msra.mxu0 %v14738_v56  ;;  %v1705_v42 = vrot.slane %v16295_v0, %v1704_v60  ;;  %v1709_v56 = vrot.slane %v16295_v0, %v1708_v16  ;;  %v14827_v60 = vld [vmem:[%s21717_s1 + $0x12ec] ss:$100 sps:$4 sm:$0xff]   ;;  %v14830_v16 = vld [vmem:[%s21717_s1 + $0xcb4] ss:$100 sps:$4 sm:$0xff]  }
 0x444   :  { %v18242_v33 = vpop.f32.mrf.mxu1  ;;  %10732 = vmatprep.subr.bf16.mxu1 %v14743_v52  ;;  %10757 = vmatprep.subr.bf16.mxu0 %v14746_v1  ;;  %v14783_v52 = vld [vmem:[%s21717_s1 + $0x1860] ss:$100 sps:$4 sm:$0xff]   ;;  %v14786_v1 = vld [vmem:[%s21717_s1 + $0x1228] ss:$100 sps:$4 sm:$0xff]  }
 0x445   :  { %10787 = vmatprep.mubr.bf16.mxu0 %v16797_v6  ;;  %v14825_v0 = vld [vmem:[%s21717_s1 + $0x12e8] ss:$100 sps:$4 sm:$0xff]  }
 0x446   :  { %v10588_v21 = vpop.f32.mrf.mxu1 }
 0x447   :  { %v14791_v21 = vld [vmem:[%s21717_s1 + $0x179c] ss:$100 sps:$4 sm:$0xff]  }
 0x448   :  { %v10589_v54 = vpop.f32.mrf.mxu1 }
 0x44b   :  { %10733 = vmatpush2.bf16.xpose.msra.mxu1 %v14741_v26  ;;  %10758 = vmatpush1.bf16.xpose.msra.mxu0 %v14744_v53  ;;  %v14794_v26 = vld [vmem:[%s21717_s1 + $0x1164] ss:$100 sps:$4 sm:$0xff]   ;;  %v10585_v53 = vadd.f32 %v18239_v61, %v1705_v42  ;;  %v14789_v61 = vld [vmem:[%s21717_s1 + $0x1798] ss:$100 sps:$4 sm:$0xff]   ;;  %v14828_v42 = vld [vmem:[%s21717_s1 + $0xcb0] ss:$100 sps:$4 sm:$0xff]  }
 0x44c   :  { %10734 = vmatprep.subr.bf16.mxu1 %v14749_v50  ;;  %10759 = vmatprep.subr.bf16.mxu0 %v14752_v3  ;;  %v10587_v50 = vadd.f32 %v18242_v33, %v1709_v56  ;;  %v14792_v33 = vld [vmem:[%s21717_s1 + $0x1160] ss:$100 sps:$4 sm:$0xff]   ;;  %v14833_v56 = vld [vmem:[%s21717_s1 + $0x186c] ss:$100 sps:$4 sm:$0xff]  }
 0x453   :  { %10735 = vmatpush2.bf16.xpose.msra.mxu1 %v14747_v4  ;;  %10760 = vmatpush1.bf16.xpose.msra.mxu0 %v14750_v5 }
 0x454   :  { %10736 = vmatprep.subr.bf16.mxu1 %v14755_v8  ;;  %10761 = vmatprep.subr.bf16.mxu0 %v14758_v9 }
 0x45b   :  { %10737 = vmatpush2.bf16.xpose.msra.mxu1 %v14753_v12  ;;  %10762 = vmatpush1.bf16.xpose.msra.mxu0 %v14756_v13  ;;  %v14797_v12 = vld [vmem:[%s21717_s1 + $0x16d4] ss:$100 sps:$4 sm:$0xff]   ;;  %v14800_v13 = vld [vmem:[%s21717_s1 + $0x109c] ss:$100 sps:$4 sm:$0xff]  }
 0x45c   :  { %10738 = vmatprep.subr.bf16.mxu1 %v14761_v17  ;;  %10763 = vmatprep.subr.bf16.mxu0 %v14764_v18  ;;  %v14795_v17 = vld [vmem:[%s21717_s1 + $0x16d0] ss:$100 sps:$4 sm:$0xff]   ;;  %v14798_v18 = vld [vmem:[%s21717_s1 + $0x1098] ss:$100 sps:$4 sm:$0xff]  }
 0x463   :  { %10739 = vmatpush2.bf16.xpose.msra.mxu1 %v14759_v19  ;;  %10764 = vmatpush1.bf16.xpose.msra.mxu0 %v14762_v22  ;;  %v14803_v19 = vld [vmem:[%s21717_s1 + $0x160c] ss:$100 sps:$4 sm:$0xff]   ;;  %v14806_v22 = vld [vmem:[%s21717_s1 + $0xfd4] ss:$100 sps:$4 sm:$0xff]  }
 0x464   :  { %10740 = vmatprep.subr.bf16.mxu1 %v14767_v23  ;;  %10765 = vmatprep.subr.bf16.mxu0 %v14770_v28  ;;  %v14801_v23 = vld [vmem:[%s21717_s1 + $0x1608] ss:$100 sps:$4 sm:$0xff]   ;;  %v14804_v28 = vld [vmem:[%s21717_s1 + $0xfd0] ss:$100 sps:$4 sm:$0xff]  }
 0x46b   :  { %10741 = vmatpush2.bf16.xpose.msra.mxu1 %v14765_v7  ;;  %10766 = vmatpush1.bf16.xpose.msra.mxu0 %v14768_v31  ;;  %v14809_v7 = vld [vmem:[%s21717_s1 + $0x1544] ss:$100 sps:$4 sm:$0xff]   ;;  %v14812_v31 = vld [vmem:[%s21717_s1 + $0xf0c] ss:$100 sps:$4 sm:$0xff]  }
 0x46c   :  { %10742 = vmatprep.subr.bf16.mxu1 %v14773_v32  ;;  %10767 = vmatprep.subr.bf16.mxu0 %v14776_v35  ;;  %v14807_v32 = vld [vmem:[%s21717_s1 + $0x1540] ss:$100 sps:$4 sm:$0xff]   ;;  %v14810_v35 = vld [vmem:[%s21717_s1 + $0xf08] ss:$100 sps:$4 sm:$0xff]  }
 0x473   :  { %10743 = vmatpush2.bf16.xpose.msra.mxu1 %v14771_v40  ;;  %10768 = vmatpush1.bf16.xpose.msra.mxu0 %v14774_v47  ;;  %v14815_v40 = vld [vmem:[%s21717_s1 + $0x147c] ss:$100 sps:$4 sm:$0xff]   ;;  %v14818_v47 = vld [vmem:[%s21717_s1 + $0xe44] ss:$100 sps:$4 sm:$0xff]  }
 0x474   :  { %10744 = vmatprep.subr.bf16.mxu1 %v14779_v48  ;;  %10769 = vmatprep.subr.bf16.mxu0 %v14782_v58  ;;  %v14813_v48 = vld [vmem:[%s21717_s1 + $0x1478] ss:$100 sps:$4 sm:$0xff]   ;;  %v14816_v58 = vld [vmem:[%s21717_s1 + $0xe40] ss:$100 sps:$4 sm:$0xff]  }
 0x47b   :  { %10745 = vmatpush2.bf16.xpose.msra.mxu1 %v14777_v34  ;;  %10770 = vmatpush1.bf16.xpose.msra.mxu0 %v14780_v51  ;;  %v14821_v34 = vld [vmem:[%s21717_s1 + $0x13b4] ss:$100 sps:$4 sm:$0xff]   ;;  %v14824_v51 = vld [vmem:[%s21717_s1 + $0xd7c] ss:$100 sps:$4 sm:$0xff]  }
 0x47c   :  { %10771 = vmatprep.subr.bf16.mxu0 %v14785_v43  ;;  %10796 = vmatprep.subr.bf16.mxu1 %v14788_v55  ;;  %v14819_v43 = vld [vmem:[%s21717_s1 + $0x13b0] ss:$100 sps:$4 sm:$0xff]   ;;  %v14822_v55 = vld [vmem:[%s21717_s1 + $0xd78] ss:$100 sps:$4 sm:$0xff]  }
 0x482   :  { %v10625_v54 = vpop.f32.mrf.mxu0  ;;  %10747 = vmatmul.mubr.bf16.vlgmr.msra.gmra.mxu1 %v17012_v62 }
 0x483   :  { %v18349_v3 = vadd.f32 %v10625_v54, %v10585_v53  ;;  %10772 = vmatpush2.bf16.xpose.msra.mxu0 %v14783_v52  ;;  %10797 = vmatpush1.bf16.xpose.msra.mxu1 %v14786_v1  ;;  %v14836_v52 = vld [vmem:[%s21717_s1 + $0x1234] ss:$100 sps:$4 sm:$0xff]   ;;  %v14831_v1 = vld [vmem:[%s21717_s1 + $0x1868] ss:$100 sps:$4 sm:$0xff]  }
 0x484   :  { %v10627_v4 = vpop.f32.mrf.mxu0  ;;  %10773 = vmatprep.subr.bf16.mxu0 %v14791_v21  ;;  %10798 = vmatprep.subr.bf16.mxu1 %v14794_v26  ;;  %v14834_v21 = vld [vmem:[%s21717_s1 + $0x1230] ss:$100 sps:$4 sm:$0xff]   ;;  %v14839_v26 = vld [vmem:[%s21717_s1 + $0x17a4] ss:$100 sps:$4 sm:$0xff]  }
 0x485   :  { %v18351_v5 = vadd.f32 %v10627_v4, %v10587_v50  ;;  %10828 = vmatprep.mubr.bf16.mxu1 %v17026_v2  ;;  %v14842_v53 = vld [vmem:[%s21717_s1 + $0x116c] ss:$100 sps:$4 sm:$0xff]  }
 0x486   :  { %v10629_v8 = vpop.f32.mrf.mxu0 }
 0x488   :  { %v10630_v9 = vpop.f32.mrf.mxu0 }
 0x48b   :  { %10774 = vmatpush2.bf16.xpose.msra.mxu0 %v14789_v61  ;;  %10799 = vmatpush1.bf16.xpose.msra.mxu1 %v14792_v33  ;;  %v14837_v33 = vld [vmem:[%s21717_s1 + $0x17a0] ss:$100 sps:$4 sm:$0xff]  }
 0x48c   :  { %10775 = vmatprep.subr.bf16.mxu0 %v14797_v12  ;;  %10800 = vmatprep.subr.bf16.mxu1 %v14800_v13  ;;  %v14845_v12 = vld [vmem:[%s21717_s1 + $0x16dc] ss:$100 sps:$4 sm:$0xff]  }
 0x48d   :  { %v14843_v13 = vld [vmem:[%s21717_s1 + $0x16d8] ss:$100 sps:$4 sm:$0xff]  }
 0x493   :  { %10776 = vmatpush2.bf16.xpose.msra.mxu0 %v14795_v17  ;;  %10801 = vmatpush1.bf16.xpose.msra.mxu1 %v14798_v18  ;;  %v14846_v17 = vld [vmem:[%s21717_s1 + $0x10a0] ss:$100 sps:$4 sm:$0xff]   ;;  %v14851_v18 = vld [vmem:[%s21717_s1 + $0x1614] ss:$100 sps:$4 sm:$0xff]  }
 0x494   :  { %10777 = vmatprep.subr.bf16.mxu0 %v14803_v19  ;;  %10802 = vmatprep.subr.bf16.mxu1 %v14806_v22  ;;  %v14854_v19 = vld [vmem:[%s21717_s1 + $0xfdc] ss:$100 sps:$4 sm:$0xff]   ;;  %v14849_v22 = vld [vmem:[%s21717_s1 + $0x1610] ss:$100 sps:$4 sm:$0xff]  }
 0x49b   :  { %10778 = vmatpush2.bf16.xpose.msra.mxu0 %v14801_v23  ;;  %10803 = vmatpush1.bf16.xpose.msra.mxu1 %v14804_v28  ;;  %v14852_v23 = vld [vmem:[%s21717_s1 + $0xfd8] ss:$100 sps:$4 sm:$0xff]   ;;  %v14857_v28 = vld [vmem:[%s21717_s1 + $0x154c] ss:$100 sps:$4 sm:$0xff]  }
 0x49c   :  { %10779 = vmatprep.subr.bf16.mxu0 %v14809_v7  ;;  %10804 = vmatprep.subr.bf16.mxu1 %v14812_v31  ;;  %v14860_v7 = vld [vmem:[%s21717_s1 + $0xf14] ss:$100 sps:$4 sm:$0xff]   ;;  %v14855_v31 = vld [vmem:[%s21717_s1 + $0x1548] ss:$100 sps:$4 sm:$0xff]  }
 0x4a3   :  { %10780 = vmatpush2.bf16.xpose.msra.mxu0 %v14807_v32  ;;  %10805 = vmatpush1.bf16.xpose.msra.mxu1 %v14810_v35  ;;  %v14858_v32 = vld [vmem:[%s21717_s1 + $0xf10] ss:$100 sps:$4 sm:$0xff]   ;;  %v14863_v35 = vld [vmem:[%s21717_s1 + $0x1484] ss:$100 sps:$4 sm:$0xff]  }
 0x4a4   :  { %10781 = vmatprep.subr.bf16.mxu0 %v14815_v40  ;;  %10806 = vmatprep.subr.bf16.mxu1 %v14818_v47  ;;  %v14866_v40 = vld [vmem:[%s21717_s1 + $0xe4c] ss:$100 sps:$4 sm:$0xff]   ;;  %v14861_v47 = vld [vmem:[%s21717_s1 + $0x1480] ss:$100 sps:$4 sm:$0xff]  }
 0x4ab   :  { %10782 = vmatpush2.bf16.xpose.msra.mxu0 %v14813_v48  ;;  %10807 = vmatpush1.bf16.xpose.msra.mxu1 %v14816_v58  ;;  %v14864_v48 = vld [vmem:[%s21717_s1 + $0xe48] ss:$100 sps:$4 sm:$0xff]   ;;  %v14869_v58 = vld [vmem:[%s21717_s1 + $0x13bc] ss:$100 sps:$4 sm:$0xff]  }
 0x4ac   :  { %10783 = vmatprep.subr.bf16.mxu0 %v14821_v34  ;;  %10808 = vmatprep.subr.bf16.mxu1 %v14824_v51  ;;  %v14872_v34 = vld [vmem:[%s21717_s1 + $0xd84] ss:$100 sps:$4 sm:$0xff]   ;;  %v14867_v51 = vld [vmem:[%s21717_s1 + $0x13b8] ss:$100 sps:$4 sm:$0xff]  }
 0x4b3   :  { %10784 = vmatpush2.bf16.xpose.msra.mxu0 %v14819_v43  ;;  %10809 = vmatpush1.bf16.xpose.msra.mxu1 %v14822_v55  ;;  %v14870_v43 = vld [vmem:[%s21717_s1 + $0xd80] ss:$100 sps:$4 sm:$0xff]   ;;  %v14875_v55 = vld [vmem:[%s21717_s1 + $0x12f4] ss:$100 sps:$4 sm:$0xff]  }
 0x4b4   :  { %10785 = vmatprep.subr.bf16.mxu0 %v14827_v60  ;;  %10810 = vmatprep.subr.bf16.mxu1 %v14830_v16  ;;  %v14878_v60 = vld [vmem:[%s21717_s1 + $0xcbc] ss:$100 sps:$4 sm:$0xff]   ;;  %v14873_v16 = vld [vmem:[%s21717_s1 + $0x12f0] ss:$100 sps:$4 sm:$0xff]  }
 0x4bb   :  { %10786 = vmatpush2.bf16.xpose.msra.mxu0 %v14825_v0  ;;  %10811 = vmatpush1.bf16.xpose.msra.mxu1 %v14828_v42  ;;  %v14876_v0 = vld [vmem:[%s21717_s1 + $0xcb8] ss:$100 sps:$4 sm:$0xff]  }
 0x4bc   :  { %10812 = vmatprep.subr.bf16.mxu1 %v14833_v56  ;;  %10837 = vmatprep.subr.bf16.mxu0 %v14836_v52  ;;  %v14881_v42 = vld [vmem:[%s21717_s1 + $0x1874] ss:$100 sps:$4 sm:$0xff]   ;;  %v14884_v56 = vld [vmem:[%s21717_s1 + $0x123c] ss:$100 sps:$4 sm:$0xff]  }
 0x4bd   :  { %v14879_v52 = vld [vmem:[%s21717_s1 + $0x1870] ss:$100 sps:$4 sm:$0xff]  }
 0x4c2   :  { %v10666_v54 = vpop.f32.mrf.mxu1  ;;  %10788 = vmatmul.mubr.bf16.vlgmr.msra.gmra.mxu0 %v17016_v63 }
 0x4c3   :  { %v18452_v50 = vadd.f32 %v10666_v54, %v18349_v3  ;;  %10813 = vmatpush2.bf16.xpose.msra.mxu1 %v14831_v1  ;;  %10838 = vmatpush1.bf16.xpose.msra.mxu0 %v14834_v21  ;;  %v14840_v3 = vld [vmem:[%s21717_s1 + $0x1168] ss:$100 sps:$4 sm:$0xff]   ;;  %v14882_v1 = vld [vmem:[%s21717_s1 + $0x1238] ss:$100 sps:$4 sm:$0xff]  }
 0x4c4   :  { %v10668_v4 = vpop.f32.mrf.mxu1  ;;  %10814 = vmatprep.subr.bf16.mxu1 %v14839_v26  ;;  %10839 = vmatprep.subr.bf16.mxu0 %v14842_v53  ;;  %v14887_v21 = vld [vmem:[%s21717_s1 + $0x17ac] ss:$100 sps:$4 sm:$0xff]   ;;  %v14890_v26 = vld [vmem:[%s21717_s1 + $0x1174] ss:$100 sps:$4 sm:$0xff]  }
 0x4c5   :  { %v18455_v8 = vadd.f32 %v10668_v4, %v18351_v5  ;;  %10869 = vmatprep.mubr.bf16.mxu0 %v17030_v20  ;;  %v14848_v5 = vld [vmem:[%s21717_s1 + $0x10a4] ss:$100 sps:$4 sm:$0xff]  }
 0x4c6   :  { %v10670_v61 = vpop.f32.mrf.mxu1 }
 0x4c8   :  { %v10671_v9 = vpop.f32.mrf.mxu1 }
 0x4cb   :  { %10815 = vmatpush2.bf16.xpose.msra.mxu1 %v14837_v33  ;;  %10840 = vmatpush1.bf16.xpose.msra.mxu0 %v14840_v3  ;;  %v14885_v3 = vld [vmem:[%s21717_s1 + $0x17a8] ss:$100 sps:$4 sm:$0xff]  }
 0x4cc   :  { %10816 = vmatprep.subr.bf16.mxu1 %v14845_v12  ;;  %10841 = vmatprep.subr.bf16.mxu0 %v14848_v5  ;;  %v14893_v12 = vld [vmem:[%s21717_s1 + $0x16e4] ss:$100 sps:$4 sm:$0xff]  }
 0x4cd   :  { %v14891_v5 = vld [vmem:[%s21717_s1 + $0x16e0] ss:$100 sps:$4 sm:$0xff]  }
 0x4d3   :  { %10817 = vmatpush2.bf16.xpose.msra.mxu1 %v14843_v13  ;;  %10842 = vmatpush1.bf16.xpose.msra.mxu0 %v14846_v17  ;;  %v14894_v13 = vld [vmem:[%s21717_s1 + $0x10a8] ss:$100 sps:$4 sm:$0xff]   ;;  %v14899_v17 = vld [vmem:[%s21717_s1 + $0x161c] ss:$100 sps:$4 sm:$0xff]  }
 0x4d4   :  { %10818 = vmatprep.subr.bf16.mxu1 %v14851_v18  ;;  %10843 = vmatprep.subr.bf16.mxu0 %v14854_v19  ;;  %v14902_v18 = vld [vmem:[%s21717_s1 + $0xfe4] ss:$100 sps:$4 sm:$0xff]   ;;  %v14897_v19 = vld [vmem:[%s21717_s1 + $0x1618] ss:$100 sps:$4 sm:$0xff]  }
 0x4db   :  { %10819 = vmatpush2.bf16.xpose.msra.mxu1 %v14849_v22  ;;  %10844 = vmatpush1.bf16.xpose.msra.mxu0 %v14852_v23  ;;  %v14900_v22 = vld [vmem:[%s21717_s1 + $0xfe0] ss:$100 sps:$4 sm:$0xff]   ;;  %v14905_v23 = vld [vmem:[%s21717_s1 + $0x1554] ss:$100 sps:$4 sm:$0xff]  }
 0x4dc   :  { %10820 = vmatprep.subr.bf16.mxu1 %v14857_v28  ;;  %10845 = vmatprep.subr.bf16.mxu0 %v14860_v7  ;;  %v14908_v28 = vld [vmem:[%s21717_s1 + $0xf1c] ss:$100 sps:$4 sm:$0xff]   ;;  %v14903_v7 = vld [vmem:[%s21717_s1 + $0x1550] ss:$100 sps:$4 sm:$0xff]  }
 0x4e3   :  { %10821 = vmatpush2.bf16.xpose.msra.mxu1 %v14855_v31  ;;  %10846 = vmatpush1.bf16.xpose.msra.mxu0 %v14858_v32  ;;  %v14906_v31 = vld [vmem:[%s21717_s1 + $0xf18] ss:$100 sps:$4 sm:$0xff]   ;;  %v14911_v32 = vld [vmem:[%s21717_s1 + $0x148c] ss:$100 sps:$4 sm:$0xff]  }
 0x4e4   :  { %10822 = vmatprep.subr.bf16.mxu1 %v14863_v35  ;;  %10847 = vmatprep.subr.bf16.mxu0 %v14866_v40  ;;  %v14914_v35 = vld [vmem:[%s21717_s1 + $0xe54] ss:$100 sps:$4 sm:$0xff]   ;;  %v14909_v40 = vld [vmem:[%s21717_s1 + $0x1488] ss:$100 sps:$4 sm:$0xff]  }
 0x4eb   :  { %10823 = vmatpush2.bf16.xpose.msra.mxu1 %v14861_v47  ;;  %10848 = vmatpush1.bf16.xpose.msra.mxu0 %v14864_v48  ;;  %v14912_v47 = vld [vmem:[%s21717_s1 + $0xe50] ss:$100 sps:$4 sm:$0xff]   ;;  %v14917_v48 = vld [vmem:[%s21717_s1 + $0x13c4] ss:$100 sps:$4 sm:$0xff]  }
 0x4ec   :  { %10824 = vmatprep.subr.bf16.mxu1 %v14869_v58  ;;  %10849 = vmatprep.subr.bf16.mxu0 %v14872_v34  ;;  %v14920_v58 = vld [vmem:[%s21717_s1 + $0xd8c] ss:$100 sps:$4 sm:$0xff]   ;;  %v14915_v34 = vld [vmem:[%s21717_s1 + $0x13c0] ss:$100 sps:$4 sm:$0xff]  }
 0x4f3   :  { %10825 = vmatpush2.bf16.xpose.msra.mxu1 %v14867_v51  ;;  %10850 = vmatpush1.bf16.xpose.msra.mxu0 %v14870_v43  ;;  %v14918_v51 = vld [vmem:[%s21717_s1 + $0xd88] ss:$100 sps:$4 sm:$0xff]   ;;  %v14923_v43 = vld [vmem:[%s21717_s1 + $0x12fc] ss:$100 sps:$4 sm:$0xff]  }
 0x4f4   :  { %10826 = vmatprep.subr.bf16.mxu1 %v14875_v55  ;;  %10851 = vmatprep.subr.bf16.mxu0 %v14878_v60  ;;  %v14926_v55 = vld [vmem:[%s21717_s1 + $0xcc4] ss:$100 sps:$4 sm:$0xff]   ;;  %v14921_v60 = vld [vmem:[%s21717_s1 + $0x12f8] ss:$100 sps:$4 sm:$0xff]  }
 0x4fb   :  { %10827 = vmatpush2.bf16.xpose.msra.mxu1 %v14873_v16  ;;  %10852 = vmatpush1.bf16.xpose.msra.mxu0 %v14876_v0  ;;  %v14924_v16 = vld [vmem:[%s21717_s1 + $0xcc0] ss:$100 sps:$4 sm:$0xff]  }
 0x4fc   :  { %10853 = vmatprep.subr.bf16.mxu0 %v14881_v42  ;;  %10878 = vmatprep.subr.bf16.mxu1 %v14884_v56  ;;  %v14929_v0 = vld [vmem:[%s21717_s1 + $0x187c] ss:$100 sps:$4 sm:$0xff]   ;;  %v14932_v42 = vld [vmem:[%s21717_s1 + $0x1244] ss:$100 sps:$4 sm:$0xff]  }
 0x4fd   :  { %v14927_v56 = vld [vmem:[%s21717_s1 + $0x1878] ss:$100 sps:$4 sm:$0xff]  }
 0x502   :  { %v10707_v53 = vpop.f32.mrf.mxu0  ;;  %10829 = vmatmul.mubr.bf16.vlgmr.msra.gmra.mxu1 %v17240_v45 }
 0x503   :  { %v18556_v54 = vadd.f32 %v10707_v53, %v18452_v50  ;;  %10854 = vmatpush2.bf16.xpose.msra.mxu0 %v14879_v52  ;;  %10879 = vmatpush1.bf16.xpose.msra.mxu1 %v14882_v1  ;;  %v14888_v50 = vld [vmem:[%s21717_s1 + $0x1170] ss:$100 sps:$4 sm:$0xff]   ;;  %v14930_v52 = vld [vmem:[%s21717_s1 + $0x1240] ss:$100 sps:$4 sm:$0xff]  }
 0x504   :  { %v10709_v4 = vpop.f32.mrf.mxu0  ;;  %10855 = vmatprep.subr.bf16.mxu0 %v14887_v21  ;;  %10880 = vmatprep.subr.bf16.mxu1 %v14890_v26  ;;  %v14935_v1 = vld [vmem:[%s21717_s1 + $0x17b4] ss:$100 sps:$4 sm:$0xff]   ;;  %v14938_v21 = vld [vmem:[%s21717_s1 + $0x117c] ss:$100 sps:$4 sm:$0xff]  }
 0x505   :  { %v18559_v61 = vadd.f32 %v10709_v4, %v18455_v8  ;;  %10910 = vmatprep.mubr.bf16.mxu1 %v17254_v49  ;;  %v14896_v8 = vld [vmem:[%s21717_s1 + $0x10ac] ss:$100 sps:$4 sm:$0xff]  }
 0x506   :  { %v10711_v33 = vpop.f32.mrf.mxu0 }
 0x508   :  { %v10712_v9 = vpop.f32.mrf.mxu0 }
 0x50b   :  { %10856 = vmatpush2.bf16.xpose.msra.mxu0 %v14885_v3  ;;  %10881 = vmatpush1.bf16.xpose.msra.mxu1 %v14888_v50  ;;  %v14933_v50 = vld [vmem:[%s21717_s1 + $0x17b0] ss:$100 sps:$4 sm:$0xff]  }
 0x50c   :  { %10857 = vmatprep.subr.bf16.mxu0 %v14893_v12  ;;  %10882 = vmatprep.subr.bf16.mxu1 %v14896_v8  ;;  %v14941_v12 = vld [vmem:[%s21717_s1 + $0x16ec] ss:$100 sps:$4 sm:$0xff]  }
 0x50d   :  { %v14939_v8 = vld [vmem:[%s21717_s1 + $0x16e8] ss:$100 sps:$4 sm:$0xff]  }
 0x513   :  { %10858 = vmatpush2.bf16.xpose.msra.mxu0 %v14891_v5  ;;  %10883 = vmatpush1.bf16.xpose.msra.mxu1 %v14894_v13  ;;  %v14942_v5 = vld [vmem:[%s21717_s1 + $0x10b0] ss:$100 sps:$4 sm:$0xff]   ;;  %v14947_v13 = vld [vmem:[%s21717_s1 + $0x1624] ss:$100 sps:$4 sm:$0xff]  }
 0x514   :  { %10859 = vmatprep.subr.bf16.mxu0 %v14899_v17  ;;  %10884 = vmatprep.subr.bf16.mxu1 %v14902_v18  ;;  %v14950_v17 = vld [vmem:[%s21717_s1 + $0xfec] ss:$100 sps:$4 sm:$0xff]   ;;  %v14945_v18 = vld [vmem:[%s21717_s1 + $0x1620] ss:$100 sps:$4 sm:$0xff]  }
 0x51b   :  { %10860 = vmatpush2.bf16.xpose.msra.mxu0 %v14897_v19  ;;  %10885 = vmatpush1.bf16.xpose.msra.mxu1 %v14900_v22  ;;  %v14948_v19 = vld [vmem:[%s21717_s1 + $0xfe8] ss:$100 sps:$4 sm:$0xff]   ;;  %v14953_v22 = vld [vmem:[%s21717_s1 + $0x155c] ss:$100 sps:$4 sm:$0xff]  }
 0x51c   :  { %10861 = vmatprep.subr.bf16.mxu0 %v14905_v23  ;;  %10886 = vmatprep.subr.bf16.mxu1 %v14908_v28  ;;  %v14956_v23 = vld [vmem:[%s21717_s1 + $0xf24] ss:$100 sps:$4 sm:$0xff]   ;;  %v14951_v28 = vld [vmem:[%s21717_s1 + $0x1558] ss:$100 sps:$4 sm:$0xff]  }
 0x523   :  { %10862 = vmatpush2.bf16.xpose.msra.mxu0 %v14903_v7  ;;  %10887 = vmatpush1.bf16.xpose.msra.mxu1 %v14906_v31  ;;  %v14954_v7 = vld [vmem:[%s21717_s1 + $0xf20] ss:$100 sps:$4 sm:$0xff]   ;;  %v14959_v31 = vld [vmem:[%s21717_s1 + $0x1494] ss:$100 sps:$4 sm:$0xff]  }
 0x524   :  { %10863 = vmatprep.subr.bf16.mxu0 %v14911_v32  ;;  %10888 = vmatprep.subr.bf16.mxu1 %v14914_v35  ;;  %v14962_v32 = vld [vmem:[%s21717_s1 + $0xe5c] ss:$100 sps:$4 sm:$0xff]   ;;  %v14957_v35 = vld [vmem:[%s21717_s1 + $0x1490] ss:$100 sps:$4 sm:$0xff]  }
 0x52b   :  { %10864 = vmatpush2.bf16.xpose.msra.mxu0 %v14909_v40  ;;  %10889 = vmatpush1.bf16.xpose.msra.mxu1 %v14912_v47  ;;  %v14960_v40 = vld [vmem:[%s21717_s1 + $0xe58] ss:$100 sps:$4 sm:$0xff]   ;;  %v14965_v47 = vld [vmem:[%s21717_s1 + $0x13cc] ss:$100 sps:$4 sm:$0xff]  }
 0x52c   :  { %10865 = vmatprep.subr.bf16.mxu0 %v14917_v48  ;;  %10890 = vmatprep.subr.bf16.mxu1 %v14920_v58  ;;  %v14968_v48 = vld [vmem:[%s21717_s1 + $0xd94] ss:$100 sps:$4 sm:$0xff]   ;;  %v14963_v58 = vld [vmem:[%s21717_s1 + $0x13c8] ss:$100 sps:$4 sm:$0xff]  }
 0x533   :  { %10866 = vmatpush2.bf16.xpose.msra.mxu0 %v14915_v34  ;;  %10891 = vmatpush1.bf16.xpose.msra.mxu1 %v14918_v51  ;;  %v14966_v34 = vld [vmem:[%s21717_s1 + $0xd90] ss:$100 sps:$4 sm:$0xff]   ;;  %v14971_v51 = vld [vmem:[%s21717_s1 + $0x1304] ss:$100 sps:$4 sm:$0xff]  }
 0x534   :  { %10867 = vmatprep.subr.bf16.mxu0 %v14923_v43  ;;  %10892 = vmatprep.subr.bf16.mxu1 %v14926_v55  ;;  %v14974_v43 = vld [vmem:[%s21717_s1 + $0xccc] ss:$100 sps:$4 sm:$0xff]   ;;  %v14969_v55 = vld [vmem:[%s21717_s1 + $0x1300] ss:$100 sps:$4 sm:$0xff]  }
 0x53b   :  { %10868 = vmatpush2.bf16.xpose.msra.mxu0 %v14921_v60  ;;  %10893 = vmatpush1.bf16.xpose.msra.mxu1 %v14924_v16  ;;  %v14972_v60 = vld [vmem:[%s21717_s1 + $0xcc8] ss:$100 sps:$4 sm:$0xff]  }
 0x53c   :  { %10894 = vmatprep.subr.bf16.mxu1 %v14929_v0  ;;  %10919 = vmatprep.subr.bf16.mxu0 %v14932_v42  ;;  %v14977_v16 = vld [vmem:[%s21717_s1 + $0x1884] ss:$100 sps:$4 sm:$0xff]   ;;  %v14980_v0 = vld [vmem:[%s21717_s1 + $0x124c] ss:$100 sps:$4 sm:$0xff]  }
 0x53d   :  { %v14975_v42 = vld [vmem:[%s21717_s1 + $0x1880] ss:$100 sps:$4 sm:$0xff]  }
 0x542   :  { %v10748_v26 = vpop.f32.mrf.mxu1  ;;  %10870 = vmatmul.mubr.bf16.vlgmr.msra.gmra.mxu0 %v17244_v46 }
 0x543   :  { %v18660_v53 = vadd.f32 %v10748_v26, %v18556_v54  ;;  %10895 = vmatpush2.bf16.xpose.msra.mxu1 %v14927_v56  ;;  %10920 = vmatpush1.bf16.xpose.msra.mxu0 %v14930_v52  ;;  %v14936_v54 = vld [vmem:[%s21717_s1 + $0x1178] ss:$100 sps:$4 sm:$0xff]   ;;  %v14978_v56 = vld [vmem:[%s21717_s1 + $0x1248] ss:$100 sps:$4 sm:$0xff]  }
 0x544   :  { %v10750_v4 = vpop.f32.mrf.mxu1  ;;  %10896 = vmatprep.subr.bf16.mxu1 %v14935_v1  ;;  %10921 = vmatprep.subr.bf16.mxu0 %v14938_v21  ;;  %v14983_v52 = vld [vmem:[%s21717_s1 + $0x17bc] ss:$100 sps:$4 sm:$0xff]   ;;  %v14986_v1 = vld [vmem:[%s21717_s1 + $0x1184] ss:$100 sps:$4 sm:$0xff]  }
 0x545   :  { %v18663_v33 = vadd.f32 %v10750_v4, %v18559_v61  ;;  %10951 = vmatprep.mubr.bf16.mxu0 %v17258_v57  ;;  %v14944_v61 = vld [vmem:[%s21717_s1 + $0x10b4] ss:$100 sps:$4 sm:$0xff]  }
 0x546   :  { %v10752_v3 = vpop.f32.mrf.mxu1 }
 0x548   :  { %v10753_v9 = vpop.f32.mrf.mxu1 }
 0x54b   :  { %10897 = vmatpush2.bf16.xpose.msra.mxu1 %v14933_v50  ;;  %10922 = vmatpush1.bf16.xpose.msra.mxu0 %v14936_v54  ;;  %v14981_v54 = vld [vmem:[%s21717_s1 + $0x17b8] ss:$100 sps:$4 sm:$0xff]  }
 0x54c   :  { %10898 = vmatprep.subr.bf16.mxu1 %v14941_v12  ;;  %10923 = vmatprep.subr.bf16.mxu0 %v14944_v61  ;;  %v14989_v12 = vld [vmem:[%s21717_s1 + $0x16f4] ss:$100 sps:$4 sm:$0xff]  }
 0x54d   :  { %v14987_v61 = vld [vmem:[%s21717_s1 + $0x16f0] ss:$100 sps:$4 sm:$0xff]  }
 0x553   :  { %10899 = vmatpush2.bf16.xpose.msra.mxu1 %v14939_v8  ;;  %10924 = vmatpush1.bf16.xpose.msra.mxu0 %v14942_v5  ;;  %v14990_v8 = vld [vmem:[%s21717_s1 + $0x10b8] ss:$100 sps:$4 sm:$0xff]   ;;  %v14995_v5 = vld [vmem:[%s21717_s1 + $0x162c] ss:$100 sps:$4 sm:$0xff]  }
 0x554   :  { %10900 = vmatprep.subr.bf16.mxu1 %v14947_v13  ;;  %10925 = vmatprep.subr.bf16.mxu0 %v14950_v17  ;;  %v14998_v13 = vld [vmem:[%s21717_s1 + $0xff4] ss:$100 sps:$4 sm:$0xff]   ;;  %v14993_v17 = vld [vmem:[%s21717_s1 + $0x1628] ss:$100 sps:$4 sm:$0xff]  }
 0x55b   :  { %10901 = vmatpush2.bf16.xpose.msra.mxu1 %v14945_v18  ;;  %10926 = vmatpush1.bf16.xpose.msra.mxu0 %v14948_v19  ;;  %v14996_v18 = vld [vmem:[%s21717_s1 + $0xff0] ss:$100 sps:$4 sm:$0xff]   ;;  %v15001_v19 = vld [vmem:[%s21717_s1 + $0x1564] ss:$100 sps:$4 sm:$0xff]  }
 0x55c   :  { %10902 = vmatprep.subr.bf16.mxu1 %v14953_v22  ;;  %10927 = vmatprep.subr.bf16.mxu0 %v14956_v23  ;;  %v15004_v22 = vld [vmem:[%s21717_s1 + $0xf2c] ss:$100 sps:$4 sm:$0xff]   ;;  %v14999_v23 = vld [vmem:[%s21717_s1 + $0x1560] ss:$100 sps:$4 sm:$0xff]  }
 0x563   :  { %10903 = vmatpush2.bf16.xpose.msra.mxu1 %v14951_v28  ;;  %10928 = vmatpush1.bf16.xpose.msra.mxu0 %v14954_v7  ;;  %v15002_v28 = vld [vmem:[%s21717_s1 + $0xf28] ss:$100 sps:$4 sm:$0xff]   ;;  %v15007_v7 = vld [vmem:[%s21717_s1 + $0x149c] ss:$100 sps:$4 sm:$0xff]  }
 0x564   :  { %10904 = vmatprep.subr.bf16.mxu1 %v14959_v31  ;;  %10929 = vmatprep.subr.bf16.mxu0 %v14962_v32  ;;  %v15010_v31 = vld [vmem:[%s21717_s1 + $0xe64] ss:$100 sps:$4 sm:$0xff]   ;;  %v15005_v32 = vld [vmem:[%s21717_s1 + $0x1498] ss:$100 sps:$4 sm:$0xff]  }
 0x56b   :  { %10905 = vmatpush2.bf16.xpose.msra.mxu1 %v14957_v35  ;;  %10930 = vmatpush1.bf16.xpose.msra.mxu0 %v14960_v40  ;;  %v15008_v35 = vld [vmem:[%s21717_s1 + $0xe60] ss:$100 sps:$4 sm:$0xff]   ;;  %v15013_v40 = vld [vmem:[%s21717_s1 + $0x13d4] ss:$100 sps:$4 sm:$0xff]  }
 0x56c   :  { %10906 = vmatprep.subr.bf16.mxu1 %v14965_v47  ;;  %10931 = vmatprep.subr.bf16.mxu0 %v14968_v48  ;;  %v15016_v47 = vld [vmem:[%s21717_s1 + $0xd9c] ss:$100 sps:$4 sm:$0xff]   ;;  %v15011_v48 = vld [vmem:[%s21717_s1 + $0x13d0] ss:$100 sps:$4 sm:$0xff]  }
 0x573   :  { %10907 = vmatpush2.bf16.xpose.msra.mxu1 %v14963_v58  ;;  %10932 = vmatpush1.bf16.xpose.msra.mxu0 %v14966_v34  ;;  %v15014_v58 = vld [vmem:[%s21717_s1 + $0xd98] ss:$100 sps:$4 sm:$0xff]   ;;  %v15019_v34 = vld [vmem:[%s21717_s1 + $0x130c] ss:$100 sps:$4 sm:$0xff]  }
 0x574   :  { %10908 = vmatprep.subr.bf16.mxu1 %v14971_v51  ;;  %10933 = vmatprep.subr.bf16.mxu0 %v14974_v43  ;;  %v15022_v51 = vld [vmem:[%s21717_s1 + $0xcd4] ss:$100 sps:$4 sm:$0xff]   ;;  %v15017_v43 = vld [vmem:[%s21717_s1 + $0x1308] ss:$100 sps:$4 sm:$0xff]  }
 0x57b   :  { %10909 = vmatpush2.bf16.xpose.msra.mxu1 %v14969_v55  ;;  %10934 = vmatpush1.bf16.xpose.msra.mxu0 %v14972_v60  ;;  %v15020_v55 = vld [vmem:[%s21717_s1 + $0xcd0] ss:$100 sps:$4 sm:$0xff]  }
 0x57c   :  { %10935 = vmatprep.subr.bf16.mxu0 %v14977_v16  ;;  %10960 = vmatprep.subr.bf16.mxu1 %v14980_v0  ;;  %v15025_v60 = vld [vmem:[%s21717_s1 + $0x188c] ss:$100 sps:$4 sm:$0xff]   ;;  %v15028_v16 = vld [vmem:[%s21717_s1 + $0x1254] ss:$100 sps:$4 sm:$0xff]  }
 0x57d   :  { %v15023_v0 = vld [vmem:[%s21717_s1 + $0x1888] ss:$100 sps:$4 sm:$0xff]  }
 0x582   :  { %v10789_v21 = vpop.f32.mrf.mxu0  ;;  %10911 = vmatmul.mubr.bf16.vlgmr.msra.gmra.mxu1 %v17468_v37 }
 0x583   :  { %v18764_v26 = vadd.f32 %v10789_v21, %v18660_v53  ;;  %10936 = vmatpush2.bf16.xpose.msra.mxu0 %v14975_v42  ;;  %10961 = vmatpush1.bf16.xpose.msra.mxu1 %v14978_v56  ;;  %v14984_v53 = vld [vmem:[%s21717_s1 + $0x1180] ss:$100 sps:$4 sm:$0xff]   ;;  %v15026_v42 = vld [vmem:[%s21717_s1 + $0x1250] ss:$100 sps:$4 sm:$0xff]  }
 0x584   :  { %v10791_v4 = vpop.f32.mrf.mxu0  ;;  %10937 = vmatprep.subr.bf16.mxu0 %v14983_v52  ;;  %10962 = vmatprep.subr.bf16.mxu1 %v14986_v1  ;;  %v15031_v56 = vld [vmem:[%s21717_s1 + $0x17c4] ss:$100 sps:$4 sm:$0xff]   ;;  %v15034_v52 = vld [vmem:[%s21717_s1 + $0x118c] ss:$100 sps:$4 sm:$0xff]  }
 0x585   :  { %v18767_v3 = vadd.f32 %v10791_v4, %v18663_v33  ;;  %10992 = vmatprep.mubr.bf16.mxu1 %v17482_v44  ;;  %v14992_v33 = vld [vmem:[%s21717_s1 + $0x10bc] ss:$100 sps:$4 sm:$0xff]  }
 0x586   :  { %v10793_v50 = vpop.f32.mrf.mxu0 }
 0x588   :  { %v10794_v9 = vpop.f32.mrf.mxu0 }
 0x58b   :  { %10938 = vmatpush2.bf16.xpose.msra.mxu0 %v14981_v54  ;;  %10963 = vmatpush1.bf16.xpose.msra.mxu1 %v14984_v53  ;;  %v15029_v53 = vld [vmem:[%s21717_s1 + $0x17c0] ss:$100 sps:$4 sm:$0xff]  }
 0x58c   :  { %10939 = vmatprep.subr.bf16.mxu0 %v14989_v12  ;;  %10964 = vmatprep.subr.bf16.mxu1 %v14992_v33  ;;  %v15037_v12 = vld [vmem:[%s21717_s1 + $0x16fc] ss:$100 sps:$4 sm:$0xff]  }
 0x58d   :  { %v15035_v33 = vld [vmem:[%s21717_s1 + $0x16f8] ss:$100 sps:$4 sm:$0xff]  }
 0x593   :  { %10940 = vmatpush2.bf16.xpose.msra.mxu0 %v14987_v61  ;;  %10965 = vmatpush1.bf16.xpose.msra.mxu1 %v14990_v8  ;;  %v15038_v61 = vld [vmem:[%s21717_s1 + $0x10c0] ss:$100 sps:$4 sm:$0xff]   ;;  %v15043_v8 = vld [vmem:[%s21717_s1 + $0x1634] ss:$100 sps:$4 sm:$0xff]  }
 0x594   :  { %10941 = vmatprep.subr.bf16.mxu0 %v14995_v5  ;;  %10966 = vmatprep.subr.bf16.mxu1 %v14998_v13  ;;  %v15046_v5 = vld [vmem:[%s21717_s1 + $0xffc] ss:$100 sps:$4 sm:$0xff]   ;;  %v15041_v13 = vld [vmem:[%s21717_s1 + $0x1630] ss:$100 sps:$4 sm:$0xff]  }
 0x59b   :  { %10942 = vmatpush2.bf16.xpose.msra.mxu0 %v14993_v17  ;;  %10967 = vmatpush1.bf16.xpose.msra.mxu1 %v14996_v18  ;;  %v15044_v17 = vld [vmem:[%s21717_s1 + $0xff8] ss:$100 sps:$4 sm:$0xff]   ;;  %v15049_v18 = vld [vmem:[%s21717_s1 + $0x156c] ss:$100 sps:$4 sm:$0xff]  }
 0x59c   :  { %10943 = vmatprep.subr.bf16.mxu0 %v15001_v19  ;;  %10968 = vmatprep.subr.bf16.mxu1 %v15004_v22  ;;  %v15052_v19 = vld [vmem:[%s21717_s1 + $0xf34] ss:$100 sps:$4 sm:$0xff]   ;;  %v15047_v22 = vld [vmem:[%s21717_s1 + $0x1568] ss:$100 sps:$4 sm:$0xff]  }
 0x5a3   :  { %10944 = vmatpush2.bf16.xpose.msra.mxu0 %v14999_v23  ;;  %10969 = vmatpush1.bf16.xpose.msra.mxu1 %v15002_v28  ;;  %v15050_v23 = vld [vmem:[%s21717_s1 + $0xf30] ss:$100 sps:$4 sm:$0xff]   ;;  %v15055_v28 = vld [vmem:[%s21717_s1 + $0x14a4] ss:$100 sps:$4 sm:$0xff]  }
 0x5a4   :  { %10945 = vmatprep.subr.bf16.mxu0 %v15007_v7  ;;  %10970 = vmatprep.subr.bf16.mxu1 %v15010_v31  ;;  %v15058_v7 = vld [vmem:[%s21717_s1 + $0xe6c] ss:$100 sps:$4 sm:$0xff]   ;;  %v15053_v31 = vld [vmem:[%s21717_s1 + $0x14a0] ss:$100 sps:$4 sm:$0xff]  }
 0x5ab   :  { %10946 = vmatpush2.bf16.xpose.msra.mxu0 %v15005_v32  ;;  %10971 = vmatpush1.bf16.xpose.msra.mxu1 %v15008_v35  ;;  %v15056_v32 = vld [vmem:[%s21717_s1 + $0xe68] ss:$100 sps:$4 sm:$0xff]   ;;  %v15061_v35 = vld [vmem:[%s21717_s1 + $0x13dc] ss:$100 sps:$4 sm:$0xff]  }
 0x5ac   :  { %10947 = vmatprep.subr.bf16.mxu0 %v15013_v40  ;;  %10972 = vmatprep.subr.bf16.mxu1 %v15016_v47  ;;  %v15064_v40 = vld [vmem:[%s21717_s1 + $0xda4] ss:$100 sps:$4 sm:$0xff]   ;;  %v15059_v47 = vld [vmem:[%s21717_s1 + $0x13d8] ss:$100 sps:$4 sm:$0xff]  }
 0x5b3   :  { %10948 = vmatpush2.bf16.xpose.msra.mxu0 %v15011_v48  ;;  %10973 = vmatpush1.bf16.xpose.msra.mxu1 %v15014_v58  ;;  %v15062_v48 = vld [vmem:[%s21717_s1 + $0xda0] ss:$100 sps:$4 sm:$0xff]   ;;  %v15067_v58 = vld [vmem:[%s21717_s1 + $0x1314] ss:$100 sps:$4 sm:$0xff]  }
 0x5b4   :  { %10949 = vmatprep.subr.bf16.mxu0 %v15019_v34  ;;  %10974 = vmatprep.subr.bf16.mxu1 %v15022_v51  ;;  %v15070_v34 = vld [vmem:[%s21717_s1 + $0xcdc] ss:$100 sps:$4 sm:$0xff]   ;;  %v15065_v51 = vld [vmem:[%s21717_s1 + $0x1310] ss:$100 sps:$4 sm:$0xff]  }
 0x5bb   :  { %10950 = vmatpush2.bf16.xpose.msra.mxu0 %v15017_v43  ;;  %10975 = vmatpush1.bf16.xpose.msra.mxu1 %v15020_v55  ;;  %v15068_v43 = vld [vmem:[%s21717_s1 + $0xcd8] ss:$100 sps:$4 sm:$0xff]  }
 0x5bc   :  { %10976 = vmatprep.subr.bf16.mxu1 %v15025_v60  ;;  %11001 = vmatprep.subr.bf16.mxu0 %v15028_v16  ;;  %v15073_v55 = vld [vmem:[%s21717_s1 + $0x1894] ss:$100 sps:$4 sm:$0xff]  }
 0x5bd   :  { %v15074_v60 = vld [vmem:[%s21717_s1 + $0x1898] ss:$100 sps:$4 sm:$0xff]  }
 0x5be   :  { %v15075_v16 = vld [vmem:[%s21717_s1 + $0x1258] ss:$100 sps:$4 sm:$0xff]  }
 0x5c2   :  { %v10830_v1 = vpop.f32.mrf.mxu1  ;;  %10952 = vmatmul.mubr.bf16.vlgmr.msra.gmra.mxu0 %v17472_v38 }
 0x5c3   :  { %v18868_v21 = vadd.f32 %v10830_v1, %v18764_v26  ;;  %10977 = vmatpush2.bf16.xpose.msra.mxu1 %v15023_v0  ;;  %11002 = vmatpush1.bf16.xpose.msra.mxu0 %v15026_v42  ;;  %v15032_v26 = vld [vmem:[%s21717_s1 + $0x1188] ss:$100 sps:$4 sm:$0xff]   ;;  %v15071_v0 = vld [vmem:[%s21717_s1 + $0x1890] ss:$100 sps:$4 sm:$0xff]   ;;  %v9895_v42 = vsel %vm9821_vm0, %v15075_v16, 0 }
 0x5c4   :  { %v10832_v4 = vpop.f32.mrf.mxu1  ;;  %10978 = vmatprep.subr.bf16.mxu1 %v15031_v56  ;;  %11003 = vmatprep.subr.bf16.mxu0 %v15034_v52  ;;  %v15078_v56 = vld [vmem:[%s21717_s1 + $0x17cc] ss:$100 sps:$4 sm:$0xff]  }
 0x5c5   :  { %v18871_v50 = vadd.f32 %v10832_v4, %v18767_v3  ;;  %11033 = vmatprep.mubr.bf16.mxu0 %v17486_v41  ;;  %v15040_v3 = vld [vmem:[%s21717_s1 + $0x10c4] ss:$100 sps:$4 sm:$0xff]   ;;  %v15079_v52 = vld [vmem:[%s21717_s1 + $0x17d0] ss:$100 sps:$4 sm:$0xff]  }
 0x5c6   :  { %v10834_v54 = vpop.f32.mrf.mxu1 }
 0x5c8   :  { %v10835_v9 = vpop.f32.mrf.mxu1 }
 0x5c9   :  { %v18986_v9 = vld [vmem:[%s21718_s0 + $0x60] ss:$0 sps:$4 sm:$0xff]  }
 0x5cb   :  { %10979 = vmatpush2.bf16.xpose.msra.mxu1 %v15029_v53  ;;  %11004 = vmatpush1.bf16.xpose.msra.mxu0 %v15032_v26  ;;  %v15080_v53 = vld [vmem:[%s21717_s1 + $0x1190] ss:$100 sps:$4 sm:$0xff]  }
 0x5cc   :  { %10980 = vmatprep.subr.bf16.mxu1 %v15037_v12  ;;  %11005 = vmatprep.subr.bf16.mxu0 %v15040_v3  ;;  %v15076_v12 = vld [vmem:[%s21717_s1 + $0x17c8] ss:$100 sps:$4 sm:$0xff]  }
 0x5d3   :  { %10981 = vmatpush2.bf16.xpose.msra.mxu1 %v15035_v33  ;;  %11006 = vmatpush1.bf16.xpose.msra.mxu0 %v15038_v61  ;;  %v9892_v33 = vsel %vm9821_vm0, %v15080_v53, 0  ;;  %v15084_v61 = vld [vmem:[%s21717_s1 + $0x1708] ss:$100 sps:$4 sm:$0xff]  }
 0x5d4   :  { %10982 = vmatprep.subr.bf16.mxu1 %v15043_v8  ;;  %11007 = vmatprep.subr.bf16.mxu0 %v15046_v5  ;;  %v15085_v8 = vld [vmem:[%s21717_s1 + $0x10c8] ss:$100 sps:$4 sm:$0xff]   ;;  %v15081_v5 = vld [vmem:[%s21717_s1 + $0x1700] ss:$100 sps:$4 sm:$0xff]  }
 0x5d5   :  { %v15116_v53 = vld [vmem:[%s21717_s1 + $0x1e84] ss:$100 sps:$4 sm:$0xff]  }
 0x5db   :  { %10983 = vmatpush2.bf16.xpose.msra.mxu1 %v15041_v13  ;;  %11008 = vmatpush1.bf16.xpose.msra.mxu0 %v15044_v17  ;;  %v9889_v13 = vsel %vm9821_vm0, %v15085_v8, 0  ;;  %v15088_v17 = vld [vmem:[%s21717_s1 + $0x163c] ss:$100 sps:$4 sm:$0xff]  }
 0x5dc   :  { %10984 = vmatprep.subr.bf16.mxu1 %v15049_v18  ;;  %11009 = vmatprep.subr.bf16.mxu0 %v15052_v19  ;;  %v15089_v18 = vld [vmem:[%s21717_s1 + $0x1640] ss:$100 sps:$4 sm:$0xff]  }
 0x5dd   :  { %v15090_v19 = vld [vmem:[%s21717_s1 + $0x1000] ss:$100 sps:$4 sm:$0xff]  }
 0x5e3   :  { %10985 = vmatpush2.bf16.xpose.msra.mxu1 %v15047_v22  ;;  %11010 = vmatpush1.bf16.xpose.msra.mxu0 %v15050_v23  ;;  %v15086_v22 = vld [vmem:[%s21717_s1 + $0x1638] ss:$100 sps:$4 sm:$0xff]   ;;  %v9886_v23 = vsel %vm9821_vm0, %v15090_v19, 0  ;;  %v15123_v19 = vld [vmem:[%s21717_s1 + $0x1ce8] ss:$100 sps:$4 sm:$0xff]  }
 0x5e4   :  { %10986 = vmatprep.subr.bf16.mxu1 %v15055_v28  ;;  %11011 = vmatprep.subr.bf16.mxu0 %v15058_v7  ;;  %v15093_v28 = vld [vmem:[%s21717_s1 + $0x1574] ss:$100 sps:$4 sm:$0xff]  }
 0x5e5   :  { %v15094_v7 = vld [vmem:[%s21717_s1 + $0x1578] ss:$100 sps:$4 sm:$0xff]  }
 0x5eb   :  { %10987 = vmatpush2.bf16.xpose.msra.mxu1 %v15053_v31  ;;  %11012 = vmatpush1.bf16.xpose.msra.mxu0 %v15056_v32  ;;  %v15095_v31 = vld [vmem:[%s21717_s1 + $0xf38] ss:$100 sps:$4 sm:$0xff]   ;;  %v15091_v32 = vld [vmem:[%s21717_s1 + $0x1570] ss:$100 sps:$4 sm:$0xff]  }
 0x5ec   :  { %10988 = vmatprep.subr.bf16.mxu1 %v15061_v35  ;;  %11013 = vmatprep.subr.bf16.mxu0 %v15064_v40  ;;  %v9883_v35 = vsel %vm9821_vm0, %v15095_v31, 0  ;;  %v15098_v40 = vld [vmem:[%s21717_s1 + $0x14ac] ss:$100 sps:$4 sm:$0xff]  }
 0x5ed   :  { %v15132_v31 = vld [vmem:[%s21717_s1 + $0x1c28] ss:$100 sps:$4 sm:$0xff]  }
 0x5f3   :  { %10989 = vmatpush2.bf16.xpose.msra.mxu1 %v15059_v47  ;;  %11014 = vmatpush1.bf16.xpose.msra.mxu0 %v15062_v48  ;;  %v15099_v47 = vld [vmem:[%s21717_s1 + $0x14b0] ss:$100 sps:$4 sm:$0xff]  }
 0x5f4   :  { %10990 = vmatprep.subr.bf16.mxu1 %v15067_v58  ;;  %11015 = vmatprep.subr.bf16.mxu0 %v15070_v34  ;;  %v15100_v48 = vld [vmem:[%s21717_s1 + $0xe70] ss:$100 sps:$4 sm:$0xff]   ;;  %v15096_v58 = vld [vmem:[%s21717_s1 + $0x14a8] ss:$100 sps:$4 sm:$0xff]  }
 0x5f5   :  { %v9880_v34 = vsel %vm9821_vm0, %v15100_v48, 0  ;;  %v15143_v48 = vld [vmem:[%s21717_s1 + $0x1a94] ss:$100 sps:$4 sm:$0xff]  }
 0x5fb   :  { %10991 = vmatpush2.bf16.xpose.msra.mxu1 %v15065_v51  ;;  %11016 = vmatpush1.bf16.xpose.msra.mxu0 %v15068_v43  ;;  %v15103_v51 = vld [vmem:[%s21717_s1 + $0x13e4] ss:$100 sps:$4 sm:$0xff]  }
 0x5fc   :  { %11017 = vmatprep.subr.bf16.mxu0 %v15073_v55  ;;  %13878 = vmatprep.subr.msk.bf16.mxu1 %vm9821_vm0, %v15074_v60  ;;  %v15104_v43 = vld [vmem:[%s21717_s1 + $0x13e8] ss:$100 sps:$4 sm:$0xff]   ;;  %v15101_v60 = vld [vmem:[%s21717_s1 + $0x13e0] ss:$100 sps:$4 sm:$0xff]  }
 0x5fd   :  { %v15105_v55 = vld [vmem:[%s21717_s1 + $0xda8] ss:$100 sps:$4 sm:$0xff]  }
 0x5fe   :  { %v9877_v16 = vsel %vm9821_vm0, %v15105_v55, 0  ;;  %v15152_v55 = vld [vmem:[%s21717_s1 + $0x19d4] ss:$100 sps:$4 sm:$0xff]  }
 0x602   :  { %v10871_v1 = vpop.f32.mrf.mxu0  ;;  %10993 = vmatmul.mubr.bf16.vlgmr.msra.gmra.mxu1 %v17684_v36 }
 0x603   :  { %v18974_v4 = vadd.f32 %v10871_v1, %v18868_v21  ;;  %11018 = vmatpush2.bf16.xpose.msra.mxu0 %v15071_v0  ;;  %13817 = vmatpush3.bf16.xpose.msra.mxu1 %v9895_v42  ;;  %v15108_v0 = vld [vmem:[%s21717_s1 + $0x131c] ss:$100 sps:$4 sm:$0xff]  }
 0x604   :  { %v10873_v54 = vpop.f32.mrf.mxu0  ;;  %11019 = vmatprep.subr.bf16.mxu0 %v15078_v56  ;;  %13879 = vmatprep.subr.msk.bf16.mxu1 %vm9821_vm0, %v15079_v52  ;;  %v15109_v42 = vld [vmem:[%s21717_s1 + $0x1320] ss:$100 sps:$4 sm:$0xff]   ;;  %v15106_v52 = vld [vmem:[%s21717_s1 + $0x1318] ss:$100 sps:$4 sm:$0xff]  }
 0x605   :  { %v18981_v26 = vadd.f32 %v10873_v54, %v18871_v50  ;;  %13832 = vmatprep.mubr.msk.bf16.mxu1 %vm9821_vm0, %v18986_v9  ;;  %v15083_v50 = vld [vmem:[%s21717_s1 + $0x1704] ss:$100 sps:$4 sm:$0xff]   ;;  %v15113_v54 = vld [vmem:[%s21717_s1 + $0x1e7c] ss:$100 sps:$4 sm:$0xff]  }
 0x606   :  { %v10875_v21 = vpop.f32.mrf.mxu0  ;;  %v15110_v56 = vld [vmem:[%s21717_s1 + $0xce0] ss:$100 sps:$4 sm:$0xff]  }
 0x607   :  { %v9874_v1 = vsel %vm9821_vm0, %v15110_v56, 0  ;;  %v15111_v21 = vld [vmem:[%s21717_s1 + $0x1e78] ss:$100 sps:$4 sm:$0xff]   ;;  %v15153_v56 = vld [vmem:[%s21717_s1 + $0x1900] ss:$100 sps:$4 sm:$0xff]  }
 0x608   :  { %v10876_v3 = vpop.f32.mrf.mxu0 }
 0x609   :  { %v15119_v3 = vld [vmem:[%s21717_s1 + $0x1db4] ss:$100 sps:$4 sm:$0xff]  }
 0x60b   :  { %11020 = vmatpush2.bf16.xpose.msra.mxu0 %v15076_v12  ;;  %13819 = vmatpush3.bf16.xpose.msra.mxu1 %v9892_v33  ;;  %v15114_v12 = vld [vmem:[%s21717_s1 + $0x1e80] ss:$100 sps:$4 sm:$0xff]  }
 0x60c   :  { %11021 = vmatprep.subr.bf16.mxu0 %v15083_v50  ;;  %13880 = vmatprep.subr.msk.bf16.mxu1 %vm9821_vm0, %v15084_v61  ;;  %v15122_v33 = vld [vmem:[%s21717_s1 + $0x1dbc] ss:$100 sps:$4 sm:$0xff]  }
 0x613   :  { %11022 = vmatpush2.bf16.xpose.msra.mxu0 %v15081_v5  ;;  %13821 = vmatpush3.bf16.xpose.msra.mxu1 %v9889_v13 }
 0x614   :  { %11023 = vmatprep.subr.bf16.mxu0 %v15088_v17  ;;  %13881 = vmatprep.subr.msk.bf16.mxu1 %vm9821_vm0, %v15089_v18  ;;  %v15125_v18 = vld [vmem:[%s21717_s1 + $0x1cec] ss:$100 sps:$4 sm:$0xff]  }
 0x61b   :  { %11024 = vmatpush2.bf16.xpose.msra.mxu0 %v15086_v22  ;;  %13823 = vmatpush3.bf16.xpose.msra.mxu1 %v9886_v23  ;;  %v15126_v22 = vld [vmem:[%s21717_s1 + $0x1cf0] ss:$100 sps:$4 sm:$0xff]   ;;  %v15131_v23 = vld [vmem:[%s21717_s1 + $0x1c24] ss:$100 sps:$4 sm:$0xff]  }
 0x61c   :  { %11025 = vmatprep.subr.bf16.mxu0 %v15093_v28  ;;  %13882 = vmatprep.subr.msk.bf16.mxu1 %vm9821_vm0, %v15094_v7  ;;  %v15134_v28 = vld [vmem:[%s21717_s1 + $0x1c2c] ss:$100 sps:$4 sm:$0xff]   ;;  %v15129_v7 = vld [vmem:[%s21717_s1 + $0x1c20] ss:$100 sps:$4 sm:$0xff]  }
 0x623   :  { %11026 = vmatpush2.bf16.xpose.msra.mxu0 %v15091_v32  ;;  %13825 = vmatpush3.bf16.xpose.msra.mxu1 %v9883_v35  ;;  %v15137_v32 = vld [vmem:[%s21717_s1 + $0x1b5c] ss:$100 sps:$4 sm:$0xff]   ;;  %v15140_v35 = vld [vmem:[%s21717_s1 + $0x1b64] ss:$100 sps:$4 sm:$0xff]  }
 0x624   :  { %11027 = vmatprep.subr.bf16.mxu0 %v15098_v40  ;;  %13883 = vmatprep.subr.msk.bf16.mxu1 %vm9821_vm0, %v15099_v47  ;;  %v15135_v40 = vld [vmem:[%s21717_s1 + $0x1b58] ss:$100 sps:$4 sm:$0xff]   ;;  %v15138_v47 = vld [vmem:[%s21717_s1 + $0x1b60] ss:$100 sps:$4 sm:$0xff]  }
 0x62b   :  { %11028 = vmatpush2.bf16.xpose.msra.mxu0 %v15096_v58  ;;  %13827 = vmatpush3.bf16.xpose.msra.mxu1 %v9880_v34  ;;  %v15146_v58 = vld [vmem:[%s21717_s1 + $0x1a9c] ss:$100 sps:$4 sm:$0xff]   ;;  %v15141_v34 = vld [vmem:[%s21717_s1 + $0x1a90] ss:$100 sps:$4 sm:$0xff]  }
 0x62c   :  { %11029 = vmatprep.subr.bf16.mxu0 %v15103_v51  ;;  %13884 = vmatprep.subr.msk.bf16.mxu1 %vm9821_vm0, %v15104_v43  ;;  %v15144_v51 = vld [vmem:[%s21717_s1 + $0x1a98] ss:$100 sps:$4 sm:$0xff]   ;;  %v15149_v43 = vld [vmem:[%s21717_s1 + $0x19cc] ss:$100 sps:$4 sm:$0xff]  }
 0x633   :  { %11030 = vmatpush2.bf16.xpose.msra.mxu0 %v15101_v60  ;;  %13829 = vmatpush3.bf16.xpose.msra.mxu1 %v9877_v16  ;;  %v15147_v60 = vld [vmem:[%s21717_s1 + $0x19c8] ss:$100 sps:$4 sm:$0xff]   ;;  %v15150_v16 = vld [vmem:[%s21717_s1 + $0x19d0] ss:$100 sps:$4 sm:$0xff]  }
 0x634   :  { %11031 = vmatprep.subr.bf16.mxu0 %v15108_v0  ;;  %13885 = vmatprep.subr.msk.bf16.mxu1 %vm9821_vm0, %v15109_v42  ;;  %v15155_v0 = vld [vmem:[%s21717_s1 + $0x1904] ss:$100 sps:$4 sm:$0xff]   ;;  %v15158_v42 = vld [vmem:[%s21717_s1 + $0x190c] ss:$100 sps:$4 sm:$0xff]  }
 0x63b   :  { %11032 = vmatpush2.bf16.xpose.msra.mxu0 %v15106_v52  ;;  %13831 = vmatpush3.bf16.xpose.msra.mxu1 %v9874_v1  ;;  %v15156_v52 = vld [vmem:[%s21717_s1 + $0x1908] ss:$100 sps:$4 sm:$0xff]   ;;  %v15161_v1 = vld [vmem:[%s21717_s1 + $0x24bc] ss:$100 sps:$4 sm:$0xff]  }
 0x63c   :  { %11083 = vmatprep.subr.bf16.mxu0 %v15113_v54  ;;  %11124 = vmatprep.subr.bf16.mxu1 %v15116_v53  ;;  %v15164_v54 = vld [vmem:[%s21717_s1 + $0x24c4] ss:$100 sps:$4 sm:$0xff]   ;;  %v15159_v53 = vld [vmem:[%s21717_s1 + $0x24b8] ss:$100 sps:$4 sm:$0xff]  }
 0x642   :  { %v10912_v50 = vpop.f32.mrf.mxu1  ;;  %11034 = vmatmul.mubr.bf16.vlgmr.msra.gmra.mxu0 %v17688_v39  ;;  %13833 = vmatmul.mubr.msk.bf16.vlgmr.msra.gmra.mxu1 %vm9821_vm0, %v18986_v9  ;;  %v15117_v9 = vld [vmem:[%s21717_s1 + $0x1db0] ss:$100 sps:$4 sm:$0xff]  }
 0x643   :  { %v19100_v61 = vadd.f32 %v10912_v50, %v18974_v4  ;;  %11084 = vmatpush1.bf16.xpose.msra.mxu0 %v15111_v21  ;;  %11125 = vmatpush1.bf16.xpose.msra.mxu1 %v15114_v12  ;;  %v15120_v4 = vld [vmem:[%s21717_s1 + $0x1db8] ss:$100 sps:$4 sm:$0xff]   ;;  %v15162_v21 = vld [vmem:[%s21717_s1 + $0x24c0] ss:$100 sps:$4 sm:$0xff]  }
 0x644   :  { %v10914_v8 = vpop.f32.mrf.mxu1  ;;  %11085 = vmatprep.subr.bf16.mxu0 %v15119_v3  ;;  %11126 = vmatprep.subr.bf16.mxu1 %v15122_v33  ;;  %v15167_v12 = vld [vmem:[%s21717_s1 + $0x23f4] ss:$100 sps:$4 sm:$0xff]   ;;  %v15170_v3 = vld [vmem:[%s21717_s1 + $0x23fc] ss:$100 sps:$4 sm:$0xff]  }
 0x645   :  { %v19103_v5 = vadd.f32 %v10914_v8, %v18981_v26  ;;  %11115 = vmatprep.mubr.bf16.mxu0 %v16406_v27  ;;  %11156 = vmatprep.mubr.bf16.mxu1 %v16415_v29  ;;  %v15128_v26 = vld [vmem:[%s21717_s1 + $0x1cf4] ss:$100 sps:$4 sm:$0xff]  }
 0x646   :  { %v10916_v13 = vpop.f32.mrf.mxu1 }
 0x648   :  { %v10917_v17 = vpop.f32.mrf.mxu1 }
 0x649   :  { %v15168_v17 = vld [vmem:[%s21717_s1 + $0x23f8] ss:$100 sps:$4 sm:$0xff]  }
 0x64b   :  { %11086 = vmatpush1.bf16.xpose.msra.mxu0 %v15117_v9  ;;  %11127 = vmatpush1.bf16.xpose.msra.mxu1 %v15120_v4  ;;  %v15165_v4 = vld [vmem:[%s21717_s1 + $0x23f0] ss:$100 sps:$4 sm:$0xff]  }
 0x64c   :  { %11087 = vmatprep.subr.bf16.mxu0 %v15125_v18  ;;  %11128 = vmatprep.subr.bf16.mxu1 %v15128_v26  ;;  %v15176_v26 = vld [vmem:[%s21717_s1 + $0x2334] ss:$100 sps:$4 sm:$0xff]  }
 0x653   :  { %11088 = vmatpush1.bf16.xpose.msra.mxu0 %v15123_v19  ;;  %11129 = vmatpush1.bf16.xpose.msra.mxu1 %v15126_v22  ;;  %v15174_v19 = vld [vmem:[%s21717_s1 + $0x2330] ss:$100 sps:$4 sm:$0xff]   ;;  %v15179_v22 = vld [vmem:[%s21717_s1 + $0x2264] ss:$100 sps:$4 sm:$0xff]  }
 0x654   :  { %11089 = vmatprep.subr.bf16.mxu0 %v15131_v23  ;;  %11130 = vmatprep.subr.bf16.mxu1 %v15134_v28  ;;  %v15182_v23 = vld [vmem:[%s21717_s1 + $0x226c] ss:$100 sps:$4 sm:$0xff]   ;;  %v15177_v28 = vld [vmem:[%s21717_s1 + $0x2260] ss:$100 sps:$4 sm:$0xff]  }
 0x65b   :  { %11090 = vmatpush1.bf16.xpose.msra.mxu0 %v15129_v7  ;;  %11131 = vmatpush1.bf16.xpose.msra.mxu1 %v15132_v31  ;;  %v15180_v7 = vld [vmem:[%s21717_s1 + $0x2268] ss:$100 sps:$4 sm:$0xff]   ;;  %v15185_v31 = vld [vmem:[%s21717_s1 + $0x219c] ss:$100 sps:$4 sm:$0xff]  }
 0x65c   :  { %11091 = vmatprep.subr.bf16.mxu0 %v15137_v32  ;;  %11132 = vmatprep.subr.bf16.mxu1 %v15140_v35  ;;  %v15188_v32 = vld [vmem:[%s21717_s1 + $0x21a4] ss:$100 sps:$4 sm:$0xff]   ;;  %v15183_v35 = vld [vmem:[%s21717_s1 + $0x2198] ss:$100 sps:$4 sm:$0xff]  }
 0x663   :  { %11092 = vmatpush1.bf16.xpose.msra.mxu0 %v15135_v40  ;;  %11133 = vmatpush1.bf16.xpose.msra.mxu1 %v15138_v47  ;;  %v15186_v40 = vld [vmem:[%s21717_s1 + $0x21a0] ss:$100 sps:$4 sm:$0xff]   ;;  %v15191_v47 = vld [vmem:[%s21717_s1 + $0x20d4] ss:$100 sps:$4 sm:$0xff]  }
 0x664   :  { %11093 = vmatprep.subr.bf16.mxu0 %v15143_v48  ;;  %11134 = vmatprep.subr.bf16.mxu1 %v15146_v58  ;;  %v15194_v48 = vld [vmem:[%s21717_s1 + $0x20dc] ss:$100 sps:$4 sm:$0xff]   ;;  %v15189_v58 = vld [vmem:[%s21717_s1 + $0x20d0] ss:$100 sps:$4 sm:$0xff]  }
 0x66b   :  { %11094 = vmatpush1.bf16.xpose.msra.mxu0 %v15141_v34  ;;  %11135 = vmatpush1.bf16.xpose.msra.mxu1 %v15144_v51  ;;  %v15192_v34 = vld [vmem:[%s21717_s1 + $0x20d8] ss:$100 sps:$4 sm:$0xff]   ;;  %v15197_v51 = vld [vmem:[%s21717_s1 + $0x200c] ss:$100 sps:$4 sm:$0xff]  }
 0x66c   :  { %11095 = vmatprep.subr.bf16.mxu0 %v15149_v43  ;;  %11136 = vmatprep.subr.bf16.mxu1 %v15152_v55  ;;  %v15200_v43 = vld [vmem:[%s21717_s1 + $0x2014] ss:$100 sps:$4 sm:$0xff]   ;;  %v15195_v55 = vld [vmem:[%s21717_s1 + $0x2008] ss:$100 sps:$4 sm:$0xff]  }
 0x673   :  { %11096 = vmatpush1.bf16.xpose.msra.mxu0 %v15147_v60  ;;  %11137 = vmatpush1.bf16.xpose.msra.mxu1 %v15150_v16  ;;  %v15198_v60 = vld [vmem:[%s21717_s1 + $0x2010] ss:$100 sps:$4 sm:$0xff]   ;;  %v15203_v16 = vld [vmem:[%s21717_s1 + $0x1f44] ss:$100 sps:$4 sm:$0xff]  }
 0x674   :  { %11097 = vmatprep.subr.bf16.mxu0 %v15155_v0  ;;  %11138 = vmatprep.subr.bf16.mxu1 %v15158_v42  ;;  %v15206_v0 = vld [vmem:[%s21717_s1 + $0x1f4c] ss:$100 sps:$4 sm:$0xff]   ;;  %v15201_v42 = vld [vmem:[%s21717_s1 + $0x1f40] ss:$100 sps:$4 sm:$0xff]  }
 0x67b   :  { %11098 = vmatpush1.bf16.xpose.msra.mxu0 %v15153_v56  ;;  %11139 = vmatpush1.bf16.xpose.msra.mxu1 %v15156_v52  ;;  %v15204_v56 = vld [vmem:[%s21717_s1 + $0x1f48] ss:$100 sps:$4 sm:$0xff]  }
 0x67c   :  { %11099 = vmatprep.subr.bf16.mxu0 %v15161_v1  ;;  %11140 = vmatprep.subr.bf16.mxu1 %v15164_v54  ;;  %v15209_v52 = vld [vmem:[%s21717_s1 + $0x1e8c] ss:$100 sps:$4 sm:$0xff]   ;;  %v15212_v1 = vld [vmem:[%s21717_s1 + $0x1e94] ss:$100 sps:$4 sm:$0xff]  }
 0x67d   :  { %v15207_v54 = vld [vmem:[%s21717_s1 + $0x1e88] ss:$100 sps:$4 sm:$0xff]  }
 0x682   :  { %v10953_v33 = vpop.f32.mrf.mxu0 }
 0x683   :  { %v19204_v50 = vadd.f32 %v10953_v33, %v19100_v61  ;;  %11100 = vmatpush2.bf16.xpose.msra.mxu0 %v15159_v53  ;;  %11141 = vmatpush2.bf16.xpose.msra.mxu1 %v15162_v21  ;;  %v15173_v61 = vld [vmem:[%s21717_s1 + $0x232c] ss:$100 sps:$4 sm:$0xff]   ;;  %v15215_v21 = vld [vmem:[%s21717_s1 + $0x1dc4] ss:$100 sps:$4 sm:$0xff]  }
 0x684   :  { %v10955_v8 = vpop.f32.mrf.mxu0  ;;  %11101 = vmatprep.subr.bf16.mxu0 %v15167_v12  ;;  %11142 = vmatprep.subr.bf16.mxu1 %v15170_v3  ;;  %v15210_v53 = vld [vmem:[%s21717_s1 + $0x1e90] ss:$100 sps:$4 sm:$0xff]  }
 0x685   :  { %v19207_v13 = vadd.f32 %v10955_v8, %v19103_v5  ;;  %v15171_v5 = vld [vmem:[%s21717_s1 + $0x2328] ss:$100 sps:$4 sm:$0xff]  }
 0x686   :  { %v10957_v9 = vpop.f32.mrf.mxu0  ;;  %v15218_v12 = vld [vmem:[%s21717_s1 + $0x1dcc] ss:$100 sps:$4 sm:$0xff]  }
 0x687   :  { %v15213_v9 = vld [vmem:[%s21717_s1 + $0x1dc0] ss:$100 sps:$4 sm:$0xff]  }
 0x688   :  { %v10958_v18 = vpop.f32.mrf.mxu0 }
 0x689   :  { %v15221_v18 = vld [vmem:[%s21717_s1 + $0x1cfc] ss:$100 sps:$4 sm:$0xff]  }
 0x68b   :  { %11102 = vmatpush2.bf16.xpose.msra.mxu0 %v15165_v4  ;;  %11143 = vmatpush2.bf16.xpose.msra.mxu1 %v15168_v17  ;;  %v15216_v4 = vld [vmem:[%s21717_s1 + $0x1dc8] ss:$100 sps:$4 sm:$0xff]  }
 0x68c   :  { %11103 = vmatprep.subr.bf16.mxu0 %v15173_v61  ;;  %11144 = vmatprep.subr.bf16.mxu1 %v15176_v26  ;;  %v15224_v61 = vld [vmem:[%s21717_s1 + $0x1d04] ss:$100 sps:$4 sm:$0xff]   ;;  %v15219_v26 = vld [vmem:[%s21717_s1 + $0x1cf8] ss:$100 sps:$4 sm:$0xff]  }
 0x693   :  { %11104 = vmatpush2.bf16.xpose.msra.mxu0 %v15171_v5  ;;  %11145 = vmatpush2.bf16.xpose.msra.mxu1 %v15174_v19  ;;  %v15222_v5 = vld [vmem:[%s21717_s1 + $0x1d00] ss:$100 sps:$4 sm:$0xff]   ;;  %v15227_v19 = vld [vmem:[%s21717_s1 + $0x1c34] ss:$100 sps:$4 sm:$0xff]  }
 0x694   :  { %11105 = vmatprep.subr.bf16.mxu0 %v15179_v22  ;;  %11146 = vmatprep.subr.bf16.mxu1 %v15182_v23  ;;  %v15230_v22 = vld [vmem:[%s21717_s1 + $0x1c3c] ss:$100 sps:$4 sm:$0xff]   ;;  %v15225_v23 = vld [vmem:[%s21717_s1 + $0x1c30] ss:$100 sps:$4 sm:$0xff]  }
 0x69b   :  { %11106 = vmatpush2.bf16.xpose.msra.mxu0 %v15177_v28  ;;  %11147 = vmatpush2.bf16.xpose.msra.mxu1 %v15180_v7  ;;  %v15228_v28 = vld [vmem:[%s21717_s1 + $0x1c38] ss:$100 sps:$4 sm:$0xff]   ;;  %v15233_v7 = vld [vmem:[%s21717_s1 + $0x1b6c] ss:$100 sps:$4 sm:$0xff]  }
 0x69c   :  { %11107 = vmatprep.subr.bf16.mxu0 %v15185_v31  ;;  %11148 = vmatprep.subr.bf16.mxu1 %v15188_v32  ;;  %v15236_v31 = vld [vmem:[%s21717_s1 + $0x1b74] ss:$100 sps:$4 sm:$0xff]   ;;  %v15231_v32 = vld [vmem:[%s21717_s1 + $0x1b68] ss:$100 sps:$4 sm:$0xff]  }
 0x6a3   :  { %11108 = vmatpush2.bf16.xpose.msra.mxu0 %v15183_v35  ;;  %11149 = vmatpush2.bf16.xpose.msra.mxu1 %v15186_v40  ;;  %v15234_v35 = vld [vmem:[%s21717_s1 + $0x1b70] ss:$100 sps:$4 sm:$0xff]   ;;  %v15239_v40 = vld [vmem:[%s21717_s1 + $0x1aa4] ss:$100 sps:$4 sm:$0xff]  }
 0x6a4   :  { %11109 = vmatprep.subr.bf16.mxu0 %v15191_v47  ;;  %11150 = vmatprep.subr.bf16.mxu1 %v15194_v48  ;;  %v15242_v47 = vld [vmem:[%s21717_s1 + $0x1aac] ss:$100 sps:$4 sm:$0xff]   ;;  %v15237_v48 = vld [vmem:[%s21717_s1 + $0x1aa0] ss:$100 sps:$4 sm:$0xff]  }
 0x6ab   :  { %11110 = vmatpush2.bf16.xpose.msra.mxu0 %v15189_v58  ;;  %11151 = vmatpush2.bf16.xpose.msra.mxu1 %v15192_v34  ;;  %v15240_v58 = vld [vmem:[%s21717_s1 + $0x1aa8] ss:$100 sps:$4 sm:$0xff]   ;;  %v15245_v34 = vld [vmem:[%s21717_s1 + $0x19dc] ss:$100 sps:$4 sm:$0xff]  }
 0x6ac   :  { %11111 = vmatprep.subr.bf16.mxu0 %v15197_v51  ;;  %11152 = vmatprep.subr.bf16.mxu1 %v15200_v43  ;;  %v15248_v51 = vld [vmem:[%s21717_s1 + $0x19e4] ss:$100 sps:$4 sm:$0xff]   ;;  %v15243_v43 = vld [vmem:[%s21717_s1 + $0x19d8] ss:$100 sps:$4 sm:$0xff]  }
 0x6b3   :  { %11112 = vmatpush2.bf16.xpose.msra.mxu0 %v15195_v55  ;;  %11153 = vmatpush2.bf16.xpose.msra.mxu1 %v15198_v60  ;;  %v15246_v55 = vld [vmem:[%s21717_s1 + $0x19e0] ss:$100 sps:$4 sm:$0xff]   ;;  %v15251_v60 = vld [vmem:[%s21717_s1 + $0x1914] ss:$100 sps:$4 sm:$0xff]  }
 0x6b4   :  { %11113 = vmatprep.subr.bf16.mxu0 %v15203_v16  ;;  %11154 = vmatprep.subr.bf16.mxu1 %v15206_v0  ;;  %v15254_v16 = vld [vmem:[%s21717_s1 + $0x191c] ss:$100 sps:$4 sm:$0xff]   ;;  %v15249_v0 = vld [vmem:[%s21717_s1 + $0x1910] ss:$100 sps:$4 sm:$0xff]  }
 0x6bb   :  { %11114 = vmatpush2.bf16.xpose.msra.mxu0 %v15201_v42  ;;  %11155 = vmatpush2.bf16.xpose.msra.mxu1 %v15204_v56  ;;  %v15252_v42 = vld [vmem:[%s21717_s1 + $0x1918] ss:$100 sps:$4 sm:$0xff]   ;;  %v15257_v56 = vld [vmem:[%s21717_s1 + $0x24cc] ss:$100 sps:$4 sm:$0xff]  }
 0x6bc   :  { %11165 = vmatprep.subr.bf16.mxu0 %v15209_v52  ;;  %11206 = vmatprep.subr.bf16.mxu1 %v15212_v1  ;;  %v15260_v52 = vld [vmem:[%s21717_s1 + $0x24d4] ss:$100 sps:$4 sm:$0xff]   ;;  %v15255_v1 = vld [vmem:[%s21717_s1 + $0x24c8] ss:$100 sps:$4 sm:$0xff]  }
 0x6c2   :  { %v19305_v3 = vpop.f32.mrf.mxu1  ;;  %11116 = vmatmul.mubr.bf16.vlgmr.msra.gmra.mxu0 %v16557_v10  ;;  %11157 = vmatmul.mubr.bf16.vlgmr.msra.gmra.mxu1 %v16561_v11 }
 0x6c3   :  { %11166 = vmatpush1.bf16.xpose.msra.mxu0 %v15207_v54  ;;  %11207 = vmatpush1.bf16.xpose.msra.mxu1 %v15210_v53  ;;  %v15258_v54 = vld [vmem:[%s21717_s1 + $0x24d0] ss:$100 sps:$4 sm:$0xff]   ;;  %v15263_v53 = vld [vmem:[%s21717_s1 + $0x2404] ss:$100 sps:$4 sm:$0xff]  }
 0x6c4   :  { %v19309_v33 = vpop.f32.mrf.mxu1  ;;  %11167 = vmatprep.subr.bf16.mxu0 %v15215_v21  ;;  %11208 = vmatprep.subr.bf16.mxu1 %v15218_v12  ;;  %v15266_v21 = vld [vmem:[%s21717_s1 + $0x240c] ss:$100 sps:$4 sm:$0xff]   ;;  %v10995_v12 = vadd.f32 %v19305_v3, %v19204_v50  ;;  %v15261_v50 = vld [vmem:[%s21717_s1 + $0x2400] ss:$100 sps:$4 sm:$0xff]  }
 0x6c5   :  { %11197 = vmatprep.mubr.bf16.mxu0 %v16571_v14  ;;  %11238 = vmatprep.mubr.bf16.mxu1 %v16575_v15 }
 0x6c6   :  { %v10998_v8 = vpop.f32.mrf.mxu1 }
 0x6c8   :  { %v10999_v17 = vpop.f32.mrf.mxu1 }
 0x6cb   :  { %11168 = vmatpush1.bf16.xpose.msra.mxu0 %v15213_v9  ;;  %11209 = vmatpush1.bf16.xpose.msra.mxu1 %v15216_v4  ;;  %v10997_v4 = vadd.f32 %v19309_v33, %v19207_v13  ;;  %v15264_v13 = vld [vmem:[%s21717_s1 + $0x2408] ss:$100 sps:$4 sm:$0xff]  }
 0x6cc   :  { %11169 = vmatprep.subr.bf16.mxu0 %v15221_v18  ;;  %11210 = vmatprep.subr.bf16.mxu1 %v15224_v61 }
 0x6d3   :  { %11170 = vmatpush1.bf16.xpose.msra.mxu0 %v15219_v26  ;;  %11211 = vmatpush1.bf16.xpose.msra.mxu1 %v15222_v5 }
 0x6d4   :  { %11171 = vmatprep.subr.bf16.mxu0 %v15227_v19  ;;  %11212 = vmatprep.subr.bf16.mxu1 %v15230_v22 }
 0x6db   :  { %11172 = vmatpush1.bf16.xpose.msra.mxu0 %v15225_v23  ;;  %11213 = vmatpush1.bf16.xpose.msra.mxu1 %v15228_v28 }
 0x6dc   :  { %11173 = vmatprep.subr.bf16.mxu0 %v15233_v7  ;;  %11214 = vmatprep.subr.bf16.mxu1 %v15236_v31  ;;  %v15269_v7 = vld [vmem:[%s21717_s1 + $0x233c] ss:$100 sps:$4 sm:$0xff]   ;;  %v15272_v31 = vld [vmem:[%s21717_s1 + $0x2344] ss:$100 sps:$4 sm:$0xff]  }
 0x6e3   :  { %11174 = vmatpush1.bf16.xpose.msra.mxu0 %v15231_v32  ;;  %11215 = vmatpush1.bf16.xpose.msra.mxu1 %v15234_v35  ;;  %v15267_v35 = vld [vmem:[%s21717_s1 + $0x2338] ss:$100 sps:$4 sm:$0xff]  }
 0x6e4   :  { %11175 = vmatprep.subr.bf16.mxu0 %v15239_v40  ;;  %11216 = vmatprep.subr.bf16.mxu1 %v15242_v47  ;;  %v15270_v40 = vld [vmem:[%s21717_s1 + $0x2340] ss:$100 sps:$4 sm:$0xff]   ;;  %v15275_v47 = vld [vmem:[%s21717_s1 + $0x2274] ss:$100 sps:$4 sm:$0xff]  }
 0x6eb   :  { %11176 = vmatpush1.bf16.xpose.msra.mxu0 %v15237_v48  ;;  %11217 = vmatpush1.bf16.xpose.msra.mxu1 %v15240_v58  ;;  %v15278_v48 = vld [vmem:[%s21717_s1 + $0x227c] ss:$100 sps:$4 sm:$0xff]   ;;  %v15273_v58 = vld [vmem:[%s21717_s1 + $0x2270] ss:$100 sps:$4 sm:$0xff]  }
 0x6ec   :  { %11177 = vmatprep.subr.bf16.mxu0 %v15245_v34  ;;  %11218 = vmatprep.subr.bf16.mxu1 %v15248_v51  ;;  %v15276_v34 = vld [vmem:[%s21717_s1 + $0x2278] ss:$100 sps:$4 sm:$0xff]   ;;  %v15281_v51 = vld [vmem:[%s21717_s1 + $0x21ac] ss:$100 sps:$4 sm:$0xff]  }
 0x6f3   :  { %11178 = vmatpush1.bf16.xpose.msra.mxu0 %v15243_v43  ;;  %11219 = vmatpush1.bf16.xpose.msra.mxu1 %v15246_v55  ;;  %v15284_v43 = vld [vmem:[%s21717_s1 + $0x21b4] ss:$100 sps:$4 sm:$0xff]   ;;  %v15279_v55 = vld [vmem:[%s21717_s1 + $0x21a8] ss:$100 sps:$4 sm:$0xff]  }
 0x6f4   :  { %11179 = vmatprep.subr.bf16.mxu0 %v15251_v60  ;;  %11220 = vmatprep.subr.bf16.mxu1 %v15254_v16  ;;  %v15282_v60 = vld [vmem:[%s21717_s1 + $0x21b0] ss:$100 sps:$4 sm:$0xff]   ;;  %v15287_v16 = vld [vmem:[%s21717_s1 + $0x20e4] ss:$100 sps:$4 sm:$0xff]  }
 0x6fb   :  { %11180 = vmatpush1.bf16.xpose.msra.mxu0 %v15249_v0  ;;  %11221 = vmatpush1.bf16.xpose.msra.mxu1 %v15252_v42  ;;  %v15290_v0 = vld [vmem:[%s21717_s1 + $0x20ec] ss:$100 sps:$4 sm:$0xff]   ;;  %v15285_v42 = vld [vmem:[%s21717_s1 + $0x20e0] ss:$100 sps:$4 sm:$0xff]  }
 0x6fc   :  { %11181 = vmatprep.subr.bf16.mxu0 %v15257_v56  ;;  %11222 = vmatprep.subr.bf16.mxu1 %v15260_v52  ;;  %v15288_v56 = vld [vmem:[%s21717_s1 + $0x20e8] ss:$100 sps:$4 sm:$0xff]   ;;  %v15293_v52 = vld [vmem:[%s21717_s1 + $0x201c] ss:$100 sps:$4 sm:$0xff]  }
 0x702   :  { %v11035_v8 = vpop.f32.mrf.mxu0  ;;  %v11076_v9 = vpop.f32.mrf.mxu1 }
 0x703   :  { %v11036_v17 = vadd.f32 %v11035_v8, %v10995_v12  ;;  %11182 = vmatpush2.bf16.xpose.msra.mxu0 %v15255_v1  ;;  %11223 = vmatpush2.bf16.xpose.msra.mxu1 %v15258_v54  ;;  %v15296_v1 = vld [vmem:[%s21717_s1 + $0x2024] ss:$100 sps:$4 sm:$0xff]   ;;  %v15291_v54 = vld [vmem:[%s21717_s1 + $0x2018] ss:$100 sps:$4 sm:$0xff]   ;;  %v15297_v8 = vld [vmem:[%s21717_s1 + $0x1f50] ss:$100 sps:$4 sm:$0xff]  }
 0x704   :  { %v11037_v18 = vpop.f32.mrf.mxu0  ;;  %v11078_v61 = vpop.f32.mrf.mxu1  ;;  %11183 = vmatprep.subr.bf16.mxu0 %v15263_v53  ;;  %11224 = vmatprep.subr.bf16.mxu1 %v15266_v21  ;;  %v15294_v53 = vld [vmem:[%s21717_s1 + $0x2020] ss:$100 sps:$4 sm:$0xff]   ;;  %v15299_v21 = vld [vmem:[%s21717_s1 + $0x1f54] ss:$100 sps:$4 sm:$0xff]  }
 0x705   :  { %v11077_v26 = vadd.f32 %v11076_v9, %v11036_v17  ;;  %v11038_v5 = vadd.f32 %v11037_v18, %v10997_v4  ;;  %v15302_v12 = vld [vmem:[%s21717_s1 + $0x1f5c] ss:$100 sps:$4 sm:$0xff]   ;;  %v15308_v17 = vld [vmem:[%s21717_s1 + $0x1ea4] ss:$100 sps:$4 sm:$0xff]  }
 0x706   :  { %v11039_v19 = vpop.f32.mrf.mxu0  ;;  %v11080_v22 = vpop.f32.mrf.mxu1  ;;  %v15300_v9 = vld [vmem:[%s21717_s1 + $0x1f58] ss:$100 sps:$4 sm:$0xff]  }
 0x707   :  { %v12151_v23 = vmax.f32 %v11077_v26, 0.0  ;;  %v11079_v28 = vadd.f32 %v11078_v61, %v11038_v5  ;;  %v15305_v4 = vld [vmem:[%s21717_s1 + $0x1e9c] ss:$100 sps:$4 sm:$0xff]   ;;  %v15311_v26 = vld [vmem:[%s21717_s1 + $0x1dd4] ss:$100 sps:$4 sm:$0xff]  }
 0x708   :  { %v11040_v3 = vpop.f32.mrf.mxu0  ;;  %v11081_v33 = vpop.f32.mrf.mxu1  ;;  %v15303_v18 = vld [vmem:[%s21717_s1 + $0x1e98] ss:$100 sps:$4 sm:$0xff]   ;;  %v15306_v61 = vld [vmem:[%s21717_s1 + $0x1ea0] ss:$100 sps:$4 sm:$0xff]   ;;  %v15309_v19 = vld [vmem:[%s21717_s1 + $0x1dd0] ss:$100 sps:$4 sm:$0xff]  }
 0x709   :  { %12159 = vst [vmem:[%s21720_s3 + $0x10] sm:$0xff] %v12151_v23  ;;  %v12152_v32 = vmax.f32 %v11079_v28, 0.0  ;;  %v15314_v5 = vld [vmem:[%s21717_s1 + $0x1ddc] ss:$100 sps:$4 sm:$0xff]   ;;  %v15317_v23 = vld [vmem:[%s21717_s1 + $0x1d0c] ss:$100 sps:$4 sm:$0xff]  }
 0x70a   :  { %v15312_v22 = vld [vmem:[%s21717_s1 + $0x1dd8] ss:$100 sps:$4 sm:$0xff]   ;;  %v15323_v3 = vld [vmem:[%s21717_s1 + $0x1c44] ss:$100 sps:$4 sm:$0xff]   ;;  %v15326_v33 = vld [vmem:[%s21717_s1 + $0x1c4c] ss:$100 sps:$4 sm:$0xff]  }
 0x70b   :  { %12160 = vst [vmem:[%s21720_s3 + $0x18] sm:$0xff] %v12152_v32  ;;  %11184 = vmatpush2.bf16.xpose.msra.mxu0 %v15261_v50  ;;  %11225 = vmatpush2.bf16.xpose.msra.mxu1 %v15264_v13  ;;  %v15320_v28 = vld [vmem:[%s21717_s1 + $0x1d14] ss:$100 sps:$4 sm:$0xff]   ;;  %v15315_v50 = vld [vmem:[%s21717_s1 + $0x1d08] ss:$100 sps:$4 sm:$0xff]  }
 0x70c   :  { %11185 = vmatprep.subr.bf16.mxu0 %v15269_v7  ;;  %11226 = vmatprep.subr.bf16.mxu1 %v15272_v31  ;;  %v15318_v13 = vld [vmem:[%s21717_s1 + $0x1d10] ss:$100 sps:$4 sm:$0xff]   ;;  %v15321_v7 = vld [vmem:[%s21717_s1 + $0x1c40] ss:$100 sps:$4 sm:$0xff]   ;;  %v15324_v31 = vld [vmem:[%s21717_s1 + $0x1c48] ss:$100 sps:$4 sm:$0xff]  }
 0x70d   :  { %v15329_v32 = vld [vmem:[%s21717_s1 + $0x1b7c] ss:$100 sps:$4 sm:$0xff]  }
 0x713   :  { %11186 = vmatpush2.bf16.xpose.msra.mxu0 %v15267_v35  ;;  %11227 = vmatpush2.bf16.xpose.msra.mxu1 %v15270_v40  ;;  %v15332_v35 = vld [vmem:[%s21717_s1 + $0x1b84] ss:$100 sps:$4 sm:$0xff]   ;;  %v15327_v40 = vld [vmem:[%s21717_s1 + $0x1b78] ss:$100 sps:$4 sm:$0xff]  }
 0x714   :  { %11187 = vmatprep.subr.bf16.mxu0 %v15275_v47  ;;  %11228 = vmatprep.subr.bf16.mxu1 %v15278_v48  ;;  %v15330_v47 = vld [vmem:[%s21717_s1 + $0x1b80] ss:$100 sps:$4 sm:$0xff]   ;;  %v15335_v48 = vld [vmem:[%s21717_s1 + $0x1ab4] ss:$100 sps:$4 sm:$0xff]  }
 0x71b   :  { %11188 = vmatpush2.bf16.xpose.msra.mxu0 %v15273_v58  ;;  %11229 = vmatpush2.bf16.xpose.msra.mxu1 %v15276_v34  ;;  %v15338_v58 = vld [vmem:[%s21717_s1 + $0x1abc] ss:$100 sps:$4 sm:$0xff]   ;;  %v15333_v34 = vld [vmem:[%s21717_s1 + $0x1ab0] ss:$100 sps:$4 sm:$0xff]  }
 0x71c   :  { %11189 = vmatprep.subr.bf16.mxu0 %v15281_v51  ;;  %11230 = vmatprep.subr.bf16.mxu1 %v15284_v43  ;;  %v15336_v51 = vld [vmem:[%s21717_s1 + $0x1ab8] ss:$100 sps:$4 sm:$0xff]   ;;  %v15341_v43 = vld [vmem:[%s21717_s1 + $0x19ec] ss:$100 sps:$4 sm:$0xff]  }
 0x723   :  { %11190 = vmatpush2.bf16.xpose.msra.mxu0 %v15279_v55  ;;  %11231 = vmatpush2.bf16.xpose.msra.mxu1 %v15282_v60  ;;  %v15344_v55 = vld [vmem:[%s21717_s1 + $0x19f4] ss:$100 sps:$4 sm:$0xff]   ;;  %v15339_v60 = vld [vmem:[%s21717_s1 + $0x19e8] ss:$100 sps:$4 sm:$0xff]  }
 0x724   :  { %11191 = vmatprep.subr.bf16.mxu0 %v15287_v16  ;;  %11232 = vmatprep.subr.bf16.mxu1 %v15290_v0  ;;  %v15342_v16 = vld [vmem:[%s21717_s1 + $0x19f0] ss:$100 sps:$4 sm:$0xff]   ;;  %v15347_v0 = vld [vmem:[%s21717_s1 + $0x1924] ss:$100 sps:$4 sm:$0xff]  }
 0x72b   :  { %11192 = vmatpush2.bf16.xpose.msra.mxu0 %v15285_v42  ;;  %11233 = vmatpush2.bf16.xpose.msra.mxu1 %v15288_v56  ;;  %v15350_v42 = vld [vmem:[%s21717_s1 + $0x192c] ss:$100 sps:$4 sm:$0xff]   ;;  %v15345_v56 = vld [vmem:[%s21717_s1 + $0x1920] ss:$100 sps:$4 sm:$0xff]  }
 0x72c   :  { %11193 = vmatprep.subr.bf16.mxu0 %v15293_v52  ;;  %11234 = vmatprep.subr.bf16.mxu1 %v15296_v1  ;;  %v15348_v52 = vld [vmem:[%s21717_s1 + $0x1928] ss:$100 sps:$4 sm:$0xff]   ;;  %v15353_v1 = vld [vmem:[%s21717_s1 + $0x24dc] ss:$100 sps:$4 sm:$0xff]  }
 0x733   :  { %11194 = vmatpush2.bf16.xpose.msra.mxu0 %v15291_v54  ;;  %11235 = vmatpush2.bf16.xpose.msra.mxu1 %v15294_v53  ;;  %v15356_v54 = vld [vmem:[%s21717_s1 + $0x24e4] ss:$100 sps:$4 sm:$0xff]   ;;  %v1712_v53 = vsub.s32 4, %v16887_v59 }
 0x734   :  { %11195 = vmatprep.subr.bf16.mxu0 %v15299_v21  ;;  %11236 = vmatprep.subr.bf16.mxu1 %v15302_v12  ;;  %v1716_v21 = vsub.s32 5, %v16887_v59  ;;  %v16297_v12 = vld [vmem:[%s21719_s2] sm:$0xff] }
 0x73b   :  { %11196 = vmatpush2.bf16.xpose.msra.mxu0 %v15297_v8  ;;  %11237 = vmatpush2.bf16.xpose.msra.mxu1 %v15300_v9  ;;  %v1713_v8 = vrot.slane %v16297_v12, %v1712_v53  ;;  %v15351_v9 = vld [vmem:[%s21717_s1 + $0x24d8] ss:$100 sps:$4 sm:$0xff]   ;;  %v15389_v53 = vld [vmem:[%s21717_s1 + $0x202c] ss:$100 sps:$4 sm:$0xff]  }
 0x73c   :  { %11247 = vmatprep.subr.bf16.mxu0 %v15305_v4  ;;  %11288 = vmatprep.subr.bf16.mxu1 %v15308_v17  ;;  %v15354_v4 = vld [vmem:[%s21717_s1 + $0x24e0] ss:$100 sps:$4 sm:$0xff]   ;;  %v15359_v17 = vld [vmem:[%s21717_s1 + $0x2414] ss:$100 sps:$4 sm:$0xff]  }
 0x742   :  { %11198 = vmatmul.mubr.bf16.vlgmr.msra.gmra.mxu0 %v16779_v24  ;;  %11239 = vmatmul.mubr.bf16.vlgmr.msra.gmra.mxu1 %v16783_v25 }
 0x743   :  { %11248 = vmatpush1.bf16.xpose.msra.mxu0 %v15303_v18  ;;  %11289 = vmatpush1.bf16.xpose.msra.mxu1 %v15306_v61  ;;  %v15362_v18 = vld [vmem:[%s21717_s1 + $0x241c] ss:$100 sps:$4 sm:$0xff]   ;;  %v1717_v61 = vrot.slane %v16297_v12, %v1716_v21  ;;  %v15392_v21 = vld [vmem:[%s21717_s1 + $0x2034] ss:$100 sps:$4 sm:$0xff]   ;;  %v15387_v12 = vld [vmem:[%s21717_s1 + $0x2028] ss:$100 sps:$4 sm:$0xff]  }
 0x744   :  { %11249 = vmatprep.subr.bf16.mxu0 %v15311_v26  ;;  %11290 = vmatprep.subr.bf16.mxu1 %v15314_v5 }
 0x745   :  { %11279 = vmatprep.mubr.bf16.mxu0 %v16793_v30  ;;  %11320 = vmatprep.mubr.bf16.mxu1 %v16797_v6 }
 0x74b   :  { %11250 = vmatpush1.bf16.xpose.msra.mxu0 %v15309_v19  ;;  %11291 = vmatpush1.bf16.xpose.msra.mxu1 %v15312_v22 }
 0x74c   :  { %11251 = vmatprep.subr.bf16.mxu0 %v15317_v23  ;;  %11292 = vmatprep.subr.bf16.mxu1 %v15320_v28 }
 0x753   :  { %11252 = vmatpush1.bf16.xpose.msra.mxu0 %v15315_v50  ;;  %11293 = vmatpush1.bf16.xpose.msra.mxu1 %v15318_v13 }
 0x754   :  { %11253 = vmatprep.subr.bf16.mxu0 %v15323_v3  ;;  %11294 = vmatprep.subr.bf16.mxu1 %v15326_v33 }
 0x75b   :  { %11254 = vmatpush1.bf16.xpose.msra.mxu0 %v15321_v7  ;;  %11295 = vmatpush1.bf16.xpose.msra.mxu1 %v15324_v31  ;;  %v15357_v7 = vld [vmem:[%s21717_s1 + $0x2410] ss:$100 sps:$4 sm:$0xff]   ;;  %v15360_v31 = vld [vmem:[%s21717_s1 + $0x2418] ss:$100 sps:$4 sm:$0xff]  }
 0x75c   :  { %11255 = vmatprep.subr.bf16.mxu0 %v15329_v32  ;;  %11296 = vmatprep.subr.bf16.mxu1 %v15332_v35 }
 0x763   :  { %11256 = vmatpush1.bf16.xpose.msra.mxu0 %v15327_v40  ;;  %11297 = vmatpush1.bf16.xpose.msra.mxu1 %v15330_v47  ;;  %v15365_v40 = vld [vmem:[%s21717_s1 + $0x234c] ss:$100 sps:$4 sm:$0xff]   ;;  %v15368_v47 = vld [vmem:[%s21717_s1 + $0x2354] ss:$100 sps:$4 sm:$0xff]  }
 0x764   :  { %11257 = vmatprep.subr.bf16.mxu0 %v15335_v48  ;;  %11298 = vmatprep.subr.bf16.mxu1 %v15338_v58  ;;  %v15363_v48 = vld [vmem:[%s21717_s1 + $0x2348] ss:$100 sps:$4 sm:$0xff]   ;;  %v15366_v58 = vld [vmem:[%s21717_s1 + $0x2350] ss:$100 sps:$4 sm:$0xff]  }
 0x76b   :  { %11258 = vmatpush1.bf16.xpose.msra.mxu0 %v15333_v34  ;;  %11299 = vmatpush1.bf16.xpose.msra.mxu1 %v15336_v51  ;;  %v15371_v34 = vld [vmem:[%s21717_s1 + $0x2284] ss:$100 sps:$4 sm:$0xff]   ;;  %v15374_v51 = vld [vmem:[%s21717_s1 + $0x228c] ss:$100 sps:$4 sm:$0xff]  }
 0x76c   :  { %11259 = vmatprep.subr.bf16.mxu0 %v15341_v43  ;;  %11300 = vmatprep.subr.bf16.mxu1 %v15344_v55  ;;  %v15369_v43 = vld [vmem:[%s21717_s1 + $0x2280] ss:$100 sps:$4 sm:$0xff]   ;;  %v15372_v55 = vld [vmem:[%s21717_s1 + $0x2288] ss:$100 sps:$4 sm:$0xff]  }
 0x773   :  { %11260 = vmatpush1.bf16.xpose.msra.mxu0 %v15339_v60  ;;  %11301 = vmatpush1.bf16.xpose.msra.mxu1 %v15342_v16  ;;  %v15377_v60 = vld [vmem:[%s21717_s1 + $0x21bc] ss:$100 sps:$4 sm:$0xff]   ;;  %v15380_v16 = vld [vmem:[%s21717_s1 + $0x21c4] ss:$100 sps:$4 sm:$0xff]  }
 0x774   :  { %11261 = vmatprep.subr.bf16.mxu0 %v15347_v0  ;;  %11302 = vmatprep.subr.bf16.mxu1 %v15350_v42  ;;  %v15375_v0 = vld [vmem:[%s21717_s1 + $0x21b8] ss:$100 sps:$4 sm:$0xff]   ;;  %v15378_v42 = vld [vmem:[%s21717_s1 + $0x21c0] ss:$100 sps:$4 sm:$0xff]  }
 0x77b   :  { %11262 = vmatpush1.bf16.xpose.msra.mxu0 %v15345_v56  ;;  %11303 = vmatpush1.bf16.xpose.msra.mxu1 %v15348_v52  ;;  %v15383_v56 = vld [vmem:[%s21717_s1 + $0x20f4] ss:$100 sps:$4 sm:$0xff]   ;;  %v15386_v52 = vld [vmem:[%s21717_s1 + $0x20fc] ss:$100 sps:$4 sm:$0xff]  }
 0x77c   :  { %11263 = vmatprep.subr.bf16.mxu0 %v15353_v1  ;;  %11304 = vmatprep.subr.bf16.mxu1 %v15356_v54  ;;  %v15381_v1 = vld [vmem:[%s21717_s1 + $0x20f0] ss:$100 sps:$4 sm:$0xff]   ;;  %v15384_v54 = vld [vmem:[%s21717_s1 + $0x20f8] ss:$100 sps:$4 sm:$0xff]  }
 0x782   :  { %v11117_v26 = vpop.f32.mrf.mxu0  ;;  %v11158_v5 = vpop.f32.mrf.mxu1 }
 0x783   :  { %v11118_v19 = vadd.f32 %v11117_v26, %v1713_v8  ;;  %11264 = vmatpush2.bf16.xpose.msra.mxu0 %v15351_v9  ;;  %11305 = vmatpush2.bf16.xpose.msra.mxu1 %v15354_v4  ;;  %v15390_v8 = vld [vmem:[%s21717_s1 + $0x2030] ss:$100 sps:$4 sm:$0xff]   ;;  %v15395_v9 = vld [vmem:[%s21717_s1 + $0x1f64] ss:$100 sps:$4 sm:$0xff]  }
 0x784   :  { %v11119_v22 = vpop.f32.mrf.mxu0  ;;  %v11160_v23 = vpop.f32.mrf.mxu1  ;;  %11265 = vmatprep.subr.bf16.mxu0 %v15359_v17  ;;  %11306 = vmatprep.subr.bf16.mxu1 %v15362_v18  ;;  %v15398_v4 = vld [vmem:[%s21717_s1 + $0x1f6c] ss:$100 sps:$4 sm:$0xff]   ;;  %v15393_v17 = vld [vmem:[%s21717_s1 + $0x1f60] ss:$100 sps:$4 sm:$0xff]   ;;  %v15404_v26 = vld [vmem:[%s21717_s1 + $0x1eb4] ss:$100 sps:$4 sm:$0xff]  }
 0x785   :  { %v19620_v28 = vadd.f32 %v11158_v5, %v11118_v19  ;;  %v11120_v50 = vadd.f32 %v11119_v22, %v1717_v61  ;;  %v15396_v18 = vld [vmem:[%s21717_s1 + $0x1f68] ss:$100 sps:$4 sm:$0xff]   ;;  %v15402_v19 = vld [vmem:[%s21717_s1 + $0x1eb0] ss:$100 sps:$4 sm:$0xff]  }
 0x786   :  { %v11121_v13 = vpop.f32.mrf.mxu0  ;;  %v11162_v3 = vpop.f32.mrf.mxu1  ;;  %v15401_v61 = vld [vmem:[%s21717_s1 + $0x1eac] ss:$100 sps:$4 sm:$0xff]   ;;  %v15407_v22 = vld [vmem:[%s21717_s1 + $0x1de4] ss:$100 sps:$4 sm:$0xff]  }
 0x787   :  { %v19622_v33 = vadd.f32 %v11160_v23, %v11120_v50  ;;  %v15399_v5 = vld [vmem:[%s21717_s1 + $0x1ea8] ss:$100 sps:$4 sm:$0xff]   ;;  %v15405_v50 = vld [vmem:[%s21717_s1 + $0x1de0] ss:$100 sps:$4 sm:$0xff]  }
 0x788   :  { %v11122_v32 = vpop.f32.mrf.mxu0  ;;  %v11163_v35 = vpop.f32.mrf.mxu1  ;;  %v15410_v23 = vld [vmem:[%s21717_s1 + $0x1dec] ss:$100 sps:$4 sm:$0xff]   ;;  %v15413_v3 = vld [vmem:[%s21717_s1 + $0x1d1c] ss:$100 sps:$4 sm:$0xff]  }
 0x789   :  { %v15408_v13 = vld [vmem:[%s21717_s1 + $0x1de8] ss:$100 sps:$4 sm:$0xff]   ;;  %v15414_v32 = vld [vmem:[%s21717_s1 + $0x1d20] ss:$100 sps:$4 sm:$0xff]   ;;  %v15419_v35 = vld [vmem:[%s21717_s1 + $0x1c54] ss:$100 sps:$4 sm:$0xff]  }
 0x78b   :  { %11266 = vmatpush2.bf16.xpose.msra.mxu0 %v15357_v7  ;;  %11307 = vmatpush2.bf16.xpose.msra.mxu1 %v15360_v31  ;;  %v15416_v7 = vld [vmem:[%s21717_s1 + $0x1d24] ss:$100 sps:$4 sm:$0xff]   ;;  %v15411_v31 = vld [vmem:[%s21717_s1 + $0x1d18] ss:$100 sps:$4 sm:$0xff]  }
 0x78c   :  { %11267 = vmatprep.subr.bf16.mxu0 %v15365_v40  ;;  %11308 = vmatprep.subr.bf16.mxu1 %v15368_v47  ;;  %v15422_v40 = vld [vmem:[%s21717_s1 + $0x1c5c] ss:$100 sps:$4 sm:$0xff]   ;;  %v15417_v47 = vld [vmem:[%s21717_s1 + $0x1c50] ss:$100 sps:$4 sm:$0xff]  }
 0x793   :  { %11268 = vmatpush2.bf16.xpose.msra.mxu0 %v15363_v48  ;;  %11309 = vmatpush2.bf16.xpose.msra.mxu1 %v15366_v58  ;;  %v15420_v48 = vld [vmem:[%s21717_s1 + $0x1c58] ss:$100 sps:$4 sm:$0xff]   ;;  %v15425_v58 = vld [vmem:[%s21717_s1 + $0x1b8c] ss:$100 sps:$4 sm:$0xff]  }
 0x794   :  { %11269 = vmatprep.subr.bf16.mxu0 %v15371_v34  ;;  %11310 = vmatprep.subr.bf16.mxu1 %v15374_v51  ;;  %v15428_v34 = vld [vmem:[%s21717_s1 + $0x1b94] ss:$100 sps:$4 sm:$0xff]   ;;  %v15423_v51 = vld [vmem:[%s21717_s1 + $0x1b88] ss:$100 sps:$4 sm:$0xff]  }
 0x79b   :  { %11270 = vmatpush2.bf16.xpose.msra.mxu0 %v15369_v43  ;;  %11311 = vmatpush2.bf16.xpose.msra.mxu1 %v15372_v55  ;;  %v15426_v43 = vld [vmem:[%s21717_s1 + $0x1b90] ss:$100 sps:$4 sm:$0xff]   ;;  %v15431_v55 = vld [vmem:[%s21717_s1 + $0x1ac4] ss:$100 sps:$4 sm:$0xff]  }
 0x79c   :  { %11271 = vmatprep.subr.bf16.mxu0 %v15377_v60  ;;  %11312 = vmatprep.subr.bf16.mxu1 %v15380_v16  ;;  %v15434_v60 = vld [vmem:[%s21717_s1 + $0x1acc] ss:$100 sps:$4 sm:$0xff]   ;;  %v15429_v16 = vld [vmem:[%s21717_s1 + $0x1ac0] ss:$100 sps:$4 sm:$0xff]  }
 0x7a3   :  { %11272 = vmatpush2.bf16.xpose.msra.mxu0 %v15375_v0  ;;  %11313 = vmatpush2.bf16.xpose.msra.mxu1 %v15378_v42  ;;  %v15432_v0 = vld [vmem:[%s21717_s1 + $0x1ac8] ss:$100 sps:$4 sm:$0xff]   ;;  %v15437_v42 = vld [vmem:[%s21717_s1 + $0x19fc] ss:$100 sps:$4 sm:$0xff]  }
 0x7a4   :  { %11273 = vmatprep.subr.bf16.mxu0 %v15383_v56  ;;  %11314 = vmatprep.subr.bf16.mxu1 %v15386_v52  ;;  %v15440_v56 = vld [vmem:[%s21717_s1 + $0x1a04] ss:$100 sps:$4 sm:$0xff]   ;;  %v15435_v52 = vld [vmem:[%s21717_s1 + $0x19f8] ss:$100 sps:$4 sm:$0xff]  }
 0x7ab   :  { %11274 = vmatpush2.bf16.xpose.msra.mxu0 %v15381_v1  ;;  %11315 = vmatpush2.bf16.xpose.msra.mxu1 %v15384_v54  ;;  %v15438_v1 = vld [vmem:[%s21717_s1 + $0x1a00] ss:$100 sps:$4 sm:$0xff]   ;;  %v15443_v54 = vld [vmem:[%s21717_s1 + $0x1934] ss:$100 sps:$4 sm:$0xff]  }
 0x7ac   :  { %11275 = vmatprep.subr.bf16.mxu0 %v15389_v53  ;;  %11316 = vmatprep.subr.bf16.mxu1 %v15392_v21  ;;  %v15446_v53 = vld [vmem:[%s21717_s1 + $0x193c] ss:$100 sps:$4 sm:$0xff]   ;;  %v15441_v21 = vld [vmem:[%s21717_s1 + $0x1930] ss:$100 sps:$4 sm:$0xff]  }
 0x7b3   :  { %11276 = vmatpush2.bf16.xpose.msra.mxu0 %v15387_v12  ;;  %11317 = vmatpush2.bf16.xpose.msra.mxu1 %v15390_v8  ;;  %v15444_v12 = vld [vmem:[%s21717_s1 + $0x1938] ss:$100 sps:$4 sm:$0xff]   ;;  %v15449_v8 = vld [vmem:[%s21717_s1 + $0x24ec] ss:$100 sps:$4 sm:$0xff]  }
 0x7b4   :  { %11277 = vmatprep.subr.bf16.mxu0 %v15395_v9  ;;  %11318 = vmatprep.subr.bf16.mxu1 %v15398_v4  ;;  %v15452_v9 = vld [vmem:[%s21717_s1 + $0x24f4] ss:$100 sps:$4 sm:$0xff]   ;;  %v15447_v4 = vld [vmem:[%s21717_s1 + $0x24e8] ss:$100 sps:$4 sm:$0xff]  }
 0x7bb   :  { %11278 = vmatpush2.bf16.xpose.msra.mxu0 %v15393_v17  ;;  %11319 = vmatpush2.bf16.xpose.msra.mxu1 %v15396_v18  ;;  %v15450_v17 = vld [vmem:[%s21717_s1 + $0x24f0] ss:$100 sps:$4 sm:$0xff]   ;;  %v15455_v18 = vld [vmem:[%s21717_s1 + $0x2424] ss:$100 sps:$4 sm:$0xff]  }
 0x7bc   :  { %11329 = vmatprep.subr.bf16.mxu0 %v15401_v61  ;;  %11370 = vmatprep.subr.bf16.mxu1 %v15404_v26  ;;  %v15458_v61 = vld [vmem:[%s21717_s1 + $0x242c] ss:$100 sps:$4 sm:$0xff]  }
 0x7c2   :  { %11280 = vmatmul.mubr.bf16.vlgmr.msra.gmra.mxu0 %v17012_v62  ;;  %11321 = vmatmul.mubr.bf16.vlgmr.msra.gmra.mxu1 %v17016_v63 }
 0x7c3   :  { %11330 = vmatpush1.bf16.xpose.msra.mxu0 %v15399_v5  ;;  %11371 = vmatpush1.bf16.xpose.msra.mxu1 %v15402_v19 }
 0x7c4   :  { %11331 = vmatprep.subr.bf16.mxu0 %v15407_v22  ;;  %11372 = vmatprep.subr.bf16.mxu1 %v15410_v23 }
 0x7c5   :  { %11361 = vmatprep.mubr.bf16.mxu0 %v17026_v2  ;;  %11402 = vmatprep.mubr.bf16.mxu1 %v17030_v20 }
 0x7cb   :  { %11332 = vmatpush1.bf16.xpose.msra.mxu0 %v15405_v50  ;;  %11373 = vmatpush1.bf16.xpose.msra.mxu1 %v15408_v13 }
 0x7cc   :  { %11333 = vmatprep.subr.bf16.mxu0 %v15413_v3  ;;  %11374 = vmatprep.subr.bf16.mxu1 %v15416_v7 }
 0x7d3   :  { %11334 = vmatpush1.bf16.xpose.msra.mxu0 %v15411_v31  ;;  %11375 = vmatpush1.bf16.xpose.msra.mxu1 %v15414_v32  ;;  %v15453_v32 = vld [vmem:[%s21717_s1 + $0x2420] ss:$100 sps:$4 sm:$0xff]  }
 0x7d4   :  { %11335 = vmatprep.subr.bf16.mxu0 %v15419_v35  ;;  %11376 = vmatprep.subr.bf16.mxu1 %v15422_v40 }
 0x7db   :  { %11336 = vmatpush1.bf16.xpose.msra.mxu0 %v15417_v47  ;;  %11377 = vmatpush1.bf16.xpose.msra.mxu1 %v15420_v48  ;;  %v15461_v47 = vld [vmem:[%s21717_s1 + $0x235c] ss:$100 sps:$4 sm:$0xff]  }
 0x7dc   :  { %11337 = vmatprep.subr.bf16.mxu0 %v15425_v58  ;;  %11378 = vmatprep.subr.bf16.mxu1 %v15428_v34  ;;  %v15459_v48 = vld [vmem:[%s21717_s1 + $0x2358] ss:$100 sps:$4 sm:$0xff]   ;;  %v15462_v58 = vld [vmem:[%s21717_s1 + $0x2360] ss:$100 sps:$4 sm:$0xff]  }
 0x7dd   :  { %v15467_v34 = vld [vmem:[%s21717_s1 + $0x2294] ss:$100 sps:$4 sm:$0xff]  }
 0x7e3   :  { %11338 = vmatpush1.bf16.xpose.msra.mxu0 %v15423_v51  ;;  %11379 = vmatpush1.bf16.xpose.msra.mxu1 %v15426_v43  ;;  %v15470_v51 = vld [vmem:[%s21717_s1 + $0x229c] ss:$100 sps:$4 sm:$0xff]   ;;  %v15465_v43 = vld [vmem:[%s21717_s1 + $0x2290] ss:$100 sps:$4 sm:$0xff]  }
 0x7e4   :  { %11339 = vmatprep.subr.bf16.mxu0 %v15431_v55  ;;  %11380 = vmatprep.subr.bf16.mxu1 %v15434_v60  ;;  %v15468_v55 = vld [vmem:[%s21717_s1 + $0x2298] ss:$100 sps:$4 sm:$0xff]   ;;  %v15473_v60 = vld [vmem:[%s21717_s1 + $0x21cc] ss:$100 sps:$4 sm:$0xff]  }
 0x7eb   :  { %11340 = vmatpush1.bf16.xpose.msra.mxu0 %v15429_v16  ;;  %11381 = vmatpush1.bf16.xpose.msra.mxu1 %v15432_v0  ;;  %v15476_v16 = vld [vmem:[%s21717_s1 + $0x21d4] ss:$100 sps:$4 sm:$0xff]   ;;  %v15471_v0 = vld [vmem:[%s21717_s1 + $0x21c8] ss:$100 sps:$4 sm:$0xff]  }
 0x7ec   :  { %11341 = vmatprep.subr.bf16.mxu0 %v15437_v42  ;;  %11382 = vmatprep.subr.bf16.mxu1 %v15440_v56  ;;  %v15474_v42 = vld [vmem:[%s21717_s1 + $0x21d0] ss:$100 sps:$4 sm:$0xff]   ;;  %v15479_v56 = vld [vmem:[%s21717_s1 + $0x2104] ss:$100 sps:$4 sm:$0xff]  }
 0x7f3   :  { %11342 = vmatpush1.bf16.xpose.msra.mxu0 %v15435_v52  ;;  %11383 = vmatpush1.bf16.xpose.msra.mxu1 %v15438_v1  ;;  %v15482_v52 = vld [vmem:[%s21717_s1 + $0x210c] ss:$100 sps:$4 sm:$0xff]   ;;  %v15477_v1 = vld [vmem:[%s21717_s1 + $0x2100] ss:$100 sps:$4 sm:$0xff]  }
 0x7f4   :  { %11343 = vmatprep.subr.bf16.mxu0 %v15443_v54  ;;  %11384 = vmatprep.subr.bf16.mxu1 %v15446_v53  ;;  %v15480_v54 = vld [vmem:[%s21717_s1 + $0x2108] ss:$100 sps:$4 sm:$0xff]   ;;  %v15485_v53 = vld [vmem:[%s21717_s1 + $0x203c] ss:$100 sps:$4 sm:$0xff]  }
 0x7fb   :  { %11344 = vmatpush1.bf16.xpose.msra.mxu0 %v15441_v21  ;;  %11385 = vmatpush1.bf16.xpose.msra.mxu1 %v15444_v12  ;;  %v15488_v21 = vld [vmem:[%s21717_s1 + $0x2044] ss:$100 sps:$4 sm:$0xff]   ;;  %v15483_v12 = vld [vmem:[%s21717_s1 + $0x2038] ss:$100 sps:$4 sm:$0xff]  }
 0x7fc   :  { %11345 = vmatprep.subr.bf16.mxu0 %v15449_v8  ;;  %11386 = vmatprep.subr.bf16.mxu1 %v15452_v9  ;;  %v15486_v8 = vld [vmem:[%s21717_s1 + $0x2040] ss:$100 sps:$4 sm:$0xff]   ;;  %v15491_v9 = vld [vmem:[%s21717_s1 + $0x1f74] ss:$100 sps:$4 sm:$0xff]  }
 0x802   :  { %v11199_v26 = vpop.f32.mrf.mxu0  ;;  %v11240_v5 = vpop.f32.mrf.mxu1 }
 0x803   :  { %v11200_v19 = vadd.f32 %v11199_v26, %v19620_v28  ;;  %11346 = vmatpush2.bf16.xpose.msra.mxu0 %v15447_v4  ;;  %11387 = vmatpush2.bf16.xpose.msra.mxu1 %v15450_v17  ;;  %v15456_v28 = vld [vmem:[%s21717_s1 + $0x2428] ss:$100 sps:$4 sm:$0xff]   ;;  %v15494_v4 = vld [vmem:[%s21717_s1 + $0x1f7c] ss:$100 sps:$4 sm:$0xff]   ;;  %v15489_v17 = vld [vmem:[%s21717_s1 + $0x1f70] ss:$100 sps:$4 sm:$0xff]  }
 0x804   :  { %v11201_v22 = vpop.f32.mrf.mxu0  ;;  %v11242_v23 = vpop.f32.mrf.mxu1  ;;  %11347 = vmatprep.subr.bf16.mxu0 %v15455_v18  ;;  %11388 = vmatprep.subr.bf16.mxu1 %v15458_v61  ;;  %v15492_v18 = vld [vmem:[%s21717_s1 + $0x1f78] ss:$100 sps:$4 sm:$0xff]   ;;  %v15500_v26 = vld [vmem:[%s21717_s1 + $0x1ec4] ss:$100 sps:$4 sm:$0xff]  }
 0x805   :  { %v19821_v50 = vadd.f32 %v11240_v5, %v11200_v19  ;;  %v11202_v13 = vadd.f32 %v11201_v22, %v19622_v33  ;;  %v15464_v33 = vld [vmem:[%s21717_s1 + $0x2364] ss:$100 sps:$4 sm:$0xff]   ;;  %v15497_v61 = vld [vmem:[%s21717_s1 + $0x1ebc] ss:$100 sps:$4 sm:$0xff]   ;;  %v15503_v22 = vld [vmem:[%s21717_s1 + $0x1df4] ss:$100 sps:$4 sm:$0xff]  }
 0x806   :  { %v11203_v3 = vpop.f32.mrf.mxu0  ;;  %v11244_v7 = vpop.f32.mrf.mxu1  ;;  %v15495_v5 = vld [vmem:[%s21717_s1 + $0x1eb8] ss:$100 sps:$4 sm:$0xff]   ;;  %v15498_v19 = vld [vmem:[%s21717_s1 + $0x1ec0] ss:$100 sps:$4 sm:$0xff]  }
 0x807   :  { %v19824_v31 = vadd.f32 %v11242_v23, %v11202_v13  ;;  %v15506_v23 = vld [vmem:[%s21717_s1 + $0x1dfc] ss:$100 sps:$4 sm:$0xff]   ;;  %v15501_v13 = vld [vmem:[%s21717_s1 + $0x1df0] ss:$100 sps:$4 sm:$0xff]  }
 0x808   :  { %v11204_v35 = vpop.f32.mrf.mxu0  ;;  %v11245_v40 = vpop.f32.mrf.mxu1  ;;  %v15504_v3 = vld [vmem:[%s21717_s1 + $0x1df8] ss:$100 sps:$4 sm:$0xff]   ;;  %v15509_v7 = vld [vmem:[%s21717_s1 + $0x1d2c] ss:$100 sps:$4 sm:$0xff]  }
 0x809   :  { %v15510_v35 = vld [vmem:[%s21717_s1 + $0x1d30] ss:$100 sps:$4 sm:$0xff]   ;;  %v15515_v40 = vld [vmem:[%s21717_s1 + $0x1c64] ss:$100 sps:$4 sm:$0xff]  }
 0x80b   :  { %11348 = vmatpush2.bf16.xpose.msra.mxu0 %v15453_v32  ;;  %11389 = vmatpush2.bf16.xpose.msra.mxu1 %v15456_v28  ;;  %v15512_v32 = vld [vmem:[%s21717_s1 + $0x1d34] ss:$100 sps:$4 sm:$0xff]   ;;  %v15507_v28 = vld [vmem:[%s21717_s1 + $0x1d28] ss:$100 sps:$4 sm:$0xff]  }
 0x80c   :  { %11349 = vmatprep.subr.bf16.mxu0 %v15461_v47  ;;  %11390 = vmatprep.subr.bf16.mxu1 %v15464_v33  ;;  %v15518_v47 = vld [vmem:[%s21717_s1 + $0x1c6c] ss:$100 sps:$4 sm:$0xff]   ;;  %v15513_v33 = vld [vmem:[%s21717_s1 + $0x1c60] ss:$100 sps:$4 sm:$0xff]  }
 0x813   :  { %11350 = vmatpush2.bf16.xpose.msra.mxu0 %v15459_v48  ;;  %11391 = vmatpush2.bf16.xpose.msra.mxu1 %v15462_v58  ;;  %v15516_v48 = vld [vmem:[%s21717_s1 + $0x1c68] ss:$100 sps:$4 sm:$0xff]   ;;  %v15521_v58 = vld [vmem:[%s21717_s1 + $0x1b9c] ss:$100 sps:$4 sm:$0xff]  }
 0x814   :  { %11351 = vmatprep.subr.bf16.mxu0 %v15467_v34  ;;  %11392 = vmatprep.subr.bf16.mxu1 %v15470_v51  ;;  %v15524_v34 = vld [vmem:[%s21717_s1 + $0x1ba4] ss:$100 sps:$4 sm:$0xff]   ;;  %v15519_v51 = vld [vmem:[%s21717_s1 + $0x1b98] ss:$100 sps:$4 sm:$0xff]  }
 0x81b   :  { %11352 = vmatpush2.bf16.xpose.msra.mxu0 %v15465_v43  ;;  %11393 = vmatpush2.bf16.xpose.msra.mxu1 %v15468_v55  ;;  %v15522_v43 = vld [vmem:[%s21717_s1 + $0x1ba0] ss:$100 sps:$4 sm:$0xff]   ;;  %v15527_v55 = vld [vmem:[%s21717_s1 + $0x1ad4] ss:$100 sps:$4 sm:$0xff]  }
 0x81c   :  { %11353 = vmatprep.subr.bf16.mxu0 %v15473_v60  ;;  %11394 = vmatprep.subr.bf16.mxu1 %v15476_v16  ;;  %v15530_v60 = vld [vmem:[%s21717_s1 + $0x1adc] ss:$100 sps:$4 sm:$0xff]   ;;  %v15525_v16 = vld [vmem:[%s21717_s1 + $0x1ad0] ss:$100 sps:$4 sm:$0xff]  }
 0x823   :  { %11354 = vmatpush2.bf16.xpose.msra.mxu0 %v15471_v0  ;;  %11395 = vmatpush2.bf16.xpose.msra.mxu1 %v15474_v42  ;;  %v15528_v0 = vld [vmem:[%s21717_s1 + $0x1ad8] ss:$100 sps:$4 sm:$0xff]   ;;  %v15533_v42 = vld [vmem:[%s21717_s1 + $0x1a0c] ss:$100 sps:$4 sm:$0xff]  }
 0x824   :  { %11355 = vmatprep.subr.bf16.mxu0 %v15479_v56  ;;  %11396 = vmatprep.subr.bf16.mxu1 %v15482_v52  ;;  %v15536_v56 = vld [vmem:[%s21717_s1 + $0x1a14] ss:$100 sps:$4 sm:$0xff]   ;;  %v15531_v52 = vld [vmem:[%s21717_s1 + $0x1a08] ss:$100 sps:$4 sm:$0xff]  }
 0x82b   :  { %11356 = vmatpush2.bf16.xpose.msra.mxu0 %v15477_v1  ;;  %11397 = vmatpush2.bf16.xpose.msra.mxu1 %v15480_v54  ;;  %v15534_v1 = vld [vmem:[%s21717_s1 + $0x1a10] ss:$100 sps:$4 sm:$0xff]   ;;  %v15539_v54 = vld [vmem:[%s21717_s1 + $0x1944] ss:$100 sps:$4 sm:$0xff]  }
 0x82c   :  { %11357 = vmatprep.subr.bf16.mxu0 %v15485_v53  ;;  %11398 = vmatprep.subr.bf16.mxu1 %v15488_v21  ;;  %v15542_v53 = vld [vmem:[%s21717_s1 + $0x194c] ss:$100 sps:$4 sm:$0xff]   ;;  %v15537_v21 = vld [vmem:[%s21717_s1 + $0x1940] ss:$100 sps:$4 sm:$0xff]  }
 0x833   :  { %11358 = vmatpush2.bf16.xpose.msra.mxu0 %v15483_v12  ;;  %11399 = vmatpush2.bf16.xpose.msra.mxu1 %v15486_v8  ;;  %v15540_v12 = vld [vmem:[%s21717_s1 + $0x1948] ss:$100 sps:$4 sm:$0xff]   ;;  %v15545_v8 = vld [vmem:[%s21717_s1 + $0x24fc] ss:$100 sps:$4 sm:$0xff]  }
 0x834   :  { %11359 = vmatprep.subr.bf16.mxu0 %v15491_v9  ;;  %11400 = vmatprep.subr.bf16.mxu1 %v15494_v4  ;;  %v15548_v9 = vld [vmem:[%s21717_s1 + $0x2504] ss:$100 sps:$4 sm:$0xff]   ;;  %v15543_v4 = vld [vmem:[%s21717_s1 + $0x24f8] ss:$100 sps:$4 sm:$0xff]  }
 0x83b   :  { %11360 = vmatpush2.bf16.xpose.msra.mxu0 %v15489_v17  ;;  %11401 = vmatpush2.bf16.xpose.msra.mxu1 %v15492_v18  ;;  %v15546_v17 = vld [vmem:[%s21717_s1 + $0x2500] ss:$100 sps:$4 sm:$0xff]   ;;  %v15551_v18 = vld [vmem:[%s21717_s1 + $0x2434] ss:$100 sps:$4 sm:$0xff]  }
 0x83c   :  { %11411 = vmatprep.subr.bf16.mxu0 %v15497_v61  ;;  %11452 = vmatprep.subr.bf16.mxu1 %v15500_v26  ;;  %v15554_v61 = vld [vmem:[%s21717_s1 + $0x243c] ss:$100 sps:$4 sm:$0xff]  }
 0x842   :  { %11362 = vmatmul.mubr.bf16.vlgmr.msra.gmra.mxu0 %v17240_v45  ;;  %11403 = vmatmul.mubr.bf16.vlgmr.msra.gmra.mxu1 %v17244_v46 }
 0x843   :  { %11412 = vmatpush1.bf16.xpose.msra.mxu0 %v15495_v5  ;;  %11453 = vmatpush1.bf16.xpose.msra.mxu1 %v15498_v19 }
 0x844   :  { %11413 = vmatprep.subr.bf16.mxu0 %v15503_v22  ;;  %11454 = vmatprep.subr.bf16.mxu1 %v15506_v23 }
 0x845   :  { %11443 = vmatprep.mubr.bf16.mxu0 %v17254_v49  ;;  %11484 = vmatprep.mubr.bf16.mxu1 %v17258_v57 }
 0x84b   :  { %11414 = vmatpush1.bf16.xpose.msra.mxu0 %v15501_v13  ;;  %11455 = vmatpush1.bf16.xpose.msra.mxu1 %v15504_v3 }
 0x84c   :  { %11415 = vmatprep.subr.bf16.mxu0 %v15509_v7  ;;  %11456 = vmatprep.subr.bf16.mxu1 %v15512_v32 }
 0x853   :  { %11416 = vmatpush1.bf16.xpose.msra.mxu0 %v15507_v28  ;;  %11457 = vmatpush1.bf16.xpose.msra.mxu1 %v15510_v35  ;;  %v15549_v35 = vld [vmem:[%s21717_s1 + $0x2430] ss:$100 sps:$4 sm:$0xff]  }
 0x854   :  { %11417 = vmatprep.subr.bf16.mxu0 %v15515_v40  ;;  %11458 = vmatprep.subr.bf16.mxu1 %v15518_v47 }
 0x85b   :  { %11418 = vmatpush1.bf16.xpose.msra.mxu0 %v15513_v33  ;;  %11459 = vmatpush1.bf16.xpose.msra.mxu1 %v15516_v48  ;;  %v15557_v33 = vld [vmem:[%s21717_s1 + $0x236c] ss:$100 sps:$4 sm:$0xff]  }
 0x85c   :  { %11419 = vmatprep.subr.bf16.mxu0 %v15521_v58  ;;  %11460 = vmatprep.subr.bf16.mxu1 %v15524_v34  ;;  %v15555_v48 = vld [vmem:[%s21717_s1 + $0x2368] ss:$100 sps:$4 sm:$0xff]   ;;  %v15558_v58 = vld [vmem:[%s21717_s1 + $0x2370] ss:$100 sps:$4 sm:$0xff]  }
 0x85d   :  { %v15563_v34 = vld [vmem:[%s21717_s1 + $0x22a4] ss:$100 sps:$4 sm:$0xff]  }
 0x863   :  { %11420 = vmatpush1.bf16.xpose.msra.mxu0 %v15519_v51  ;;  %11461 = vmatpush1.bf16.xpose.msra.mxu1 %v15522_v43  ;;  %v15566_v51 = vld [vmem:[%s21717_s1 + $0x22ac] ss:$100 sps:$4 sm:$0xff]   ;;  %v15561_v43 = vld [vmem:[%s21717_s1 + $0x22a0] ss:$100 sps:$4 sm:$0xff]  }
 0x864   :  { %11421 = vmatprep.subr.bf16.mxu0 %v15527_v55  ;;  %11462 = vmatprep.subr.bf16.mxu1 %v15530_v60  ;;  %v15564_v55 = vld [vmem:[%s21717_s1 + $0x22a8] ss:$100 sps:$4 sm:$0xff]   ;;  %v15569_v60 = vld [vmem:[%s21717_s1 + $0x21dc] ss:$100 sps:$4 sm:$0xff]  }
 0x86b   :  { %11422 = vmatpush1.bf16.xpose.msra.mxu0 %v15525_v16  ;;  %11463 = vmatpush1.bf16.xpose.msra.mxu1 %v15528_v0  ;;  %v15572_v16 = vld [vmem:[%s21717_s1 + $0x21e4] ss:$100 sps:$4 sm:$0xff]   ;;  %v15567_v0 = vld [vmem:[%s21717_s1 + $0x21d8] ss:$100 sps:$4 sm:$0xff]  }
 0x86c   :  { %11423 = vmatprep.subr.bf16.mxu0 %v15533_v42  ;;  %11464 = vmatprep.subr.bf16.mxu1 %v15536_v56  ;;  %v15570_v42 = vld [vmem:[%s21717_s1 + $0x21e0] ss:$100 sps:$4 sm:$0xff]   ;;  %v15575_v56 = vld [vmem:[%s21717_s1 + $0x2114] ss:$100 sps:$4 sm:$0xff]  }
 0x873   :  { %11424 = vmatpush1.bf16.xpose.msra.mxu0 %v15531_v52  ;;  %11465 = vmatpush1.bf16.xpose.msra.mxu1 %v15534_v1  ;;  %v15578_v52 = vld [vmem:[%s21717_s1 + $0x211c] ss:$100 sps:$4 sm:$0xff]   ;;  %v15573_v1 = vld [vmem:[%s21717_s1 + $0x2110] ss:$100 sps:$4 sm:$0xff]  }
 0x874   :  { %11425 = vmatprep.subr.bf16.mxu0 %v15539_v54  ;;  %11466 = vmatprep.subr.bf16.mxu1 %v15542_v53  ;;  %v15576_v54 = vld [vmem:[%s21717_s1 + $0x2118] ss:$100 sps:$4 sm:$0xff]   ;;  %v15581_v53 = vld [vmem:[%s21717_s1 + $0x204c] ss:$100 sps:$4 sm:$0xff]  }
 0x87b   :  { %11426 = vmatpush1.bf16.xpose.msra.mxu0 %v15537_v21  ;;  %11467 = vmatpush1.bf16.xpose.msra.mxu1 %v15540_v12  ;;  %v15584_v21 = vld [vmem:[%s21717_s1 + $0x2054] ss:$100 sps:$4 sm:$0xff]   ;;  %v15579_v12 = vld [vmem:[%s21717_s1 + $0x2048] ss:$100 sps:$4 sm:$0xff]  }
 0x87c   :  { %11427 = vmatprep.subr.bf16.mxu0 %v15545_v8  ;;  %11468 = vmatprep.subr.bf16.mxu1 %v15548_v9  ;;  %v15582_v8 = vld [vmem:[%s21717_s1 + $0x2050] ss:$100 sps:$4 sm:$0xff]   ;;  %v15587_v9 = vld [vmem:[%s21717_s1 + $0x1f84] ss:$100 sps:$4 sm:$0xff]  }
 0x882   :  { %v11281_v26 = vpop.f32.mrf.mxu0  ;;  %v11322_v5 = vpop.f32.mrf.mxu1 }
 0x883   :  { %v11282_v19 = vadd.f32 %v11281_v26, %v19821_v50  ;;  %11428 = vmatpush2.bf16.xpose.msra.mxu0 %v15543_v4  ;;  %11469 = vmatpush2.bf16.xpose.msra.mxu1 %v15546_v17  ;;  %v15552_v50 = vld [vmem:[%s21717_s1 + $0x2438] ss:$100 sps:$4 sm:$0xff]   ;;  %v15590_v4 = vld [vmem:[%s21717_s1 + $0x1f8c] ss:$100 sps:$4 sm:$0xff]   ;;  %v15585_v17 = vld [vmem:[%s21717_s1 + $0x1f80] ss:$100 sps:$4 sm:$0xff]  }
 0x884   :  { %v11283_v22 = vpop.f32.mrf.mxu0  ;;  %v11324_v23 = vpop.f32.mrf.mxu1  ;;  %11429 = vmatprep.subr.bf16.mxu0 %v15551_v18  ;;  %11470 = vmatprep.subr.bf16.mxu1 %v15554_v61  ;;  %v15588_v18 = vld [vmem:[%s21717_s1 + $0x1f88] ss:$100 sps:$4 sm:$0xff]   ;;  %v15596_v26 = vld [vmem:[%s21717_s1 + $0x1ed4] ss:$100 sps:$4 sm:$0xff]  }
 0x885   :  { %v20023_v13 = vadd.f32 %v11322_v5, %v11282_v19  ;;  %v11284_v3 = vadd.f32 %v11283_v22, %v19824_v31  ;;  %v15560_v31 = vld [vmem:[%s21717_s1 + $0x2374] ss:$100 sps:$4 sm:$0xff]   ;;  %v15593_v61 = vld [vmem:[%s21717_s1 + $0x1ecc] ss:$100 sps:$4 sm:$0xff]   ;;  %v15599_v22 = vld [vmem:[%s21717_s1 + $0x1e04] ss:$100 sps:$4 sm:$0xff]  }
 0x886   :  { %v11285_v7 = vpop.f32.mrf.mxu0  ;;  %v11326_v32 = vpop.f32.mrf.mxu1  ;;  %v15591_v5 = vld [vmem:[%s21717_s1 + $0x1ec8] ss:$100 sps:$4 sm:$0xff]   ;;  %v15594_v19 = vld [vmem:[%s21717_s1 + $0x1ed0] ss:$100 sps:$4 sm:$0xff]  }
 0x887   :  { %v20026_v28 = vadd.f32 %v11324_v23, %v11284_v3  ;;  %v15602_v23 = vld [vmem:[%s21717_s1 + $0x1e0c] ss:$100 sps:$4 sm:$0xff]   ;;  %v15597_v3 = vld [vmem:[%s21717_s1 + $0x1e00] ss:$100 sps:$4 sm:$0xff]  }
 0x888   :  { %v11286_v40 = vpop.f32.mrf.mxu0  ;;  %v11327_v47 = vpop.f32.mrf.mxu1  ;;  %v15600_v7 = vld [vmem:[%s21717_s1 + $0x1e08] ss:$100 sps:$4 sm:$0xff]   ;;  %v15605_v32 = vld [vmem:[%s21717_s1 + $0x1d3c] ss:$100 sps:$4 sm:$0xff]  }
 0x889   :  { %v15606_v40 = vld [vmem:[%s21717_s1 + $0x1d40] ss:$100 sps:$4 sm:$0xff]   ;;  %v15611_v47 = vld [vmem:[%s21717_s1 + $0x1c74] ss:$100 sps:$4 sm:$0xff]  }
 0x88b   :  { %11430 = vmatpush2.bf16.xpose.msra.mxu0 %v15549_v35  ;;  %11471 = vmatpush2.bf16.xpose.msra.mxu1 %v15552_v50  ;;  %v15608_v35 = vld [vmem:[%s21717_s1 + $0x1d44] ss:$100 sps:$4 sm:$0xff]   ;;  %v15603_v50 = vld [vmem:[%s21717_s1 + $0x1d38] ss:$100 sps:$4 sm:$0xff]  }
 0x88c   :  { %11431 = vmatprep.subr.bf16.mxu0 %v15557_v33  ;;  %11472 = vmatprep.subr.bf16.mxu1 %v15560_v31  ;;  %v15614_v33 = vld [vmem:[%s21717_s1 + $0x1c7c] ss:$100 sps:$4 sm:$0xff]   ;;  %v15609_v31 = vld [vmem:[%s21717_s1 + $0x1c70] ss:$100 sps:$4 sm:$0xff]  }
 0x893   :  { %11432 = vmatpush2.bf16.xpose.msra.mxu0 %v15555_v48  ;;  %11473 = vmatpush2.bf16.xpose.msra.mxu1 %v15558_v58  ;;  %v15612_v48 = vld [vmem:[%s21717_s1 + $0x1c78] ss:$100 sps:$4 sm:$0xff]   ;;  %v15617_v58 = vld [vmem:[%s21717_s1 + $0x1bac] ss:$100 sps:$4 sm:$0xff]  }
 0x894   :  { %11433 = vmatprep.subr.bf16.mxu0 %v15563_v34  ;;  %11474 = vmatprep.subr.bf16.mxu1 %v15566_v51  ;;  %v15620_v34 = vld [vmem:[%s21717_s1 + $0x1bb4] ss:$100 sps:$4 sm:$0xff]   ;;  %v15615_v51 = vld [vmem:[%s21717_s1 + $0x1ba8] ss:$100 sps:$4 sm:$0xff]  }
 0x89b   :  { %11434 = vmatpush2.bf16.xpose.msra.mxu0 %v15561_v43  ;;  %11475 = vmatpush2.bf16.xpose.msra.mxu1 %v15564_v55  ;;  %v15618_v43 = vld [vmem:[%s21717_s1 + $0x1bb0] ss:$100 sps:$4 sm:$0xff]   ;;  %v15623_v55 = vld [vmem:[%s21717_s1 + $0x1ae4] ss:$100 sps:$4 sm:$0xff]  }
 0x89c   :  { %11435 = vmatprep.subr.bf16.mxu0 %v15569_v60  ;;  %11476 = vmatprep.subr.bf16.mxu1 %v15572_v16  ;;  %v15626_v60 = vld [vmem:[%s21717_s1 + $0x1aec] ss:$100 sps:$4 sm:$0xff]   ;;  %v15621_v16 = vld [vmem:[%s21717_s1 + $0x1ae0] ss:$100 sps:$4 sm:$0xff]  }
 0x8a3   :  { %11436 = vmatpush2.bf16.xpose.msra.mxu0 %v15567_v0  ;;  %11477 = vmatpush2.bf16.xpose.msra.mxu1 %v15570_v42  ;;  %v15624_v0 = vld [vmem:[%s21717_s1 + $0x1ae8] ss:$100 sps:$4 sm:$0xff]   ;;  %v15629_v42 = vld [vmem:[%s21717_s1 + $0x1a1c] ss:$100 sps:$4 sm:$0xff]  }
 0x8a4   :  { %11437 = vmatprep.subr.bf16.mxu0 %v15575_v56  ;;  %11478 = vmatprep.subr.bf16.mxu1 %v15578_v52  ;;  %v15632_v56 = vld [vmem:[%s21717_s1 + $0x1a24] ss:$100 sps:$4 sm:$0xff]   ;;  %v15627_v52 = vld [vmem:[%s21717_s1 + $0x1a18] ss:$100 sps:$4 sm:$0xff]  }
 0x8ab   :  { %11438 = vmatpush2.bf16.xpose.msra.mxu0 %v15573_v1  ;;  %11479 = vmatpush2.bf16.xpose.msra.mxu1 %v15576_v54  ;;  %v15630_v1 = vld [vmem:[%s21717_s1 + $0x1a20] ss:$100 sps:$4 sm:$0xff]   ;;  %v15635_v54 = vld [vmem:[%s21717_s1 + $0x1954] ss:$100 sps:$4 sm:$0xff]  }
 0x8ac   :  { %11439 = vmatprep.subr.bf16.mxu0 %v15581_v53  ;;  %11480 = vmatprep.subr.bf16.mxu1 %v15584_v21  ;;  %v15638_v53 = vld [vmem:[%s21717_s1 + $0x195c] ss:$100 sps:$4 sm:$0xff]   ;;  %v15633_v21 = vld [vmem:[%s21717_s1 + $0x1950] ss:$100 sps:$4 sm:$0xff]  }
 0x8b3   :  { %11440 = vmatpush2.bf16.xpose.msra.mxu0 %v15579_v12  ;;  %11481 = vmatpush2.bf16.xpose.msra.mxu1 %v15582_v8  ;;  %v15636_v12 = vld [vmem:[%s21717_s1 + $0x1958] ss:$100 sps:$4 sm:$0xff]   ;;  %v15641_v8 = vld [vmem:[%s21717_s1 + $0x250c] ss:$100 sps:$4 sm:$0xff]  }
 0x8b4   :  { %11441 = vmatprep.subr.bf16.mxu0 %v15587_v9  ;;  %11482 = vmatprep.subr.bf16.mxu1 %v15590_v4  ;;  %v15644_v9 = vld [vmem:[%s21717_s1 + $0x2514] ss:$100 sps:$4 sm:$0xff]   ;;  %v15639_v4 = vld [vmem:[%s21717_s1 + $0x2508] ss:$100 sps:$4 sm:$0xff]  }
 0x8bb   :  { %11442 = vmatpush2.bf16.xpose.msra.mxu0 %v15585_v17  ;;  %11483 = vmatpush2.bf16.xpose.msra.mxu1 %v15588_v18  ;;  %v15642_v17 = vld [vmem:[%s21717_s1 + $0x2510] ss:$100 sps:$4 sm:$0xff]   ;;  %v15647_v18 = vld [vmem:[%s21717_s1 + $0x2444] ss:$100 sps:$4 sm:$0xff]  }
 0x8bc   :  { %11493 = vmatprep.subr.bf16.mxu0 %v15593_v61  ;;  %11534 = vmatprep.subr.bf16.mxu1 %v15596_v26  ;;  %v15650_v61 = vld [vmem:[%s21717_s1 + $0x244c] ss:$100 sps:$4 sm:$0xff]  }
 0x8c2   :  { %11444 = vmatmul.mubr.bf16.vlgmr.msra.gmra.mxu0 %v17468_v37  ;;  %11485 = vmatmul.mubr.bf16.vlgmr.msra.gmra.mxu1 %v17472_v38 }
 0x8c3   :  { %11494 = vmatpush1.bf16.xpose.msra.mxu0 %v15591_v5  ;;  %11535 = vmatpush1.bf16.xpose.msra.mxu1 %v15594_v19 }
 0x8c4   :  { %11495 = vmatprep.subr.bf16.mxu0 %v15599_v22  ;;  %11536 = vmatprep.subr.bf16.mxu1 %v15602_v23 }
 0x8c5   :  { %11525 = vmatprep.mubr.bf16.mxu0 %v17482_v44  ;;  %11566 = vmatprep.mubr.bf16.mxu1 %v17486_v41 }
 0x8cb   :  { %11496 = vmatpush1.bf16.xpose.msra.mxu0 %v15597_v3  ;;  %11537 = vmatpush1.bf16.xpose.msra.mxu1 %v15600_v7 }
 0x8cc   :  { %11497 = vmatprep.subr.bf16.mxu0 %v15605_v32  ;;  %11538 = vmatprep.subr.bf16.mxu1 %v15608_v35 }
 0x8d3   :  { %11498 = vmatpush1.bf16.xpose.msra.mxu0 %v15603_v50  ;;  %11539 = vmatpush1.bf16.xpose.msra.mxu1 %v15606_v40  ;;  %v15645_v40 = vld [vmem:[%s21717_s1 + $0x2440] ss:$100 sps:$4 sm:$0xff]  }
 0x8d4   :  { %11499 = vmatprep.subr.bf16.mxu0 %v15611_v47  ;;  %11540 = vmatprep.subr.bf16.mxu1 %v15614_v33 }
 0x8db   :  { %11500 = vmatpush1.bf16.xpose.msra.mxu0 %v15609_v31  ;;  %11541 = vmatpush1.bf16.xpose.msra.mxu1 %v15612_v48  ;;  %v15653_v31 = vld [vmem:[%s21717_s1 + $0x237c] ss:$100 sps:$4 sm:$0xff]  }
 0x8dc   :  { %11501 = vmatprep.subr.bf16.mxu0 %v15617_v58  ;;  %11542 = vmatprep.subr.bf16.mxu1 %v15620_v34  ;;  %v15651_v48 = vld [vmem:[%s21717_s1 + $0x2378] ss:$100 sps:$4 sm:$0xff]   ;;  %v15654_v58 = vld [vmem:[%s21717_s1 + $0x2380] ss:$100 sps:$4 sm:$0xff]  }
 0x8dd   :  { %v15659_v34 = vld [vmem:[%s21717_s1 + $0x22b4] ss:$100 sps:$4 sm:$0xff]  }
 0x8e3   :  { %11502 = vmatpush1.bf16.xpose.msra.mxu0 %v15615_v51  ;;  %11543 = vmatpush1.bf16.xpose.msra.mxu1 %v15618_v43  ;;  %v15662_v51 = vld [vmem:[%s21717_s1 + $0x22bc] ss:$100 sps:$4 sm:$0xff]   ;;  %v15657_v43 = vld [vmem:[%s21717_s1 + $0x22b0] ss:$100 sps:$4 sm:$0xff]  }
 0x8e4   :  { %11503 = vmatprep.subr.bf16.mxu0 %v15623_v55  ;;  %11544 = vmatprep.subr.bf16.mxu1 %v15626_v60  ;;  %v15660_v55 = vld [vmem:[%s21717_s1 + $0x22b8] ss:$100 sps:$4 sm:$0xff]   ;;  %v15665_v60 = vld [vmem:[%s21717_s1 + $0x21ec] ss:$100 sps:$4 sm:$0xff]  }
 0x8eb   :  { %11504 = vmatpush1.bf16.xpose.msra.mxu0 %v15621_v16  ;;  %11545 = vmatpush1.bf16.xpose.msra.mxu1 %v15624_v0  ;;  %v15668_v16 = vld [vmem:[%s21717_s1 + $0x21f4] ss:$100 sps:$4 sm:$0xff]   ;;  %v15663_v0 = vld [vmem:[%s21717_s1 + $0x21e8] ss:$100 sps:$4 sm:$0xff]  }
 0x8ec   :  { %11505 = vmatprep.subr.bf16.mxu0 %v15629_v42  ;;  %11546 = vmatprep.subr.bf16.mxu1 %v15632_v56  ;;  %v15666_v42 = vld [vmem:[%s21717_s1 + $0x21f0] ss:$100 sps:$4 sm:$0xff]   ;;  %v15671_v56 = vld [vmem:[%s21717_s1 + $0x2124] ss:$100 sps:$4 sm:$0xff]  }
 0x8f3   :  { %11506 = vmatpush1.bf16.xpose.msra.mxu0 %v15627_v52  ;;  %11547 = vmatpush1.bf16.xpose.msra.mxu1 %v15630_v1  ;;  %v15674_v52 = vld [vmem:[%s21717_s1 + $0x212c] ss:$100 sps:$4 sm:$0xff]   ;;  %v15669_v1 = vld [vmem:[%s21717_s1 + $0x2120] ss:$100 sps:$4 sm:$0xff]  }
 0x8f4   :  { %11507 = vmatprep.subr.bf16.mxu0 %v15635_v54  ;;  %11548 = vmatprep.subr.bf16.mxu1 %v15638_v53  ;;  %v15672_v54 = vld [vmem:[%s21717_s1 + $0x2128] ss:$100 sps:$4 sm:$0xff]   ;;  %v15677_v53 = vld [vmem:[%s21717_s1 + $0x205c] ss:$100 sps:$4 sm:$0xff]  }
 0x8fb   :  { %11508 = vmatpush1.bf16.xpose.msra.mxu0 %v15633_v21  ;;  %11549 = vmatpush1.bf16.xpose.msra.mxu1 %v15636_v12  ;;  %v15680_v21 = vld [vmem:[%s21717_s1 + $0x2064] ss:$100 sps:$4 sm:$0xff]   ;;  %v15675_v12 = vld [vmem:[%s21717_s1 + $0x2058] ss:$100 sps:$4 sm:$0xff]  }
 0x8fc   :  { %11509 = vmatprep.subr.bf16.mxu0 %v15641_v8  ;;  %11550 = vmatprep.subr.bf16.mxu1 %v15644_v9  ;;  %v15678_v8 = vld [vmem:[%s21717_s1 + $0x2060] ss:$100 sps:$4 sm:$0xff]   ;;  %v15683_v9 = vld [vmem:[%s21717_s1 + $0x1f94] ss:$100 sps:$4 sm:$0xff]  }
 0x902   :  { %v11363_v26 = vpop.f32.mrf.mxu0  ;;  %v11404_v5 = vpop.f32.mrf.mxu1 }
 0x903   :  { %v11364_v19 = vadd.f32 %v11363_v26, %v20023_v13  ;;  %11510 = vmatpush2.bf16.xpose.msra.mxu0 %v15639_v4  ;;  %11551 = vmatpush2.bf16.xpose.msra.mxu1 %v15642_v17  ;;  %v15648_v13 = vld [vmem:[%s21717_s1 + $0x2448] ss:$100 sps:$4 sm:$0xff]   ;;  %v15686_v4 = vld [vmem:[%s21717_s1 + $0x1f9c] ss:$100 sps:$4 sm:$0xff]   ;;  %v15681_v17 = vld [vmem:[%s21717_s1 + $0x1f90] ss:$100 sps:$4 sm:$0xff]  }
 0x904   :  { %v11365_v22 = vpop.f32.mrf.mxu0  ;;  %v11406_v23 = vpop.f32.mrf.mxu1  ;;  %11511 = vmatprep.subr.bf16.mxu0 %v15647_v18  ;;  %11552 = vmatprep.subr.bf16.mxu1 %v15650_v61  ;;  %v15684_v18 = vld [vmem:[%s21717_s1 + $0x1f98] ss:$100 sps:$4 sm:$0xff]  }
 0x905   :  { %v20225_v3 = vadd.f32 %v11404_v5, %v11364_v19  ;;  %v11366_v7 = vadd.f32 %v11365_v22, %v20026_v28  ;;  %v15656_v28 = vld [vmem:[%s21717_s1 + $0x2384] ss:$100 sps:$4 sm:$0xff]   ;;  %v15687_v61 = vld [vmem:[%s21717_s1 + $0x2518] ss:$100 sps:$4 sm:$0xff]  }
 0x906   :  { %v11367_v32 = vpop.f32.mrf.mxu0  ;;  %v11408_v35 = vpop.f32.mrf.mxu1  ;;  %v15690_v26 = vld [vmem:[%s21717_s1 + $0x2afc] ss:$100 sps:$4 sm:$0xff]  }
 0x907   :  { %v20228_v50 = vadd.f32 %v11406_v23, %v11366_v7  ;;  %v15691_v5 = vld [vmem:[%s21717_s1 + $0x1ed8] ss:$100 sps:$4 sm:$0xff]   ;;  %v15692_v23 = vld [vmem:[%s21717_s1 + $0x2450] ss:$100 sps:$4 sm:$0xff]   ;;  %v20337_v35 = vld [vmem:[%s21718_s0 + $0x60] ss:$0 sps:$4 sm:$0xff]  }
 0x908   :  { %v11368_v47 = vpop.f32.mrf.mxu0  ;;  %v11409_v33 = vpop.f32.mrf.mxu1  ;;  %v15688_v19 = vld [vmem:[%s21717_s1 + $0x2af8] ss:$100 sps:$4 sm:$0xff]   ;;  %v9943_v22 = vsel %vm9821_vm0, %v15691_v5, 0  ;;  %v15696_v32 = vld [vmem:[%s21717_s1 + $0x1e10] ss:$100 sps:$4 sm:$0xff]  }
 0x909   :  { %v15695_v7 = vld [vmem:[%s21717_s1 + $0x2a34] ss:$100 sps:$4 sm:$0xff]   ;;  %v15697_v47 = vld [vmem:[%s21717_s1 + $0x2388] ss:$100 sps:$4 sm:$0xff]  }
 0x90a   :  { %v15700_v33 = vld [vmem:[%s21717_s1 + $0x296c] ss:$100 sps:$4 sm:$0xff]  }
 0x90b   :  { %11512 = vmatpush2.bf16.xpose.msra.mxu0 %v15645_v40  ;;  %11553 = vmatpush2.bf16.xpose.msra.mxu1 %v15648_v13  ;;  %v15693_v40 = vld [vmem:[%s21717_s1 + $0x2a30] ss:$100 sps:$4 sm:$0xff]   ;;  %v9940_v13 = vsel %vm9821_vm0, %v15696_v32, 0 }
 0x90c   :  { %11513 = vmatprep.subr.bf16.mxu0 %v15653_v31  ;;  %11554 = vmatprep.subr.bf16.mxu1 %v15656_v28  ;;  %v15698_v31 = vld [vmem:[%s21717_s1 + $0x2968] ss:$100 sps:$4 sm:$0xff]   ;;  %v15735_v32 = vld [vmem:[%s21717_s1 + $0x3074] ss:$100 sps:$4 sm:$0xff]  }
 0x913   :  { %11514 = vmatpush2.bf16.xpose.msra.mxu0 %v15651_v48  ;;  %11555 = vmatpush2.bf16.xpose.msra.mxu1 %v15654_v58  ;;  %v15702_v48 = vld [vmem:[%s21717_s1 + $0x22c0] ss:$100 sps:$4 sm:$0xff]  }
 0x914   :  { %11515 = vmatprep.subr.bf16.mxu0 %v15659_v34  ;;  %11556 = vmatprep.subr.bf16.mxu1 %v15662_v51  ;;  %v15705_v58 = vld [vmem:[%s21717_s1 + $0x28a4] ss:$100 sps:$4 sm:$0xff]  }
 0x915   :  { %v15706_v34 = vld [vmem:[%s21717_s1 + $0x1c80] ss:$100 sps:$4 sm:$0xff]  }
 0x916   :  { %v15703_v51 = vld [vmem:[%s21717_s1 + $0x28a0] ss:$100 sps:$4 sm:$0xff]  }
 0x91b   :  { %11516 = vmatpush2.bf16.xpose.msra.mxu0 %v15657_v43  ;;  %11557 = vmatpush2.bf16.xpose.msra.mxu1 %v15660_v55  ;;  %v9934_v43 = vsel %vm9821_vm0, %v15706_v34, 0  ;;  %v15707_v55 = vld [vmem:[%s21717_s1 + $0x21f8] ss:$100 sps:$4 sm:$0xff]  }
 0x91c   :  { %11517 = vmatprep.subr.bf16.mxu0 %v15665_v60  ;;  %11558 = vmatprep.subr.bf16.mxu1 %v15668_v16  ;;  %v15710_v60 = vld [vmem:[%s21717_s1 + $0x27dc] ss:$100 sps:$4 sm:$0xff]  }
 0x91d   :  { %v15711_v16 = vld [vmem:[%s21717_s1 + $0x1bb8] ss:$100 sps:$4 sm:$0xff]  }
 0x923   :  { %11518 = vmatpush2.bf16.xpose.msra.mxu0 %v15663_v0  ;;  %11559 = vmatpush2.bf16.xpose.msra.mxu1 %v15666_v42  ;;  %v15708_v0 = vld [vmem:[%s21717_s1 + $0x27d8] ss:$100 sps:$4 sm:$0xff]   ;;  %v9931_v42 = vsel %vm9821_vm0, %v15711_v16, 0  ;;  %v15742_v16 = vld [vmem:[%s21717_s1 + $0x2970] ss:$100 sps:$4 sm:$0xff]  }
 0x924   :  { %11519 = vmatprep.subr.bf16.mxu0 %v15671_v56  ;;  %11560 = vmatprep.subr.bf16.mxu1 %v15674_v52  ;;  %v15712_v56 = vld [vmem:[%s21717_s1 + $0x2130] ss:$100 sps:$4 sm:$0xff]  }
 0x925   :  { %v15715_v52 = vld [vmem:[%s21717_s1 + $0x2714] ss:$100 sps:$4 sm:$0xff]  }
 0x92b   :  { %11520 = vmatpush2.bf16.xpose.msra.mxu0 %v15669_v1  ;;  %11561 = vmatpush2.bf16.xpose.msra.mxu1 %v15672_v54  ;;  %v15716_v1 = vld [vmem:[%s21717_s1 + $0x1af0] ss:$100 sps:$4 sm:$0xff]  }
 0x92c   :  { %11521 = vmatprep.subr.bf16.mxu0 %v15677_v53  ;;  %11562 = vmatprep.subr.bf16.mxu1 %v15680_v21  ;;  %v15713_v54 = vld [vmem:[%s21717_s1 + $0x2710] ss:$100 sps:$4 sm:$0xff]   ;;  %v9928_v53 = vsel %vm9821_vm0, %v15716_v1, 0  ;;  %v15717_v21 = vld [vmem:[%s21717_s1 + $0x2068] ss:$100 sps:$4 sm:$0xff]  }
 0x92d   :  { %v15753_v1 = vld [vmem:[%s21717_s1 + $0x2e1c] ss:$100 sps:$4 sm:$0xff]  }
 0x933   :  { %11522 = vmatpush2.bf16.xpose.msra.mxu0 %v15675_v12  ;;  %11563 = vmatpush2.bf16.xpose.msra.mxu1 %v15678_v8  ;;  %v15720_v12 = vld [vmem:[%s21717_s1 + $0x264c] ss:$100 sps:$4 sm:$0xff]  }
 0x934   :  { %11523 = vmatprep.subr.bf16.mxu0 %v15683_v9  ;;  %11564 = vmatprep.subr.bf16.mxu1 %v15686_v4  ;;  %v15721_v8 = vld [vmem:[%s21717_s1 + $0x1a28] ss:$100 sps:$4 sm:$0xff]  }
 0x935   :  { %v15718_v9 = vld [vmem:[%s21717_s1 + $0x2648] ss:$100 sps:$4 sm:$0xff]   ;;  %v9925_v4 = vsel %vm9821_vm0, %v15721_v8, 0  ;;  %v15762_v8 = vld [vmem:[%s21717_s1 + $0x271c] ss:$100 sps:$4 sm:$0xff]  }
 0x93b   :  { %11524 = vmatpush2.bf16.xpose.msra.mxu0 %v15681_v17  ;;  %11565 = vmatpush2.bf16.xpose.msra.mxu1 %v15684_v18  ;;  %v15722_v17 = vld [vmem:[%s21717_s1 + $0x1fa0] ss:$100 sps:$4 sm:$0xff]  }
 0x93c   :  { %13886 = vmatprep.subr.msk.bf16.mxu0 %vm9821_vm0, %v15687_v61  ;;  %11616 = vmatprep.subr.bf16.mxu1 %v15690_v26  ;;  %v15725_v18 = vld [vmem:[%s21717_s1 + $0x2584] ss:$100 sps:$4 sm:$0xff]  }
 0x93d   :  { %v15726_v61 = vld [vmem:[%s21717_s1 + $0x1960] ss:$100 sps:$4 sm:$0xff]  }
 0x93e   :  { %v15723_v26 = vld [vmem:[%s21717_s1 + $0x2580] ss:$100 sps:$4 sm:$0xff]   ;;  %v9922_v5 = vsel %vm9821_vm0, %v15726_v61, 0  ;;  %v15763_v61 = vld [vmem:[%s21717_s1 + $0x2c88] ss:$100 sps:$4 sm:$0xff]  }
 0x942   :  { %11526 = vmatmul.mubr.bf16.vlgmr.msra.gmra.mxu0 %v17684_v36  ;;  %11567 = vmatmul.mubr.bf16.vlgmr.msra.gmra.mxu1 %v17688_v39 }
 0x943   :  { %13835 = vmatpush3.bf16.xpose.msra.mxu0 %v9943_v22  ;;  %11617 = vmatpush1.bf16.xpose.msra.mxu1 %v15688_v19  ;;  %v15729_v19 = vld [vmem:[%s21717_s1 + $0x313c] ss:$100 sps:$4 sm:$0xff]   ;;  %v15732_v22 = vld [vmem:[%s21717_s1 + $0x2b04] ss:$100 sps:$4 sm:$0xff]  }
 0x944   :  { %13887 = vmatprep.subr.msk.bf16.mxu0 %vm9821_vm0, %v15692_v23  ;;  %11618 = vmatprep.subr.bf16.mxu1 %v15695_v7  ;;  %v15727_v23 = vld [vmem:[%s21717_s1 + $0x3138] ss:$100 sps:$4 sm:$0xff]   ;;  %v15730_v7 = vld [vmem:[%s21717_s1 + $0x2b00] ss:$100 sps:$4 sm:$0xff]  }
 0x945   :  { %13850 = vmatprep.mubr.msk.bf16.mxu0 %vm9821_vm0, %v20337_v35  ;;  %11648 = vmatprep.mubr.bf16.mxu1 %v16406_v27  ;;  %v15701_v27 = vld [vmem:[%s21717_s1 + $0x1d48] ss:$100 sps:$4 sm:$0xff]  }
 0x946   :  { %v9937_v28 = vsel %vm9821_vm0, %v15701_v27, 0 }
 0x94b   :  { %13837 = vmatpush3.bf16.xpose.msra.mxu0 %v9940_v13  ;;  %11619 = vmatpush1.bf16.xpose.msra.mxu1 %v15693_v40  ;;  %v15738_v40 = vld [vmem:[%s21717_s1 + $0x2a3c] ss:$100 sps:$4 sm:$0xff]  }
 0x94c   :  { %13888 = vmatprep.subr.msk.bf16.mxu0 %vm9821_vm0, %v15697_v47  ;;  %11620 = vmatprep.subr.bf16.mxu1 %v15700_v33 }
 0x953   :  { %13839 = vmatpush3.bf16.xpose.msra.mxu0 %v9937_v28  ;;  %11621 = vmatpush1.bf16.xpose.msra.mxu1 %v15698_v31 }
 0x954   :  { %13889 = vmatprep.subr.msk.bf16.mxu0 %vm9821_vm0, %v15702_v48  ;;  %11622 = vmatprep.subr.bf16.mxu1 %v15705_v58 }
 0x95b   :  { %13841 = vmatpush3.bf16.xpose.msra.mxu0 %v9934_v43  ;;  %11623 = vmatpush1.bf16.xpose.msra.mxu1 %v15703_v51 }
 0x95c   :  { %13890 = vmatprep.subr.msk.bf16.mxu0 %vm9821_vm0, %v15707_v55  ;;  %11624 = vmatprep.subr.bf16.mxu1 %v15710_v60  ;;  %v15739_v60 = vld [vmem:[%s21717_s1 + $0x2fa8] ss:$100 sps:$4 sm:$0xff]  }
 0x963   :  { %13843 = vmatpush3.bf16.xpose.msra.mxu0 %v9931_v42  ;;  %11625 = vmatpush1.bf16.xpose.msra.mxu1 %v15708_v0  ;;  %v15747_v0 = vld [vmem:[%s21717_s1 + $0x2ee4] ss:$100 sps:$4 sm:$0xff]   ;;  %v15750_v42 = vld [vmem:[%s21717_s1 + $0x28ac] ss:$100 sps:$4 sm:$0xff]  }
 0x964   :  { %13891 = vmatprep.subr.msk.bf16.mxu0 %vm9821_vm0, %v15712_v56  ;;  %11626 = vmatprep.subr.bf16.mxu1 %v15715_v52  ;;  %v15745_v56 = vld [vmem:[%s21717_s1 + $0x2ee0] ss:$100 sps:$4 sm:$0xff]   ;;  %v15748_v52 = vld [vmem:[%s21717_s1 + $0x28a8] ss:$100 sps:$4 sm:$0xff]  }
 0x96b   :  { %13845 = vmatpush3.bf16.xpose.msra.mxu0 %v9928_v53  ;;  %11627 = vmatpush1.bf16.xpose.msra.mxu1 %v15713_v54  ;;  %v15756_v54 = vld [vmem:[%s21717_s1 + $0x27e4] ss:$100 sps:$4 sm:$0xff]   ;;  %v15751_v53 = vld [vmem:[%s21717_s1 + $0x2e18] ss:$100 sps:$4 sm:$0xff]  }
 0x96c   :  { %13892 = vmatprep.subr.msk.bf16.mxu0 %vm9821_vm0, %v15717_v21  ;;  %11628 = vmatprep.subr.bf16.mxu1 %v15720_v12  ;;  %v15754_v21 = vld [vmem:[%s21717_s1 + $0x27e0] ss:$100 sps:$4 sm:$0xff]   ;;  %v15759_v12 = vld [vmem:[%s21717_s1 + $0x2d54] ss:$100 sps:$4 sm:$0xff]  }
 0x973   :  { %13847 = vmatpush3.bf16.xpose.msra.mxu0 %v9925_v4  ;;  %11629 = vmatpush1.bf16.xpose.msra.mxu1 %v15718_v9  ;;  %v15757_v9 = vld [vmem:[%s21717_s1 + $0x2d50] ss:$100 sps:$4 sm:$0xff]   ;;  %v15760_v4 = vld [vmem:[%s21717_s1 + $0x2718] ss:$100 sps:$4 sm:$0xff]  }
 0x974   :  { %13893 = vmatprep.subr.msk.bf16.mxu0 %vm9821_vm0, %v15722_v17  ;;  %11630 = vmatprep.subr.bf16.mxu1 %v15725_v18  ;;  %v15765_v17 = vld [vmem:[%s21717_s1 + $0x2c8c] ss:$100 sps:$4 sm:$0xff]   ;;  %v15768_v18 = vld [vmem:[%s21717_s1 + $0x2654] ss:$100 sps:$4 sm:$0xff]  }
 0x97b   :  { %13849 = vmatpush3.bf16.xpose.msra.mxu0 %v9922_v5  ;;  %11631 = vmatpush1.bf16.xpose.msra.mxu1 %v15723_v26  ;;  %v15766_v26 = vld [vmem:[%s21717_s1 + $0x2650] ss:$100 sps:$4 sm:$0xff]   ;;  %v15771_v5 = vld [vmem:[%s21717_s1 + $0x2bc4] ss:$100 sps:$4 sm:$0xff]  }
 0x97c   :  { %11632 = vmatprep.subr.bf16.mxu1 %v15729_v19  ;;  %11657 = vmatprep.subr.bf16.mxu0 %v15732_v22  ;;  %v15774_v19 = vld [vmem:[%s21717_s1 + $0x258c] ss:$100 sps:$4 sm:$0xff]   ;;  %v15769_v22 = vld [vmem:[%s21717_s1 + $0x2bc0] ss:$100 sps:$4 sm:$0xff]  }
 0x982   :  { %v11445_v13 = vpop.f32.mrf.mxu0  ;;  %v11486_v47 = vpop.f32.mrf.mxu1  ;;  %13851 = vmatmul.mubr.msk.bf16.vlgmr.msra.gmra.mxu0 %vm9821_vm0, %v20337_v35  ;;  %v15736_v35 = vld [vmem:[%s21717_s1 + $0x2a38] ss:$100 sps:$4 sm:$0xff]  }
 0x983   :  { %v11446_v33 = vadd.f32 %v11445_v13, %v20225_v3  ;;  %11633 = vmatpush2.bf16.xpose.msra.mxu1 %v15727_v23  ;;  %11658 = vmatpush1.bf16.xpose.msra.mxu0 %v15730_v7  ;;  %v15733_v3 = vld [vmem:[%s21717_s1 + $0x3070] ss:$100 sps:$4 sm:$0xff]   ;;  %v15772_v23 = vld [vmem:[%s21717_s1 + $0x2588] ss:$100 sps:$4 sm:$0xff]  }
 0x984   :  { %v11447_v27 = vpop.f32.mrf.mxu0  ;;  %v11488_v31 = vpop.f32.mrf.mxu1  ;;  %11634 = vmatprep.subr.bf16.mxu1 %v15735_v32  ;;  %11659 = vmatprep.subr.bf16.mxu0 %v15738_v40  ;;  %v15777_v7 = vld [vmem:[%s21717_s1 + $0x3144] ss:$100 sps:$4 sm:$0xff]   ;;  %v15780_v32 = vld [vmem:[%s21717_s1 + $0x2b0c] ss:$100 sps:$4 sm:$0xff]  }
 0x985   :  { %v20451_v28 = vadd.f32 %v11486_v47, %v11446_v33  ;;  %v11448_v48 = vadd.f32 %v11447_v27, %v20228_v50  ;;  %11689 = vmatprep.mubr.bf16.mxu0 %v16415_v29  ;;  %v15741_v50 = vld [vmem:[%s21717_s1 + $0x2fac] ss:$100 sps:$4 sm:$0xff]   ;;  %v15744_v29 = vld [vmem:[%s21717_s1 + $0x2974] ss:$100 sps:$4 sm:$0xff]   ;;  %v15775_v40 = vld [vmem:[%s21717_s1 + $0x3140] ss:$100 sps:$4 sm:$0xff]  }
 0x986   :  { %v11449_v58 = vpop.f32.mrf.mxu0  ;;  %v11490_v34 = vpop.f32.mrf.mxu1  ;;  %v15778_v13 = vld [vmem:[%s21717_s1 + $0x2b08] ss:$100 sps:$4 sm:$0xff]   ;;  %v15783_v47 = vld [vmem:[%s21717_s1 + $0x307c] ss:$100 sps:$4 sm:$0xff]  }
 0x987   :  { %v20455_v51 = vadd.f32 %v11488_v31, %v11448_v48  ;;  %v15786_v33 = vld [vmem:[%s21717_s1 + $0x2a44] ss:$100 sps:$4 sm:$0xff]   ;;  %v15781_v27 = vld [vmem:[%s21717_s1 + $0x3078] ss:$100 sps:$4 sm:$0xff]   ;;  %v15795_v34 = vld [vmem:[%s21717_s1 + $0x2eec] ss:$100 sps:$4 sm:$0xff]  }
 0x988   :  { %v11450_v43 = vpop.f32.mrf.mxu0  ;;  %v11491_v55 = vpop.f32.mrf.mxu1  ;;  %v15784_v31 = vld [vmem:[%s21717_s1 + $0x2a40] ss:$100 sps:$4 sm:$0xff]   ;;  %v15789_v48 = vld [vmem:[%s21717_s1 + $0x2fb4] ss:$100 sps:$4 sm:$0xff]  }
 0x989   :  { %v15790_v58 = vld [vmem:[%s21717_s1 + $0x2978] ss:$100 sps:$4 sm:$0xff]   ;;  %v15796_v43 = vld [vmem:[%s21717_s1 + $0x28b0] ss:$100 sps:$4 sm:$0xff]   ;;  %v15801_v55 = vld [vmem:[%s21717_s1 + $0x2e24] ss:$100 sps:$4 sm:$0xff]  }
 0x98b   :  { %11635 = vmatpush2.bf16.xpose.msra.mxu1 %v15733_v3  ;;  %11660 = vmatpush1.bf16.xpose.msra.mxu0 %v15736_v35  ;;  %v15798_v3 = vld [vmem:[%s21717_s1 + $0x28b4] ss:$100 sps:$4 sm:$0xff]   ;;  %v15793_v35 = vld [vmem:[%s21717_s1 + $0x2ee8] ss:$100 sps:$4 sm:$0xff]  }
 0x98c   :  { %11636 = vmatprep.subr.bf16.mxu1 %v15741_v50  ;;  %11661 = vmatprep.subr.bf16.mxu0 %v15744_v29  ;;  %v15804_v50 = vld [vmem:[%s21717_s1 + $0x27ec] ss:$100 sps:$4 sm:$0xff]   ;;  %v15799_v29 = vld [vmem:[%s21717_s1 + $0x2e20] ss:$100 sps:$4 sm:$0xff]  }
 0x993   :  { %11637 = vmatpush2.bf16.xpose.msra.mxu1 %v15739_v60  ;;  %11662 = vmatpush1.bf16.xpose.msra.mxu0 %v15742_v16  ;;  %v15802_v60 = vld [vmem:[%s21717_s1 + $0x27e8] ss:$100 sps:$4 sm:$0xff]   ;;  %v15807_v16 = vld [vmem:[%s21717_s1 + $0x2d5c] ss:$100 sps:$4 sm:$0xff]  }
 0x994   :  { %11638 = vmatprep.subr.bf16.mxu1 %v15747_v0  ;;  %11663 = vmatprep.subr.bf16.mxu0 %v15750_v42  ;;  %v15810_v0 = vld [vmem:[%s21717_s1 + $0x2724] ss:$100 sps:$4 sm:$0xff]   ;;  %v15805_v42 = vld [vmem:[%s21717_s1 + $0x2d58] ss:$100 sps:$4 sm:$0xff]  }
 0x99b   :  { %11639 = vmatpush2.bf16.xpose.msra.mxu1 %v15745_v56  ;;  %11664 = vmatpush1.bf16.xpose.msra.mxu0 %v15748_v52  ;;  %v15808_v56 = vld [vmem:[%s21717_s1 + $0x2720] ss:$100 sps:$4 sm:$0xff]   ;;  %v15813_v52 = vld [vmem:[%s21717_s1 + $0x2c94] ss:$100 sps:$4 sm:$0xff]  }
 0x99c   :  { %11640 = vmatprep.subr.bf16.mxu1 %v15753_v1  ;;  %11665 = vmatprep.subr.bf16.mxu0 %v15756_v54  ;;  %v15816_v1 = vld [vmem:[%s21717_s1 + $0x265c] ss:$100 sps:$4 sm:$0xff]   ;;  %v15811_v54 = vld [vmem:[%s21717_s1 + $0x2c90] ss:$100 sps:$4 sm:$0xff]  }
 0x9a3   :  { %11641 = vmatpush2.bf16.xpose.msra.mxu1 %v15751_v53  ;;  %11666 = vmatpush1.bf16.xpose.msra.mxu0 %v15754_v21  ;;  %v15814_v53 = vld [vmem:[%s21717_s1 + $0x2658] ss:$100 sps:$4 sm:$0xff]   ;;  %v15819_v21 = vld [vmem:[%s21717_s1 + $0x2bcc] ss:$100 sps:$4 sm:$0xff]  }
 0x9a4   :  { %11642 = vmatprep.subr.bf16.mxu1 %v15759_v12  ;;  %11667 = vmatprep.subr.bf16.mxu0 %v15762_v8  ;;  %v15822_v12 = vld [vmem:[%s21717_s1 + $0x2594] ss:$100 sps:$4 sm:$0xff]   ;;  %v15817_v8 = vld [vmem:[%s21717_s1 + $0x2bc8] ss:$100 sps:$4 sm:$0xff]  }
 0x9ab   :  { %11643 = vmatpush2.bf16.xpose.msra.mxu1 %v15757_v9  ;;  %11668 = vmatpush1.bf16.xpose.msra.mxu0 %v15760_v4  ;;  %v15820_v9 = vld [vmem:[%s21717_s1 + $0x2590] ss:$100 sps:$4 sm:$0xff]  }
 0x9ac   :  { %11644 = vmatprep.subr.bf16.mxu1 %v15765_v17  ;;  %11669 = vmatprep.subr.bf16.mxu0 %v15768_v18  ;;  %v15825_v4 = vld [vmem:[%s21717_s1 + $0x314c] ss:$100 sps:$4 sm:$0xff]   ;;  %v15828_v17 = vld [vmem:[%s21717_s1 + $0x2b14] ss:$100 sps:$4 sm:$0xff]  }
 0x9ad   :  { %v15823_v18 = vld [vmem:[%s21717_s1 + $0x3148] ss:$100 sps:$4 sm:$0xff]  }
 0x9b3   :  { %11645 = vmatpush2.bf16.xpose.msra.mxu1 %v15763_v61  ;;  %11670 = vmatpush1.bf16.xpose.msra.mxu0 %v15766_v26  ;;  %v15826_v61 = vld [vmem:[%s21717_s1 + $0x2b10] ss:$100 sps:$4 sm:$0xff]   ;;  %v15831_v26 = vld [vmem:[%s21717_s1 + $0x3084] ss:$100 sps:$4 sm:$0xff]  }
 0x9b4   :  { %11646 = vmatprep.subr.bf16.mxu1 %v15771_v5  ;;  %11671 = vmatprep.subr.bf16.mxu0 %v15774_v19  ;;  %v15834_v5 = vld [vmem:[%s21717_s1 + $0x2a4c] ss:$100 sps:$4 sm:$0xff]  }
 0x9bb   :  { %11647 = vmatpush2.bf16.xpose.msra.mxu1 %v15769_v22  ;;  %11672 = vmatpush1.bf16.xpose.msra.mxu0 %v15772_v23 }
 0x9bc   :  { %11673 = vmatprep.subr.bf16.mxu0 %v15777_v7  ;;  %11698 = vmatprep.subr.bf16.mxu1 %v15780_v32 }
 0x9c2   :  { %11649 = vmatmul.mubr.bf16.vlgmr.msra.gmra.mxu1 %v16557_v10  ;;  %v15792_v10 = vld [vmem:[%s21717_s1 + $0x297c] ss:$100 sps:$4 sm:$0xff]  }
 0x9c3   :  { %11674 = vmatpush2.bf16.xpose.msra.mxu0 %v15775_v40  ;;  %11699 = vmatpush1.bf16.xpose.msra.mxu1 %v15778_v13  ;;  %v15829_v13 = vld [vmem:[%s21717_s1 + $0x3080] ss:$100 sps:$4 sm:$0xff]  }
 0x9c4   :  { %11675 = vmatprep.subr.bf16.mxu0 %v15783_v47  ;;  %11700 = vmatprep.subr.bf16.mxu1 %v15786_v33 }
 0x9c5   :  { %11730 = vmatprep.mubr.bf16.mxu1 %v16571_v14  ;;  %v15787_v14 = vld [vmem:[%s21717_s1 + $0x2fb0] ss:$100 sps:$4 sm:$0xff]  }
 0x9cb   :  { %11676 = vmatpush2.bf16.xpose.msra.mxu0 %v15781_v27  ;;  %11701 = vmatpush1.bf16.xpose.msra.mxu1 %v15784_v31  ;;  %v15837_v27 = vld [vmem:[%s21717_s1 + $0x2fbc] ss:$100 sps:$4 sm:$0xff]  }
 0x9cc   :  { %11677 = vmatprep.subr.bf16.mxu0 %v15789_v48  ;;  %11702 = vmatprep.subr.bf16.mxu1 %v15792_v10  ;;  %v15835_v31 = vld [vmem:[%s21717_s1 + $0x2fb8] ss:$100 sps:$4 sm:$0xff]   ;;  %v15838_v48 = vld [vmem:[%s21717_s1 + $0x2980] ss:$100 sps:$4 sm:$0xff]  }
 0x9cd   :  { %v15843_v10 = vld [vmem:[%s21717_s1 + $0x2ef4] ss:$100 sps:$4 sm:$0xff]  }
 0x9d3   :  { %11678 = vmatpush2.bf16.xpose.msra.mxu0 %v15787_v14  ;;  %11703 = vmatpush1.bf16.xpose.msra.mxu1 %v15790_v58  ;;  %v15846_v14 = vld [vmem:[%s21717_s1 + $0x28bc] ss:$100 sps:$4 sm:$0xff]   ;;  %v15841_v58 = vld [vmem:[%s21717_s1 + $0x2ef0] ss:$100 sps:$4 sm:$0xff]  }
 0x9d4   :  { %11679 = vmatprep.subr.bf16.mxu0 %v15795_v34  ;;  %11704 = vmatprep.subr.bf16.mxu1 %v15798_v3  ;;  %v15844_v34 = vld [vmem:[%s21717_s1 + $0x28b8] ss:$100 sps:$4 sm:$0xff]   ;;  %v15849_v3 = vld [vmem:[%s21717_s1 + $0x2e2c] ss:$100 sps:$4 sm:$0xff]  }
 0x9db   :  { %11680 = vmatpush2.bf16.xpose.msra.mxu0 %v15793_v35  ;;  %11705 = vmatpush1.bf16.xpose.msra.mxu1 %v15796_v43  ;;  %v15852_v35 = vld [vmem:[%s21717_s1 + $0x27f4] ss:$100 sps:$4 sm:$0xff]   ;;  %v15847_v43 = vld [vmem:[%s21717_s1 + $0x2e28] ss:$100 sps:$4 sm:$0xff]  }
 0x9dc   :  { %11681 = vmatprep.subr.bf16.mxu0 %v15801_v55  ;;  %11706 = vmatprep.subr.bf16.mxu1 %v15804_v50  ;;  %v15850_v55 = vld [vmem:[%s21717_s1 + $0x27f0] ss:$100 sps:$4 sm:$0xff]   ;;  %v15855_v50 = vld [vmem:[%s21717_s1 + $0x2d64] ss:$100 sps:$4 sm:$0xff]  }
 0x9e3   :  { %11682 = vmatpush2.bf16.xpose.msra.mxu0 %v15799_v29  ;;  %11707 = vmatpush1.bf16.xpose.msra.mxu1 %v15802_v60  ;;  %v15858_v29 = vld [vmem:[%s21717_s1 + $0x272c] ss:$100 sps:$4 sm:$0xff]   ;;  %v15853_v60 = vld [vmem:[%s21717_s1 + $0x2d60] ss:$100 sps:$4 sm:$0xff]  }
 0x9e4   :  { %11683 = vmatprep.subr.bf16.mxu0 %v15807_v16  ;;  %11708 = vmatprep.subr.bf16.mxu1 %v15810_v0  ;;  %v15856_v16 = vld [vmem:[%s21717_s1 + $0x2728] ss:$100 sps:$4 sm:$0xff]   ;;  %v15861_v0 = vld [vmem:[%s21717_s1 + $0x2c9c] ss:$100 sps:$4 sm:$0xff]  }
 0x9eb   :  { %11684 = vmatpush2.bf16.xpose.msra.mxu0 %v15805_v42  ;;  %11709 = vmatpush1.bf16.xpose.msra.mxu1 %v15808_v56  ;;  %v15864_v42 = vld [vmem:[%s21717_s1 + $0x2664] ss:$100 sps:$4 sm:$0xff]   ;;  %v15859_v56 = vld [vmem:[%s21717_s1 + $0x2c98] ss:$100 sps:$4 sm:$0xff]  }
 0x9ec   :  { %11685 = vmatprep.subr.bf16.mxu0 %v15813_v52  ;;  %11710 = vmatprep.subr.bf16.mxu1 %v15816_v1  ;;  %v15862_v52 = vld [vmem:[%s21717_s1 + $0x2660] ss:$100 sps:$4 sm:$0xff]   ;;  %v15867_v1 = vld [vmem:[%s21717_s1 + $0x2bd4] ss:$100 sps:$4 sm:$0xff]  }
 0x9f3   :  { %11686 = vmatpush2.bf16.xpose.msra.mxu0 %v15811_v54  ;;  %11711 = vmatpush1.bf16.xpose.msra.mxu1 %v15814_v53  ;;  %v15870_v54 = vld [vmem:[%s21717_s1 + $0x259c] ss:$100 sps:$4 sm:$0xff]   ;;  %v15865_v53 = vld [vmem:[%s21717_s1 + $0x2bd0] ss:$100 sps:$4 sm:$0xff]  }
 0x9f4   :  { %11687 = vmatprep.subr.bf16.mxu0 %v15819_v21  ;;  %11712 = vmatprep.subr.bf16.mxu1 %v15822_v12  ;;  %v15868_v21 = vld [vmem:[%s21717_s1 + $0x2598] ss:$100 sps:$4 sm:$0xff]  }
 0x9f5   :  { %v15873_v12 = vld [vmem:[%s21717_s1 + $0x3154] ss:$100 sps:$4 sm:$0xff]  }
 0x9fb   :  { %11688 = vmatpush2.bf16.xpose.msra.mxu0 %v15817_v8  ;;  %11713 = vmatpush1.bf16.xpose.msra.mxu1 %v15820_v9  ;;  %v15876_v8 = vld [vmem:[%s21717_s1 + $0x2b1c] ss:$100 sps:$4 sm:$0xff]  }
 0x9fc   :  { %11714 = vmatprep.subr.bf16.mxu1 %v15825_v4  ;;  %11739 = vmatprep.subr.bf16.mxu0 %v15828_v17  ;;  %v15871_v17 = vld [vmem:[%s21717_s1 + $0x3150] ss:$100 sps:$4 sm:$0xff]  }
 0xa02   :  { %v20651_v19 = vpop.f32.mrf.mxu0  ;;  %v20653_v22 = vpop.f32.mrf.mxu1  ;;  %11690 = vmatmul.mubr.bf16.vlgmr.msra.gmra.mxu0 %v16561_v11  ;;  %v15832_v11 = vld [vmem:[%s21717_s1 + $0x2a48] ss:$100 sps:$4 sm:$0xff]  }
 0xa03   :  { %11715 = vmatpush2.bf16.xpose.msra.mxu1 %v15823_v18  ;;  %11740 = vmatpush1.bf16.xpose.msra.mxu0 %v15826_v61  ;;  %v11528_v9 = vadd.f32 %v20651_v19, %v20451_v28  ;;  %v15874_v18 = vld [vmem:[%s21717_s1 + $0x2b18] ss:$100 sps:$4 sm:$0xff]   ;;  %v15879_v61 = vld [vmem:[%s21717_s1 + $0x308c] ss:$100 sps:$4 sm:$0xff]  }
 0xa04   :  { %v20656_v23 = vpop.f32.mrf.mxu0  ;;  %v20658_v7 = vpop.f32.mrf.mxu1  ;;  %11716 = vmatprep.subr.bf16.mxu1 %v15831_v26  ;;  %11741 = vmatprep.subr.bf16.mxu0 %v15834_v5  ;;  %v15882_v26 = vld [vmem:[%s21717_s1 + $0x2a54] ss:$100 sps:$4 sm:$0xff]  }
 0xa05   :  { %11771 = vmatprep.mubr.bf16.mxu0 %v16575_v15  ;;  %v15840_v15 = vld [vmem:[%s21717_s1 + $0x2984] ss:$100 sps:$4 sm:$0xff]   ;;  %v11530_v4 = vadd.f32 %v20656_v23, %v20455_v51  ;;  %v11569_v28 = vadd.f32 %v20653_v22, %v11528_v9  ;;  %v15930_v9 = vld [vmem:[%s21717_s1 + $0x2a5c] ss:$100 sps:$4 sm:$0xff]  }
 0xa06   :  { %v11531_v32 = vpop.f32.mrf.mxu0  ;;  %v11572_v40 = vpop.f32.mrf.mxu1 }
 0xa07   :  { %v11571_v51 = vadd.f32 %v20658_v7, %v11530_v4  ;;  %v15880_v7 = vld [vmem:[%s21717_s1 + $0x2a50] ss:$100 sps:$4 sm:$0xff]  }
 0xa08   :  { %v11532_v47 = vpop.f32.mrf.mxu0  ;;  %v11573_v33 = vpop.f32.mrf.mxu1 }
 0xa09   :  { %v15885_v47 = vld [vmem:[%s21717_s1 + $0x2fc4] ss:$100 sps:$4 sm:$0xff]  }
 0xa0a   :  { %v15883_v33 = vld [vmem:[%s21717_s1 + $0x2fc0] ss:$100 sps:$4 sm:$0xff]  }
 0xa0b   :  { %11717 = vmatpush2.bf16.xpose.msra.mxu1 %v15829_v13  ;;  %11742 = vmatpush1.bf16.xpose.msra.mxu0 %v15832_v11 }
 0xa0c   :  { %11718 = vmatprep.subr.bf16.mxu1 %v15837_v27  ;;  %11743 = vmatprep.subr.bf16.mxu0 %v15840_v15  ;;  %v15886_v27 = vld [vmem:[%s21717_s1 + $0x2988] ss:$100 sps:$4 sm:$0xff]   ;;  %v15891_v15 = vld [vmem:[%s21717_s1 + $0x2efc] ss:$100 sps:$4 sm:$0xff]  }
 0xa13   :  { %11719 = vmatpush2.bf16.xpose.msra.mxu1 %v15835_v31  ;;  %11744 = vmatpush1.bf16.xpose.msra.mxu0 %v15838_v48  ;;  %v15894_v31 = vld [vmem:[%s21717_s1 + $0x28c4] ss:$100 sps:$4 sm:$0xff]   ;;  %v15889_v48 = vld [vmem:[%s21717_s1 + $0x2ef8] ss:$100 sps:$4 sm:$0xff]  }
 0xa14   :  { %11720 = vmatprep.subr.bf16.mxu1 %v15843_v10  ;;  %11745 = vmatprep.subr.bf16.mxu0 %v15846_v14  ;;  %v15892_v10 = vld [vmem:[%s21717_s1 + $0x28c0] ss:$100 sps:$4 sm:$0xff]   ;;  %v15897_v14 = vld [vmem:[%s21717_s1 + $0x2e34] ss:$100 sps:$4 sm:$0xff]  }
 0xa1b   :  { %11721 = vmatpush2.bf16.xpose.msra.mxu1 %v15841_v58  ;;  %11746 = vmatpush1.bf16.xpose.msra.mxu0 %v15844_v34  ;;  %v15900_v58 = vld [vmem:[%s21717_s1 + $0x27fc] ss:$100 sps:$4 sm:$0xff]   ;;  %v15895_v34 = vld [vmem:[%s21717_s1 + $0x2e30] ss:$100 sps:$4 sm:$0xff]  }
 0xa1c   :  { %11722 = vmatprep.subr.bf16.mxu1 %v15849_v3  ;;  %11747 = vmatprep.subr.bf16.mxu0 %v15852_v35  ;;  %v15898_v3 = vld [vmem:[%s21717_s1 + $0x27f8] ss:$100 sps:$4 sm:$0xff]   ;;  %v15903_v35 = vld [vmem:[%s21717_s1 + $0x2d6c] ss:$100 sps:$4 sm:$0xff]  }
 0xa23   :  { %11723 = vmatpush2.bf16.xpose.msra.mxu1 %v15847_v43  ;;  %11748 = vmatpush1.bf16.xpose.msra.mxu0 %v15850_v55  ;;  %v15906_v43 = vld [vmem:[%s21717_s1 + $0x2734] ss:$100 sps:$4 sm:$0xff]   ;;  %v15901_v55 = vld [vmem:[%s21717_s1 + $0x2d68] ss:$100 sps:$4 sm:$0xff]  }
 0xa24   :  { %11724 = vmatprep.subr.bf16.mxu1 %v15855_v50  ;;  %11749 = vmatprep.subr.bf16.mxu0 %v15858_v29  ;;  %v15904_v50 = vld [vmem:[%s21717_s1 + $0x2730] ss:$100 sps:$4 sm:$0xff]   ;;  %v15909_v29 = vld [vmem:[%s21717_s1 + $0x2ca4] ss:$100 sps:$4 sm:$0xff]  }
 0xa2b   :  { %11725 = vmatpush2.bf16.xpose.msra.mxu1 %v15853_v60  ;;  %11750 = vmatpush1.bf16.xpose.msra.mxu0 %v15856_v16  ;;  %v15912_v60 = vld [vmem:[%s21717_s1 + $0x266c] ss:$100 sps:$4 sm:$0xff]   ;;  %v15907_v16 = vld [vmem:[%s21717_s1 + $0x2ca0] ss:$100 sps:$4 sm:$0xff]  }
 0xa2c   :  { %11726 = vmatprep.subr.bf16.mxu1 %v15861_v0  ;;  %11751 = vmatprep.subr.bf16.mxu0 %v15864_v42  ;;  %v15910_v0 = vld [vmem:[%s21717_s1 + $0x2668] ss:$100 sps:$4 sm:$0xff]   ;;  %v15915_v42 = vld [vmem:[%s21717_s1 + $0x2bdc] ss:$100 sps:$4 sm:$0xff]  }
 0xa33   :  { %11727 = vmatpush2.bf16.xpose.msra.mxu1 %v15859_v56  ;;  %11752 = vmatpush1.bf16.xpose.msra.mxu0 %v15862_v52  ;;  %v15918_v56 = vld [vmem:[%s21717_s1 + $0x25a4] ss:$100 sps:$4 sm:$0xff]   ;;  %v15913_v52 = vld [vmem:[%s21717_s1 + $0x2bd8] ss:$100 sps:$4 sm:$0xff]  }
 0xa34   :  { %11728 = vmatprep.subr.bf16.mxu1 %v15867_v1  ;;  %11753 = vmatprep.subr.bf16.mxu0 %v15870_v54  ;;  %v15916_v1 = vld [vmem:[%s21717_s1 + $0x25a0] ss:$100 sps:$4 sm:$0xff]  }
 0xa35   :  { %v15921_v54 = vld [vmem:[%s21717_s1 + $0x315c] ss:$100 sps:$4 sm:$0xff]  }
 0xa3b   :  { %11729 = vmatpush2.bf16.xpose.msra.mxu1 %v15865_v53  ;;  %11754 = vmatpush1.bf16.xpose.msra.mxu0 %v15868_v21  ;;  %v15924_v53 = vld [vmem:[%s21717_s1 + $0x2b24] ss:$100 sps:$4 sm:$0xff]   ;;  %v15919_v21 = vld [vmem:[%s21717_s1 + $0x3158] ss:$100 sps:$4 sm:$0xff]  }
 0xa3c   :  { %11755 = vmatprep.subr.bf16.mxu0 %v15873_v12  ;;  %11780 = vmatprep.subr.bf16.mxu1 %v15876_v8  ;;  %v15922_v12 = vld [vmem:[%s21717_s1 + $0x2b20] ss:$100 sps:$4 sm:$0xff]   ;;  %v15927_v8 = vld [vmem:[%s21717_s1 + $0x3094] ss:$100 sps:$4 sm:$0xff]  }
 0xa42   :  { %v11609_v5 = vpop.f32.mrf.mxu0  ;;  %11731 = vmatmul.mubr.bf16.vlgmr.msra.gmra.mxu1 %v16779_v24  ;;  %v15877_v24 = vld [vmem:[%s21717_s1 + $0x3088] ss:$100 sps:$4 sm:$0xff]  }
 0xa43   :  { %v11610_v19 = vadd.f32 %v11609_v5, %v11569_v28  ;;  %11756 = vmatpush2.bf16.xpose.msra.mxu0 %v15871_v17  ;;  %11781 = vmatpush1.bf16.xpose.msra.mxu1 %v15874_v18  ;;  %v15936_v5 = vld [vmem:[%s21717_s1 + $0x2994] ss:$100 sps:$4 sm:$0xff]  }
 0xa44   :  { %v11611_v23 = vpop.f32.mrf.mxu0  ;;  %11757 = vmatprep.subr.bf16.mxu0 %v15879_v61  ;;  %11782 = vmatprep.subr.bf16.mxu1 %v15882_v26  ;;  %v15925_v61 = vld [vmem:[%s21717_s1 + $0x3090] ss:$100 sps:$4 sm:$0xff]   ;;  %v15928_v26 = vld [vmem:[%s21717_s1 + $0x2a58] ss:$100 sps:$4 sm:$0xff]  }
 0xa45   :  { %v12153_v32 = vmax.f32 %v11610_v19, 0.0  ;;  %v11612_v40 = vadd.f32 %v11611_v23, %v11571_v51  ;;  %11812 = vmatprep.mubr.bf16.mxu1 %v16793_v30  ;;  %v15888_v30 = vld [vmem:[%s21717_s1 + $0x298c] ss:$100 sps:$4 sm:$0xff]   ;;  %v15939_v19 = vld [vmem:[%s21717_s1 + $0x2f04] ss:$100 sps:$4 sm:$0xff]  }
 0xa46   :  { %v11613_v13 = vpop.f32.mrf.mxu0  ;;  %v15934_v51 = vld [vmem:[%s21717_s1 + $0x2990] ss:$100 sps:$4 sm:$0xff]  }
 0xa47   :  { %12161 = vst [vmem:[%s21720_s3 + $0x20] sm:$0xff] %v12153_v32  ;;  %v12154_v22 = vmax.f32 %v11612_v40, 0.0  ;;  %v15942_v23 = vld [vmem:[%s21717_s1 + $0x28cc] ss:$100 sps:$4 sm:$0xff]   ;;  %v15937_v32 = vld [vmem:[%s21717_s1 + $0x2f00] ss:$100 sps:$4 sm:$0xff]  }
 0xa48   :  { %v11614_v11 = vpop.f32.mrf.mxu0  ;;  %v15940_v40 = vld [vmem:[%s21717_s1 + $0x28c8] ss:$100 sps:$4 sm:$0xff]   ;;  %v15945_v13 = vld [vmem:[%s21717_s1 + $0x2e3c] ss:$100 sps:$4 sm:$0xff]  }
 0xa49   :  { %12162 = vst [vmem:[%s21720_s3 + $0x28] sm:$0xff] %v12154_v22  ;;  %v15948_v22 = vld [vmem:[%s21717_s1 + $0x2804] ss:$100 sps:$4 sm:$0xff]   ;;  %v15951_v11 = vld [vmem:[%s21717_s1 + $0x2d74] ss:$100 sps:$4 sm:$0xff]  }
 0xa4b   :  { %11758 = vmatpush2.bf16.xpose.msra.mxu0 %v15877_v24  ;;  %11783 = vmatpush1.bf16.xpose.msra.mxu1 %v15880_v7  ;;  %v15943_v24 = vld [vmem:[%s21717_s1 + $0x2e38] ss:$100 sps:$4 sm:$0xff]   ;;  %v15946_v7 = vld [vmem:[%s21717_s1 + $0x2800] ss:$100 sps:$4 sm:$0xff]  }
 0xa4c   :  { %11759 = vmatprep.subr.bf16.mxu0 %v15885_v47  ;;  %11784 = vmatprep.subr.bf16.mxu1 %v15888_v30  ;;  %v15954_v47 = vld [vmem:[%s21717_s1 + $0x273c] ss:$100 sps:$4 sm:$0xff]   ;;  %v15949_v30 = vld [vmem:[%s21717_s1 + $0x2d70] ss:$100 sps:$4 sm:$0xff]  }
 0xa53   :  { %11760 = vmatpush2.bf16.xpose.msra.mxu0 %v15883_v33  ;;  %11785 = vmatpush1.bf16.xpose.msra.mxu1 %v15886_v27  ;;  %v15952_v33 = vld [vmem:[%s21717_s1 + $0x2738] ss:$100 sps:$4 sm:$0xff]   ;;  %v15957_v27 = vld [vmem:[%s21717_s1 + $0x2cac] ss:$100 sps:$4 sm:$0xff]  }
 0xa54   :  { %11761 = vmatprep.subr.bf16.mxu0 %v15891_v15  ;;  %11786 = vmatprep.subr.bf16.mxu1 %v15894_v31  ;;  %v15960_v15 = vld [vmem:[%s21717_s1 + $0x2674] ss:$100 sps:$4 sm:$0xff]   ;;  %v15955_v31 = vld [vmem:[%s21717_s1 + $0x2ca8] ss:$100 sps:$4 sm:$0xff]  }
 0xa5b   :  { %11762 = vmatpush2.bf16.xpose.msra.mxu0 %v15889_v48  ;;  %11787 = vmatpush1.bf16.xpose.msra.mxu1 %v15892_v10  ;;  %v15958_v48 = vld [vmem:[%s21717_s1 + $0x2670] ss:$100 sps:$4 sm:$0xff]   ;;  %v15963_v10 = vld [vmem:[%s21717_s1 + $0x2be4] ss:$100 sps:$4 sm:$0xff]  }
 0xa5c   :  { %11763 = vmatprep.subr.bf16.mxu0 %v15897_v14  ;;  %11788 = vmatprep.subr.bf16.mxu1 %v15900_v58  ;;  %v15966_v14 = vld [vmem:[%s21717_s1 + $0x25ac] ss:$100 sps:$4 sm:$0xff]   ;;  %v15961_v58 = vld [vmem:[%s21717_s1 + $0x2be0] ss:$100 sps:$4 sm:$0xff]  }
 0xa63   :  { %11764 = vmatpush2.bf16.xpose.msra.mxu0 %v15895_v34  ;;  %11789 = vmatpush1.bf16.xpose.msra.mxu1 %v15898_v3  ;;  %v15964_v34 = vld [vmem:[%s21717_s1 + $0x25a8] ss:$100 sps:$4 sm:$0xff]  }
 0xa64   :  { %11765 = vmatprep.subr.bf16.mxu0 %v15903_v35  ;;  %11790 = vmatprep.subr.bf16.mxu1 %v15906_v43  ;;  %v15969_v3 = vld [vmem:[%s21717_s1 + $0x3164] ss:$100 sps:$4 sm:$0xff]   ;;  %v15972_v35 = vld [vmem:[%s21717_s1 + $0x2b2c] ss:$100 sps:$4 sm:$0xff]   ;;  %v1720_v43 = vsub.s32 6, %v16887_v59 }
 0xa6b   :  { %11766 = vmatpush2.bf16.xpose.msra.mxu0 %v15901_v55  ;;  %11791 = vmatpush1.bf16.xpose.msra.mxu1 %v15904_v50  ;;  %v1724_v55 = vsub.s32 7, %v16887_v59  ;;  %v16299_v50 = vld [vmem:[%s21719_s2] sm:$0xff] }
 0xa6c   :  { %11767 = vmatprep.subr.bf16.mxu0 %v15909_v29  ;;  %11792 = vmatprep.subr.bf16.mxu1 %v15912_v60  ;;  %v1721_v29 = vrot.slane %v16299_v50, %v1720_v43  ;;  %v15975_v59 = vld [vmem:[%s21717_s1 + $0x309c] ss:$100 sps:$4 sm:$0xff]  }
 0xa6d   :  { %v1725_v60 = vrot.slane %v16299_v50, %v1724_v55  ;;  %v16021_v50 = vld [vmem:[%s21717_s1 + $0x30a0] ss:$100 sps:$4 sm:$0xff]  }
 0xa73   :  { %11768 = vmatpush2.bf16.xpose.msra.mxu0 %v15907_v16  ;;  %11793 = vmatpush1.bf16.xpose.msra.mxu1 %v15910_v0  ;;  %v15967_v16 = vld [vmem:[%s21717_s1 + $0x3160] ss:$100 sps:$4 sm:$0xff]   ;;  %v15970_v0 = vld [vmem:[%s21717_s1 + $0x2b28] ss:$100 sps:$4 sm:$0xff]  }
 0xa74   :  { %11769 = vmatprep.subr.bf16.mxu0 %v15915_v42  ;;  %11794 = vmatprep.subr.bf16.mxu1 %v15918_v56  ;;  %v15978_v42 = vld [vmem:[%s21717_s1 + $0x2a64] ss:$100 sps:$4 sm:$0xff]  }
 0xa7b   :  { %11770 = vmatpush2.bf16.xpose.msra.mxu0 %v15913_v52  ;;  %11795 = vmatpush1.bf16.xpose.msra.mxu1 %v15916_v1 }
 0xa7c   :  { %11796 = vmatprep.subr.bf16.mxu1 %v15921_v54  ;;  %11821 = vmatprep.subr.bf16.mxu0 %v15924_v53 }
 0xa82   :  { %v20867_v4 = vpop.f32.mrf.mxu1  ;;  %11772 = vmatmul.mubr.bf16.vlgmr.msra.gmra.mxu0 %v16783_v25  ;;  %v15933_v25 = vld [vmem:[%s21717_s1 + $0x2fcc] ss:$100 sps:$4 sm:$0xff]  }
 0xa83   :  { %11797 = vmatpush2.bf16.xpose.msra.mxu1 %v15919_v21  ;;  %11822 = vmatpush1.bf16.xpose.msra.mxu0 %v15922_v12  ;;  %v11651_v56 = vadd.f32 %v20867_v4, %v1721_v29  ;;  %v15981_v4 = vld [vmem:[%s21717_s1 + $0x2fd4] ss:$100 sps:$4 sm:$0xff]  }
 0xa84   :  { %v20870_v17 = vpop.f32.mrf.mxu1  ;;  %11798 = vmatprep.subr.bf16.mxu1 %v15927_v8  ;;  %11823 = vmatprep.subr.bf16.mxu0 %v15930_v9  ;;  %v15973_v8 = vld [vmem:[%s21717_s1 + $0x3098] ss:$100 sps:$4 sm:$0xff]  }
 0xa85   :  { %11853 = vmatprep.mubr.bf16.mxu0 %v16797_v6  ;;  %v15931_v6 = vld [vmem:[%s21717_s1 + $0x2fc8] ss:$100 sps:$4 sm:$0xff]   ;;  %v11653_v1 = vadd.f32 %v20870_v17, %v1725_v60  ;;  %v15984_v17 = vld [vmem:[%s21717_s1 + $0x299c] ss:$100 sps:$4 sm:$0xff]  }
 0xa86   :  { %v11654_v18 = vpop.f32.mrf.mxu1  ;;  %v16029_v60 = vld [vmem:[%s21717_s1 + $0x2fdc] ss:$100 sps:$4 sm:$0xff]  }
 0xa87   :  { %v15982_v18 = vld [vmem:[%s21717_s1 + $0x2998] ss:$100 sps:$4 sm:$0xff]  }
 0xa88   :  { %v11655_v28 = vpop.f32.mrf.mxu1 }
 0xa89   :  { %v15985_v28 = vld [vmem:[%s21717_s1 + $0x2f08] ss:$100 sps:$4 sm:$0xff]  }
 0xa8b   :  { %11799 = vmatpush2.bf16.xpose.msra.mxu1 %v15925_v61  ;;  %11824 = vmatpush1.bf16.xpose.msra.mxu0 %v15928_v26  ;;  %v15987_v61 = vld [vmem:[%s21717_s1 + $0x2f0c] ss:$100 sps:$4 sm:$0xff]   ;;  %v15990_v26 = vld [vmem:[%s21717_s1 + $0x28d4] ss:$100 sps:$4 sm:$0xff]  }
 0xa8c   :  { %11800 = vmatprep.subr.bf16.mxu1 %v15933_v25  ;;  %11825 = vmatprep.subr.bf16.mxu0 %v15936_v5  ;;  %v15988_v25 = vld [vmem:[%s21717_s1 + $0x28d0] ss:$100 sps:$4 sm:$0xff]   ;;  %v15993_v5 = vld [vmem:[%s21717_s1 + $0x2e44] ss:$100 sps:$4 sm:$0xff]  }
 0xa93   :  { %11801 = vmatpush2.bf16.xpose.msra.mxu1 %v15931_v6  ;;  %11826 = vmatpush1.bf16.xpose.msra.mxu0 %v15934_v51  ;;  %v15996_v6 = vld [vmem:[%s21717_s1 + $0x280c] ss:$100 sps:$4 sm:$0xff]   ;;  %v15991_v51 = vld [vmem:[%s21717_s1 + $0x2e40] ss:$100 sps:$4 sm:$0xff]  }
 0xa94   :  { %11802 = vmatprep.subr.bf16.mxu1 %v15939_v19  ;;  %11827 = vmatprep.subr.bf16.mxu0 %v15942_v23  ;;  %v15994_v19 = vld [vmem:[%s21717_s1 + $0x2808] ss:$100 sps:$4 sm:$0xff]   ;;  %v15999_v23 = vld [vmem:[%s21717_s1 + $0x2d7c] ss:$100 sps:$4 sm:$0xff]  }
 0xa9b   :  { %11803 = vmatpush2.bf16.xpose.msra.mxu1 %v15937_v32  ;;  %11828 = vmatpush1.bf16.xpose.msra.mxu0 %v15940_v40  ;;  %v16002_v32 = vld [vmem:[%s21717_s1 + $0x2744] ss:$100 sps:$4 sm:$0xff]   ;;  %v15997_v40 = vld [vmem:[%s21717_s1 + $0x2d78] ss:$100 sps:$4 sm:$0xff]  }
 0xa9c   :  { %11804 = vmatprep.subr.bf16.mxu1 %v15945_v13  ;;  %11829 = vmatprep.subr.bf16.mxu0 %v15948_v22  ;;  %v16000_v13 = vld [vmem:[%s21717_s1 + $0x2740] ss:$100 sps:$4 sm:$0xff]   ;;  %v16005_v22 = vld [vmem:[%s21717_s1 + $0x2cb4] ss:$100 sps:$4 sm:$0xff]  }
 0xaa3   :  { %11805 = vmatpush2.bf16.xpose.msra.mxu1 %v15943_v24  ;;  %11830 = vmatpush1.bf16.xpose.msra.mxu0 %v15946_v7  ;;  %v16008_v24 = vld [vmem:[%s21717_s1 + $0x267c] ss:$100 sps:$4 sm:$0xff]   ;;  %v16003_v7 = vld [vmem:[%s21717_s1 + $0x2cb0] ss:$100 sps:$4 sm:$0xff]  }
 0xaa4   :  { %11806 = vmatprep.subr.bf16.mxu1 %v15951_v11  ;;  %11831 = vmatprep.subr.bf16.mxu0 %v15954_v47  ;;  %v16006_v11 = vld [vmem:[%s21717_s1 + $0x2678] ss:$100 sps:$4 sm:$0xff]   ;;  %v16011_v47 = vld [vmem:[%s21717_s1 + $0x2bec] ss:$100 sps:$4 sm:$0xff]  }
 0xaab   :  { %11807 = vmatpush2.bf16.xpose.msra.mxu1 %v15949_v30  ;;  %11832 = vmatpush1.bf16.xpose.msra.mxu0 %v15952_v33  ;;  %v16014_v30 = vld [vmem:[%s21717_s1 + $0x25b4] ss:$100 sps:$4 sm:$0xff]   ;;  %v16009_v33 = vld [vmem:[%s21717_s1 + $0x2be8] ss:$100 sps:$4 sm:$0xff]  }
 0xaac   :  { %11808 = vmatprep.subr.bf16.mxu1 %v15957_v27  ;;  %11833 = vmatprep.subr.bf16.mxu0 %v15960_v15  ;;  %v16012_v27 = vld [vmem:[%s21717_s1 + $0x25b0] ss:$100 sps:$4 sm:$0xff]  }
 0xaad   :  { %v16017_v15 = vld [vmem:[%s21717_s1 + $0x316c] ss:$100 sps:$4 sm:$0xff]  }
 0xab3   :  { %11809 = vmatpush2.bf16.xpose.msra.mxu1 %v15955_v31  ;;  %11834 = vmatpush1.bf16.xpose.msra.mxu0 %v15958_v48  ;;  %v16020_v31 = vld [vmem:[%s21717_s1 + $0x2b34] ss:$100 sps:$4 sm:$0xff]   ;;  %v16015_v48 = vld [vmem:[%s21717_s1 + $0x3168] ss:$100 sps:$4 sm:$0xff]  }
 0xab4   :  { %11810 = vmatprep.subr.bf16.mxu1 %v15963_v10  ;;  %11835 = vmatprep.subr.bf16.mxu0 %v15966_v14  ;;  %v16018_v10 = vld [vmem:[%s21717_s1 + $0x2b30] ss:$100 sps:$4 sm:$0xff]   ;;  %v16023_v14 = vld [vmem:[%s21717_s1 + $0x30a4] ss:$100 sps:$4 sm:$0xff]  }
 0xabb   :  { %11811 = vmatpush2.bf16.xpose.msra.mxu1 %v15961_v58  ;;  %11836 = vmatpush1.bf16.xpose.msra.mxu0 %v15964_v34  ;;  %v16026_v58 = vld [vmem:[%s21717_s1 + $0x2a6c] ss:$100 sps:$4 sm:$0xff]  }
 0xabc   :  { %11837 = vmatprep.subr.bf16.mxu0 %v15969_v3  ;;  %11862 = vmatprep.subr.bf16.mxu1 %v15972_v35 }
 0xac2   :  { %v11691_v52 = vpop.f32.mrf.mxu0  ;;  %11813 = vmatmul.mubr.bf16.vlgmr.msra.gmra.mxu1 %v17012_v62  ;;  %v15976_v62 = vld [vmem:[%s21717_s1 + $0x2a60] ss:$100 sps:$4 sm:$0xff]  }
 0xac3   :  { %v20977_v54 = vadd.f32 %v11691_v52, %v11651_v56  ;;  %11838 = vmatpush2.bf16.xpose.msra.mxu0 %v15967_v16  ;;  %11863 = vmatpush1.bf16.xpose.msra.mxu1 %v15970_v0  ;;  %v16032_v16 = vld [vmem:[%s21717_s1 + $0x29a4] ss:$100 sps:$4 sm:$0xff]   ;;  %v16033_v56 = vld [vmem:[%s21717_s1 + $0x2f10] ss:$100 sps:$4 sm:$0xff]   ;;  %v16036_v52 = vld [vmem:[%s21717_s1 + $0x28d8] ss:$100 sps:$4 sm:$0xff]  }
 0xac4   :  { %v11693_v53 = vpop.f32.mrf.mxu0  ;;  %11839 = vmatprep.subr.bf16.mxu0 %v15975_v59  ;;  %11864 = vmatprep.subr.bf16.mxu1 %v15978_v42  ;;  %v16030_v0 = vld [vmem:[%s21717_s1 + $0x29a0] ss:$100 sps:$4 sm:$0xff]   ;;  %v16035_v59 = vld [vmem:[%s21717_s1 + $0x2f14] ss:$100 sps:$4 sm:$0xff]  }
 0xac5   :  { %v20979_v21 = vadd.f32 %v11693_v53, %v11653_v1  ;;  %11894 = vmatprep.mubr.bf16.mxu1 %v17026_v2  ;;  %v15979_v2 = vld [vmem:[%s21717_s1 + $0x2fd0] ss:$100 sps:$4 sm:$0xff]   ;;  %v16038_v42 = vld [vmem:[%s21717_s1 + $0x28dc] ss:$100 sps:$4 sm:$0xff]   ;;  %v16039_v53 = vld [vmem:[%s21717_s1 + $0x2e48] ss:$100 sps:$4 sm:$0xff]  }
 0xac6   :  { %v11695_v12 = vpop.f32.mrf.mxu0  ;;  %v16041_v1 = vld [vmem:[%s21717_s1 + $0x2e4c] ss:$100 sps:$4 sm:$0xff]  }
 0xac7   :  { %v16047_v12 = vld [vmem:[%s21717_s1 + $0x2d84] ss:$100 sps:$4 sm:$0xff]  }
 0xac8   :  { %v11696_v9 = vpop.f32.mrf.mxu0 }
 0xac9   :  { %v16048_v9 = vld [vmem:[%s21717_s1 + $0x2748] ss:$100 sps:$4 sm:$0xff]  }
 0xacb   :  { %11840 = vmatpush2.bf16.xpose.msra.mxu0 %v15973_v8  ;;  %11865 = vmatpush1.bf16.xpose.msra.mxu1 %v15976_v62  ;;  %v16050_v8 = vld [vmem:[%s21717_s1 + $0x274c] ss:$100 sps:$4 sm:$0xff]   ;;  %v16045_v62 = vld [vmem:[%s21717_s1 + $0x2d80] ss:$100 sps:$4 sm:$0xff]  }
 0xacc   :  { %11841 = vmatprep.subr.bf16.mxu0 %v15981_v4  ;;  %11866 = vmatprep.subr.bf16.mxu1 %v15984_v17  ;;  %v16053_v4 = vld [vmem:[%s21717_s1 + $0x2cbc] ss:$100 sps:$4 sm:$0xff]   ;;  %v16056_v17 = vld [vmem:[%s21717_s1 + $0x2684] ss:$100 sps:$4 sm:$0xff]  }
 0xad3   :  { %11842 = vmatpush2.bf16.xpose.msra.mxu0 %v15979_v2  ;;  %11867 = vmatpush1.bf16.xpose.msra.mxu1 %v15982_v18  ;;  %v16051_v2 = vld [vmem:[%s21717_s1 + $0x2cb8] ss:$100 sps:$4 sm:$0xff]   ;;  %v16054_v18 = vld [vmem:[%s21717_s1 + $0x2680] ss:$100 sps:$4 sm:$0xff]  }
 0xad4   :  { %11843 = vmatprep.subr.bf16.mxu0 %v15987_v61  ;;  %11868 = vmatprep.subr.bf16.mxu1 %v15990_v26  ;;  %v16059_v61 = vld [vmem:[%s21717_s1 + $0x2bf4] ss:$100 sps:$4 sm:$0xff]   ;;  %v16062_v26 = vld [vmem:[%s21717_s1 + $0x25bc] ss:$100 sps:$4 sm:$0xff]  }
 0xadb   :  { %11844 = vmatpush2.bf16.xpose.msra.mxu0 %v15985_v28  ;;  %11869 = vmatpush1.bf16.xpose.msra.mxu1 %v15988_v25  ;;  %v16057_v28 = vld [vmem:[%s21717_s1 + $0x2bf0] ss:$100 sps:$4 sm:$0xff]   ;;  %v16060_v25 = vld [vmem:[%s21717_s1 + $0x25b8] ss:$100 sps:$4 sm:$0xff]  }
 0xadc   :  { %11845 = vmatprep.subr.bf16.mxu0 %v15993_v5  ;;  %11870 = vmatprep.subr.bf16.mxu1 %v15996_v6  ;;  %v16065_v5 = vld [vmem:[%s21717_s1 + $0x3174] ss:$100 sps:$4 sm:$0xff]   ;;  %v16068_v6 = vld [vmem:[%s21717_s1 + $0x2b3c] ss:$100 sps:$4 sm:$0xff]  }
 0xae3   :  { %11846 = vmatpush2.bf16.xpose.msra.mxu0 %v15991_v51  ;;  %11871 = vmatpush1.bf16.xpose.msra.mxu1 %v15994_v19  ;;  %v16063_v51 = vld [vmem:[%s21717_s1 + $0x3170] ss:$100 sps:$4 sm:$0xff]   ;;  %v16066_v19 = vld [vmem:[%s21717_s1 + $0x2b38] ss:$100 sps:$4 sm:$0xff]  }
 0xae4   :  { %11847 = vmatprep.subr.bf16.mxu0 %v15999_v23  ;;  %11872 = vmatprep.subr.bf16.mxu1 %v16002_v32  ;;  %v16071_v23 = vld [vmem:[%s21717_s1 + $0x30ac] ss:$100 sps:$4 sm:$0xff]   ;;  %v16074_v32 = vld [vmem:[%s21717_s1 + $0x2a74] ss:$100 sps:$4 sm:$0xff]  }
 0xaeb   :  { %11848 = vmatpush2.bf16.xpose.msra.mxu0 %v15997_v40  ;;  %11873 = vmatpush1.bf16.xpose.msra.mxu1 %v16000_v13 }
 0xaec   :  { %11849 = vmatprep.subr.bf16.mxu0 %v16005_v22  ;;  %11874 = vmatprep.subr.bf16.mxu1 %v16008_v24 }
 0xaf3   :  { %11850 = vmatpush2.bf16.xpose.msra.mxu0 %v16003_v7  ;;  %11875 = vmatpush1.bf16.xpose.msra.mxu1 %v16006_v11  ;;  %v16069_v11 = vld [vmem:[%s21717_s1 + $0x30a8] ss:$100 sps:$4 sm:$0xff]  }
 0xaf4   :  { %11851 = vmatprep.subr.bf16.mxu0 %v16011_v47  ;;  %11876 = vmatprep.subr.bf16.mxu1 %v16014_v30  ;;  %v16077_v30 = vld [vmem:[%s21717_s1 + $0x2fe4] ss:$100 sps:$4 sm:$0xff]  }
 0xafb   :  { %11852 = vmatpush2.bf16.xpose.msra.mxu0 %v16009_v33  ;;  %11877 = vmatpush1.bf16.xpose.msra.mxu1 %v16012_v27  ;;  %v16080_v33 = vld [vmem:[%s21717_s1 + $0x29ac] ss:$100 sps:$4 sm:$0xff]  }
 0xafc   :  { %11878 = vmatprep.subr.bf16.mxu1 %v16017_v15  ;;  %11903 = vmatprep.subr.bf16.mxu0 %v16020_v31  ;;  %v16078_v27 = vld [vmem:[%s21717_s1 + $0x29a8] ss:$100 sps:$4 sm:$0xff]   ;;  %v16083_v15 = vld [vmem:[%s21717_s1 + $0x2f1c] ss:$100 sps:$4 sm:$0xff]  }
 0xafd   :  { %v16086_v31 = vld [vmem:[%s21717_s1 + $0x28e4] ss:$100 sps:$4 sm:$0xff]  }
 0xb02   :  { %v11732_v34 = vpop.f32.mrf.mxu1  ;;  %11854 = vmatmul.mubr.bf16.vlgmr.msra.gmra.mxu0 %v17016_v63  ;;  %v16024_v63 = vld [vmem:[%s21717_s1 + $0x2a68] ss:$100 sps:$4 sm:$0xff]  }
 0xb03   :  { %v21080_v3 = vadd.f32 %v11732_v34, %v20977_v54  ;;  %11879 = vmatpush2.bf16.xpose.msra.mxu1 %v16015_v48  ;;  %11904 = vmatpush1.bf16.xpose.msra.mxu0 %v16018_v10  ;;  %v16044_v54 = vld [vmem:[%s21717_s1 + $0x2814] ss:$100 sps:$4 sm:$0xff]   ;;  %v16084_v10 = vld [vmem:[%s21717_s1 + $0x28e0] ss:$100 sps:$4 sm:$0xff]  }
 0xb04   :  { %v11734_v35 = vpop.f32.mrf.mxu1  ;;  %11880 = vmatprep.subr.bf16.mxu1 %v16023_v14  ;;  %11905 = vmatprep.subr.bf16.mxu0 %v16026_v58  ;;  %v16081_v48 = vld [vmem:[%s21717_s1 + $0x2f18] ss:$100 sps:$4 sm:$0xff]   ;;  %v16087_v34 = vld [vmem:[%s21717_s1 + $0x2e50] ss:$100 sps:$4 sm:$0xff]  }
 0xb05   :  { %v21083_v43 = vadd.f32 %v11734_v35, %v20979_v21  ;;  %11935 = vmatprep.mubr.bf16.mxu0 %v17030_v20  ;;  %v16027_v20 = vld [vmem:[%s21717_s1 + $0x2fd8] ss:$100 sps:$4 sm:$0xff]   ;;  %v16042_v21 = vld [vmem:[%s21717_s1 + $0x2810] ss:$100 sps:$4 sm:$0xff]  }
 0xb06   :  { %v11736_v55 = vpop.f32.mrf.mxu1  ;;  %v16089_v14 = vld [vmem:[%s21717_s1 + $0x2e54] ss:$100 sps:$4 sm:$0xff]   ;;  %v16092_v58 = vld [vmem:[%s21717_s1 + $0x281c] ss:$100 sps:$4 sm:$0xff]   ;;  %v16095_v35 = vld [vmem:[%s21717_s1 + $0x2d8c] ss:$100 sps:$4 sm:$0xff]  }
 0xb07   :  { %v16093_v55 = vld [vmem:[%s21717_s1 + $0x2d88] ss:$100 sps:$4 sm:$0xff]  }
 0xb08   :  { %v11737_v29 = vpop.f32.mrf.mxu1 }
 0xb09   :  { %v16104_v29 = vld [vmem:[%s21717_s1 + $0x268c] ss:$100 sps:$4 sm:$0xff]  }
 0xb0b   :  { %11881 = vmatpush2.bf16.xpose.msra.mxu1 %v16021_v50  ;;  %11906 = vmatpush1.bf16.xpose.msra.mxu0 %v16024_v63  ;;  %v16096_v50 = vld [vmem:[%s21717_s1 + $0x2750] ss:$100 sps:$4 sm:$0xff]   ;;  %v16101_v63 = vld [vmem:[%s21717_s1 + $0x2cc4] ss:$100 sps:$4 sm:$0xff]  }
 0xb0c   :  { %11882 = vmatprep.subr.bf16.mxu1 %v16029_v60  ;;  %11907 = vmatprep.subr.bf16.mxu0 %v16032_v16  ;;  %v16099_v60 = vld [vmem:[%s21717_s1 + $0x2cc0] ss:$100 sps:$4 sm:$0xff]   ;;  %v16102_v16 = vld [vmem:[%s21717_s1 + $0x2688] ss:$100 sps:$4 sm:$0xff]  }
 0xb13   :  { %11883 = vmatpush2.bf16.xpose.msra.mxu1 %v16027_v20  ;;  %11908 = vmatpush1.bf16.xpose.msra.mxu0 %v16030_v0  ;;  %v16107_v20 = vld [vmem:[%s21717_s1 + $0x2bfc] ss:$100 sps:$4 sm:$0xff]   ;;  %v16110_v0 = vld [vmem:[%s21717_s1 + $0x25c4] ss:$100 sps:$4 sm:$0xff]  }
 0xb14   :  { %11884 = vmatprep.subr.bf16.mxu1 %v16035_v59  ;;  %11909 = vmatprep.subr.bf16.mxu0 %v16038_v42  ;;  %v16105_v59 = vld [vmem:[%s21717_s1 + $0x2bf8] ss:$100 sps:$4 sm:$0xff]   ;;  %v16108_v42 = vld [vmem:[%s21717_s1 + $0x25c0] ss:$100 sps:$4 sm:$0xff]  }
 0xb1b   :  { %11885 = vmatpush2.bf16.xpose.msra.mxu1 %v16033_v56  ;;  %11910 = vmatpush1.bf16.xpose.msra.mxu0 %v16036_v52  ;;  %v16113_v56 = vld [vmem:[%s21717_s1 + $0x317c] ss:$100 sps:$4 sm:$0xff]   ;;  %v16116_v52 = vld [vmem:[%s21717_s1 + $0x2b44] ss:$100 sps:$4 sm:$0xff]  }
 0xb1c   :  { %11886 = vmatprep.subr.bf16.mxu1 %v16041_v1  ;;  %11911 = vmatprep.subr.bf16.mxu0 %v16044_v54  ;;  %v16111_v1 = vld [vmem:[%s21717_s1 + $0x3178] ss:$100 sps:$4 sm:$0xff]   ;;  %v16114_v54 = vld [vmem:[%s21717_s1 + $0x2b40] ss:$100 sps:$4 sm:$0xff]  }
 0xb23   :  { %11887 = vmatpush2.bf16.xpose.msra.mxu1 %v16039_v53  ;;  %11912 = vmatpush1.bf16.xpose.msra.mxu0 %v16042_v21  ;;  %v16119_v53 = vld [vmem:[%s21717_s1 + $0x30b4] ss:$100 sps:$4 sm:$0xff]   ;;  %v16122_v21 = vld [vmem:[%s21717_s1 + $0x2a7c] ss:$100 sps:$4 sm:$0xff]  }
 0xb24   :  { %11888 = vmatprep.subr.bf16.mxu1 %v16047_v12  ;;  %11913 = vmatprep.subr.bf16.mxu0 %v16050_v8 }
 0xb2b   :  { %11889 = vmatpush2.bf16.xpose.msra.mxu1 %v16045_v62  ;;  %11914 = vmatpush1.bf16.xpose.msra.mxu0 %v16048_v9 }
 0xb2c   :  { %11890 = vmatprep.subr.bf16.mxu1 %v16053_v4  ;;  %11915 = vmatprep.subr.bf16.mxu0 %v16056_v17  ;;  %v16117_v17 = vld [vmem:[%s21717_s1 + $0x30b0] ss:$100 sps:$4 sm:$0xff]  }
 0xb33   :  { %11891 = vmatpush2.bf16.xpose.msra.mxu1 %v16051_v2  ;;  %11916 = vmatpush1.bf16.xpose.msra.mxu0 %v16054_v18  ;;  %v16125_v18 = vld [vmem:[%s21717_s1 + $0x2fec] ss:$100 sps:$4 sm:$0xff]  }
 0xb34   :  { %11892 = vmatprep.subr.bf16.mxu1 %v16059_v61  ;;  %11917 = vmatprep.subr.bf16.mxu0 %v16062_v26  ;;  %v16128_v61 = vld [vmem:[%s21717_s1 + $0x29b4] ss:$100 sps:$4 sm:$0xff]  }
 0xb35   :  { %v16126_v26 = vld [vmem:[%s21717_s1 + $0x29b0] ss:$100 sps:$4 sm:$0xff]  }
 0xb3b   :  { %11893 = vmatpush2.bf16.xpose.msra.mxu1 %v16057_v28  ;;  %11918 = vmatpush1.bf16.xpose.msra.mxu0 %v16060_v25  ;;  %v16131_v28 = vld [vmem:[%s21717_s1 + $0x2f24] ss:$100 sps:$4 sm:$0xff]   ;;  %v16134_v25 = vld [vmem:[%s21717_s1 + $0x28ec] ss:$100 sps:$4 sm:$0xff]  }
 0xb3c   :  { %11919 = vmatprep.subr.bf16.mxu0 %v16065_v5  ;;  %11944 = vmatprep.subr.bf16.mxu1 %v16068_v6  ;;  %v16129_v5 = vld [vmem:[%s21717_s1 + $0x2f20] ss:$100 sps:$4 sm:$0xff]   ;;  %v16132_v6 = vld [vmem:[%s21717_s1 + $0x28e8] ss:$100 sps:$4 sm:$0xff]  }
 0xb42   :  { %v11773_v40 = vpop.f32.mrf.mxu0  ;;  %11895 = vmatmul.mubr.bf16.vlgmr.msra.gmra.mxu1 %v17240_v45  ;;  %v16072_v45 = vld [vmem:[%s21717_s1 + $0x2a70] ss:$100 sps:$4 sm:$0xff]  }
 0xb43   :  { %v21184_v13 = vadd.f32 %v11773_v40, %v21080_v3  ;;  %11920 = vmatpush2.bf16.xpose.msra.mxu0 %v16063_v51  ;;  %11945 = vmatpush1.bf16.xpose.msra.mxu1 %v16066_v19  ;;  %v16090_v3 = vld [vmem:[%s21717_s1 + $0x2818] ss:$100 sps:$4 sm:$0xff]   ;;  %v16140_v19 = vld [vmem:[%s21717_s1 + $0x2824] ss:$100 sps:$4 sm:$0xff]  }
 0xb44   :  { %v11775_v22 = vpop.f32.mrf.mxu0  ;;  %11921 = vmatprep.subr.bf16.mxu0 %v16071_v23  ;;  %11946 = vmatprep.subr.bf16.mxu1 %v16074_v32  ;;  %v16137_v51 = vld [vmem:[%s21717_s1 + $0x2e5c] ss:$100 sps:$4 sm:$0xff]   ;;  %v16143_v40 = vld [vmem:[%s21717_s1 + $0x2d94] ss:$100 sps:$4 sm:$0xff]  }
 0xb45   :  { %v21187_v24 = vadd.f32 %v11775_v22, %v21083_v43  ;;  %11976 = vmatprep.mubr.bf16.mxu1 %v17254_v49  ;;  %v16075_v49 = vld [vmem:[%s21717_s1 + $0x2fe0] ss:$100 sps:$4 sm:$0xff]   ;;  %v16098_v43 = vld [vmem:[%s21717_s1 + $0x2754] ss:$100 sps:$4 sm:$0xff]  }
 0xb46   :  { %v11777_v7 = vpop.f32.mrf.mxu0  ;;  %v16135_v23 = vld [vmem:[%s21717_s1 + $0x2e58] ss:$100 sps:$4 sm:$0xff]   ;;  %v16138_v32 = vld [vmem:[%s21717_s1 + $0x2820] ss:$100 sps:$4 sm:$0xff]   ;;  %v16141_v22 = vld [vmem:[%s21717_s1 + $0x2d90] ss:$100 sps:$4 sm:$0xff]  }
 0xb47   :  { %v16149_v7 = vld [vmem:[%s21717_s1 + $0x2ccc] ss:$100 sps:$4 sm:$0xff]  }
 0xb48   :  { %v11778_v47 = vpop.f32.mrf.mxu0 }
 0xb49   :  { %v16150_v47 = vld [vmem:[%s21717_s1 + $0x2690] ss:$100 sps:$4 sm:$0xff]  }
 0xb4b   :  { %11922 = vmatpush2.bf16.xpose.msra.mxu0 %v16069_v11  ;;  %11947 = vmatpush1.bf16.xpose.msra.mxu1 %v16072_v45  ;;  %v16152_v11 = vld [vmem:[%s21717_s1 + $0x2694] ss:$100 sps:$4 sm:$0xff]   ;;  %v16147_v45 = vld [vmem:[%s21717_s1 + $0x2cc8] ss:$100 sps:$4 sm:$0xff]  }
 0xb4c   :  { %11923 = vmatprep.subr.bf16.mxu0 %v16077_v30  ;;  %11948 = vmatprep.subr.bf16.mxu1 %v16080_v33  ;;  %v16155_v30 = vld [vmem:[%s21717_s1 + $0x2c04] ss:$100 sps:$4 sm:$0xff]   ;;  %v16158_v33 = vld [vmem:[%s21717_s1 + $0x25cc] ss:$100 sps:$4 sm:$0xff]  }
 0xb53   :  { %11924 = vmatpush2.bf16.xpose.msra.mxu0 %v16075_v49  ;;  %11949 = vmatpush1.bf16.xpose.msra.mxu1 %v16078_v27  ;;  %v16153_v49 = vld [vmem:[%s21717_s1 + $0x2c00] ss:$100 sps:$4 sm:$0xff]   ;;  %v16156_v27 = vld [vmem:[%s21717_s1 + $0x25c8] ss:$100 sps:$4 sm:$0xff]  }
 0xb54   :  { %11925 = vmatprep.subr.bf16.mxu0 %v16083_v15  ;;  %11950 = vmatprep.subr.bf16.mxu1 %v16086_v31  ;;  %v16161_v15 = vld [vmem:[%s21717_s1 + $0x3184] ss:$100 sps:$4 sm:$0xff]   ;;  %v16164_v31 = vld [vmem:[%s21717_s1 + $0x2b4c] ss:$100 sps:$4 sm:$0xff]  }
 0xb5b   :  { %11926 = vmatpush2.bf16.xpose.msra.mxu0 %v16081_v48  ;;  %11951 = vmatpush1.bf16.xpose.msra.mxu1 %v16084_v10  ;;  %v16159_v48 = vld [vmem:[%s21717_s1 + $0x3180] ss:$100 sps:$4 sm:$0xff]   ;;  %v16162_v10 = vld [vmem:[%s21717_s1 + $0x2b48] ss:$100 sps:$4 sm:$0xff]  }
 0xb5c   :  { %11927 = vmatprep.subr.bf16.mxu0 %v16089_v14  ;;  %11952 = vmatprep.subr.bf16.mxu1 %v16092_v58  ;;  %v16167_v14 = vld [vmem:[%s21717_s1 + $0x30bc] ss:$100 sps:$4 sm:$0xff]   ;;  %v16170_v58 = vld [vmem:[%s21717_s1 + $0x2a84] ss:$100 sps:$4 sm:$0xff]  }
 0xb63   :  { %11928 = vmatpush2.bf16.xpose.msra.mxu0 %v16087_v34  ;;  %11953 = vmatpush1.bf16.xpose.msra.mxu1 %v16090_v3 }
 0xb64   :  { %11929 = vmatprep.subr.bf16.mxu0 %v16095_v35  ;;  %11954 = vmatprep.subr.bf16.mxu1 %v16098_v43 }
 0xb6b   :  { %11930 = vmatpush2.bf16.xpose.msra.mxu0 %v16093_v55  ;;  %11955 = vmatpush1.bf16.xpose.msra.mxu1 %v16096_v50  ;;  %v16165_v50 = vld [vmem:[%s21717_s1 + $0x30b8] ss:$100 sps:$4 sm:$0xff]  }
 0xb6c   :  { %11931 = vmatprep.subr.bf16.mxu0 %v16101_v63  ;;  %11956 = vmatprep.subr.bf16.mxu1 %v16104_v29  ;;  %v16173_v29 = vld [vmem:[%s21717_s1 + $0x2ff4] ss:$100 sps:$4 sm:$0xff]  }
 0xb73   :  { %11932 = vmatpush2.bf16.xpose.msra.mxu0 %v16099_v60  ;;  %11957 = vmatpush1.bf16.xpose.msra.mxu1 %v16102_v16  ;;  %v16176_v60 = vld [vmem:[%s21717_s1 + $0x29bc] ss:$100 sps:$4 sm:$0xff]  }
 0xb74   :  { %11933 = vmatprep.subr.bf16.mxu0 %v16107_v20  ;;  %11958 = vmatprep.subr.bf16.mxu1 %v16110_v0  ;;  %v16174_v16 = vld [vmem:[%s21717_s1 + $0x29b8] ss:$100 sps:$4 sm:$0xff]   ;;  %v16179_v20 = vld [vmem:[%s21717_s1 + $0x2f2c] ss:$100 sps:$4 sm:$0xff]  }
 0xb75   :  { %v16182_v0 = vld [vmem:[%s21717_s1 + $0x28f4] ss:$100 sps:$4 sm:$0xff]  }
 0xb7b   :  { %11934 = vmatpush2.bf16.xpose.msra.mxu0 %v16105_v59  ;;  %11959 = vmatpush1.bf16.xpose.msra.mxu1 %v16108_v42  ;;  %v16177_v59 = vld [vmem:[%s21717_s1 + $0x2f28] ss:$100 sps:$4 sm:$0xff]   ;;  %v16180_v42 = vld [vmem:[%s21717_s1 + $0x28f0] ss:$100 sps:$4 sm:$0xff]  }
 0xb7c   :  { %11960 = vmatprep.subr.bf16.mxu1 %v16113_v56  ;;  %11985 = vmatprep.subr.bf16.mxu0 %v16116_v52  ;;  %v16185_v56 = vld [vmem:[%s21717_s1 + $0x2e64] ss:$100 sps:$4 sm:$0xff]   ;;  %v16188_v52 = vld [vmem:[%s21717_s1 + $0x282c] ss:$100 sps:$4 sm:$0xff]  }
 0xb82   :  { %v11814_v12 = vpop.f32.mrf.mxu1  ;;  %11936 = vmatmul.mubr.bf16.vlgmr.msra.gmra.mxu0 %v17244_v46  ;;  %v16120_v46 = vld [vmem:[%s21717_s1 + $0x2a78] ss:$100 sps:$4 sm:$0xff]  }
 0xb83   :  { %v21288_v8 = vadd.f32 %v11814_v12, %v21184_v13  ;;  %11961 = vmatpush2.bf16.xpose.msra.mxu1 %v16111_v1  ;;  %11986 = vmatpush1.bf16.xpose.msra.mxu0 %v16114_v54  ;;  %v16146_v13 = vld [vmem:[%s21717_s1 + $0x275c] ss:$100 sps:$4 sm:$0xff]   ;;  %v16186_v54 = vld [vmem:[%s21717_s1 + $0x2828] ss:$100 sps:$4 sm:$0xff]  }
 0xb84   :  { %v11816_v62 = vpop.f32.mrf.mxu1  ;;  %11962 = vmatprep.subr.bf16.mxu1 %v16119_v53  ;;  %11987 = vmatprep.subr.bf16.mxu0 %v16122_v21  ;;  %v16183_v1 = vld [vmem:[%s21717_s1 + $0x2e60] ss:$100 sps:$4 sm:$0xff]   ;;  %v16189_v12 = vld [vmem:[%s21717_s1 + $0x2d98] ss:$100 sps:$4 sm:$0xff]  }
 0xb85   :  { %v21291_v9 = vadd.f32 %v11816_v62, %v21187_v24  ;;  %12017 = vmatprep.mubr.bf16.mxu0 %v17258_v57  ;;  %v16123_v57 = vld [vmem:[%s21717_s1 + $0x2fe8] ss:$100 sps:$4 sm:$0xff]   ;;  %v16144_v24 = vld [vmem:[%s21717_s1 + $0x2758] ss:$100 sps:$4 sm:$0xff]  }
 0xb86   :  { %v11818_v4 = vpop.f32.mrf.mxu1  ;;  %v16191_v53 = vld [vmem:[%s21717_s1 + $0x2d9c] ss:$100 sps:$4 sm:$0xff]   ;;  %v16194_v21 = vld [vmem:[%s21717_s1 + $0x2764] ss:$100 sps:$4 sm:$0xff]   ;;  %v16197_v62 = vld [vmem:[%s21717_s1 + $0x2cd4] ss:$100 sps:$4 sm:$0xff]  }
 0xb87   :  { %v16195_v4 = vld [vmem:[%s21717_s1 + $0x2cd0] ss:$100 sps:$4 sm:$0xff]  }
 0xb88   :  { %v11819_v2 = vpop.f32.mrf.mxu1 }
 0xb89   :  { %v16206_v2 = vld [vmem:[%s21717_s1 + $0x25d4] ss:$100 sps:$4 sm:$0xff]  }
 0xb8b   :  { %11963 = vmatpush2.bf16.xpose.msra.mxu1 %v16117_v17  ;;  %11988 = vmatpush1.bf16.xpose.msra.mxu0 %v16120_v46  ;;  %v16198_v17 = vld [vmem:[%s21717_s1 + $0x2698] ss:$100 sps:$4 sm:$0xff]   ;;  %v16203_v46 = vld [vmem:[%s21717_s1 + $0x2c0c] ss:$100 sps:$4 sm:$0xff]  }
 0xb8c   :  { %11964 = vmatprep.subr.bf16.mxu1 %v16125_v18  ;;  %11989 = vmatprep.subr.bf16.mxu0 %v16128_v61  ;;  %v16201_v18 = vld [vmem:[%s21717_s1 + $0x2c08] ss:$100 sps:$4 sm:$0xff]   ;;  %v16204_v61 = vld [vmem:[%s21717_s1 + $0x25d0] ss:$100 sps:$4 sm:$0xff]  }
 0xb93   :  { %11965 = vmatpush2.bf16.xpose.msra.mxu1 %v16123_v57  ;;  %11990 = vmatpush1.bf16.xpose.msra.mxu0 %v16126_v26  ;;  %v16209_v57 = vld [vmem:[%s21717_s1 + $0x318c] ss:$100 sps:$4 sm:$0xff]   ;;  %v16212_v26 = vld [vmem:[%s21717_s1 + $0x2b54] ss:$100 sps:$4 sm:$0xff]  }
 0xb94   :  { %11966 = vmatprep.subr.bf16.mxu1 %v16131_v28  ;;  %11991 = vmatprep.subr.bf16.mxu0 %v16134_v25  ;;  %v16207_v28 = vld [vmem:[%s21717_s1 + $0x3188] ss:$100 sps:$4 sm:$0xff]   ;;  %v16210_v25 = vld [vmem:[%s21717_s1 + $0x2b50] ss:$100 sps:$4 sm:$0xff]  }
 0xb9b   :  { %11967 = vmatpush2.bf16.xpose.msra.mxu1 %v16129_v5  ;;  %11992 = vmatpush1.bf16.xpose.msra.mxu0 %v16132_v6  ;;  %v16215_v5 = vld [vmem:[%s21717_s1 + $0x30c4] ss:$100 sps:$4 sm:$0xff]   ;;  %v16218_v6 = vld [vmem:[%s21717_s1 + $0x2a8c] ss:$100 sps:$4 sm:$0xff]  }
 0xb9c   :  { %11968 = vmatprep.subr.bf16.mxu1 %v16137_v51  ;;  %11993 = vmatprep.subr.bf16.mxu0 %v16140_v19 }
 0xba3   :  { %11969 = vmatpush2.bf16.xpose.msra.mxu1 %v16135_v23  ;;  %11994 = vmatpush1.bf16.xpose.msra.mxu0 %v16138_v32 }
 0xba4   :  { %11970 = vmatprep.subr.bf16.mxu1 %v16143_v40  ;;  %11995 = vmatprep.subr.bf16.mxu0 %v16146_v13  ;;  %v16213_v13 = vld [vmem:[%s21717_s1 + $0x30c0] ss:$100 sps:$4 sm:$0xff]  }
 0xbab   :  { %11971 = vmatpush2.bf16.xpose.msra.mxu1 %v16141_v22  ;;  %11996 = vmatpush1.bf16.xpose.msra.mxu0 %v16144_v24  ;;  %v16221_v24 = vld [vmem:[%s21717_s1 + $0x2ffc] ss:$100 sps:$4 sm:$0xff]  }
 0xbac   :  { %11972 = vmatprep.subr.bf16.mxu1 %v16149_v7  ;;  %11997 = vmatprep.subr.bf16.mxu0 %v16152_v11  ;;  %v16224_v7 = vld [vmem:[%s21717_s1 + $0x29c4] ss:$100 sps:$4 sm:$0xff]  }
 0xbad   :  { %v16222_v11 = vld [vmem:[%s21717_s1 + $0x29c0] ss:$100 sps:$4 sm:$0xff]  }
 0xbb3   :  { %11973 = vmatpush2.bf16.xpose.msra.mxu1 %v16147_v45  ;;  %11998 = vmatpush1.bf16.xpose.msra.mxu0 %v16150_v47  ;;  %v16227_v45 = vld [vmem:[%s21717_s1 + $0x2f34] ss:$100 sps:$4 sm:$0xff]   ;;  %v16230_v47 = vld [vmem:[%s21717_s1 + $0x28fc] ss:$100 sps:$4 sm:$0xff]  }
 0xbb4   :  { %11974 = vmatprep.subr.bf16.mxu1 %v16155_v30  ;;  %11999 = vmatprep.subr.bf16.mxu0 %v16158_v33  ;;  %v16225_v30 = vld [vmem:[%s21717_s1 + $0x2f30] ss:$100 sps:$4 sm:$0xff]   ;;  %v16228_v33 = vld [vmem:[%s21717_s1 + $0x28f8] ss:$100 sps:$4 sm:$0xff]  }
 0xbbb   :  { %11975 = vmatpush2.bf16.xpose.msra.mxu1 %v16153_v49  ;;  %12000 = vmatpush1.bf16.xpose.msra.mxu0 %v16156_v27  ;;  %v16233_v49 = vld [vmem:[%s21717_s1 + $0x2e6c] ss:$100 sps:$4 sm:$0xff]   ;;  %v16236_v27 = vld [vmem:[%s21717_s1 + $0x2834] ss:$100 sps:$4 sm:$0xff]  }
 0xbbc   :  { %12001 = vmatprep.subr.bf16.mxu0 %v16161_v15  ;;  %12026 = vmatprep.subr.bf16.mxu1 %v16164_v31  ;;  %v16231_v15 = vld [vmem:[%s21717_s1 + $0x2e68] ss:$100 sps:$4 sm:$0xff]   ;;  %v16234_v31 = vld [vmem:[%s21717_s1 + $0x2830] ss:$100 sps:$4 sm:$0xff]  }
 0xbc2   :  { %v11855_v34 = vpop.f32.mrf.mxu0  ;;  %11977 = vmatmul.mubr.bf16.vlgmr.msra.gmra.mxu1 %v17468_v37  ;;  %v16168_v37 = vld [vmem:[%s21717_s1 + $0x2a80] ss:$100 sps:$4 sm:$0xff]  }
 0xbc3   :  { %v21392_v3 = vadd.f32 %v11855_v34, %v21288_v8  ;;  %12002 = vmatpush2.bf16.xpose.msra.mxu0 %v16159_v48  ;;  %12027 = vmatpush1.bf16.xpose.msra.mxu1 %v16162_v10  ;;  %v16192_v8 = vld [vmem:[%s21717_s1 + $0x2760] ss:$100 sps:$4 sm:$0xff]   ;;  %v16242_v10 = vld [vmem:[%s21717_s1 + $0x276c] ss:$100 sps:$4 sm:$0xff]  }
 0xbc4   :  { %v11857_v35 = vpop.f32.mrf.mxu0  ;;  %12003 = vmatprep.subr.bf16.mxu0 %v16167_v14  ;;  %12028 = vmatprep.subr.bf16.mxu1 %v16170_v58  ;;  %v16239_v48 = vld [vmem:[%s21717_s1 + $0x2da4] ss:$100 sps:$4 sm:$0xff]   ;;  %v16245_v34 = vld [vmem:[%s21717_s1 + $0x2cdc] ss:$100 sps:$4 sm:$0xff]  }
 0xbc5   :  { %v21395_v43 = vadd.f32 %v11857_v35, %v21291_v9  ;;  %12058 = vmatprep.mubr.bf16.mxu1 %v17482_v44  ;;  %v16171_v44 = vld [vmem:[%s21717_s1 + $0x2ff0] ss:$100 sps:$4 sm:$0xff]   ;;  %v16200_v9 = vld [vmem:[%s21717_s1 + $0x269c] ss:$100 sps:$4 sm:$0xff]   ;;  %v16240_v58 = vld [vmem:[%s21717_s1 + $0x2768] ss:$100 sps:$4 sm:$0xff]  }
 0xbc6   :  { %v11859_v55 = vpop.f32.mrf.mxu0  ;;  %v16237_v14 = vld [vmem:[%s21717_s1 + $0x2da0] ss:$100 sps:$4 sm:$0xff]   ;;  %v16243_v35 = vld [vmem:[%s21717_s1 + $0x2cd8] ss:$100 sps:$4 sm:$0xff]  }
 0xbc7   :  { %v16251_v55 = vld [vmem:[%s21717_s1 + $0x2c14] ss:$100 sps:$4 sm:$0xff]  }
 0xbc8   :  { %v11860_v63 = vpop.f32.mrf.mxu0 }
 0xbc9   :  { %v16252_v63 = vld [vmem:[%s21717_s1 + $0x25d8] ss:$100 sps:$4 sm:$0xff]  }
 0xbcb   :  { %12004 = vmatpush2.bf16.xpose.msra.mxu0 %v16165_v50  ;;  %12029 = vmatpush1.bf16.xpose.msra.mxu1 %v16168_v37  ;;  %v16254_v50 = vld [vmem:[%s21717_s1 + $0x25dc] ss:$100 sps:$4 sm:$0xff]   ;;  %v16249_v37 = vld [vmem:[%s21717_s1 + $0x2c10] ss:$100 sps:$4 sm:$0xff]  }
 0xbcc   :  { %12005 = vmatprep.subr.bf16.mxu0 %v16173_v29  ;;  %12030 = vmatprep.subr.bf16.mxu1 %v16176_v60  ;;  %v16257_v29 = vld [vmem:[%s21717_s1 + $0x3194] ss:$100 sps:$4 sm:$0xff]  }
 0xbcd   :  { %v16258_v60 = vld [vmem:[%s21717_s1 + $0x3198] ss:$100 sps:$4 sm:$0xff]  }
 0xbd3   :  { %12006 = vmatpush2.bf16.xpose.msra.mxu0 %v16171_v44  ;;  %12031 = vmatpush1.bf16.xpose.msra.mxu1 %v16174_v16  ;;  %v16259_v44 = vld [vmem:[%s21717_s1 + $0x2b58] ss:$100 sps:$4 sm:$0xff]   ;;  %v16255_v16 = vld [vmem:[%s21717_s1 + $0x3190] ss:$100 sps:$4 sm:$0xff]  }
 0xbd4   :  { %12007 = vmatprep.subr.bf16.mxu0 %v16179_v20  ;;  %12032 = vmatprep.subr.bf16.mxu1 %v16182_v0  ;;  %v9991_v20 = vsel %vm9821_vm0, %v16259_v44, 0  ;;  %v16262_v0 = vld [vmem:[%s21717_s1 + $0x30cc] ss:$100 sps:$4 sm:$0xff]  }
 0xbdb   :  { %12008 = vmatpush2.bf16.xpose.msra.mxu0 %v16177_v59  ;;  %12033 = vmatpush1.bf16.xpose.msra.mxu1 %v16180_v42  ;;  %v16263_v59 = vld [vmem:[%s21717_s1 + $0x30d0] ss:$100 sps:$4 sm:$0xff]  }
 0xbdc   :  { %12009 = vmatprep.subr.bf16.mxu0 %v16185_v56  ;;  %12034 = vmatprep.subr.bf16.mxu1 %v16188_v52 }
 0xbe3   :  { %12010 = vmatpush2.bf16.xpose.msra.mxu0 %v16183_v1  ;;  %12035 = vmatpush1.bf16.xpose.msra.mxu1 %v16186_v54  ;;  %v16264_v1 = vld [vmem:[%s21717_s1 + $0x2a90] ss:$100 sps:$4 sm:$0xff]  }
 0xbe4   :  { %12011 = vmatprep.subr.bf16.mxu0 %v16191_v53  ;;  %12036 = vmatprep.subr.bf16.mxu1 %v16194_v21  ;;  %v16260_v21 = vld [vmem:[%s21717_s1 + $0x30c8] ss:$100 sps:$4 sm:$0xff]  }
 0xbeb   :  { %12012 = vmatpush2.bf16.xpose.msra.mxu0 %v16189_v12  ;;  %12037 = vmatpush1.bf16.xpose.msra.mxu1 %v16192_v8  ;;  %v9988_v8 = vsel %vm9821_vm0, %v16264_v1, 0 }
 0xbec   :  { %12013 = vmatprep.subr.bf16.mxu0 %v16197_v62  ;;  %12038 = vmatprep.subr.bf16.mxu1 %v16200_v9  ;;  %v16267_v62 = vld [vmem:[%s21717_s1 + $0x3004] ss:$100 sps:$4 sm:$0xff]  }
 0xbed   :  { %v16268_v9 = vld [vmem:[%s21717_s1 + $0x3008] ss:$100 sps:$4 sm:$0xff]  }
 0xbf3   :  { %12014 = vmatpush2.bf16.xpose.msra.mxu0 %v16195_v4  ;;  %12039 = vmatpush1.bf16.xpose.msra.mxu1 %v16198_v17  ;;  %v16269_v4 = vld [vmem:[%s21717_s1 + $0x29c8] ss:$100 sps:$4 sm:$0xff]   ;;  %v16265_v17 = vld [vmem:[%s21717_s1 + $0x3000] ss:$100 sps:$4 sm:$0xff]  }
 0xbf4   :  { %12015 = vmatprep.subr.bf16.mxu0 %v16203_v46  ;;  %12040 = vmatprep.subr.bf16.mxu1 %v16206_v2  ;;  %v9985_v46 = vsel %vm9821_vm0, %v16269_v4, 0  ;;  %v16272_v2 = vld [vmem:[%s21717_s1 + $0x2f3c] ss:$100 sps:$4 sm:$0xff]  }
 0xbfb   :  { %12016 = vmatpush2.bf16.xpose.msra.mxu0 %v16201_v18  ;;  %12041 = vmatpush1.bf16.xpose.msra.mxu1 %v16204_v61  ;;  %v16273_v18 = vld [vmem:[%s21717_s1 + $0x2f40] ss:$100 sps:$4 sm:$0xff]  }
 0xbfc   :  { %12042 = vmatprep.subr.bf16.mxu1 %v16209_v57  ;;  %12067 = vmatprep.subr.bf16.mxu0 %v16212_v26  ;;  %v16274_v61 = vld [vmem:[%s21717_s1 + $0x2900] ss:$100 sps:$4 sm:$0xff]   ;;  %v16270_v57 = vld [vmem:[%s21717_s1 + $0x2f38] ss:$100 sps:$4 sm:$0xff]  }
 0xbfd   :  { %v9982_v26 = vsel %vm9821_vm0, %v16274_v61, 0 }
 0xc02   :  { %v11896_v51 = vpop.f32.mrf.mxu1  ;;  %12018 = vmatmul.mubr.bf16.vlgmr.msra.gmra.mxu0 %v17472_v38  ;;  %v16216_v38 = vld [vmem:[%s21717_s1 + $0x2a88] ss:$100 sps:$4 sm:$0xff]  }
 0xc03   :  { %v21496_v19 = vadd.f32 %v11896_v51, %v21392_v3  ;;  %12043 = vmatpush2.bf16.xpose.msra.mxu1 %v16207_v28  ;;  %12068 = vmatpush1.bf16.xpose.msra.mxu0 %v16210_v25  ;;  %v16248_v3 = vld [vmem:[%s21717_s1 + $0x26a4] ss:$100 sps:$4 sm:$0xff]   ;;  %v16277_v28 = vld [vmem:[%s21717_s1 + $0x2e74] ss:$100 sps:$4 sm:$0xff]  }
 0xc04   :  { %v11898_v23 = vpop.f32.mrf.mxu1  ;;  %12044 = vmatprep.subr.bf16.mxu1 %v16215_v5  ;;  %12069 = vmatprep.subr.bf16.mxu0 %v16218_v6  ;;  %v16278_v25 = vld [vmem:[%s21717_s1 + $0x2e78] ss:$100 sps:$4 sm:$0xff]   ;;  %v16275_v6 = vld [vmem:[%s21717_s1 + $0x2e70] ss:$100 sps:$4 sm:$0xff]  }
 0xc05   :  { %v21499_v32 = vadd.f32 %v11898_v23, %v21395_v43  ;;  %12099 = vmatprep.mubr.bf16.mxu0 %v17486_v41  ;;  %v16219_v41 = vld [vmem:[%s21717_s1 + $0x2ff8] ss:$100 sps:$4 sm:$0xff]   ;;  %v16246_v43 = vld [vmem:[%s21717_s1 + $0x26a0] ss:$100 sps:$4 sm:$0xff]   ;;  %v16283_v23 = vld [vmem:[%s21717_s1 + $0x2db0] ss:$100 sps:$4 sm:$0xff]  }
 0xc06   :  { %v11900_v40 = vpop.f32.mrf.mxu1  ;;  %v16279_v5 = vld [vmem:[%s21717_s1 + $0x2838] ss:$100 sps:$4 sm:$0xff]  }
 0xc07   :  { %v9979_v51 = vsel %vm9821_vm0, %v16279_v5, 0  ;;  %v16280_v40 = vld [vmem:[%s21717_s1 + $0x2da8] ss:$100 sps:$4 sm:$0xff]  }
 0xc08   :  { %v11901_v22 = vpop.f32.mrf.mxu1 }
 0xc09   :  { %v16288_v22 = vld [vmem:[%s21717_s1 + $0x2ce8] ss:$100 sps:$4 sm:$0xff]  }
 0xc0b   :  { %12045 = vmatpush2.bf16.xpose.msra.mxu1 %v16213_v13  ;;  %12070 = vmatpush1.bf16.xpose.msra.mxu0 %v16216_v38  ;;  %v16287_v38 = vld [vmem:[%s21717_s1 + $0x2ce4] ss:$100 sps:$4 sm:$0xff]  }
 0xc0c   :  { %12046 = vmatprep.subr.bf16.mxu1 %v16221_v24  ;;  %12071 = vmatprep.subr.bf16.mxu0 %v16224_v7  ;;  %v16289_v24 = vld [vmem:[%s21717_s1 + $0x26a8] ss:$100 sps:$4 sm:$0xff]   ;;  %v16285_v7 = vld [vmem:[%s21717_s1 + $0x2ce0] ss:$100 sps:$4 sm:$0xff]  }
 0xc13   :  { %12047 = vmatpush2.bf16.xpose.msra.mxu1 %v16219_v41  ;;  %12072 = vmatpush1.bf16.xpose.msra.mxu0 %v16222_v11  ;;  %v9973_v41 = vsel %vm9821_vm0, %v16289_v24, 0  ;;  %v16292_v11 = vld [vmem:[%s21717_s1 + $0x2c1c] ss:$100 sps:$4 sm:$0xff]  }
 0xc14   :  { %12048 = vmatprep.subr.bf16.mxu1 %v16227_v45  ;;  %12073 = vmatprep.subr.bf16.mxu0 %v16230_v47  ;;  %v16293_v45 = vld [vmem:[%s21717_s1 + $0x2c20] ss:$100 sps:$4 sm:$0xff]  }
 0xc15   :  { %v16294_v47 = vld [vmem:[%s21717_s1 + $0x25e0] ss:$100 sps:$4 sm:$0xff]  }
 0xc1b   :  { %12049 = vmatpush2.bf16.xpose.msra.mxu1 %v16225_v30  ;;  %12074 = vmatpush1.bf16.xpose.msra.mxu0 %v16228_v33  ;;  %v16290_v30 = vld [vmem:[%s21717_s1 + $0x2c18] ss:$100 sps:$4 sm:$0xff]   ;;  %v9970_v33 = vsel %vm9821_vm0, %v16294_v47, 0 }
 0xc1c   :  { %12050 = vmatprep.subr.bf16.mxu1 %v16233_v49  ;;  %12075 = vmatprep.subr.bf16.mxu0 %v16236_v27 }
 0xc23   :  { %12051 = vmatpush2.bf16.xpose.msra.mxu1 %v16231_v15  ;;  %12076 = vmatpush1.bf16.xpose.msra.mxu0 %v16234_v31 }
 0xc24   :  { %12052 = vmatprep.subr.bf16.mxu1 %v16239_v48  ;;  %12077 = vmatprep.subr.bf16.mxu0 %v16242_v10 }
 0xc2b   :  { %12053 = vmatpush2.bf16.xpose.msra.mxu1 %v16237_v14  ;;  %12078 = vmatpush1.bf16.xpose.msra.mxu0 %v16240_v58 }
 0xc2c   :  { %12054 = vmatprep.subr.bf16.mxu1 %v16245_v34  ;;  %12079 = vmatprep.subr.bf16.mxu0 %v16248_v3 }
 0xc33   :  { %12055 = vmatpush2.bf16.xpose.msra.mxu1 %v16243_v35  ;;  %12080 = vmatpush1.bf16.xpose.msra.mxu0 %v16246_v43 }
 0xc34   :  { %12056 = vmatprep.subr.bf16.mxu1 %v16251_v55  ;;  %12081 = vmatprep.subr.bf16.mxu0 %v16254_v50 }
 0xc3b   :  { %12057 = vmatpush2.bf16.xpose.msra.mxu1 %v16249_v37  ;;  %12082 = vmatpush1.bf16.xpose.msra.mxu0 %v16252_v63 }
 0xc3c   :  { %12083 = vmatprep.subr.bf16.mxu0 %v16257_v29  ;;  %13894 = vmatprep.subr.msk.bf16.mxu1 %vm9821_vm0, %v16258_v60 }
 0xc42   :  { %v11937_v42 = vpop.f32.mrf.mxu0  ;;  %12059 = vmatmul.mubr.bf16.vlgmr.msra.gmra.mxu1 %v17684_v36  ;;  %v21614_v36 = vld [vmem:[%s21718_s0 + $0x60] ss:$0 sps:$4 sm:$0xff]  }
 0xc43   :  { %v21602_v56 = vadd.f32 %v11937_v42, %v21496_v19  ;;  %12084 = vmatpush2.bf16.xpose.msra.mxu0 %v16255_v16  ;;  %13853 = vmatpush3.bf16.xpose.msra.mxu1 %v9991_v20  ;;  %v16282_v19 = vld [vmem:[%s21717_s1 + $0x2dac] ss:$100 sps:$4 sm:$0xff]  }
 0xc44   :  { %v11939_v52 = vpop.f32.mrf.mxu0  ;;  %12085 = vmatprep.subr.bf16.mxu0 %v16262_v0  ;;  %13895 = vmatprep.subr.msk.bf16.mxu1 %vm9821_vm0, %v16263_v59 }
 0xc45   :  { %v21609_v54 = vadd.f32 %v11939_v52, %v21499_v32  ;;  %13868 = vmatprep.mubr.msk.bf16.mxu1 %vm9821_vm0, %v21614_v36  ;;  %v16284_v32 = vld [vmem:[%s21717_s1 + $0x2770] ss:$100 sps:$4 sm:$0xff]  }
 0xc46   :  { %v11941_v53 = vpop.f32.mrf.mxu0  ;;  %v9976_v13 = vsel %vm9821_vm0, %v16284_v32, 0 }
 0xc48   :  { %v11942_v12 = vpop.f32.mrf.mxu0 }
 0xc4b   :  { %12086 = vmatpush2.bf16.xpose.msra.mxu0 %v16260_v21  ;;  %13855 = vmatpush3.bf16.xpose.msra.mxu1 %v9988_v8 }
 0xc4c   :  { %12087 = vmatprep.subr.bf16.mxu0 %v16267_v62  ;;  %13896 = vmatprep.subr.msk.bf16.mxu1 %vm9821_vm0, %v16268_v9 }
 0xc53   :  { %12088 = vmatpush2.bf16.xpose.msra.mxu0 %v16265_v17  ;;  %13857 = vmatpush3.bf16.xpose.msra.mxu1 %v9985_v46 }
 0xc54   :  { %12089 = vmatprep.subr.bf16.mxu0 %v16272_v2  ;;  %13897 = vmatprep.subr.msk.bf16.mxu1 %vm9821_vm0, %v16273_v18 }
 0xc5b   :  { %12090 = vmatpush2.bf16.xpose.msra.mxu0 %v16270_v57  ;;  %13859 = vmatpush3.bf16.xpose.msra.mxu1 %v9982_v26 }
 0xc5c   :  { %12091 = vmatprep.subr.bf16.mxu0 %v16277_v28  ;;  %13898 = vmatprep.subr.msk.bf16.mxu1 %vm9821_vm0, %v16278_v25 }
 0xc63   :  { %12092 = vmatpush2.bf16.xpose.msra.mxu0 %v16275_v6  ;;  %13861 = vmatpush3.bf16.xpose.msra.mxu1 %v9979_v51 }
 0xc64   :  { %12093 = vmatprep.subr.bf16.mxu0 %v16282_v19  ;;  %13899 = vmatprep.subr.msk.bf16.mxu1 %vm9821_vm0, %v16283_v23 }
 0xc6b   :  { %12094 = vmatpush2.bf16.xpose.msra.mxu0 %v16280_v40  ;;  %13863 = vmatpush3.bf16.xpose.msra.mxu1 %v9976_v13 }
 0xc6c   :  { %12095 = vmatprep.subr.bf16.mxu0 %v16287_v38  ;;  %13900 = vmatprep.subr.msk.bf16.mxu1 %vm9821_vm0, %v16288_v22 }
 0xc73   :  { %12096 = vmatpush2.bf16.xpose.msra.mxu0 %v16285_v7  ;;  %13865 = vmatpush3.bf16.xpose.msra.mxu1 %v9973_v41 }
 0xc74   :  { %12097 = vmatprep.subr.bf16.mxu0 %v16292_v11  ;;  %13901 = vmatprep.subr.msk.bf16.mxu1 %vm9821_vm0, %v16293_v45 }
 0xc7b   :  { %12098 = vmatpush2.bf16.xpose.msra.mxu0 %v16290_v30  ;;  %13867 = vmatpush3.bf16.xpose.msra.mxu1 %v9970_v33 }
 0xc82   :  { %v11978_v49 = vpop.f32.mrf.mxu1  ;;  %12100 = vmatmul.mubr.bf16.vlgmr.msra.gmra.mxu0 %v17688_v39  ;;  %13869 = vmatmul.mubr.msk.bf16.vlgmr.msra.gmra.mxu1 %vm9821_vm0, %v21614_v36 }
 0xc83   :  { %v11979_v27 = vadd.f32 %v11978_v49, %v21602_v56 }
 0xc84   :  { %v11980_v15 = vpop.f32.mrf.mxu1 }
 0xc85   :  { %v11981_v31 = vadd.f32 %v11980_v15, %v21609_v54 }
 0xc86   :  { %v11982_v48 = vpop.f32.mrf.mxu1 }
 0xc88   :  { %v11983_v10 = vpop.f32.mrf.mxu1 }
 0xcc2   :  { %v12019_v14 = vpop.f32.mrf.mxu0 }
 0xcc3   :  { %v12020_v58 = vadd.f32 %v12019_v14, %v11979_v27 }
 0xcc4   :  { %v12021_v34 = vpop.f32.mrf.mxu0 }
 0xcc5   :  { %v12022_v3 = vadd.f32 %v12021_v34, %v11981_v31 }
 0xcc6   :  { %v12023_v35 = vpop.f32.mrf.mxu0 }
 0xcc8   :  { %v12024_v43 = vpop.f32.mrf.mxu0 }
 0xd02   :  { %v12060_v55 = vpop.f32.mrf.mxu1 }
 0xd03   :  { %v12061_v63 = vadd.f32 %v12060_v55, %v12020_v58 }
 0xd04   :  { %v12062_v50 = vpop.f32.mrf.mxu1 }
 0xd05   :  { %v12063_v44 = vadd.f32 %v12062_v50, %v12022_v3 }
 0xd06   :  { %v12064_v37 = vpop.f32.mrf.mxu1 }
 0xd08   :  { %v12065_v39 = vpop.f32.mrf.mxu1 }
 0xd42   :  { %v12101_v29 = vpop.f32.mrf.mxu0  ;;  %v12142_v60 = vpop.f32.mrf.mxu1 }
 0xd43   :  { %v12102_v16 = vadd.f32 %v12101_v29, %v12061_v63 }
 0xd44   :  { %v12103_v20 = vpop.f32.mrf.mxu0  ;;  %v12144_v0 = vpop.f32.mrf.mxu1 }
 0xd45   :  { %v12143_v59 = vadd.f32 %v12142_v60, %v12102_v16  ;;  %v12104_v42 = vadd.f32 %v12103_v20, %v12063_v44 }
 0xd46   :  { %v12105_v56 = vpop.f32.mrf.mxu0  ;;  %v12146_v52 = vpop.f32.mrf.mxu1 }
 0xd47   :  { %v12155_v1 = vmax.f32 %v12143_v59, 0.0  ;;  %v12145_v54 = vadd.f32 %v12144_v0, %v12104_v42 }
 0xd48   :  { %v12106_v36 = vpop.f32.mrf.mxu0  ;;  %v12147_v53 = vpop.f32.mrf.mxu1 }
 0xd49   :  { %12163 = vst [vmem:[%s21720_s3 + $0x30] sm:$0xff] %v12155_v1  ;;  %v12156_v21 = vmax.f32 %v12145_v54, 0.0 }
 0xd4b   :  { %12164 = vst [vmem:[%s21720_s3 + $0x38] sm:$0xff] %v12156_v21 }

</bundles_post_ra>
